<compile_context>
chip_gen: v6e
topology: v6e:2x2x1
jax: 0.10.0
libtpu: 0.0.40
codegen_flags: <defaults>
</compile_context>

<pallas_src>
import jax
import jax.numpy as jnp
from jax import lax
from jax.experimental import pallas as pl
from jax.experimental.pallas import tpu as pltpu


def _round_up(x, m):
    return (x + m - 1) // m * m


# ---------------------------------------------------------------------------
# Fused rollout kernel: grid=(T,), all layers unrolled inside the body.
# ---------------------------------------------------------------------------
def _make_rollout_kernel(layer_dims, Hs, Ws, KH, KW, N):
    """layer_dims: per-layer (Cx, Ch, cx_pad, Ktap, Kpad, ones_row)."""
    n_layers = len(layer_dims)
    ph, pw = KH // 2, KW // 2
    taps = []
    for dh in range(KH):
        for dw in range(KW):
            oy, ox = dh - ph, dw - pw
            taps.append((oy * Ws + ox, (oy == 0 and ox == 0)))
    n_taps = len(taps)

    def kernel(*refs):
        L = n_layers
        x_ref, m_ref = refs[0], refs[1]
        w_refs = refs[2:2 + L]
        h0_refs = refs[2 + L:2 + 2 * L]
        c0_refs = refs[2 + 2 * L:2 + 3 * L]
        o = 2 + 3 * L
        hseq_ref = refs[o]
        h_out = refs[o + 1:o + 1 + L]
        c_out = refs[o + 1 + L:o + 1 + 2 * L]
        s = o + 1 + 2 * L
        h_scr = refs[s:s + L]          # bf16 recurrent hidden state
        p_scr = refs[s + L:s + 2 * L]  # bf16 im2col patch scratch

        t = pl.program_id(0)

        # One-time init: load initial state, zero the patch scratch (pad rows
        # must be exactly zero -- uninitialized VMEM could hold NaNs) and set
        # the constant ones row that carries the bias through the matmul.
        @pl.when(t == 0)
        def _init():
            for j in range(n_layers):
                ones_row = layer_dims[j][5]
                h_scr[j][...] = h0_refs[j][...].astype(jnp.bfloat16)
                c_out[j][...] = c0_refs[j][...]
                p_scr[j][...] = jnp.zeros_like(p_scr[j])
                p_scr[j][ones_row:ones_row + 1, :] = jnp.ones(
                    (1, N), jnp.bfloat16)

        # Boundary masks, loaded once per step ((1, N) bf16 rows).
        mask_rows = [m_ref[k:k + 1, :] for k in range(n_taps)]

        x_in = x_ref[0]                      # (Cx0, N) bf16 layer-0 input
        last_h = None
        for j in range(n_layers):
            Cx, Ch, cx_pad, Ktap, Kpad, ones_row = layer_dims[j]
            h_prev = h_scr[j][...]           # (Ch, N) bf16

            # im2col: one rolled+masked copy of x and h per spatial tap,
            # written straight into the aligned patch scratch (tap-major
            # rows [x | pad | h | pad]; pad rows stay zero; the masks kill
            # row / batch wrap-around of the flattened-lane roll).
            for k, (shift, is_center) in enumerate(taps):
                base = k * Ktap
                xv = x_in if shift == 0 else jnp.roll(x_in, -shift, axis=1)
                hv = h_prev if shift == 0 else jnp.roll(h_prev, -shift, axis=1)
                if not is_center:            # center-tap mask is all ones
                    xv = xv * mask_rows[k]
                    hv = hv * mask_rows[k]
                p_scr[j][base:base + Cx, :] = xv
                p_scr[j][base + cx_pad:base + cx_pad + Ch, :] = hv

            # One deep-K MXU pass for all four gates of the whole batch;
            # the bias rides along via the ones row / bias column.
            acc = jnp.dot(w_refs[j][...], p_scr[j][...],
                          preferred_element_type=jnp.float32)   # (4*Ch, N)

            # Gate nonlinearities on wide contiguous tiles (f32; on v6e/v7x
            # these could run in bf16 on the EUP).
            ifo = jax.nn.sigmoid(acc[:3 * Ch, :])
            g = jnp.tanh(acc[3 * Ch:, :])
            i_g = ifo[:Ch, :]
            f_g = ifo[Ch:2 * Ch, :]
            o_g = ifo[2 * Ch:, :]

            c_next = f_g * c_out[j][...] + i_g * g
            h_next = o_g * jnp.tanh(c_next)

            c_out[j][...] = c_next                 # resident f32 cell state
            h_out[j][...] = h_next                 # resident f32 final output
            h_bf = h_next.astype(jnp.bfloat16)
            h_scr[j][...] = h_bf                   # bf16 recurrent h
            x_in = h_bf                            # feeds the next layer
            last_h = h_next

        hseq_ref[0] = last_h                       # per-step last-layer h

    return kernel


# ---------------------------------------------------------------------------
# ConvLSTM stack, mirroring the PyTorch module's forward()
# ---------------------------------------------------------------------------
class ConvLSTMPallas:
    """Mirrors models_PhyDNet.ConvLSTM forward() with a fused Pallas kernel."""

    def __init__(self, input_shape, input_dim, hidden_dims, n_layers,
                 kernel_size, key):
        self.input_shape = tuple(input_shape)
        self.input_dim = input_dim
        self.hidden_dims = list(hidden_dims)
        self.n_layers = n_layers
        self.kernel_size = tuple(kernel_size)
        KH, KW = self.kernel_size

        self.layer_dims = []
        self.conv_params = []    # nn.Conv2d-style (OIHW weight, bias), f32
        self.packed_w = []       # (4*Ch, Kpad) bf16, tap-major, bias folded
        for i in range(n_layers):
            Cx = input_dim if i == 0 else self.hidden_dims[i - 1]
            Ch = self.hidden_dims[i]
            cx_pad = _round_up(Cx, 16)          # bf16 sublane-tile alignment
            ch_pad = _round_up(Ch, 16)
            Ktap = cx_pad + ch_pad
            k_data = KH * KW * Ktap
            Kpad = _round_up(k_data + 1, 128)   # MXU-friendly K, + ones row
            ones_row = k_data
            self.layer_dims.append((Cx, Ch, cx_pad, Ktap, Kpad, ones_row))

            c4 = 4 * Ch
            key, kw_, kb_ = jax.random.split(key, 3)
            # Deterministic synthetic init (stand-in for a checkpoint load).
            w = 0.1 * jax.random.normal(kw_, (c4, Cx + Ch, KH, KW),
                                        jnp.float32)
            b = 0.1 * jax.random.normal(kb_, (c4,), jnp.float32)
            self.conv_params.append((w, b))
            self.packed_w.append(
                self._pack_weights(w, b, Cx, Ch, cx_pad, Ktap, Kpad, ones_row))

        self.H = None
        self.C = None
        self._call_cache = {}
        self._mask_cache = {}

    # -- host-side packing: OIHW conv weight -> (4Ch, Kpad) bf16 matrix -----
    def _pack_weights(self, w, b, Cx, Ch, cx_pad, Ktap, Kpad, ones_row):
        KH, KW = self.kernel_size
        c4 = 4 * Ch
        cols = jnp.zeros((c4, Kpad), jnp.float32)
        tap = 0
        for dh in range(KH):
            for dw in range(KW):
                base = tap * Ktap
                cols = cols.at[:, base:base + Cx].set(w[:, :Cx, dh, dw])
                cols = cols.at[:, base + cx_pad:base + cx_pad + Ch].set(
                    w[:, Cx:, dh, dw])
                tap += 1
        cols = cols.at[:, ones_row].set(b)      # bias rides the ones row
        return cols.astype(jnp.bfloat16)

    # -- "same"-padding boundary masks, built once per batch size -----------
    def _masks(self, batch):
        if batch not in self._mask_cache:
            Hs, Ws = self.input_shape
            KH, KW = self.kernel_size
            ph, pw = KH // 2, KW // 2
            N = batch * Hs * Ws
            lane = jnp.arange(N, dtype=jnp.int32)
            xi = lane % Ws
            yi = (lane // Ws) % Hs
            rows = []
            for dh in range(KH):
                for dw in range(KW):
                    oy, ox = dh - ph, dw - pw
                    ok = ((yi + oy >= 0) & (yi + oy < Hs) &
                          (xi + ox >= 0) & (xi + ox < Ws))
                    rows.append(ok.astype(jnp.bfloat16))
            self._mask_cache[batch] = jnp.stack(rows, axis=0)
        return self._mask_cache[batch]

    # -- layout helpers: NCHW <-> channel-first flattened (C, B*H*W) --------
    def to_cf(self, x_nchw):
        B, C, Hs, Ws = x_nchw.shape
        return jnp.transpose(x_nchw, (1, 0, 2, 3)).reshape(C, B * Hs * Ws)

    def from_cf(self, s_cf, batch):
        Hs, Ws = self.input_shape
        return jnp.transpose(s_cf.reshape(s_cf.shape[0], batch, Hs, Ws),
                             (1, 0, 2, 3))

    # -- fused pallas_call builder (cached per (T, batch)) ------------------
    def _get_call(self, T, batch):
        cache_key = (T, batch)
        if cache_key in self._call_cache:
            return self._call_cache[cache_key]

        Hs, Ws = self.input_shape
        KH, KW = self.kernel_size
        N = batch * Hs * Ws
        L = self.n_layers
        Cx0 = self.input_dim
        Ch_last = self.hidden_dims[-1]
        n_taps = KH * KW
        layer_dims = self.layer_dims

        kernel = _make_rollout_kernel(layer_dims, Hs, Ws, KH, KW, N)

        const = lambda t: (0, 0)
        in_specs = [pl.BlockSpec((1, Cx0, N), lambda t: (t, 0, 0)),   # x_seq
                    pl.BlockSpec((n_taps, N), const)]                 # masks
        in_specs += [pl.BlockSpec((4 * ld[1], ld[4]), const)
                     for ld in layer_dims]                            # weights
        in_specs += [pl.BlockSpec((ld[1], N), const)
                     for ld in layer_dims]                            # h0
        in_specs += [pl.BlockSpec((ld[1], N), const)
                     for ld in layer_dims]                            # c0

        out_specs = [pl.BlockSpec((1, Ch_last, N), lambda t: (t, 0, 0))]
        out_shape = [jax.ShapeDtypeStruct((T, Ch_last, N), jnp.float32)]
        for ld in layer_dims:                                         # H_j
            out_specs.append(pl.BlockSpec((ld[1], N), const))
            out_shape.append(jax.ShapeDtypeStruct((ld[1], N), jnp.float32))
        for ld in layer_dims:                                         # C_j
            out_specs.append(pl.BlockSpec((ld[1], N), const))
            out_shape.append(jax.ShapeDtypeStruct((ld[1], N), jnp.float32))

        scratch_shapes = (
            [pltpu.VMEM((ld[1], N), jnp.bfloat16) for ld in layer_dims] +
            [pltpu.VMEM((ld[4], N), jnp.bfloat16) for ld in layer_dims])

        call = pl.pallas_call(
            kernel,
            out_shape=tuple(out_shape),
            grid_spec=pltpu.PrefetchScalarGridSpec(
                num_scalar_prefetch=0,
                grid=(T,),
                in_specs=in_specs,
                out_specs=tuple(out_specs),
                scratch_shapes=scratch_shapes),
            compiler_params=pltpu.CompilerParams(
                dimension_semantics=("arbitrary",)),
        )

        @jax.jit
        def run(x_seq_cf, masks, weights, h0, c0):
            outs = call(x_seq_cf, masks, *weights, *h0, *c0)
            h_seq = outs[0]
            hs = list(outs[1:1 + L])
            cs = list(outs[1 + L:1 + 2 * L])
            return h_seq, hs, cs

        self._call_cache[cache_key] = run
        return run

    # -- module API ----------------------------------------------------------
    def init_hidden(self, batch):
        Hs, Ws = self.input_shape
        N = batch * Hs * Ws
        self.H = [jnp.zeros((ch, N), jnp.float32) for ch in self.hidden_dims]
        self.C = [jnp.zeros((ch, N), jnp.float32) for ch in self.hidden_dims]

    def forward(self, x_nchw, first_timestep=False):
        """One timestep, all layers (same contract as the PyTorch forward)."""
        batch = x_nchw.shape[0]
        if first_timestep or self.H is None:
            self.init_hidden(batch)
        x_cf = self.to_cf(x_nchw).astype(jnp.bfloat16)[None]   # (1, Cx, N)
        run = self._get_call(1, batch)
        _, hs, cs = run(x_cf, self._masks(batch), tuple(self.packed_w),
                        tuple(self.H), tuple(self.C))
        self.H, self.C = hs, cs
        return (self.H, self.C), self.H

    def rollout(self, x_seq_nchw):
        """Whole sequence (from zero state) in ONE fused pallas_call."""
        T, batch = x_seq_nchw.shape[0], x_seq_nchw.shape[1]
        Hs, Ws = self.input_shape
        N = batch * Hs * Ws
        x_cf = jnp.transpose(x_seq_nchw, (0, 2, 1, 3, 4)).reshape(
            T, self.input_dim, N).astype(jnp.bfloat16)
        h0 = tuple(jnp.zeros((ch, N), jnp.float32) for ch in self.hidden_dims)
        c0 = tuple(jnp.zeros((ch, N), jnp.float32) for ch in self.hidden_dims)
        run = self._get_call(T, batch)
        h_seq, hs, cs = run(x_cf, self._masks(batch), tuple(self.packed_w),
                            h0, c0)
        return hs, cs, h_seq


# ---------------------------------------------------------------------------
# Pure-JAX reference (NCHW lax.conv), matching the kernel's MXU precision
# (bf16 conv operands, f32 accumulation, f32 gate/state math).
# ---------------------------------------------------------------------------
def _cell_reference(x, h, c, w_oihw, bias):
    ch = h.shape[1]
    comb = jnp.concatenate([x, h], axis=1)
    cc = lax.conv_general_dilated(
        comb.astype(jnp.bfloat16), w_oihw.astype(jnp.bfloat16),
        window_strides=(1, 1), padding="SAME",
        dimension_numbers=("NCHW", "OIHW", "NCHW"),
        preferred_element_type=jnp.float32)
    cc = cc + bias.reshape(1, -1, 1, 1)
    i = jax.nn.sigmoid(cc[:, 0 * ch:1 * ch])
    f = jax.nn.sigmoid(cc[:, 1 * ch:2 * ch])
    o = jax.nn.sigmoid(cc[:, 2 * ch:3 * ch])
    g = jnp.tanh(cc[:, 3 * ch:4 * ch])
    c_next = f * c + i * g
    h_next = o * jnp.tanh(c_next)
    return h_next, c_next


if __name__ == "__main__":
    key = jax.random.PRNGKey(0)
    key, kx, kp = jax.random.split(key, 3)

    B, Cin, HS, WS, T = 2, 4, 16, 16, 8
    hidden_dims = [32, 32]
    n_layers = 2
    kernel_size = (3, 3)

    # PyTorch-style NCHW input sequence (seq, batch, channels, H, W).
    x_seq = jax.random.normal(kx, (T, B, Cin, HS, WS), jnp.float32)

    model = ConvLSTMPallas(input_shape=(HS, WS), input_dim=Cin,
                           hidden_dims=hidden_dims, n_layers=n_layers,
                           kernel_size=kernel_size, key=kp)

    # Pallas path: the whole sequence in one fused kernel (grid over T).
    Hf, Cf, h_seq = model.rollout(x_seq)
    Hf = [jax.block_until_ready(h) for h in Hf]
    Cf = [jax.block_until_ready(c) for c in Cf]
    h_seq = jax.block_until_ready(h_seq)

    # Reference recurrence (same precision choices as the kernel).
    ref_H = [jnp.zeros((B, ch, HS, WS), jnp.float32) for ch in hidden_dims]
    ref_C = [jnp.zeros((B, ch, HS, WS), jnp.float32) for ch in hidden_dims]
    ref_last = []
    for t in range(T):
        for j in range(n_layers):
            w, b = model.conv_params[j]
            inp = x_seq[t] if j == 0 else ref_H[j - 1]
            ref_H[j], ref_C[j] = _cell_reference(inp, ref_H[j], ref_C[j], w, b)
        ref_last.append(ref_H[-1])
    ref_last = jnp.stack(ref_last)

    ok = True
    for j in range(n_layers):
        ok &= bool(jnp.allclose(model.from_cf(Hf[j], B), ref_H[j],
                                rtol=1e-2, atol=1e-2))
        ok &= bool(jnp.allclose(model.from_cf(Cf[j], B), ref_C[j],
                                rtol=1e-2, atol=1e-2))
    h_seq_nchw = jnp.transpose(
        h_seq.reshape(T, hidden_dims[-1], B, HS, WS), (0, 2, 1, 3, 4))
    ok &= bool(jnp.allclose(h_seq_nchw, ref_last, rtol=1e-2, atol=1e-2))

    print("KERNEL_OK" if ok else "MISMATCH")
</pallas_src>

<mosaic_0001>
module attributes {stable_mosaic.version = 11 : i64} {
  func.func @kernel(%arg0: i32, %arg1: memref<1x4x512xbf16, #tpu.memory_space<vmem>>, %arg2: memref<9x512xbf16, #tpu.memory_space<vmem>>, %arg3: memref<128x512xbf16, #tpu.memory_space<vmem>>, %arg4: memref<128x640xbf16, #tpu.memory_space<vmem>>, %arg5: memref<32x512xf32, #tpu.memory_space<vmem>>, %arg6: memref<32x512xf32, #tpu.memory_space<vmem>>, %arg7: memref<32x512xf32, #tpu.memory_space<vmem>>, %arg8: memref<32x512xf32, #tpu.memory_space<vmem>>, %arg9: memref<1x32x512xf32, #tpu.memory_space<vmem>>, %arg10: memref<32x512xf32, #tpu.memory_space<vmem>>, %arg11: memref<32x512xf32, #tpu.memory_space<vmem>>, %arg12: memref<32x512xf32, #tpu.memory_space<vmem>>, %arg13: memref<32x512xf32, #tpu.memory_space<vmem>>, %arg14: memref<32x512xbf16, #tpu.memory_space<vmem>>, %arg15: memref<32x512xbf16, #tpu.memory_space<vmem>>, %arg16: memref<512x512xbf16, #tpu.memory_space<vmem>>, %arg17: memref<640x512xbf16, #tpu.memory_space<vmem>>) attributes {dimension_semantics = [#tpu.dimension_semantics<arbitrary>], iteration_bounds = array<i64: 8>, scalar_prefetch = 0 : i64, scratch_operands = 4 : i64, tpu.core_type = #tpu.core_type<tc>, window_params = [{transform_indices = @transform_0, window_bounds = array<i64: 1, 4, 512>}, {pipeline_mode = #tpu.pipeline_mode<synchronous>, transform_indices = @transform_1, window_bounds = array<i64: 9, 512>}, {pipeline_mode = #tpu.pipeline_mode<synchronous>, transform_indices = @transform_2, window_bounds = array<i64: 128, 512>}, {pipeline_mode = #tpu.pipeline_mode<synchronous>, transform_indices = @transform_3, window_bounds = array<i64: 128, 640>}, {pipeline_mode = #tpu.pipeline_mode<synchronous>, transform_indices = @transform_4, window_bounds = array<i64: 32, 512>}, {pipeline_mode = #tpu.pipeline_mode<synchronous>, transform_indices = @transform_5, window_bounds = array<i64: 32, 512>}, {pipeline_mode = #tpu.pipeline_mode<synchronous>, transform_indices = @transform_6, window_bounds = array<i64: 32, 512>}, {pipeline_mode = #tpu.pipeline_mode<synchronous>, transform_indices = @transform_7, window_bounds = array<i64: 32, 512>}, {transform_indices = @transform_8, window_bounds = array<i64: 1, 32, 512>}, {pipeline_mode = #tpu.pipeline_mode<synchronous>, transform_indices = @transform_9, window_bounds = array<i64: 32, 512>}, {pipeline_mode = #tpu.pipeline_mode<synchronous>, transform_indices = @transform_10, window_bounds = array<i64: 32, 512>}, {pipeline_mode = #tpu.pipeline_mode<synchronous>, transform_indices = @transform_11, window_bounds = array<i64: 32, 512>}, {pipeline_mode = #tpu.pipeline_mode<synchronous>, transform_indices = @transform_12, window_bounds = array<i64: 32, 512>}]} {
    %c0_i32 = arith.constant 0 : i32
    %0 = arith.cmpi eq, %arg0, %c0_i32 : i32
    %1 = arith.extui %0 : i1 to i32
    %c0_i32_0 = arith.constant 0 : i32
    %2 = arith.cmpi ne, %1, %c0_i32_0 : i32
    scf.if %2 {
      %c0_92 = arith.constant 0 : index
      %c0_93 = arith.constant 0 : index
      %262 = vector.load %arg5[%c0_92, %c0_93] : memref<32x512xf32, #tpu.memory_space<vmem>>, vector<32x512xf32>
      %263 = arith.truncf %262 : vector<32x512xf32> to vector<32x512xbf16>
      %c0_94 = arith.constant 0 : index
      %c0_95 = arith.constant 0 : index
      %264 = vector.load %arg14[%c0_94, %c0_95] : memref<32x512xbf16, #tpu.memory_space<vmem>>, vector<32x512xbf16>
      tpu.vector_store %arg14[%c0_94, %c0_95], %263 {strides = array<i32>} : memref<32x512xbf16, #tpu.memory_space<vmem>>, vector<32x512xbf16>,
      %c0_96 = arith.constant 0 : index
      %c0_97 = arith.constant 0 : index
      %265 = vector.load %arg7[%c0_96, %c0_97] : memref<32x512xf32, #tpu.memory_space<vmem>>, vector<32x512xf32>
      %c0_98 = arith.constant 0 : index
      %c0_99 = arith.constant 0 : index
      %266 = vector.load %arg12[%c0_98, %c0_99] : memref<32x512xf32, #tpu.memory_space<vmem>>, vector<32x512xf32>
      tpu.vector_store %arg12[%c0_98, %c0_99], %265 {strides = array<i32>} : memref<32x512xf32, #tpu.memory_space<vmem>>, vector<32x512xf32>,
      %cst_100 = arith.constant 0.000000e+00 : bf16
      %267 = vector.broadcast %cst_100 : bf16 to vector<512x512xbf16>
      %c0_101 = arith.constant 0 : index
      %c0_102 = arith.constant 0 : index
      %268 = vector.load %arg16[%c0_101, %c0_102] : memref<512x512xbf16, #tpu.memory_space<vmem>>, vector<512x512xbf16>
      tpu.vector_store %arg16[%c0_101, %c0_102], %267 {strides = array<i32>} : memref<512x512xbf16, #tpu.memory_space<vmem>>, vector<512x512xbf16>,
      %cst_103 = arith.constant 1.000000e+00 : bf16
      %269 = vector.broadcast %cst_103 : bf16 to vector<1x512xbf16>
      %c432 = arith.constant 432 : index
      %c0_104 = arith.constant 0 : index
      %270 = vector.load %arg16[%c432, %c0_104] : memref<512x512xbf16, #tpu.memory_space<vmem>>, vector<1x512xbf16>
      tpu.vector_store %arg16[%c432, %c0_104], %269 {strides = array<i32>} : memref<512x512xbf16, #tpu.memory_space<vmem>>, vector<1x512xbf16>,
      %c0_105 = arith.constant 0 : index
      %c0_106 = arith.constant 0 : index
      %271 = vector.load %arg6[%c0_105, %c0_106] : memref<32x512xf32, #tpu.memory_space<vmem>>, vector<32x512xf32>
      %272 = arith.truncf %271 : vector<32x512xf32> to vector<32x512xbf16>
      %c0_107 = arith.constant 0 : index
      %c0_108 = arith.constant 0 : index
      %273 = vector.load %arg15[%c0_107, %c0_108] : memref<32x512xbf16, #tpu.memory_space<vmem>>, vector<32x512xbf16>
      tpu.vector_store %arg15[%c0_107, %c0_108], %272 {strides = array<i32>} : memref<32x512xbf16, #tpu.memory_space<vmem>>, vector<32x512xbf16>,
      %c0_109 = arith.constant 0 : index
      %c0_110 = arith.constant 0 : index
      %274 = vector.load %arg8[%c0_109, %c0_110] : memref<32x512xf32, #tpu.memory_space<vmem>>, vector<32x512xf32>
      %c0_111 = arith.constant 0 : index
      %c0_112 = arith.constant 0 : index
      %275 = vector.load %arg13[%c0_111, %c0_112] : memref<32x512xf32, #tpu.memory_space<vmem>>, vector<32x512xf32>
      tpu.vector_store %arg13[%c0_111, %c0_112], %274 {strides = array<i32>} : memref<32x512xf32, #tpu.memory_space<vmem>>, vector<32x512xf32>,
      %cst_113 = arith.constant 0.000000e+00 : bf16
      %276 = vector.broadcast %cst_113 : bf16 to vector<640x512xbf16>
      %c0_114 = arith.constant 0 : index
      %c0_115 = arith.constant 0 : index
      %277 = vector.load %arg17[%c0_114, %c0_115] : memref<640x512xbf16, #tpu.memory_space<vmem>>, vector<640x512xbf16>
      tpu.vector_store %arg17[%c0_114, %c0_115], %276 {strides = array<i32>} : memref<640x512xbf16, #tpu.memory_space<vmem>>, vector<640x512xbf16>,
      %cst_116 = arith.constant 1.000000e+00 : bf16
      %278 = vector.broadcast %cst_116 : bf16 to vector<1x512xbf16>
      %c576 = arith.constant 576 : index
      %c0_117 = arith.constant 0 : index
      %279 = vector.load %arg17[%c576, %c0_117] : memref<640x512xbf16, #tpu.memory_space<vmem>>, vector<1x512xbf16>
      tpu.vector_store %arg17[%c576, %c0_117], %278 {strides = array<i32>} : memref<640x512xbf16, #tpu.memory_space<vmem>>, vector<1x512xbf16>,
    } else {
    }
    %c0 = arith.constant 0 : index
    %c0_1 = arith.constant 0 : index
    %3 = vector.load %arg2[%c0, %c0_1] : memref<9x512xbf16, #tpu.memory_space<vmem>>, vector<1x512xbf16>
    %c1 = arith.constant 1 : index
    %c0_2 = arith.constant 0 : index
    %4 = vector.load %arg2[%c1, %c0_2] : memref<9x512xbf16, #tpu.memory_space<vmem>>, vector<1x512xbf16>
    %c2 = arith.constant 2 : index
    %c0_3 = arith.constant 0 : index
    %5 = vector.load %arg2[%c2, %c0_3] : memref<9x512xbf16, #tpu.memory_space<vmem>>, vector<1x512xbf16>
    %c3 = arith.constant 3 : index
    %c0_4 = arith.constant 0 : index
    %6 = vector.load %arg2[%c3, %c0_4] : memref<9x512xbf16, #tpu.memory_space<vmem>>, vector<1x512xbf16>
    %c5 = arith.constant 5 : index
    %c0_5 = arith.constant 0 : index
    %7 = vector.load %arg2[%c5, %c0_5] : memref<9x512xbf16, #tpu.memory_space<vmem>>, vector<1x512xbf16>
    %c6 = arith.constant 6 : index
    %c0_6 = arith.constant 0 : index
    %8 = vector.load %arg2[%c6, %c0_6] : memref<9x512xbf16, #tpu.memory_space<vmem>>, vector<1x512xbf16>
    %c7 = arith.constant 7 : index
    %c0_7 = arith.constant 0 : index
    %9 = vector.load %arg2[%c7, %c0_7] : memref<9x512xbf16, #tpu.memory_space<vmem>>, vector<1x512xbf16>
    %c8 = arith.constant 8 : index
    %c0_8 = arith.constant 0 : index
    %10 = vector.load %arg2[%c8, %c0_8] : memref<9x512xbf16, #tpu.memory_space<vmem>>, vector<1x512xbf16>
    %c0_9 = arith.constant 0 : index
    %c0_10 = arith.constant 0 : index
    %c0_11 = arith.constant 0 : index
    %11 = vector.load %arg1[%c0_9, %c0_10, %c0_11] : memref<1x4x512xbf16, #tpu.memory_space<vmem>>, vector<1x4x512xbf16>
    %12 = vector.shape_cast %11 : vector<1x4x512xbf16> to vector<4x512xbf16>
    %c0_12 = arith.constant 0 : index
    %c0_13 = arith.constant 0 : index
    %13 = vector.load %arg14[%c0_12, %c0_13] : memref<32x512xbf16, #tpu.memory_space<vmem>>, vector<32x512xbf16>
    %14 = vector.extract_strided_slice %12 {offsets = [0, 495], sizes = [4, 17], strides = [1, 1]} : vector<4x512xbf16> to vector<4x17xbf16>
    %15 = vector.extract_strided_slice %12 {offsets = [0, 0], sizes = [4, 495], strides = [1, 1]} : vector<4x512xbf16> to vector<4x495xbf16>
    %16 = tpu.concatenate %14, %15 in 1 : vector<4x17xbf16>, vector<4x495xbf16> -> vector<4x512xbf16>
    %17 = vector.extract_strided_slice %13 {offsets = [0, 495], sizes = [32, 17], strides = [1, 1]} : vector<32x512xbf16> to vector<32x17xbf16>
    %18 = vector.extract_strided_slice %13 {offsets = [0, 0], sizes = [32, 495], strides = [1, 1]} : vector<32x512xbf16> to vector<32x495xbf16>
    %19 = tpu.concatenate %17, %18 in 1 : vector<32x17xbf16>, vector<32x495xbf16> -> vector<32x512xbf16>
    %20 = vector.broadcast %3 : vector<1x512xbf16> to vector<4x512xbf16>
    %21 = arith.mulf %16, %20 : vector<4x512xbf16>
    %22 = vector.broadcast %3 : vector<1x512xbf16> to vector<32x512xbf16>
    %23 = arith.mulf %19, %22 : vector<32x512xbf16>
    %c0_14 = arith.constant 0 : index
    %c0_15 = arith.constant 0 : index
    %24 = vector.load %arg16[%c0_14, %c0_15] : memref<512x512xbf16, #tpu.memory_space<vmem>>, vector<4x512xbf16>
    tpu.vector_store %arg16[%c0_14, %c0_15], %21 {strides = array<i32>} : memref<512x512xbf16, #tpu.memory_space<vmem>>, vector<4x512xbf16>,
    %c16 = arith.constant 16 : index
    %c0_16 = arith.constant 0 : index
    %25 = vector.load %arg16[%c16, %c0_16] : memref<512x512xbf16, #tpu.memory_space<vmem>>, vector<32x512xbf16>
    tpu.vector_store %arg16[%c16, %c0_16], %23 {strides = array<i32>} : memref<512x512xbf16, #tpu.memory_space<vmem>>, vector<32x512xbf16>,
    %26 = vector.extract_strided_slice %12 {offsets = [0, 496], sizes = [4, 16], strides = [1, 1]} : vector<4x512xbf16> to vector<4x16xbf16>
    %27 = vector.extract_strided_slice %12 {offsets = [0, 0], sizes = [4, 496], strides = [1, 1]} : vector<4x512xbf16> to vector<4x496xbf16>
    %28 = tpu.concatenate %26, %27 in 1 : vector<4x16xbf16>, vector<4x496xbf16> -> vector<4x512xbf16>
    %29 = vector.extract_strided_slice %13 {offsets = [0, 496], sizes = [32, 16], strides = [1, 1]} : vector<32x512xbf16> to vector<32x16xbf16>
    %30 = vector.extract_strided_slice %13 {offsets = [0, 0], sizes = [32, 496], strides = [1, 1]} : vector<32x512xbf16> to vector<32x496xbf16>
    %31 = tpu.concatenate %29, %30 in 1 : vector<32x16xbf16>, vector<32x496xbf16> -> vector<32x512xbf16>
    %32 = vector.broadcast %4 : vector<1x512xbf16> to vector<4x512xbf16>
    %33 = arith.mulf %28, %32 : vector<4x512xbf16>
    %34 = vector.broadcast %4 : vector<1x512xbf16> to vector<32x512xbf16>
    %35 = arith.mulf %31, %34 : vector<32x512xbf16>
    %c48 = arith.constant 48 : index
    %c0_17 = arith.constant 0 : index
    %36 = vector.load %arg16[%c48, %c0_17] : memref<512x512xbf16, #tpu.memory_space<vmem>>, vector<4x512xbf16>
    tpu.vector_store %arg16[%c48, %c0_17], %33 {strides = array<i32>} : memref<512x512xbf16, #tpu.memory_space<vmem>>, vector<4x512xbf16>,
    %c64 = arith.constant 64 : index
    %c0_18 = arith.constant 0 : index
    %37 = vector.load %arg16[%c64, %c0_18] : memref<512x512xbf16, #tpu.memory_space<vmem>>, vector<32x512xbf16>
    tpu.vector_store %arg16[%c64, %c0_18], %35 {strides = array<i32>} : memref<512x512xbf16, #tpu.memory_space<vmem>>, vector<32x512xbf16>,
    %38 = vector.extract_strided_slice %12 {offsets = [0, 497], sizes = [4, 15], strides = [1, 1]} : vector<4x512xbf16> to vector<4x15xbf16>
    %39 = vector.extract_strided_slice %12 {offsets = [0, 0], sizes = [4, 497], strides = [1, 1]} : vector<4x512xbf16> to vector<4x497xbf16>
    %40 = tpu.concatenate %38, %39 in 1 : vector<4x15xbf16>, vector<4x497xbf16> -> vector<4x512xbf16>
    %41 = vector.extract_strided_slice %13 {offsets = [0, 497], sizes = [32, 15], strides = [1, 1]} : vector<32x512xbf16> to vector<32x15xbf16>
    %42 = vector.extract_strided_slice %13 {offsets = [0, 0], sizes = [32, 497], strides = [1, 1]} : vector<32x512xbf16> to vector<32x497xbf16>
    %43 = tpu.concatenate %41, %42 in 1 : vector<32x15xbf16>, vector<32x497xbf16> -> vector<32x512xbf16>
    %44 = vector.broadcast %5 : vector<1x512xbf16> to vector<4x512xbf16>
    %45 = arith.mulf %40, %44 : vector<4x512xbf16>
    %46 = vector.broadcast %5 : vector<1x512xbf16> to vector<32x512xbf16>
    %47 = arith.mulf %43, %46 : vector<32x512xbf16>
    %c96 = arith.constant 96 : index
    %c0_19 = arith.constant 0 : index
    %48 = vector.load %arg16[%c96, %c0_19] : memref<512x512xbf16, #tpu.memory_space<vmem>>, vector<4x512xbf16>
    tpu.vector_store %arg16[%c96, %c0_19], %45 {strides = array<i32>} : memref<512x512xbf16, #tpu.memory_space<vmem>>, vector<4x512xbf16>,
    %c112 = arith.constant 112 : index
    %c0_20 = arith.constant 0 : index
    %49 = vector.load %arg16[%c112, %c0_20] : memref<512x512xbf16, #tpu.memory_space<vmem>>, vector<32x512xbf16>
    tpu.vector_store %arg16[%c112, %c0_20], %47 {strides = array<i32>} : memref<512x512xbf16, #tpu.memory_space<vmem>>, vector<32x512xbf16>,
    %50 = vector.extract_strided_slice %12 {offsets = [0, 511], sizes = [4, 1], strides = [1, 1]} : vector<4x512xbf16> to vector<4x1xbf16>
    %51 = vector.extract_strided_slice %12 {offsets = [0, 0], sizes = [4, 511], strides = [1, 1]} : vector<4x512xbf16> to vector<4x511xbf16>
    %52 = tpu.concatenate %50, %51 in 1 : vector<4x1xbf16>, vector<4x511xbf16> -> vector<4x512xbf16>
    %53 = vector.extract_strided_slice %13 {offsets = [0, 511], sizes = [32, 1], strides = [1, 1]} : vector<32x512xbf16> to vector<32x1xbf16>
    %54 = vector.extract_strided_slice %13 {offsets = [0, 0], sizes = [32, 511], strides = [1, 1]} : vector<32x512xbf16> to vector<32x511xbf16>
    %55 = tpu.concatenate %53, %54 in 1 : vector<32x1xbf16>, vector<32x511xbf16> -> vector<32x512xbf16>
    %56 = vector.broadcast %6 : vector<1x512xbf16> to vector<4x512xbf16>
    %57 = arith.mulf %52, %56 : vector<4x512xbf16>
    %58 = vector.broadcast %6 : vector<1x512xbf16> to vector<32x512xbf16>
    %59 = arith.mulf %55, %58 : vector<32x512xbf16>
    %c144 = arith.constant 144 : index
    %c0_21 = arith.constant 0 : index
    %60 = vector.load %arg16[%c144, %c0_21] : memref<512x512xbf16, #tpu.memory_space<vmem>>, vector<4x512xbf16>
    tpu.vector_store %arg16[%c144, %c0_21], %57 {strides = array<i32>} : memref<512x512xbf16, #tpu.memory_space<vmem>>, vector<4x512xbf16>,
    %c160 = arith.constant 160 : index
    %c0_22 = arith.constant 0 : index
    %61 = vector.load %arg16[%c160, %c0_22] : memref<512x512xbf16, #tpu.memory_space<vmem>>, vector<32x512xbf16>
    tpu.vector_store %arg16[%c160, %c0_22], %59 {strides = array<i32>} : memref<512x512xbf16, #tpu.memory_space<vmem>>, vector<32x512xbf16>,
    %c192 = arith.constant 192 : index
    %c0_23 = arith.constant 0 : index
    %62 = vector.load %arg16[%c192, %c0_23] : memref<512x512xbf16, #tpu.memory_space<vmem>>, vector<4x512xbf16>
    tpu.vector_store %arg16[%c192, %c0_23], %12 {strides = array<i32>} : memref<512x512xbf16, #tpu.memory_space<vmem>>, vector<4x512xbf16>,
    %c208 = arith.constant 208 : index
    %c0_24 = arith.constant 0 : index
    %63 = vector.load %arg16[%c208, %c0_24] : memref<512x512xbf16, #tpu.memory_space<vmem>>, vector<32x512xbf16>
    tpu.vector_store %arg16[%c208, %c0_24], %13 {strides = array<i32>} : memref<512x512xbf16, #tpu.memory_space<vmem>>, vector<32x512xbf16>,
    %64 = vector.extract_strided_slice %12 {offsets = [0, 1], sizes = [4, 511], strides = [1, 1]} : vector<4x512xbf16> to vector<4x511xbf16>
    %65 = vector.extract_strided_slice %12 {offsets = [0, 0], sizes = [4, 1], strides = [1, 1]} : vector<4x512xbf16> to vector<4x1xbf16>
    %66 = tpu.concatenate %64, %65 in 1 : vector<4x511xbf16>, vector<4x1xbf16> -> vector<4x512xbf16>
    %67 = vector.extract_strided_slice %13 {offsets = [0, 1], sizes = [32, 511], strides = [1, 1]} : vector<32x512xbf16> to vector<32x511xbf16>
    %68 = vector.extract_strided_slice %13 {offsets = [0, 0], sizes = [32, 1], strides = [1, 1]} : vector<32x512xbf16> to vector<32x1xbf16>
    %69 = tpu.concatenate %67, %68 in 1 : vector<32x511xbf16>, vector<32x1xbf16> -> vector<32x512xbf16>
    %70 = vector.broadcast %7 : vector<1x512xbf16> to vector<4x512xbf16>
    %71 = arith.mulf %66, %70 : vector<4x512xbf16>
    %72 = vector.broadcast %7 : vector<1x512xbf16> to vector<32x512xbf16>
    %73 = arith.mulf %69, %72 : vector<32x512xbf16>
    %c240 = arith.constant 240 : index
    %c0_25 = arith.constant 0 : index
    %74 = vector.load %arg16[%c240, %c0_25] : memref<512x512xbf16, #tpu.memory_space<vmem>>, vector<4x512xbf16>
    tpu.vector_store %arg16[%c240, %c0_25], %71 {strides = array<i32>} : memref<512x512xbf16, #tpu.memory_space<vmem>>, vector<4x512xbf16>,
    %c256 = arith.constant 256 : index
    %c0_26 = arith.constant 0 : index
    %75 = vector.load %arg16[%c256, %c0_26] : memref<512x512xbf16, #tpu.memory_space<vmem>>, vector<32x512xbf16>
    tpu.vector_store %arg16[%c256, %c0_26], %73 {strides = array<i32>} : memref<512x512xbf16, #tpu.memory_space<vmem>>, vector<32x512xbf16>,
    %76 = vector.extract_strided_slice %12 {offsets = [0, 15], sizes = [4, 497], strides = [1, 1]} : vector<4x512xbf16> to vector<4x497xbf16>
    %77 = vector.extract_strided_slice %12 {offsets = [0, 0], sizes = [4, 15], strides = [1, 1]} : vector<4x512xbf16> to vector<4x15xbf16>
    %78 = tpu.concatenate %76, %77 in 1 : vector<4x497xbf16>, vector<4x15xbf16> -> vector<4x512xbf16>
    %79 = vector.extract_strided_slice %13 {offsets = [0, 15], sizes = [32, 497], strides = [1, 1]} : vector<32x512xbf16> to vector<32x497xbf16>
    %80 = vector.extract_strided_slice %13 {offsets = [0, 0], sizes = [32, 15], strides = [1, 1]} : vector<32x512xbf16> to vector<32x15xbf16>
    %81 = tpu.concatenate %79, %80 in 1 : vector<32x497xbf16>, vector<32x15xbf16> -> vector<32x512xbf16>
    %82 = vector.broadcast %8 : vector<1x512xbf16> to vector<4x512xbf16>
    %83 = arith.mulf %78, %82 : vector<4x512xbf16>
    %84 = vector.broadcast %8 : vector<1x512xbf16> to vector<32x512xbf16>
    %85 = arith.mulf %81, %84 : vector<32x512xbf16>
    %c288 = arith.constant 288 : index
    %c0_27 = arith.constant 0 : index
    %86 = vector.load %arg16[%c288, %c0_27] : memref<512x512xbf16, #tpu.memory_space<vmem>>, vector<4x512xbf16>
    tpu.vector_store %arg16[%c288, %c0_27], %83 {strides = array<i32>} : memref<512x512xbf16, #tpu.memory_space<vmem>>, vector<4x512xbf16>,
    %c304 = arith.constant 304 : index
    %c0_28 = arith.constant 0 : index
    %87 = vector.load %arg16[%c304, %c0_28] : memref<512x512xbf16, #tpu.memory_space<vmem>>, vector<32x512xbf16>
    tpu.vector_store %arg16[%c304, %c0_28], %85 {strides = array<i32>} : memref<512x512xbf16, #tpu.memory_space<vmem>>, vector<32x512xbf16>,
    %88 = vector.extract_strided_slice %12 {offsets = [0, 16], sizes = [4, 496], strides = [1, 1]} : vector<4x512xbf16> to vector<4x496xbf16>
    %89 = vector.extract_strided_slice %12 {offsets = [0, 0], sizes = [4, 16], strides = [1, 1]} : vector<4x512xbf16> to vector<4x16xbf16>
    %90 = tpu.concatenate %88, %89 in 1 : vector<4x496xbf16>, vector<4x16xbf16> -> vector<4x512xbf16>
    %91 = vector.extract_strided_slice %13 {offsets = [0, 16], sizes = [32, 496], strides = [1, 1]} : vector<32x512xbf16> to vector<32x496xbf16>
    %92 = vector.extract_strided_slice %13 {offsets = [0, 0], sizes = [32, 16], strides = [1, 1]} : vector<32x512xbf16> to vector<32x16xbf16>
    %93 = tpu.concatenate %91, %92 in 1 : vector<32x496xbf16>, vector<32x16xbf16> -> vector<32x512xbf16>
    %94 = vector.broadcast %9 : vector<1x512xbf16> to vector<4x512xbf16>
    %95 = arith.mulf %90, %94 : vector<4x512xbf16>
    %96 = vector.broadcast %9 : vector<1x512xbf16> to vector<32x512xbf16>
    %97 = arith.mulf %93, %96 : vector<32x512xbf16>
    %c336 = arith.constant 336 : index
    %c0_29 = arith.constant 0 : index
    %98 = vector.load %arg16[%c336, %c0_29] : memref<512x512xbf16, #tpu.memory_space<vmem>>, vector<4x512xbf16>
    tpu.vector_store %arg16[%c336, %c0_29], %95 {strides = array<i32>} : memref<512x512xbf16, #tpu.memory_space<vmem>>, vector<4x512xbf16>,
    %c352 = arith.constant 352 : index
    %c0_30 = arith.constant 0 : index
    %99 = vector.load %arg16[%c352, %c0_30] : memref<512x512xbf16, #tpu.memory_space<vmem>>, vector<32x512xbf16>
    tpu.vector_store %arg16[%c352, %c0_30], %97 {strides = array<i32>} : memref<512x512xbf16, #tpu.memory_space<vmem>>, vector<32x512xbf16>,
    %100 = vector.extract_strided_slice %12 {offsets = [0, 17], sizes = [4, 495], strides = [1, 1]} : vector<4x512xbf16> to vector<4x495xbf16>
    %101 = vector.extract_strided_slice %12 {offsets = [0, 0], sizes = [4, 17], strides = [1, 1]} : vector<4x512xbf16> to vector<4x17xbf16>
    %102 = tpu.concatenate %100, %101 in 1 : vector<4x495xbf16>, vector<4x17xbf16> -> vector<4x512xbf16>
    %103 = vector.extract_strided_slice %13 {offsets = [0, 17], sizes = [32, 495], strides = [1, 1]} : vector<32x512xbf16> to vector<32x495xbf16>
    %104 = vector.extract_strided_slice %13 {offsets = [0, 0], sizes = [32, 17], strides = [1, 1]} : vector<32x512xbf16> to vector<32x17xbf16>
    %105 = tpu.concatenate %103, %104 in 1 : vector<32x495xbf16>, vector<32x17xbf16> -> vector<32x512xbf16>
    %106 = vector.broadcast %10 : vector<1x512xbf16> to vector<4x512xbf16>
    %107 = arith.mulf %102, %106 : vector<4x512xbf16>
    %108 = vector.broadcast %10 : vector<1x512xbf16> to vector<32x512xbf16>
    %109 = arith.mulf %105, %108 : vector<32x512xbf16>
    %c384 = arith.constant 384 : index
    %c0_31 = arith.constant 0 : index
    %110 = vector.load %arg16[%c384, %c0_31] : memref<512x512xbf16, #tpu.memory_space<vmem>>, vector<4x512xbf16>
    tpu.vector_store %arg16[%c384, %c0_31], %107 {strides = array<i32>} : memref<512x512xbf16, #tpu.memory_space<vmem>>, vector<4x512xbf16>,
    %c400 = arith.constant 400 : index
    %c0_32 = arith.constant 0 : index
    %111 = vector.load %arg16[%c400, %c0_32] : memref<512x512xbf16, #tpu.memory_space<vmem>>, vector<32x512xbf16>
    tpu.vector_store %arg16[%c400, %c0_32], %109 {strides = array<i32>} : memref<512x512xbf16, #tpu.memory_space<vmem>>, vector<32x512xbf16>,
    %c0_33 = arith.constant 0 : index
    %c0_34 = arith.constant 0 : index
    %112 = vector.load %arg3[%c0_33, %c0_34] : memref<128x512xbf16, #tpu.memory_space<vmem>>, vector<128x512xbf16>
    %c0_35 = arith.constant 0 : index
    %c0_36 = arith.constant 0 : index
    %113 = vector.load %arg16[%c0_35, %c0_36] : memref<512x512xbf16, #tpu.memory_space<vmem>>, vector<512x512xbf16>
    %cst = arith.constant dense<0.000000e+00> : vector<128x512xf32>
    %114 = tpu.matmul %112, %113, %cst {dimension_numbers = #tpu.dot_dimension_numbers<[1], [0], [0], [1], [0, 0, 1, 1], [], []>} : vector<128x512xbf16>, vector<512x512xbf16>, vector<128x512xf32> -> vector<128x512xf32>
    %115 = vector.extract_strided_slice %114 {offsets = [0, 0], sizes = [96, 512], strides = [1, 1]} : vector<128x512xf32> to vector<96x512xf32>
    %116 = arith.negf %115 : vector<96x512xf32>
    %117 = math.exp %116 : vector<96x512xf32>
    %cst_37 = arith.constant 1.000000e+00 : f32
    %118 = vector.broadcast %cst_37 : f32 to vector<96x512xf32>
    %119 = arith.addf %118, %117 : vector<96x512xf32>
    %120 = arith.divf %118, %119 : vector<96x512xf32>
    %121 = vector.extract_strided_slice %114 {offsets = [96, 0], sizes = [32, 512], strides = [1, 1]} : vector<128x512xf32> to vector<32x512xf32>
    %122 = math.tanh %121 : vector<32x512xf32>
    %123 = vector.extract_strided_slice %120 {offsets = [0, 0], sizes = [32, 512], strides = [1, 1]} : vector<96x512xf32> to vector<32x512xf32>
    %124 = vector.extract_strided_slice %120 {offsets = [32, 0], sizes = [32, 512], strides = [1, 1]} : vector<96x512xf32> to vector<32x512xf32>
    %125 = vector.extract_strided_slice %120 {offsets = [64, 0], sizes = [32, 512], strides = [1, 1]} : vector<96x512xf32> to vector<32x512xf32>
    %c0_38 = arith.constant 0 : index
    %c0_39 = arith.constant 0 : index
    %126 = vector.load %arg12[%c0_38, %c0_39] : memref<32x512xf32, #tpu.memory_space<vmem>>, vector<32x512xf32>
    %127 = arith.mulf %124, %126 : vector<32x512xf32>
    %128 = arith.mulf %123, %122 : vector<32x512xf32>
    %129 = arith.addf %127, %128 : vector<32x512xf32>
    %130 = math.tanh %129 : vector<32x512xf32>
    %131 = arith.mulf %125, %130 : vector<32x512xf32>
    %c0_40 = arith.constant 0 : index
    %c0_41 = arith.constant 0 : index
    %132 = vector.load %arg12[%c0_40, %c0_41] : memref<32x512xf32, #tpu.memory_space<vmem>>, vector<32x512xf32>
    tpu.vector_store %arg12[%c0_40, %c0_41], %129 {strides = array<i32>} : memref<32x512xf32, #tpu.memory_space<vmem>>, vector<32x512xf32>,
    %c0_42 = arith.constant 0 : index
    %c0_43 = arith.constant 0 : index
    %133 = vector.load %arg10[%c0_42, %c0_43] : memref<32x512xf32, #tpu.memory_space<vmem>>, vector<32x512xf32>
    tpu.vector_store %arg10[%c0_42, %c0_43], %131 {strides = array<i32>} : memref<32x512xf32, #tpu.memory_space<vmem>>, vector<32x512xf32>,
    %134 = arith.truncf %131 : vector<32x512xf32> to vector<32x512xbf16>
    %c0_44 = arith.constant 0 : index
    %c0_45 = arith.constant 0 : index
    %135 = vector.load %arg14[%c0_44, %c0_45] : memref<32x512xbf16, #tpu.memory_space<vmem>>, vector<32x512xbf16>
    tpu.vector_store %arg14[%c0_44, %c0_45], %134 {strides = array<i32>} : memref<32x512xbf16, #tpu.memory_space<vmem>>, vector<32x512xbf16>,
    %c0_46 = arith.constant 0 : index
    %c0_47 = arith.constant 0 : index
    %136 = vector.load %arg15[%c0_46, %c0_47] : memref<32x512xbf16, #tpu.memory_space<vmem>>, vector<32x512xbf16>
    %137 = vector.extract_strided_slice %134 {offsets = [0, 495], sizes = [32, 17], strides = [1, 1]} : vector<32x512xbf16> to vector<32x17xbf16>
    %138 = vector.extract_strided_slice %134 {offsets = [0, 0], sizes = [32, 495], strides = [1, 1]} : vector<32x512xbf16> to vector<32x495xbf16>
    %139 = tpu.concatenate %137, %138 in 1 : vector<32x17xbf16>, vector<32x495xbf16> -> vector<32x512xbf16>
    %140 = vector.extract_strided_slice %136 {offsets = [0, 495], sizes = [32, 17], strides = [1, 1]} : vector<32x512xbf16> to vector<32x17xbf16>
    %141 = vector.extract_strided_slice %136 {offsets = [0, 0], sizes = [32, 495], strides = [1, 1]} : vector<32x512xbf16> to vector<32x495xbf16>
    %142 = tpu.concatenate %140, %141 in 1 : vector<32x17xbf16>, vector<32x495xbf16> -> vector<32x512xbf16>
    %143 = vector.broadcast %3 : vector<1x512xbf16> to vector<32x512xbf16>
    %144 = arith.mulf %139, %143 : vector<32x512xbf16>
    %145 = vector.broadcast %3 : vector<1x512xbf16> to vector<32x512xbf16>
    %146 = arith.mulf %142, %145 : vector<32x512xbf16>
    %c0_48 = arith.constant 0 : index
    %c0_49 = arith.constant 0 : index
    %147 = vector.load %arg17[%c0_48, %c0_49] : memref<640x512xbf16, #tpu.memory_space<vmem>>, vector<32x512xbf16>
    tpu.vector_store %arg17[%c0_48, %c0_49], %144 {strides = array<i32>} : memref<640x512xbf16, #tpu.memory_space<vmem>>, vector<32x512xbf16>,
    %c32 = arith.constant 32 : index
    %c0_50 = arith.constant 0 : index
    %148 = vector.load %arg17[%c32, %c0_50] : memref<640x512xbf16, #tpu.memory_space<vmem>>, vector<32x512xbf16>
    tpu.vector_store %arg17[%c32, %c0_50], %146 {strides = array<i32>} : memref<640x512xbf16, #tpu.memory_space<vmem>>, vector<32x512xbf16>,
    %149 = vector.extract_strided_slice %134 {offsets = [0, 496], sizes = [32, 16], strides = [1, 1]} : vector<32x512xbf16> to vector<32x16xbf16>
    %150 = vector.extract_strided_slice %134 {offsets = [0, 0], sizes = [32, 496], strides = [1, 1]} : vector<32x512xbf16> to vector<32x496xbf16>
    %151 = tpu.concatenate %149, %150 in 1 : vector<32x16xbf16>, vector<32x496xbf16> -> vector<32x512xbf16>
    %152 = vector.extract_strided_slice %136 {offsets = [0, 496], sizes = [32, 16], strides = [1, 1]} : vector<32x512xbf16> to vector<32x16xbf16>
    %153 = vector.extract_strided_slice %136 {offsets = [0, 0], sizes = [32, 496], strides = [1, 1]} : vector<32x512xbf16> to vector<32x496xbf16>
    %154 = tpu.concatenate %152, %153 in 1 : vector<32x16xbf16>, vector<32x496xbf16> -> vector<32x512xbf16>
    %155 = vector.broadcast %4 : vector<1x512xbf16> to vector<32x512xbf16>
    %156 = arith.mulf %151, %155 : vector<32x512xbf16>
    %157 = vector.broadcast %4 : vector<1x512xbf16> to vector<32x512xbf16>
    %158 = arith.mulf %154, %157 : vector<32x512xbf16>
    %c64_51 = arith.constant 64 : index
    %c0_52 = arith.constant 0 : index
    %159 = vector.load %arg17[%c64_51, %c0_52] : memref<640x512xbf16, #tpu.memory_space<vmem>>, vector<32x512xbf16>
    tpu.vector_store %arg17[%c64_51, %c0_52], %156 {strides = array<i32>} : memref<640x512xbf16, #tpu.memory_space<vmem>>, vector<32x512xbf16>,
    %c96_53 = arith.constant 96 : index
    %c0_54 = arith.constant 0 : index
    %160 = vector.load %arg17[%c96_53, %c0_54] : memref<640x512xbf16, #tpu.memory_space<vmem>>, vector<32x512xbf16>
    tpu.vector_store %arg17[%c96_53, %c0_54], %158 {strides = array<i32>} : memref<640x512xbf16, #tpu.memory_space<vmem>>, vector<32x512xbf16>,
    %161 = vector.extract_strided_slice %134 {offsets = [0, 497], sizes = [32, 15], strides = [1, 1]} : vector<32x512xbf16> to vector<32x15xbf16>
    %162 = vector.extract_strided_slice %134 {offsets = [0, 0], sizes = [32, 497], strides = [1, 1]} : vector<32x512xbf16> to vector<32x497xbf16>
    %163 = tpu.concatenate %161, %162 in 1 : vector<32x15xbf16>, vector<32x497xbf16> -> vector<32x512xbf16>
    %164 = vector.extract_strided_slice %136 {offsets = [0, 497], sizes = [32, 15], strides = [1, 1]} : vector<32x512xbf16> to vector<32x15xbf16>
    %165 = vector.extract_strided_slice %136 {offsets = [0, 0], sizes = [32, 497], strides = [1, 1]} : vector<32x512xbf16> to vector<32x497xbf16>
    %166 = tpu.concatenate %164, %165 in 1 : vector<32x15xbf16>, vector<32x497xbf16> -> vector<32x512xbf16>
    %167 = vector.broadcast %5 : vector<1x512xbf16> to vector<32x512xbf16>
    %168 = arith.mulf %163, %167 : vector<32x512xbf16>
    %169 = vector.broadcast %5 : vector<1x512xbf16> to vector<32x512xbf16>
    %170 = arith.mulf %166, %169 : vector<32x512xbf16>
    %c128 = arith.constant 128 : index
    %c0_55 = arith.constant 0 : index
    %171 = vector.load %arg17[%c128, %c0_55] : memref<640x512xbf16, #tpu.memory_space<vmem>>, vector<32x512xbf16>
    tpu.vector_store %arg17[%c128, %c0_55], %168 {strides = array<i32>} : memref<640x512xbf16, #tpu.memory_space<vmem>>, vector<32x512xbf16>,
    %c160_56 = arith.constant 160 : index
    %c0_57 = arith.constant 0 : index
    %172 = vector.load %arg17[%c160_56, %c0_57] : memref<640x512xbf16, #tpu.memory_space<vmem>>, vector<32x512xbf16>
    tpu.vector_store %arg17[%c160_56, %c0_57], %170 {strides = array<i32>} : memref<640x512xbf16, #tpu.memory_space<vmem>>, vector<32x512xbf16>,
    %173 = vector.extract_strided_slice %134 {offsets = [0, 511], sizes = [32, 1], strides = [1, 1]} : vector<32x512xbf16> to vector<32x1xbf16>
    %174 = vector.extract_strided_slice %134 {offsets = [0, 0], sizes = [32, 511], strides = [1, 1]} : vector<32x512xbf16> to vector<32x511xbf16>
    %175 = tpu.concatenate %173, %174 in 1 : vector<32x1xbf16>, vector<32x511xbf16> -> vector<32x512xbf16>
    %176 = vector.extract_strided_slice %136 {offsets = [0, 511], sizes = [32, 1], strides = [1, 1]} : vector<32x512xbf16> to vector<32x1xbf16>
    %177 = vector.extract_strided_slice %136 {offsets = [0, 0], sizes = [32, 511], strides = [1, 1]} : vector<32x512xbf16> to vector<32x511xbf16>
    %178 = tpu.concatenate %176, %177 in 1 : vector<32x1xbf16>, vector<32x511xbf16> -> vector<32x512xbf16>
    %179 = vector.broadcast %6 : vector<1x512xbf16> to vector<32x512xbf16>
    %180 = arith.mulf %175, %179 : vector<32x512xbf16>
    %181 = vector.broadcast %6 : vector<1x512xbf16> to vector<32x512xbf16>
    %182 = arith.mulf %178, %181 : vector<32x512xbf16>
    %c192_58 = arith.constant 192 : index
    %c0_59 = arith.constant 0 : index
    %183 = vector.load %arg17[%c192_58, %c0_59] : memref<640x512xbf16, #tpu.memory_space<vmem>>, vector<32x512xbf16>
    tpu.vector_store %arg17[%c192_58, %c0_59], %180 {strides = array<i32>} : memref<640x512xbf16, #tpu.memory_space<vmem>>, vector<32x512xbf16>,
    %c224 = arith.constant 224 : index
    %c0_60 = arith.constant 0 : index
    %184 = vector.load %arg17[%c224, %c0_60] : memref<640x512xbf16, #tpu.memory_space<vmem>>, vector<32x512xbf16>
    tpu.vector_store %arg17[%c224, %c0_60], %182 {strides = array<i32>} : memref<640x512xbf16, #tpu.memory_space<vmem>>, vector<32x512xbf16>,
    %c256_61 = arith.constant 256 : index
    %c0_62 = arith.constant 0 : index
    %185 = vector.load %arg17[%c256_61, %c0_62] : memref<640x512xbf16, #tpu.memory_space<vmem>>, vector<32x512xbf16>
    tpu.vector_store %arg17[%c256_61, %c0_62], %134 {strides = array<i32>} : memref<640x512xbf16, #tpu.memory_space<vmem>>, vector<32x512xbf16>,
    %c288_63 = arith.constant 288 : index
    %c0_64 = arith.constant 0 : index
    %186 = vector.load %arg17[%c288_63, %c0_64] : memref<640x512xbf16, #tpu.memory_space<vmem>>, vector<32x512xbf16>
    tpu.vector_store %arg17[%c288_63, %c0_64], %136 {strides = array<i32>} : memref<640x512xbf16, #tpu.memory_space<vmem>>, vector<32x512xbf16>,
    %187 = vector.extract_strided_slice %134 {offsets = [0, 1], sizes = [32, 511], strides = [1, 1]} : vector<32x512xbf16> to vector<32x511xbf16>
    %188 = vector.extract_strided_slice %134 {offsets = [0, 0], sizes = [32, 1], strides = [1, 1]} : vector<32x512xbf16> to vector<32x1xbf16>
    %189 = tpu.concatenate %187, %188 in 1 : vector<32x511xbf16>, vector<32x1xbf16> -> vector<32x512xbf16>
    %190 = vector.extract_strided_slice %136 {offsets = [0, 1], sizes = [32, 511], strides = [1, 1]} : vector<32x512xbf16> to vector<32x511xbf16>
    %191 = vector.extract_strided_slice %136 {offsets = [0, 0], sizes = [32, 1], strides = [1, 1]} : vector<32x512xbf16> to vector<32x1xbf16>
    %192 = tpu.concatenate %190, %191 in 1 : vector<32x511xbf16>, vector<32x1xbf16> -> vector<32x512xbf16>
    %193 = vector.broadcast %7 : vector<1x512xbf16> to vector<32x512xbf16>
    %194 = arith.mulf %189, %193 : vector<32x512xbf16>
    %195 = vector.broadcast %7 : vector<1x512xbf16> to vector<32x512xbf16>
    %196 = arith.mulf %192, %195 : vector<32x512xbf16>
    %c320 = arith.constant 320 : index
    %c0_65 = arith.constant 0 : index
    %197 = vector.load %arg17[%c320, %c0_65] : memref<640x512xbf16, #tpu.memory_space<vmem>>, vector<32x512xbf16>
    tpu.vector_store %arg17[%c320, %c0_65], %194 {strides = array<i32>} : memref<640x512xbf16, #tpu.memory_space<vmem>>, vector<32x512xbf16>,
    %c352_66 = arith.constant 352 : index
    %c0_67 = arith.constant 0 : index
    %198 = vector.load %arg17[%c352_66, %c0_67] : memref<640x512xbf16, #tpu.memory_space<vmem>>, vector<32x512xbf16>
    tpu.vector_store %arg17[%c352_66, %c0_67], %196 {strides = array<i32>} : memref<640x512xbf16, #tpu.memory_space<vmem>>, vector<32x512xbf16>,
    %199 = vector.extract_strided_slice %134 {offsets = [0, 15], sizes = [32, 497], strides = [1, 1]} : vector<32x512xbf16> to vector<32x497xbf16>
    %200 = vector.extract_strided_slice %134 {offsets = [0, 0], sizes = [32, 15], strides = [1, 1]} : vector<32x512xbf16> to vector<32x15xbf16>
    %201 = tpu.concatenate %199, %200 in 1 : vector<32x497xbf16>, vector<32x15xbf16> -> vector<32x512xbf16>
    %202 = vector.extract_strided_slice %136 {offsets = [0, 15], sizes = [32, 497], strides = [1, 1]} : vector<32x512xbf16> to vector<32x497xbf16>
    %203 = vector.extract_strided_slice %136 {offsets = [0, 0], sizes = [32, 15], strides = [1, 1]} : vector<32x512xbf16> to vector<32x15xbf16>
    %204 = tpu.concatenate %202, %203 in 1 : vector<32x497xbf16>, vector<32x15xbf16> -> vector<32x512xbf16>
    %205 = vector.broadcast %8 : vector<1x512xbf16> to vector<32x512xbf16>
    %206 = arith.mulf %201, %205 : vector<32x512xbf16>
    %207 = vector.broadcast %8 : vector<1x512xbf16> to vector<32x512xbf16>
    %208 = arith.mulf %204, %207 : vector<32x512xbf16>
    %c384_68 = arith.constant 384 : index
    %c0_69 = arith.constant 0 : index
    %209 = vector.load %arg17[%c384_68, %c0_69] : memref<640x512xbf16, #tpu.memory_space<vmem>>, vector<32x512xbf16>
    tpu.vector_store %arg17[%c384_68, %c0_69], %206 {strides = array<i32>} : memref<640x512xbf16, #tpu.memory_space<vmem>>, vector<32x512xbf16>,
    %c416 = arith.constant 416 : index
    %c0_70 = arith.constant 0 : index
    %210 = vector.load %arg17[%c416, %c0_70] : memref<640x512xbf16, #tpu.memory_space<vmem>>, vector<32x512xbf16>
    tpu.vector_store %arg17[%c416, %c0_70], %208 {strides = array<i32>} : memref<640x512xbf16, #tpu.memory_space<vmem>>, vector<32x512xbf16>,
    %211 = vector.extract_strided_slice %134 {offsets = [0, 16], sizes = [32, 496], strides = [1, 1]} : vector<32x512xbf16> to vector<32x496xbf16>
    %212 = vector.extract_strided_slice %134 {offsets = [0, 0], sizes = [32, 16], strides = [1, 1]} : vector<32x512xbf16> to vector<32x16xbf16>
    %213 = tpu.concatenate %211, %212 in 1 : vector<32x496xbf16>, vector<32x16xbf16> -> vector<32x512xbf16>
    %214 = vector.extract_strided_slice %136 {offsets = [0, 16], sizes = [32, 496], strides = [1, 1]} : vector<32x512xbf16> to vector<32x496xbf16>
    %215 = vector.extract_strided_slice %136 {offsets = [0, 0], sizes = [32, 16], strides = [1, 1]} : vector<32x512xbf16> to vector<32x16xbf16>
    %216 = tpu.concatenate %214, %215 in 1 : vector<32x496xbf16>, vector<32x16xbf16> -> vector<32x512xbf16>
    %217 = vector.broadcast %9 : vector<1x512xbf16> to vector<32x512xbf16>
    %218 = arith.mulf %213, %217 : vector<32x512xbf16>
    %219 = vector.broadcast %9 : vector<1x512xbf16> to vector<32x512xbf16>
    %220 = arith.mulf %216, %219 : vector<32x512xbf16>
    %c448 = arith.constant 448 : index
    %c0_71 = arith.constant 0 : index
    %221 = vector.load %arg17[%c448, %c0_71] : memref<640x512xbf16, #tpu.memory_space<vmem>>, vector<32x512xbf16>
    tpu.vector_store %arg17[%c448, %c0_71], %218 {strides = array<i32>} : memref<640x512xbf16, #tpu.memory_space<vmem>>, vector<32x512xbf16>,
    %c480 = arith.constant 480 : index
    %c0_72 = arith.constant 0 : index
    %222 = vector.load %arg17[%c480, %c0_72] : memref<640x512xbf16, #tpu.memory_space<vmem>>, vector<32x512xbf16>
    tpu.vector_store %arg17[%c480, %c0_72], %220 {strides = array<i32>} : memref<640x512xbf16, #tpu.memory_space<vmem>>, vector<32x512xbf16>,
    %223 = vector.extract_strided_slice %134 {offsets = [0, 17], sizes = [32, 495], strides = [1, 1]} : vector<32x512xbf16> to vector<32x495xbf16>
    %224 = vector.extract_strided_slice %134 {offsets = [0, 0], sizes = [32, 17], strides = [1, 1]} : vector<32x512xbf16> to vector<32x17xbf16>
    %225 = tpu.concatenate %223, %224 in 1 : vector<32x495xbf16>, vector<32x17xbf16> -> vector<32x512xbf16>
    %226 = vector.extract_strided_slice %136 {offsets = [0, 17], sizes = [32, 495], strides = [1, 1]} : vector<32x512xbf16> to vector<32x495xbf16>
    %227 = vector.extract_strided_slice %136 {offsets = [0, 0], sizes = [32, 17], strides = [1, 1]} : vector<32x512xbf16> to vector<32x17xbf16>
    %228 = tpu.concatenate %226, %227 in 1 : vector<32x495xbf16>, vector<32x17xbf16> -> vector<32x512xbf16>
    %229 = vector.broadcast %10 : vector<1x512xbf16> to vector<32x512xbf16>
    %230 = arith.mulf %225, %229 : vector<32x512xbf16>
    %231 = vector.broadcast %10 : vector<1x512xbf16> to vector<32x512xbf16>
    %232 = arith.mulf %228, %231 : vector<32x512xbf16>
    %c512 = arith.constant 512 : index
    %c0_73 = arith.constant 0 : index
    %233 = vector.load %arg17[%c512, %c0_73] : memref<640x512xbf16, #tpu.memory_space<vmem>>, vector<32x512xbf16>
    tpu.vector_store %arg17[%c512, %c0_73], %230 {strides = array<i32>} : memref<640x512xbf16, #tpu.memory_space<vmem>>, vector<32x512xbf16>,
    %c544 = arith.constant 544 : index
    %c0_74 = arith.constant 0 : index
    %234 = vector.load %arg17[%c544, %c0_74] : memref<640x512xbf16, #tpu.memory_space<vmem>>, vector<32x512xbf16>
    tpu.vector_store %arg17[%c544, %c0_74], %232 {strides = array<i32>} : memref<640x512xbf16, #tpu.memory_space<vmem>>, vector<32x512xbf16>,
    %c0_75 = arith.constant 0 : index
    %c0_76 = arith.constant 0 : index
    %235 = vector.load %arg4[%c0_75, %c0_76] : memref<128x640xbf16, #tpu.memory_space<vmem>>, vector<128x640xbf16>
    %c0_77 = arith.constant 0 : index
    %c0_78 = arith.constant 0 : index
    %236 = vector.load %arg17[%c0_77, %c0_78] : memref<640x512xbf16, #tpu.memory_space<vmem>>, vector<640x512xbf16>
    %cst_79 = arith.constant dense<0.000000e+00> : vector<128x512xf32>
    %237 = tpu.matmul %235, %236, %cst_79 {dimension_numbers = #tpu.dot_dimension_numbers<[1], [0], [0], [1], [0, 0, 1, 1], [], []>} : vector<128x640xbf16>, vector<640x512xbf16>, vector<128x512xf32> -> vector<128x512xf32>
    %238 = vector.extract_strided_slice %237 {offsets = [0, 0], sizes = [96, 512], strides = [1, 1]} : vector<128x512xf32> to vector<96x512xf32>
    %239 = arith.negf %238 : vector<96x512xf32>
    %240 = math.exp %239 : vector<96x512xf32>
    %cst_80 = arith.constant 1.000000e+00 : f32
    %241 = vector.broadcast %cst_80 : f32 to vector<96x512xf32>
    %242 = arith.addf %241, %240 : vector<96x512xf32>
    %243 = arith.divf %241, %242 : vector<96x512xf32>
    %244 = vector.extract_strided_slice %237 {offsets = [96, 0], sizes = [32, 512], strides = [1, 1]} : vector<128x512xf32> to vector<32x512xf32>
    %245 = math.tanh %244 : vector<32x512xf32>
    %246 = vector.extract_strided_slice %243 {offsets = [0, 0], sizes = [32, 512], strides = [1, 1]} : vector<96x512xf32> to vector<32x512xf32>
    %247 = vector.extract_strided_slice %243 {offsets = [32, 0], sizes = [32, 512], strides = [1, 1]} : vector<96x512xf32> to vector<32x512xf32>
    %248 = vector.extract_strided_slice %243 {offsets = [64, 0], sizes = [32, 512], strides = [1, 1]} : vector<96x512xf32> to vector<32x512xf32>
    %c0_81 = arith.constant 0 : index
    %c0_82 = arith.constant 0 : index
    %249 = vector.load %arg13[%c0_81, %c0_82] : memref<32x512xf32, #tpu.memory_space<vmem>>, vector<32x512xf32>
    %250 = arith.mulf %247, %249 : vector<32x512xf32>
    %251 = arith.mulf %246, %245 : vector<32x512xf32>
    %252 = arith.addf %250, %251 : vector<32x512xf32>
    %253 = math.tanh %252 : vector<32x512xf32>
    %254 = arith.mulf %248, %253 : vector<32x512xf32>
    %c0_83 = arith.constant 0 : index
    %c0_84 = arith.constant 0 : index
    %255 = vector.load %arg13[%c0_83, %c0_84] : memref<32x512xf32, #tpu.memory_space<vmem>>, vector<32x512xf32>
    tpu.vector_store %arg13[%c0_83, %c0_84], %252 {strides = array<i32>} : memref<32x512xf32, #tpu.memory_space<vmem>>, vector<32x512xf32>,
    %c0_85 = arith.constant 0 : index
    %c0_86 = arith.constant 0 : index
    %256 = vector.load %arg11[%c0_85, %c0_86] : memref<32x512xf32, #tpu.memory_space<vmem>>, vector<32x512xf32>
    tpu.vector_store %arg11[%c0_85, %c0_86], %254 {strides = array<i32>} : memref<32x512xf32, #tpu.memory_space<vmem>>, vector<32x512xf32>,
    %257 = arith.truncf %254 : vector<32x512xf32> to vector<32x512xbf16>
    %c0_87 = arith.constant 0 : index
    %c0_88 = arith.constant 0 : index
    %258 = vector.load %arg15[%c0_87, %c0_88] : memref<32x512xbf16, #tpu.memory_space<vmem>>, vector<32x512xbf16>
    tpu.vector_store %arg15[%c0_87, %c0_88], %257 {strides = array<i32>} : memref<32x512xbf16, #tpu.memory_space<vmem>>, vector<32x512xbf16>,
    %c0_89 = arith.constant 0 : index
    %c0_90 = arith.constant 0 : index
    %c0_91 = arith.constant 0 : index
    %259 = vector.load %arg9[%c0_89, %c0_90, %c0_91] : memref<1x32x512xf32, #tpu.memory_space<vmem>>, vector<1x32x512xf32>
    %260 = vector.shape_cast %259 : vector<1x32x512xf32> to vector<32x512xf32>
    %261 = vector.shape_cast %254 : vector<32x512xf32> to vector<1x32x512xf32>
    tpu.vector_store %arg9[%c0_89, %c0_90, %c0_91], %261 {strides = array<i32>} : memref<1x32x512xf32, #tpu.memory_space<vmem>>, vector<1x32x512xf32>,
    return
  }
  func.func @transform_0(%arg0: i32) -> (i32, i32, i32) {
    %c0_i32 = arith.constant 0 : i32
    %c0_i32_0 = arith.constant 0 : i32
    %c0_i32_1 = arith.constant 0 : i32
    return %arg0, %c0_i32, %c0_i32_0 : i32, i32, i32
  }
  func.func @transform_1(%arg0: i32) -> (i32, i32) {
    %c0_i32 = arith.constant 0 : i32
    %c0_i32_0 = arith.constant 0 : i32
    %c0_i32_1 = arith.constant 0 : i32
    return %c0_i32, %c0_i32_0 : i32, i32
  }
  func.func @transform_2(%arg0: i32) -> (i32, i32) {
    %c0_i32 = arith.constant 0 : i32
    %c0_i32_0 = arith.constant 0 : i32
    %c0_i32_1 = arith.constant 0 : i32
    return %c0_i32, %c0_i32_0 : i32, i32
  }
  func.func @transform_3(%arg0: i32) -> (i32, i32) {
    %c0_i32 = arith.constant 0 : i32
    %c0_i32_0 = arith.constant 0 : i32
    %c0_i32_1 = arith.constant 0 : i32
    return %c0_i32, %c0_i32_0 : i32, i32
  }
  func.func @transform_4(%arg0: i32) -> (i32, i32) {
    %c0_i32 = arith.constant 0 : i32
    %c0_i32_0 = arith.constant 0 : i32
    %c0_i32_1 = arith.constant 0 : i32
    return %c0_i32, %c0_i32_0 : i32, i32
  }
  func.func @transform_5(%arg0: i32) -> (i32, i32) {
    %c0_i32 = arith.constant 0 : i32
    %c0_i32_0 = arith.constant 0 : i32
    %c0_i32_1 = arith.constant 0 : i32
    return %c0_i32, %c0_i32_0 : i32, i32
  }
  func.func @transform_6(%arg0: i32) -> (i32, i32) {
    %c0_i32 = arith.constant 0 : i32
    %c0_i32_0 = arith.constant 0 : i32
    %c0_i32_1 = arith.constant 0 : i32
    return %c0_i32, %c0_i32_0 : i32, i32
  }
  func.func @transform_7(%arg0: i32) -> (i32, i32) {
    %c0_i32 = arith.constant 0 : i32
    %c0_i32_0 = arith.constant 0 : i32
    %c0_i32_1 = arith.constant 0 : i32
    return %c0_i32, %c0_i32_0 : i32, i32
  }
  func.func @transform_8(%arg0: i32) -> (i32, i32, i32) {
    %c0_i32 = arith.constant 0 : i32
    %c0_i32_0 = arith.constant 0 : i32
    %c0_i32_1 = arith.constant 0 : i32
    return %arg0, %c0_i32, %c0_i32_0 : i32, i32, i32
  }
  func.func @transform_9(%arg0: i32) -> (i32, i32) {
    %c0_i32 = arith.constant 0 : i32
    %c0_i32_0 = arith.constant 0 : i32
    %c0_i32_1 = arith.constant 0 : i32
    return %c0_i32, %c0_i32_0 : i32, i32
  }
  func.func @transform_10(%arg0: i32) -> (i32, i32) {
    %c0_i32 = arith.constant 0 : i32
    %c0_i32_0 = arith.constant 0 : i32
    %c0_i32_1 = arith.constant 0 : i32
    return %c0_i32, %c0_i32_0 : i32, i32
  }
  func.func @transform_11(%arg0: i32) -> (i32, i32) {
    %c0_i32 = arith.constant 0 : i32
    %c0_i32_0 = arith.constant 0 : i32
    %c0_i32_1 = arith.constant 0 : i32
    return %c0_i32, %c0_i32_0 : i32, i32
  }
  func.func @transform_12(%arg0: i32) -> (i32, i32) {
    %c0_i32 = arith.constant 0 : i32
    %c0_i32_0 = arith.constant 0 : i32
    %c0_i32_1 = arith.constant 0 : i32
    return %c0_i32, %c0_i32_0 : i32, i32
  }
}

</mosaic_0001>

<bundles_post_ra>
// kernel: run.1
= control target key start
LH: loop header
LB: loop body
LE: loop exit
PB: predicated region body
PF: predicated region fallthrough
CT: control target
= control target key end

     0   :  { %s14189_s0 = inlined_call_operand.hbm [shape: bf16[8,4,512], index: 0, kind: input, shape index: {}]   ;;  %s14190_s1 = inlined_call_operand.hbm [shape: bf16[9,512], index: 1, kind: input, shape index: {}]   ;;  %s14191_s2 = inlined_call_operand.hbm [shape: bf16[128,512], index: 2, kind: input, shape index: {}]   ;;  %s14192_s3 = inlined_call_operand.hbm [shape: bf16[128,640], index: 3, kind: input, shape index: {}]   ;;  %s14193_s4 = inlined_call_operand.hbm [shape: f32[32,512], index: 4, kind: input, shape index: {}]   ;;  %s14194_s5 = inlined_call_operand.hbm [shape: f32[32,512], index: 5, kind: input, shape index: {}]   ;;  %s14195_s6 = inlined_call_operand.hbm [shape: f32[32,512], index: 6, kind: input, shape index: {}]   ;;  %s14196_s7 = inlined_call_operand.hbm [shape: f32[32,512], index: 7, kind: input, shape index: {}]   ;;  %s14197_s8 = inlined_call_operand.hbm [shape: f32[8,32,512], index: 8, kind: output, shape index: {0}]   ;;  %s14198_s9 = inlined_call_operand.hbm [shape: f32[32,512], index: 9, kind: output, shape index: {1}]   ;;  %s14199_s10 = inlined_call_operand.hbm [shape: f32[32,512], index: 10, kind: output, shape index: {2}]   ;;  %s14200_s11 = inlined_call_operand.hbm [shape: f32[32,512], index: 11, kind: output, shape index: {3}]   ;;  %s14201_s12 = inlined_call_operand.hbm [shape: f32[32,512], index: 12, kind: output, shape index: {4}]  }
   0x1   :  { %14336 = sst [smem:[#allocation85_spill]] %s14190_s1 }
   0x2   :  { %14337 = sst [smem:[#allocation86_spill]] %s14191_s2 }
   0x3   :  { %14338 = sst [smem:[#allocation87_spill]] %s14192_s3 }
   0x4   :  { %14339 = sst [smem:[#allocation88_spill]] %s14193_s4 }
   0x5   :  { %14340 = sst [smem:[#allocation89_spill]] %s14194_s5 }
   0x6   :  { %14341 = sst [smem:[#allocation90_spill]] %s14195_s6 }
   0x7   :  { %14342 = sst [smem:[#allocation91_spill]] %s14199_s10 }
   0x8   :  { %18 = vsyncpa [#allocation7], 0 }
   0x9   :  { %20 = vsyncpa [#allocation7 + $0x1], 0 }
   0xa   :  { %21 = vsyncpa [#allocation10], 0 }
   0xb   :  { %22 = vsyncpa [#allocation13], 0 }
   0xc   :  { %23 = vsyncpa [#allocation16], 0 }
   0xd   :  { %24 = vsyncpa [#allocation19], 0 }
   0xe   :  { %25 = vsyncpa [#allocation8], 0 }
   0xf   :  { %27 = vsyncpa [#allocation8 + $0x1], 0 }
  0x10   :  { %28 = vsyncpa [#allocation22], 0 }
  0x11   :  { %29 = vsyncpa [#allocation25], 0  ;;  %s10771_s21 = smov 0   ;;  %s10773_s22 = smov 0  }
  0x12   :  { %s10775_s23 = smov 0   ;;  %s10777_s24 = smov 0  }
  0x13 LB: > { %s10674_s25 = smov [#allocation9]   ;;  %s10792_s27 = sadd.s32 4294967295, %s10672_s24   ;;  %s10672_s24 = sphi %s10777_s24, %s14684_s24   ;;  %s10668_s23 = sphi %s10775_s23, %s14683_s23   ;;  %s10664_s22 = sphi %s10773_s22, %s14682_s22   ;;  %s10660_s21 = sphi %s10771_s21, %s14681_s21  }
  0x14   : > { %s335_s26 = sshll.u32 %s10674_s25, 4  ;;  %p8518_p0 = scmp.ge.s32.totalorder %s10672_s24, 1  ;;  %s336_s26 = int_to_ptr.vmem [resolvable:$true] %s335_s26 }
  0x15   : > { %p14207_p1 = scmp.eq.s32.totalorder %s10792_s27, 0  ;;  %p323_p2 = scmp.lt.s32.totalorder %s10672_s24, 9 }
  0x16   : > { %s10675_s29 = smov [#allocation12]   ;;  %s10289_s15 = scalar_lea.vmem %s336_s26, 512 }
  0x17   : > { %p10798_p4 = pnand %p8518_p0, %p323_p2  ;;  %s361_s30 = sshll.u32 %s10675_s29, 4  ;;  %s362_s30 = int_to_ptr.vmem [resolvable:$true] %s361_s30 }
  0x18   : > { %p10290_p8 = scmp.ne.s32.totalorder %s336_s26, %s10289_s15  ;;  %p10297_p11 = scmp.lt.s32.totalorder %s336_s26, %s336_s26 }
  0x19   : > { %s14343_s28 = scalar_select %p10798_p4, 1, 0 }
  0x1a   : > { %p9370_p5 = pneg %p10798_p4  ;;  %p10298_p12 = scmp.lt.s32.totalorder %s10289_s15, %s10289_s15 }
  0x1c   : > { %p10806_p6 = pnand %p9370_p5, %p14207_p1  ;;  %p10299_p13 = por %p10298_p12, %p10297_p11 }
  0x1e   : > { %p10812_p7 = pneg %p10806_p6 }
  0x20   : > { %p10292_p9 = pnand %p10290_p8, %p10812_p7 }
  0x22   : > { %p10293_p10 = pneg %p10292_p9 }
  0x24   : > { %p10300_p0 = pnand %p10299_p13, %p10293_p10 }
  0x26   : > { %10303 = shalt.err (!%p10300_p0)
}
  0x27   : > { %s14202_s16 = smov 256   ;;  %s14203_s17 = smov 16  }
  0x28   : > { %s14346_s1 = sld [smem:[#allocation85_spill]]  ;;  %s10315_s20 = scalar_lea.vmem %s362_s30, 5120 }
  0x29   : > { %p10316_p2 = scmp.ne.s32.totalorder %s362_s30, %s10315_s20  ;;  %p10323_p9 = scmp.lt.s32.totalorder %s362_s30, %s362_s30 }
  0x2a   : > { %p10324_p10 = scmp.lt.s32.totalorder %s10315_s20, %s10315_s20 }
  0x2b   : > { %p10318_p5 = pnand %p10316_p2, %p10812_p7 }
  0x2c   : > { %p10325_p11 = por %p10324_p10, %p10323_p9 }
  0x2d   : > { %p10319_p8 = pneg %p10318_p5 }
  0x2e   : > { %9373 = dma.hbm_to_vmem [thread:$0]  (!%p10806_p6), %s14346_s1, 512, %s336_s26, [#allocation10], %s14202_s16, %s14202_s16, %s14203_s17  }
  0x2f   : > { %p10326_p12 = pnand %p10325_p11, %p10319_p8 }
  0x31   : > { %10329 = shalt.err (!%p10326_p12)
}
  0x32   : > { %s10678_s25 = smov 320   ;;  %s10679_s29 = smov 20  }
  0x33   : > { %s14347_s3 = sld [smem:[#allocation87_spill]]  ;;  %s10680_s26 = smov [#allocation15]  }
  0x34   : > { %s387_s18 = sshll.u32 %s10680_s26, 4  ;;  %s10681_s19 = smov [#allocation11]   ;;  %s388_s18 = int_to_ptr.vmem [resolvable:$true] %s387_s18 }
  0x35   : > { %s348_s16 = sshll.u32 %s10681_s19, 4  ;;  %s10341_s17 = scalar_lea.vmem %s388_s18, 2048  ;;  %s349_s16 = int_to_ptr.vmem [resolvable:$true] %s348_s16 }
  0x36   : > { %p10342_p13 = scmp.ne.s32.totalorder %s388_s18, %s10341_s17  ;;  %p10349_p5 = scmp.lt.s32.totalorder %s388_s18, %s388_s18 }
  0x37   : > { %p10350_p8 = scmp.lt.s32.totalorder %s10341_s17, %s10341_s17 }
  0x38   : > { %p10344_p0 = pnand %p10342_p13, %p10812_p7 }
  0x39   : > { %9379 = dma.hbm_to_vmem [thread:$0]  (!%p10806_p6), %s14347_s3, 5120, %s362_s30, [#allocation13], %s10678_s25, %s10678_s25, %s10679_s29  }
  0x3a   : > { %p10345_p2 = pneg %p10344_p0  ;;  %p10351_p9 = por %p10350_p8, %p10349_p5 }
  0x3c   : > { %p10352_p10 = pnand %p10351_p9, %p10345_p2 }
  0x3e   : > { %10355 = shalt.err (!%p10352_p10)
}
  0x3f   : > { %s14204_s20 = smov 512   ;;  %s10683_s10 = smov 32  }
  0x40   : > { %s14348_s5 = sld [smem:[#allocation89_spill]]  ;;  %s10367_s29 = scalar_lea.vmem %s349_s16, 4096 }
  0x41   : > { %p10368_p11 = scmp.ne.s32.totalorder %s349_s16, %s10367_s29  ;;  %p10375_p0 = scmp.lt.s32.totalorder %s349_s16, %s349_s16 }
  0x42   : > { %p10376_p2 = scmp.lt.s32.totalorder %s10367_s29, %s10367_s29 }
  0x43   : > { %p10370_p12 = pnand %p10368_p11, %p10812_p7 }
  0x44   : > { %p10377_p5 = por %p10376_p2, %p10375_p0 }
  0x45   : > { %p10371_p13 = pneg %p10370_p12 }
  0x46   : > { %9385 = dma.hbm_to_vmem [thread:$0]  (!%p10806_p6), %s14348_s5, 2048, %s388_s18, [#allocation16], %s14204_s20, %s14204_s20, %s10683_s10  }
  0x47   : > { %p10378_p8 = pnand %p10377_p5, %p10371_p13 }
  0x49   : > { %10381 = shalt.err (!%p10378_p8)
}
  0x4a   : > { %s14349_s17 = smov 16   ;;  %s14350_s15 = smov 256  }
  0x4b   : > { %s14351_s2 = sld [smem:[#allocation86_spill]]  ;;  %s10684_s18 = smov [#allocation14]  }
  0x4c   : > { %s374_s30 = sshll.u32 %s10684_s18, 4  ;;  %s10685_s25 = smov [#allocation17]   ;;  %s375_s30 = int_to_ptr.vmem [resolvable:$true] %s374_s30 }
  0x4d   : > { %s400_s20 = sshll.u32 %s10685_s25, 4  ;;  %s10393_s29 = scalar_lea.vmem %s375_s30, 2048  ;;  %s401_s20 = int_to_ptr.vmem [resolvable:$true] %s400_s20 }
  0x4e   : > { %p10394_p9 = scmp.ne.s32.totalorder %s375_s30, %s10393_s29  ;;  %p10401_p12 = scmp.lt.s32.totalorder %s375_s30, %s375_s30 }
  0x4f   : > { %p10402_p13 = scmp.lt.s32.totalorder %s10393_s29, %s10393_s29 }
  0x50   : > { %p10396_p10 = pnand %p10394_p9, %p10812_p7 }
  0x51   : > { %9376 = dma.hbm_to_vmem [thread:$0]  (!%p10806_p6), %s14351_s2, 4096, %s349_s16, [#allocation10], %s14350_s15, %s14350_s15, %s14349_s17  }
  0x52   : > { %p10397_p11 = pneg %p10396_p10  ;;  %p10403_p0 = por %p10402_p13, %p10401_p12 }
  0x54   : > { %p10404_p2 = pnand %p10403_p0, %p10397_p11 }
  0x56   : > { %10407 = shalt.err (!%p10404_p2)
}
  0x57   : > { %s14352_s16 = smov 512   ;;  %s14353_s4 = sld [smem:[#allocation88_spill]] }
  0x58   : > { %s10419_s26 = scalar_lea.vmem %s401_s20, 2048  ;;  %p10427_p10 = scmp.lt.s32.totalorder %s401_s20, %s401_s20 }
  0x59   : > { %p10420_p5 = scmp.ne.s32.totalorder %s401_s20, %s10419_s26  ;;  %p10428_p3 = scmp.lt.s32.totalorder %s10419_s26, %s10419_s26 }
  0x5b   : > { %p10422_p8 = pnand %p10420_p5, %p10812_p7  ;;  %p10429_p12 = por %p10428_p3, %p10427_p10 }
  0x5d   : > { %9382 = dma.hbm_to_vmem [thread:$0]  (!%p10806_p6), %s14353_s4, 2048, %s375_s30, [#allocation13], %s14352_s16, %s14352_s16, %s10683_s10  }
  0x5e   : > { %p10423_p9 = pneg %p10422_p8 }
  0x60   : > { %p10430_p11 = pnand %p10429_p12, %p10423_p9 }
  0x62   : > { %10433 = shalt.err (!%p10430_p11)
}
  0x63   : > { %s14354_s6 = sld [smem:[#allocation90_spill]]  ;;  %s10686_s30 = smov [#allocation18]  }
  0x64   : > { %s413_s25 = sshll.u32 %s10686_s30, 4  ;;  %s414_s25 = int_to_ptr.vmem [resolvable:$true] %s413_s25 }
  0x65   : > { %s10445_s29 = scalar_lea.vmem %s414_s25, 2048  ;;  %p10453_p2 = scmp.lt.s32.totalorder %s414_s25, %s414_s25 }
  0x66   : > { %p10446_p13 = scmp.ne.s32.totalorder %s414_s25, %s10445_s29  ;;  %p10454_p5 = scmp.lt.s32.totalorder %s10445_s29, %s10445_s29 }
  0x68   : > { %p10448_p0 = pnand %p10446_p13, %p10812_p7  ;;  %p10455_p8 = por %p10454_p5, %p10453_p2 }
  0x69   : > { %9388 = dma.hbm_to_vmem [thread:$0]  (!%p10806_p6), %s14354_s6, 2048, %s401_s20, [#allocation16], %s14352_s16, %s14352_s16, %s10683_s10  }
  0x6a   : > { %p10449_p3 = pneg %p10448_p0 }
  0x6c   : > { %p10456_p9 = pnand %p10455_p8, %p10449_p3 }
  0x6e   : > { %10459 = shalt.err (!%p10456_p9)
}
  0x6f   : > { %9391 = dma.hbm_to_vmem [thread:$0]  (!%p10806_p6), %s14196_s7, 2048, %s414_s25, [#allocation19], %s14352_s16, %s14352_s16, %s10683_s10  }
  0x70   : > { %s8517_s13 = sadd.s32 4294967294, %s10672_s24   ;;  %s10885_s14 = sadd.s32 1, %s10672_s24  }
  0x71   : > { %s42_s15 = sadd.s32 1, %s10668_s23  ;;  %s39_s26 = ssub.s32 %s10672_s24, %s10885_s14 }
  0x72   : > { %p49_p7 = scmp.ne.s32.totalorder %s10668_s23, %s10664_s22  ;;  %p40_p10 = scmp.eq.s32.totalorder %s39_s26, 0 }
  0x73   : > { %p50_p12 = scmp.eq.s32.totalorder %s10672_s24, 0  ;;  %p55_p11 = scmp.ne.s32.totalorder %s10664_s22, %s10660_s21 }
  0x74   : > { %p14206_p13 = scmp.eq.s32.totalorder %s10792_s27, 7  ;;  %p232_p2 = scmp.eq.s32.totalorder %s8517_s13, 7 }
  0x75   : > { %s10897_s19 = scalar_select %p40_p10, %s10668_s23, %s42_s15  }
  0x76   : > { %p51_p0 = por %p50_p12, %p49_p7  ;;  %p10901_p3 = por %p14207_p1, %p55_p11 }
  0x77   : > { %p10907_p6 = por %p14206_p13, %p49_p7  ;;  %p9407_p5 = scmp.lt.s32.totalorder %s10672_s24, 8 }
  0x78   : > { %s14355_s18 = scalar_select %p10901_p3, 1, 0 }
  0x79   : > { %s14356_s10 = scalar_select %p10907_p6, 1, 0 }
  0x7a   : > { %s427_s16 = sand.u32 1, %s10668_s23   ;;  %p10913_p8 = por %p232_p2, %p55_p11 }
  0x7b   : > { %s8527_s25 = sshll.u32 %s427_s16, 3  ;;  %s9288_s29 = sshll.u32 %s10672_s24, 7 }
  0x7c   : > { %s14357_s30 = scalar_select %p10913_p8, 1, 0 }
  0x7d   : > { %s10921_s15 = scalar_lea.hbm %s14189_s0, %s9288_s29  ;;  %s431_s26 = scalar_lea.vmem [#allocation6], %s8527_s25 }
  0x7e   : > { %s439_s1 = sshll.u32 %s431_s26, 4  ;;  %p10923_p9 = pnand %p9407_p5, %p51_p0  ;;  %s440_s1 = int_to_ptr.vmem [resolvable:$true] %s439_s1 }
  0x7f   : > { %s428_s2 = scalar_lea.sflag [#allocation7], %s427_s16  ;;  %s10460_s3 = scalar_lea.hbm %s10921_s15, 128 }
  0x80   : > { %p10461_p7 = scmp.ne.s32.totalorder %s10921_s15, %s10460_s3  ;;  %p10462_p10 = pneg %p10923_p9 }
  0x81   : > { %s10465_s20 = scalar_lea.hbm %s14189_s0, 1024  ;;  %p10466_p0 = scmp.lt.s32.totalorder %s10921_s15, %s14189_s0 }
  0x82   : > { %p10463_p12 = pnand %p10462_p10, %p10461_p7  ;;  %p10467_p2 = scmp.lt.s32.totalorder %s10465_s20, %s10460_s3 }
  0x84   : > { %p10464_p11 = pneg %p10463_p12  ;;  %p10468_p5 = por %p10467_p2, %p10466_p0 }
  0x86   : > { %p10469_p13 = pnand %p10468_p5, %p10464_p11 }
  0x88   : > { %10472 = shalt.err (!%p10469_p13)
}
  0x89   : > { %s10473_s26 = scalar_lea.vmem %s440_s1, 128  ;;  %s10687_s16 = smov [#allocation6]  }
  0x8a   : > { %p10474_p1 = scmp.ne.s32.totalorder %s440_s1, %s10473_s26  ;;  %s10478_s5 = sshll.u32 %s10687_s16, 4  ;;  %s10479_s5 = int_to_ptr.vmem [resolvable:$false] %s10478_s5 }
  0x8b   : > { %s10480_s6 = scalar_lea.vmem %s10479_s5, 256  ;;  %p10481_p7 = scmp.lt.s32.totalorder %s440_s1, %s10479_s5 }
  0x8c   : > { %p10476_p8 = pnand %p10474_p1, %p10462_p10  ;;  %p10482_p12 = scmp.lt.s32.totalorder %s10480_s6, %s10473_s26 }
  0x8e   : > { %p10477_p6 = pneg %p10476_p8  ;;  %p10483_p3 = por %p10482_p12, %p10481_p7 }
  0x90   : > { %p10484_p4 = pnand %p10483_p3, %p10477_p6 }
  0x92   : > { %10487 = shalt.err (!%p10484_p4)
}
  0x93   : > { %9395 = dma.hbm_to_vmem [thread:$0]  (!%p10923_p9), %s10921_s15, 128, %s440_s1, %s428_s2  }
  0x94   : > { %p14359_p11 = scmp.ne.s32.totalorder %s14343_s28, 0 }
  0x96   : > { %448 = sbr.rel (%p14359_p11) target bundleno = 1549 (0x60d), region = 52 }
  0x9b   : > { %s10944_s3 = sand.u32 1, %s10664_s22   ;;  %p14360_p1 = scmp.ne.s32.totalorder %s14355_s18, 0 }
  0x9c   : > { %s8531_s4 = sshll.u32 %s10944_s3, 3  ;;  %s451_s29 = scalar_lea.sflag [#allocation7], %s10944_s3 }
  0x9d   : > { %s10948_s5 = scalar_lea.vmem [#allocation6], %s8531_s4 }
  0x9e   : > { %10627 = dma.done.wait (%p14360_p1), %s451_s29, 128  }
  0x9f   : > { %10629 = vsyncadd (%p14360_p1), %s451_s29, 4294967168  ;;  %p14361_p4 = scmp.eq.s32.totalorder %s10792_s27, 0 }
  0xa1   : > { %10631 = dma.done.wait (%p14361_p4), [#allocation10], 4608   ;;  %p14362_p13 = pmov %p14361_p4 }
  0xa2   : > { %p14363_p3 = pmov %p14361_p4 }
  0xa3   : > { %10633 = vsyncadd (%p14362_p13), [#allocation10], 4294962688 }
  0xa4   : > { %10635 = dma.done.wait (%p14363_p3), [#allocation13], 7168   ;;  %p14364_p6 = pmov %p14363_p3 }
  0xa5   : > { %p14365_p8 = pmov %p14363_p3 }
  0xa6   : > { %10637 = vsyncadd (%p14364_p6), [#allocation13], 4294960128 }
  0xa7   : > { %10639 = dma.done.wait (%p14365_p8), [#allocation16], 4096   ;;  %p14366_p9 = pmov %p14363_p3 }
  0xa8   : > { %p14367_p10 = pmov %p14363_p3 }
  0xa9   : > { %10641 = vsyncadd (%p14366_p9), [#allocation16], 4294963200 }
  0xaa   : > { %10643 = dma.done.wait (%p14367_p10), [#allocation19], 2048   ;;  %p14368_p0 = pmov %p14363_p3 }
  0xab   : > { %s8539_s1 = sshll.u32 %s10944_s3, 7  ;;  %p14369_p2 = scmp.ne.s32.totalorder %s10792_s27, 0 }
  0xac   : > { %10645 = vsyncadd (%p14368_p0), [#allocation19], 4294965248  ;;  %s10971_s2 = scalar_lea.vmem [#allocation20], %s8539_s1 }
  0xad   : > { %528 = sbr.rel (%p14369_p2) target bundleno = 255 (0xff), region = 88 }
  0xb2   : > { %v10975_v0 = vld [vmem:[#allocation14] sm:$0xff]  ;;  %v10977_v1 = vld [vmem:[#allocation14 + $0x8] sm:$0xff]  ;;  %v10979_v2 = vld [vmem:[#allocation14 + $0x10] sm:$0xff]  ;;  %v10688_v3 = vmov 0   ;;  %vm761_vm0 = vcmask 1040384   ;;  %vm764_vm2 = vcmask 1044484  }
  0xb3   : > { %741 = vst [vmem:[#allocation4 + $0x360] sm:$0xff] %v10688_v3  ;;  %633 = vst [vmem:[#allocation4] sm:$0xff] %v10688_v3  ;;  %v9289_v4 = vpack.c.bf16 %v10977_v1, %v10975_v0  ;;  %v532_v5 = vld [vmem:[#allocation14 + $0x18] sm:$0xff]  ;;  %v533_v6 = vld [vmem:[#allocation14 + $0x20] sm:$0xff]  ;;  %vm762_vm1 = vsmask.f32 256 }
  0xb4   : > { %634 = vst [vmem:[#allocation4 + $0x8] sm:$0xff] %v10688_v3  ;;  %635 = vst [vmem:[#allocation4 + $0x10] sm:$0xff] %v10688_v3  ;;  %v534_v7 = vld [vmem:[#allocation14 + $0x28] sm:$0xff]  ;;  %v9290_v8 = vpack.c.bf16 %v532_v5, %v10979_v2  ;;  %v535_v10 = vld [vmem:[#allocation14 + $0x30] sm:$0xff]  ;;  %vm765_vm3 = vsmask.f32 4352 }
  0xb5   : > { %636 = vst [vmem:[#allocation4 + $0x18] sm:$0xff] %v10688_v3  ;;  %645 = vst [vmem:[#allocation4 + $0x60] sm:$0xff] %v10688_v3  ;;  %v9291_v9 = vpack.c.bf16 %v534_v7, %v533_v6  ;;  %v536_v11 = vld [vmem:[#allocation14 + $0x38] sm:$0xff]  ;;  %v537_v12 = vld [vmem:[#allocation14 + $0x40] sm:$0xff] }
  0xb6   : > { %646 = vst [vmem:[#allocation4 + $0x68] sm:$0xff] %v10688_v3  ;;  %647 = vst [vmem:[#allocation4 + $0x70] sm:$0xff] %v10688_v3  ;;  %v9292_v13 = vpack.c.bf16 %v536_v11, %v535_v10  ;;  %v538_v14 = vld [vmem:[#allocation14 + $0x48] sm:$0xff]  ;;  %v539_v15 = vld [vmem:[#allocation14 + $0x50] sm:$0xff] }
  0xb7   : > { %648 = vst [vmem:[#allocation4 + $0x78] sm:$0xff] %v10688_v3  ;;  %657 = vst [vmem:[#allocation4 + $0xc0] sm:$0xff] %v10688_v3  ;;  %v540_v16 = vld [vmem:[#allocation14 + $0x58] sm:$0xff]  ;;  %v9293_v17 = vpack.c.bf16 %v538_v14, %v537_v12  ;;  %v541_v19 = vld [vmem:[#allocation14 + $0x60] sm:$0xff] }
  0xb8   : > { %658 = vst [vmem:[#allocation4 + $0xc8] sm:$0xff] %v10688_v3  ;;  %659 = vst [vmem:[#allocation4 + $0xd0] sm:$0xff] %v10688_v3  ;;  %v9294_v18 = vpack.c.bf16 %v540_v16, %v539_v15  ;;  %v542_v20 = vld [vmem:[#allocation14 + $0x68] sm:$0xff]  ;;  %v543_v21 = vld [vmem:[#allocation14 + $0x70] sm:$0xff] }
  0xb9   : > { %660 = vst [vmem:[#allocation4 + $0xd8] sm:$0xff] %v10688_v3  ;;  %669 = vst [vmem:[#allocation4 + $0x120] sm:$0xff] %v10688_v3  ;;  %v9295_v22 = vpack.c.bf16 %v542_v20, %v541_v19  ;;  %v544_v23 = vld [vmem:[#allocation14 + $0x78] sm:$0xff]  ;;  %v601_v24 = vld [vmem:[#allocation17] sm:$0xff] }
  0xba   : > { %670 = vst [vmem:[#allocation4 + $0x128] sm:$0xff] %v10688_v3  ;;  %671 = vst [vmem:[#allocation4 + $0x130] sm:$0xff] %v10688_v3  ;;  %v602_v25 = vld [vmem:[#allocation17 + $0x8] sm:$0xff]  ;;  %v9296_v26 = vpack.c.bf16 %v544_v23, %v543_v21  ;;  %v603_v27 = vld [vmem:[#allocation17 + $0x10] sm:$0xff] }
  0xbb   : > { %672 = vst [vmem:[#allocation4 + $0x138] sm:$0xff] %v10688_v3  ;;  %681 = vst [vmem:[#allocation4 + $0x180] sm:$0xff] %v10688_v3  ;;  %v604_v28 = vld [vmem:[#allocation17 + $0x18] sm:$0xff]  ;;  %v605_v29 = vld [vmem:[#allocation17 + $0x20] sm:$0xff] }
  0xbc   : > { %682 = vst [vmem:[#allocation4 + $0x188] sm:$0xff] %v10688_v3  ;;  %683 = vst [vmem:[#allocation4 + $0x190] sm:$0xff] %v10688_v3  ;;  %v606_v30 = vld [vmem:[#allocation17 + $0x28] sm:$0xff]  ;;  %v607_v31 = vld [vmem:[#allocation17 + $0x30] sm:$0xff] }
  0xbd   : > { %684 = vst [vmem:[#allocation4 + $0x198] sm:$0xff] %v10688_v3  ;;  %685 = vst [vmem:[#allocation4 + $0x1a0] sm:$0xff] %v10688_v3  ;;  %v608_v32 = vld [vmem:[#allocation17 + $0x38] sm:$0xff]  ;;  %v609_v33 = vld [vmem:[#allocation17 + $0x40] sm:$0xff] }
  0xbe   : > { %686 = vst [vmem:[#allocation4 + $0x1a8] sm:$0xff] %v10688_v3  ;;  %687 = vst [vmem:[#allocation4 + $0x1b0] sm:$0xff] %v10688_v3  ;;  %v610_v34 = vld [vmem:[#allocation17 + $0x48] sm:$0xff]  ;;  %v611_v35 = vld [vmem:[#allocation17 + $0x50] sm:$0xff] }
  0xbf   : > { %688 = vst [vmem:[#allocation4 + $0x1b8] sm:$0xff] %v10688_v3  ;;  %689 = vst [vmem:[#allocation4 + $0x1c0] sm:$0xff] %v10688_v3  ;;  %v612_v36 = vld [vmem:[#allocation17 + $0x58] sm:$0xff]  ;;  %v613_v37 = vld [vmem:[#allocation17 + $0x60] sm:$0xff] }
  0xc0   : > { %690 = vst [vmem:[#allocation4 + $0x1c8] sm:$0xff] %v10688_v3  ;;  %691 = vst [vmem:[#allocation4 + $0x1d0] sm:$0xff] %v10688_v3  ;;  %v614_v38 = vld [vmem:[#allocation17 + $0x68] sm:$0xff]  ;;  %v615_v39 = vld [vmem:[#allocation17 + $0x70] sm:$0xff] }
  0xc1   : > { %692 = vst [vmem:[#allocation4 + $0x1d8] sm:$0xff] %v10688_v3  ;;  %693 = vst [vmem:[#allocation4 + $0x1e0] sm:$0xff] %v10688_v3  ;;  %v616_v40 = vld [vmem:[#allocation17 + $0x78] sm:$0xff]  ;;  %v768_v41 = vld [vmem:[#allocation4 + $0x360] sm:$0x11] }
  0xc2   : > { %694 = vst [vmem:[#allocation4 + $0x1e8] sm:$0xff] %v10688_v3  ;;  %695 = vst [vmem:[#allocation4 + $0x1f0] sm:$0xff] %v10688_v3  ;;  %v774_v44 = vld [vmem:[#allocation15] sm:$0xff]  ;;  %v775_v45 = vld [vmem:[#allocation15 + $0x8] sm:$0xff] }
  0xc3   : > { %696 = vst [vmem:[#allocation4 + $0x1f8] sm:$0xff] %v10688_v3  ;;  %705 = vst [vmem:[#allocation4 + $0x240] sm:$0xff] %v10688_v3  ;;  %v9297_v48 = vpack.c.bf16 %v775_v45, %v774_v44  ;;  %v776_v49 = vld [vmem:[#allocation15 + $0x10] sm:$0xff]  ;;  %v777_v50 = vld [vmem:[#allocation15 + $0x18] sm:$0xff] }
  0xc4   : > { %706 = vst [vmem:[#allocation4 + $0x248] sm:$0xff] %v10688_v3  ;;  %707 = vst [vmem:[#allocation4 + $0x250] sm:$0xff] %v10688_v3  ;;  %v9298_v51 = vpack.c.bf16 %v777_v50, %v776_v49  ;;  %v778_v52 = vld [vmem:[#allocation15 + $0x20] sm:$0xff]  ;;  %v779_v53 = vld [vmem:[#allocation15 + $0x28] sm:$0xff] }
  0xc5   : > { %708 = vst [vmem:[#allocation4 + $0x258] sm:$0xff] %v10688_v3  ;;  %717 = vst [vmem:[#allocation4 + $0x2a0] sm:$0xff] %v10688_v3  ;;  %v780_v54 = vld [vmem:[#allocation15 + $0x30] sm:$0xff]  ;;  %v9299_v55 = vpack.c.bf16 %v779_v53, %v778_v52  ;;  %v781_v56 = vld [vmem:[#allocation15 + $0x38] sm:$0xff] }
  0xc6   : > { %718 = vst [vmem:[#allocation4 + $0x2a8] sm:$0xff] %v10688_v3  ;;  %719 = vst [vmem:[#allocation4 + $0x2b0] sm:$0xff] %v10688_v3  ;;  %v782_v57 = vld [vmem:[#allocation15 + $0x40] sm:$0xff]  ;;  %v783_v58 = vld [vmem:[#allocation15 + $0x48] sm:$0xff]  ;;  %v9300_v59 = vpack.c.bf16 %v781_v56, %v780_v54 }
  0xc7   : > { %720 = vst [vmem:[#allocation4 + $0x2b8] sm:$0xff] %v10688_v3  ;;  %729 = vst [vmem:[#allocation4 + $0x300] sm:$0xff] %v10688_v3  ;;  %v9301_v60 = vpack.c.bf16 %v783_v58, %v782_v57  ;;  %v784_v61 = vld [vmem:[#allocation15 + $0x50] sm:$0xff]  ;;  %v785_v62 = vld [vmem:[#allocation15 + $0x58] sm:$0xff] }
  0xc8   : > { %730 = vst [vmem:[#allocation4 + $0x308] sm:$0xff] %v10688_v3  ;;  %731 = vst [vmem:[#allocation4 + $0x310] sm:$0xff] %v10688_v3  ;;  %v786_v63 = vld [vmem:[#allocation15 + $0x60] sm:$0xff]  ;;  %v9302_v0 = vpack.c.bf16 %v785_v62, %v784_v61  ;;  %v787_v1 = vld [vmem:[#allocation15 + $0x68] sm:$0xff] }
  0xc9   : > { %732 = vst [vmem:[#allocation4 + $0x318] sm:$0xff] %v10688_v3  ;;  %742 = vst [vmem:[#allocation4 + $0x368] sm:$0xff] %v10688_v3  ;;  %v788_v2 = vld [vmem:[#allocation15 + $0x70] sm:$0xff]  ;;  %v846_v6 = vld [vmem:[#allocation18] sm:$0xff] }
  0xca   : > { %743 = vst [vmem:[#allocation4 + $0x370] sm:$0xff] %v10688_v3  ;;  %744 = vst [vmem:[#allocation4 + $0x378] sm:$0xff] %v10688_v3  ;;  %v847_v7 = vld [vmem:[#allocation18 + $0x8] sm:$0xff]  ;;  %v850_v10 = vld [vmem:[#allocation18 + $0x20] sm:$0xff] }
  0xcb   : > { %745 = vst [vmem:[#allocation4 + $0x380] sm:$0xff] %v10688_v3  ;;  %746 = vst [vmem:[#allocation4 + $0x388] sm:$0xff] %v10688_v3  ;;  %v851_v11 = vld [vmem:[#allocation18 + $0x28] sm:$0xff]  ;;  %v852_v12 = vld [vmem:[#allocation18 + $0x30] sm:$0xff] }
  0xcc   : > { %747 = vst [vmem:[#allocation4 + $0x390] sm:$0xff] %v10688_v3  ;;  %748 = vst [vmem:[#allocation4 + $0x398] sm:$0xff] %v10688_v3  ;;  %v854_v14 = vld [vmem:[#allocation18 + $0x40] sm:$0xff]  ;;  %v855_v15 = vld [vmem:[#allocation18 + $0x48] sm:$0xff] }
  0xcd   : > { %749 = vst [vmem:[#allocation4 + $0x3a0] sm:$0xff] %v10688_v3  ;;  %750 = vst [vmem:[#allocation4 + $0x3a8] sm:$0xff] %v10688_v3  ;;  %v856_v16 = vld [vmem:[#allocation18 + $0x50] sm:$0xff]  ;;  %v859_v19 = vld [vmem:[#allocation18 + $0x68] sm:$0xff] }
  0xce   : > { %751 = vst [vmem:[#allocation4 + $0x3b0] sm:$0xff] %v10688_v3  ;;  %752 = vst [vmem:[#allocation4 + $0x3b8] sm:$0xff] %v10688_v3  ;;  %v860_v20 = vld [vmem:[#allocation18 + $0x70] sm:$0xff]  ;;  %v861_v21 = vld [vmem:[#allocation18 + $0x78] sm:$0xff] }
  0xcf   : > { %753 = vst [vmem:[#allocation4 + $0x3c0] sm:$0xff] %v10688_v3  ;;  %754 = vst [vmem:[#allocation4 + $0x3c8] sm:$0xff] %v10688_v3 }
  0xd0   : > { %755 = vst [vmem:[#allocation4 + $0x3d0] sm:$0xff] %v10688_v3  ;;  %756 = vst [vmem:[#allocation4 + $0x3d8] sm:$0xff] %v10688_v3  ;;  %v771_v42 = vld [vmem:[#allocation4 + $0x368] sm:$0x11] }
  0xd1   : > { %757 = vst [vmem:[#allocation4 + $0x3e0] sm:$0xff] %v10688_v3  ;;  %758 = vst [vmem:[#allocation4 + $0x3e8] sm:$0xff] %v10688_v3 }
  0xd2   : > { %759 = vst [vmem:[#allocation4 + $0x3f0] sm:$0xff] %v10688_v3  ;;  %760 = vst [vmem:[#allocation4 + $0x3f8] sm:$0xff] %v10688_v3 }
  0xd3   : > { %942 = vst [vmem:[#allocation5 + $0x10] sm:$0xff] %v10688_v3  ;;  %943 = vst [vmem:[#allocation5 + $0x208] sm:$0xff] %v10688_v3 }
  0xd4   : > { %944 = vst [vmem:[#allocation5 + $0x360] sm:$0xff] %v10688_v3  ;;  %945 = vst [vmem:[#allocation5 + $0x490] sm:$0xff] %v10688_v3 }
  0xd5   : > { %946 = vst [vmem:[#allocation5 + $0x480] sm:$0xff] %v10688_v3  ;;  %947 = vst [vmem:[#allocation5 + $0x3c0] sm:$0xff] %v10688_v3 }
  0xd6   : > { %948 = vst [vmem:[#allocation5 + $0x2e0] sm:$0xff] %v10688_v3  ;;  %949 = vst [vmem:[#allocation5 + $0x300] sm:$0xff] %v10688_v3 }
  0xd7   : > { %950 = vst [vmem:[#allocation5 + $0x358] sm:$0xff] %v10688_v3  ;;  %951 = vst [vmem:[#allocation5 + $0x20] sm:$0xff] %v10688_v3 }
  0xd8   : > { %952 = vst [vmem:[#allocation5 + $0x4c8] sm:$0xff] %v10688_v3  ;;  %953 = vst [vmem:[#allocation5 + $0xe8] sm:$0xff] %v10688_v3 }
  0xd9   : > { %954 = vst [vmem:[#allocation5 + $0x400] sm:$0xff] %v10688_v3  ;;  %955 = vst [vmem:[#allocation5 + $0x268] sm:$0xff] %v10688_v3 }
  0xda   : > { %956 = vst [vmem:[#allocation5 + $0x288] sm:$0xff] %v10688_v3  ;;  %957 = vst [vmem:[#allocation5 + $0x218] sm:$0xff] %v10688_v3 }
  0xdb   : > { %1022 = vst [vmem:[#allocation5 + $0x310] sm:$0xff] %v10688_v3  ;;  %1023 = vst [vmem:[#allocation5 + $0x280] sm:$0xff] %v10688_v3 }
  0xdc   : > { %1024 = vst [vmem:[#allocation5 + $0x460] sm:$0xff] %v10688_v3  ;;  %1025 = vst [vmem:[#allocation5 + $0x130] sm:$0xff] %v10688_v3 }
  0xdd   : > { %1026 = vst [vmem:[#allocation5 + $0x298] sm:$0xff] %v10688_v3  ;;  %1027 = vst [vmem:[#allocation5 + $0x158] sm:$0xff] %v10688_v3 }
  0xde   : > { %1028 = vst [vmem:[#allocation5 + $0x200] sm:$0xff] %v10688_v3  ;;  %1029 = vst [vmem:[#allocation5 + $0x2e8] sm:$0xff] %v10688_v3 }
  0xdf   : > { %1030 = vst [vmem:[#allocation5 + $0x380] sm:$0xff] %v10688_v3  ;;  %1031 = vst [vmem:[#allocation5 + $0x2d8] sm:$0xff] %v10688_v3 }
  0xe0   : > { %1032 = vst [vmem:[#allocation5 + $0x248] sm:$0xff] %v10688_v3  ;;  %1033 = vst [vmem:[#allocation5 + $0xd8] sm:$0xff] %v10688_v3 }
  0xe1   : > { %1034 = vst [vmem:[#allocation5 + $0x398] sm:$0xff] %v10688_v3  ;;  %1035 = vst [vmem:[#allocation5 + $0x98] sm:$0xff] %v10688_v3 }
  0xe2   : > { %1036 = vst [vmem:[#allocation5 + $0x1b0] sm:$0xff] %v10688_v3  ;;  %1037 = vst [vmem:[#allocation5 + $0x4c0] sm:$0xff] %v10688_v3  ;;  %v789_v3 = vld [vmem:[#allocation15 + $0x78] sm:$0xff]  ;;  %v1041_v23 = vld [vmem:[#allocation5 + $0x280] sm:$0x11] }
  0xe3   : > { %593 = vst [vmem:[#allocation2 + $0x30] sm:$0xff] %v9289_v4  ;;  %594 = vst [vmem:[#allocation2] sm:$0xff] %v9290_v8  ;;  %v9303_v4 = vpack.c.bf16 %v787_v1, %v786_v63  ;;  %v9304_v5 = vpack.c.bf16 %v789_v3, %v788_v2  ;;  %v848_v8 = vld [vmem:[#allocation18 + $0x10] sm:$0xff] }
  0xe4   : > { %595 = vst [vmem:[#allocation2 + $0x18] sm:$0xff] %v9291_v9  ;;  %596 = vst [vmem:[#allocation2 + $0x10] sm:$0xff] %v9292_v13  ;;  %v849_v9 = vld [vmem:[#allocation18 + $0x18] sm:$0xff] }
  0xe5   : > { %597 = vst [vmem:[#allocation2 + $0x8] sm:$0xff] %v9293_v17  ;;  %598 = vst [vmem:[#allocation2 + $0x20] sm:$0xff] %v9294_v18  ;;  %v853_v13 = vld [vmem:[#allocation18 + $0x38] sm:$0xff]  ;;  %v858_v18 = vld [vmem:[#allocation18 + $0x60] sm:$0xff] }
  0xe6   : > { %617 = vst [vmem:[#allocation24] sm:$0xff] %v601_v24  ;;  %618 = vst [vmem:[#allocation24 + $0x8] sm:$0xff] %v602_v25  ;;  %v857_v17 = vld [vmem:[#allocation18 + $0x58] sm:$0xff] }
  0xe7   : > { %599 = vst [vmem:[#allocation2 + $0x28] sm:$0xff] %v9295_v22  ;;  %619 = vst [vmem:[#allocation24 + $0x10] sm:$0xff] %v603_v27  ;;  %v1038_v22 = vld [vmem:[#allocation5 + $0x310] sm:$0x11] }
  0xe8   : > { %620 = vst [vmem:[#allocation24 + $0x18] sm:$0xff] %v604_v28  ;;  %621 = vst [vmem:[#allocation24 + $0x20] sm:$0xff] %v605_v29 }
  0xe9   : > { %600 = vst [vmem:[#allocation2 + $0x38] sm:$0xff] %v9296_v26  ;;  %622 = vst [vmem:[#allocation24 + $0x28] sm:$0xff] %v606_v30 }
  0xea   : > { %623 = vst [vmem:[#allocation24 + $0x30] sm:$0xff] %v607_v31  ;;  %624 = vst [vmem:[#allocation24 + $0x38] sm:$0xff] %v608_v32 }
  0xeb   : > { %625 = vst [vmem:[#allocation24 + $0x40] sm:$0xff] %v609_v33  ;;  %626 = vst [vmem:[#allocation24 + $0x48] sm:$0xff] %v610_v34 }
  0xec   : > { %627 = vst [vmem:[#allocation24 + $0x50] sm:$0xff] %v611_v35  ;;  %628 = vst [vmem:[#allocation24 + $0x58] sm:$0xff] %v612_v36 }
  0xed   : > { %629 = vst [vmem:[#allocation24 + $0x60] sm:$0xff] %v613_v37  ;;  %630 = vst [vmem:[#allocation24 + $0x68] sm:$0xff] %v614_v38 }
  0xee   : > { %vm763_vm4 = vmand %vm761_vm0, %vm762_vm1  ;;  %631 = vst [vmem:[#allocation24 + $0x70] sm:$0xff] %v615_v39 }
  0xef   : > { %632 = vst [vmem:[#allocation24 + $0x78] sm:$0xff] %v616_v40  ;;  %vm766_vm5 = vmand %vm764_vm2, %vm765_vm3 }
  0xf0   : > { %vm11084_vm6 = vmor %vm766_vm5, %vm763_vm4  ;;  %838 = vst [vmem:[#allocation3] sm:$0xff] %v9297_v48 }
  0xf1   : > { %v769_v46 = vsel %vm11084_vm6, 1065369472, %v768_v41  ;;  %v772_v47 = vsel %vm11084_vm6, 1065369472, %v771_v42  ;;  %839 = vst [vmem:[#allocation3 + $0x18] sm:$0xff] %v9298_v51  ;;  %840 = vst [vmem:[#allocation3 + $0x10] sm:$0xff] %v9299_v55 }
  0xf2   : > { %770 = vst [vmem:[#allocation4 + $0x360] sm:$0x11] %v769_v46  ;;  %773 = vst [vmem:[#allocation4 + $0x368] sm:$0x11] %v772_v47  ;;  %v1039_v24 = vsel %vm11084_vm6, 1065369472, %v1038_v22 }
  0xf3   : > { %841 = vst [vmem:[#allocation3 + $0x20] sm:$0xff] %v9300_v59  ;;  %842 = vst [vmem:[#allocation3 + $0x28] sm:$0xff] %v9301_v60  ;;  %v1042_v25 = vsel %vm11084_vm6, 1065369472, %v1041_v23 }
  0xf4   : > { %843 = vst [vmem:[#allocation3 + $0x8] sm:$0xff] %v9302_v0  ;;  %862 = vst [vmem:[#allocation26] sm:$0xff] %v846_v6 }
  0xf5   : > { %863 = vst [vmem:[#allocation26 + $0x8] sm:$0xff] %v847_v7  ;;  %864 = vst [vmem:[#allocation26 + $0x10] sm:$0xff] %v848_v8 }
  0xf6   : > { %844 = vst [vmem:[#allocation3 + $0x30] sm:$0xff] %v9303_v4  ;;  %845 = vst [vmem:[#allocation3 + $0x38] sm:$0xff] %v9304_v5 }
  0xf7   : > { %865 = vst [vmem:[#allocation26 + $0x18] sm:$0xff] %v849_v9  ;;  %866 = vst [vmem:[#allocation26 + $0x20] sm:$0xff] %v850_v10 }
  0xf8   : > { %867 = vst [vmem:[#allocation26 + $0x28] sm:$0xff] %v851_v11  ;;  %868 = vst [vmem:[#allocation26 + $0x30] sm:$0xff] %v852_v12 }
  0xf9   : > { %869 = vst [vmem:[#allocation26 + $0x38] sm:$0xff] %v853_v13  ;;  %870 = vst [vmem:[#allocation26 + $0x40] sm:$0xff] %v854_v14 }
  0xfa   : > { %871 = vst [vmem:[#allocation26 + $0x48] sm:$0xff] %v855_v15  ;;  %872 = vst [vmem:[#allocation26 + $0x50] sm:$0xff] %v856_v16 }
  0xfb   : > { %873 = vst [vmem:[#allocation26 + $0x58] sm:$0xff] %v857_v17  ;;  %874 = vst [vmem:[#allocation26 + $0x60] sm:$0xff] %v858_v18 }
  0xfc   : > { %875 = vst [vmem:[#allocation26 + $0x68] sm:$0xff] %v859_v19  ;;  %876 = vst [vmem:[#allocation26 + $0x70] sm:$0xff] %v860_v20 }
  0xfd   : > { %877 = vst [vmem:[#allocation26 + $0x78] sm:$0xff] %v861_v21  ;;  %1040 = vst [vmem:[#allocation5 + $0x310] sm:$0x11] %v1039_v24 }
  0xfe   : > { %1043 = vst [vmem:[#allocation5 + $0x280] sm:$0x11] %v1042_v25 }
  0xff PF: > { %v1056_v26 = vld [vmem:[#allocation2] sm:$0xff]  ;;  %v1058_v27 = vld [vmem:[#allocation2 + $0x10] sm:$0xff]  ;;  %v1068_v29 = vlaneseq  ;;  %v1057_v31 = vld [vmem:[#allocation2 + $0x18] sm:$0xff]  ;;  %s10689_s6 = smov 15   ;;  %v10690_v39 = vmov 1983009808  }
 0x100   : > { %v1055_v28 = vld [vmem:[#allocation2 + $0x30] sm:$0xff]  ;;  %v11096_v30 = vcombine.high %v1056_v26, %v1058_v27  ;;  %1770 = vst [vmem:[#allocation4 + $0x1a8] sm:$0xff] %v1056_v26  ;;  %1772 = vst [vmem:[#allocation4 + $0x1b8] sm:$0xff] %v1058_v27  ;;  %v1059_v32 = vld [vmem:[#allocation2 + $0x8] sm:$0xff]  ;;  %v1066_v40 = vunpack.c.l.s4 %v10690_v39  ;;  %s10691_s28 = smov 112   ;;  %v11144_v52 = vcombine.low %v1056_v26, %v1058_v27  ;;  %s10692_s18 = smov 16  }
 0x101   : > { %1769 = vst [vmem:[#allocation4 + $0x1a0] sm:$0xff] %v1055_v28  ;;  %v1061_v33 = vld [vmem:[#allocation2 + $0x28] sm:$0xff]  ;;  %v11098_v34 = vcombine.high %v1055_v28, %v1057_v31  ;;  %1771 = vst [vmem:[#allocation4 + $0x1b0] sm:$0xff] %v1057_v31  ;;  %v1060_v35 = vld [vmem:[#allocation2 + $0x20] sm:$0xff]  ;;  %v11103_v38 = vcombine.low %v1055_v28, %v1057_v31  ;;  %v11105_v41 = vshrl.u32 %v1068_v29, 7  ;;  %s10693_s15 = smov 113  }
 0x102   : > { %1773 = vst [vmem:[#allocation4 + $0x1c0] sm:$0xff] %v1059_v32  ;;  %1775 = vst [vmem:[#allocation4 + $0x1d0] sm:$0xff] %v1061_v33  ;;  %v1062_v36 = vld [vmem:[#allocation2 + $0x38] sm:$0xff]  ;;  %v1054_v37 = vld [vmem:[%s10948_s5] sm:$0xff]  ;;  %1459 = vrot.lane.b32.xlu0 %v11096_v30, %s10689_s6  ;;  %v11109_v43 = vcombine.low %v1059_v32, %v1061_v33  ;;  %v1067_v44 = vunpack.c.0.s8 %v1066_v40  ;;  %v11113_v45 = vcombine.high %v1059_v32, %v1061_v33  ;;  %s10694_s13 = smov 17   ;;  %s10695_s17 = smov 127  }
 0x103   : > { %1774 = vst [vmem:[#allocation4 + $0x1c8] sm:$0xff] %v1060_v35  ;;  %1776 = vst [vmem:[#allocation4 + $0x1d8] sm:$0xff] %v1062_v36  ;;  %v1064_v42 = vcombine.high %v1054_v37, %v1054_v37  ;;  %1465 = vrot.lane.b32.xlu1 %v11098_v34, %s10689_s6  ;;  %v11118_v47 = vcombine.low %v1060_v35, %v1062_v36  ;;  %v11148_v53 = vcombine.high %v1060_v35, %v1062_v36  ;;  %s10696_s20 = smov 1   ;;  %v1046_v54 = vld [vmem:[#allocation9] sm:$0x22]  ;;  %s10697_s25 = smov 111  }
 0x104   : > { %8613 = vst.sshfl [vmem:[#allocation4 + $0x180] sm:$0xf pattern:$0x76325410] %v1054_v37  ;;  %v1070_v46 = vsub.s32 %v1067_v44, %v11105_v41  ;;  %v1050_v55 = vld [vmem:[#allocation9] sm:$0x88]  ;;  %v11238_v56 = vcombine.low %v1046_v54, %v1046_v54  ;;  %v11240_v57 = vcombine.high %v1046_v54, %v1046_v54 }
 0x105   : > { %8614 = vst.sshfl [vmem:[#allocation4 + $0x188] sm:$0xf pattern:$0x76325410] %v1064_v42  ;;  %v11242_v58 = vcombine.low %v1050_v55, %v1050_v55  ;;  %v11246_v59 = vcombine.high %v1050_v55, %v1050_v55  ;;  %v11251_v60 = vsub.s32 1, %v11105_v41  ;;  %vm1447_vm7 = vcmask 121856  }
 0x106   : > { %1463 = vrot.lane.b32.xlu0 %v11103_v38, %s10689_s6  ;;  %v11120_v48 = vrot.slane %v1064_v42, %v1070_v46  ;;  %v11130_v50 = vrot.slane %v1054_v37, %v1070_v46  ;;  %v1506_v61 = vpack.i.b16 %v11238_v56, %v11238_v56  ;;  %v1513_v62 = vpack.i.b16 %v11240_v57, %v11240_v57  ;;  %v1044_v22 = vld [vmem:[#allocation9] sm:$0x11]  ;;  %s10699_s26 = smov [#allocation21]   ;;  %s10700_s4 = smov [#allocation24]  }
 0x107   : > { %2145 = vrot.lane.b32.xlu1 %v11109_v43, %s10691_s28  ;;  %v2173_v63 = vshrl.u32 %v11242_v58, 16  ;;  %v2180_v0 = vshrl.u32 %v11246_v59, 16  ;;  %v11274_v5 = vsub.s32 3, %v11105_v41  ;;  %vm2125_vm8 = vcmask 916480   ;;  %v9554_v55 = vld [vmem:[#allocation11 + $0x4] ss:$16 sps:$4 sm:$0xff]  }
 0x108   : > { %v11126_v49 = vcombine.high %v11120_v48, %v11120_v48  ;;  %v11136_v51 = vcombine.high %v11130_v50, %v11130_v50  ;;  %v11268_v3 = vrot.slane %v1506_v61, %v11251_v60  ;;  %v11271_v4 = vrot.slane %v1513_v62, %v11251_v60  ;;  %3435 = vmatprep.mubr.bf16.mxu0 %v9554_v55  ;;  %s8296_s16 = sshll.u32 %s10699_s26, 4  ;;  %s8322_s29 = sshll.u32 %s10700_s4, 4  ;;  %s8297_s16 = int_to_ptr.vmem [resolvable:$true] %s8296_s16  ;;  %s13958_s29 = int_to_ptr.vmem [resolvable:$true] %s8322_s29 }
 0x109   : > { %v2174_v6 = vpack.i.b16 %v2173_v63, %v2173_v63  ;;  %v2181_v7 = vpack.i.b16 %v2180_v0, %v2180_v0  ;;  %v11312_v25 = vcombine.low %v1044_v22, %v1044_v22  ;;  %v11314_v26 = vcombine.high %v1044_v22, %v1044_v22  ;;  %s10488_s5 = scalar_lea.vmem %s8297_s16, 2048  ;;  %p14652_p7 = scmp.eq.s32.totalorder %s10792_s27, 7 }
 0x10a   : > { %2147 = vrot.lane.b32.xlu0 %v11113_v45, %s10691_s28  ;;  %14372 = vst [vmem:[#allocation35_spill] sm:$0xff] %v11271_v4  ;;  %vm1289_vm9 = vcmask 130048   ;;  %vm1957_vm10 = vcmask 924672   ;;  %vm1089_vm11 = vcmask 138240   ;;  %vm1785_vm12 = vcmask 1039360   ;;  %p10489_p5 = scmp.ne.s32.totalorder %s8297_s16, %s10488_s5  ;;  %p10495_p1 = scmp.lt.s32.totalorder %s8297_s16, %s8297_s16 }
 0x10b   : > { %2149 = vrot.lane.b32.xlu1 %v11118_v47, %s10691_s28  ;;  %v11289_v14 = vrot.slane %v2174_v6, %v11274_v5  ;;  %v11294_v15 = vrot.slane %v2181_v7, %v11274_v5  ;;  %v1344_v35 = vshrl.u32 %v11314_v26, 16  ;;  %vm1615_vm13 = vcmask 7168   ;;  %p10496_p4 = scmp.lt.s32.totalorder %s10488_s5, %s10488_s5 }
 0x10c   : > { %vm2283_vm14 = vcmask 908288   ;;  %p10490_p12 = pnand %p10489_p5, %p14652_p7 }
 0x10d   : > { %14373 = vst [vmem:[#allocation36_spill] sm:$0xff] %v11289_v14  ;;  %14374 = vst [vmem:[#allocation37_spill] sm:$0xff] %v11294_v15  ;;  %v1345_v46 = vpack.i.b16 %v1344_v35, %v1344_v35  ;;  %p10497_p13 = por %p10496_p4, %p10495_p1 }
 0x10e   : > { %1439 = vrot.lane.b32.xlu0 %v11126_v49, %s10689_s6  ;;  %p10491_p11 = pneg %p10490_p12 }
 0x10f   : > { %1441 = vrot.lane.b32.xlu1 %v11130_v50, %s10689_s6 }
 0x110   : > { %p10498_p3 = pnand %p10497_p13, %p10491_p11 }
 0x112   : > { %1443 = vrot.lane.b32.xlu0 %v11136_v51, %s10689_s6 }
 0x113   : > { %2137 = vrot.lane.b32.xlu1 %v11103_v38, %s10691_s28 }
 0x116   : > { %2139 = vrot.lane.b32.xlu0 %v11098_v34, %s10691_s28 }
 0x117   : > { %2141 = vrot.lane.b32.xlu1 %v11144_v52, %s10691_s28 }
 0x11a   : > { %1303 = vrot.lane.b32.xlu0 %v11148_v53, %s10692_s18 }
 0x11b   : > { %1311 = vrot.lane.b32.xlu1 %v11109_v43, %s10692_s18 }
 0x11e   : > { %1313 = vrot.lane.b32.xlu0 %v11113_v45, %s10692_s18 }
 0x11f   : > { %2117 = vrot.lane.b32.xlu1 %v11130_v50, %s10691_s28 }
 0x122   : > { %2119 = vrot.lane.b32.xlu0 %v11136_v51, %s10691_s28 }
 0x123   : > { %2121 = vrot.lane.b32.xlu1 %v11120_v48, %s10691_s28 }
 0x126   : > { %1301 = vrot.lane.b32.xlu0 %v11096_v30, %s10692_s18 }
 0x127   : > { %1305 = vrot.lane.b32.xlu1 %v11103_v38, %s10692_s18 }
 0x12a   : > { %1307 = vrot.lane.b32.xlu0 %v11098_v34, %s10692_s18 }
 0x12b   : > { %1977 = vrot.lane.b32.xlu1 %v11109_v43, %s10693_s15 }
 0x12e   : > { %1979 = vrot.lane.b32.xlu0 %v11113_v45, %s10693_s15 }
 0x12f   : > { %1981 = vrot.lane.b32.xlu1 %v11118_v47, %s10693_s15 }
 0x132   : > { %1281 = vrot.lane.b32.xlu0 %v11126_v49, %s10692_s18 }
 0x133   : > { %1283 = vrot.lane.b32.xlu1 %v11130_v50, %s10692_s18 }
 0x136   : > { %1285 = vrot.lane.b32.xlu0 %v11136_v51, %s10692_s18 }
 0x137   : > { %1969 = vrot.lane.b32.xlu1 %v11103_v38, %s10693_s15 }
 0x13a   : > { %1971 = vrot.lane.b32.xlu0 %v11098_v34, %s10693_s15 }
 0x13b   : > { %1973 = vrot.lane.b32.xlu1 %v11144_v52, %s10693_s15 }
 0x13e   : > { %1113 = vrot.lane.b32.xlu0 %v11148_v53, %s10694_s13 }
 0x13f   : > { %1143 = vrot.lane.b32.xlu1 %v11109_v43, %s10694_s13 }
 0x142   : > { %1145 = vrot.lane.b32.xlu0 %v11113_v45, %s10694_s13 }
 0x143   : > { %1949 = vrot.lane.b32.xlu1 %v11130_v50, %s10693_s15 }
 0x146   : > { %1951 = vrot.lane.b32.xlu0 %v11136_v51, %s10693_s15 }
 0x147   : > { %1953 = vrot.lane.b32.xlu1 %v11120_v48, %s10693_s15 }
 0x14a   : > { %1111 = vrot.lane.b32.xlu0 %v11096_v30, %s10694_s13 }
 0x14b   : > { %1137 = vrot.lane.b32.xlu1 %v11103_v38, %s10694_s13 }
 0x14e   : > { %1139 = vrot.lane.b32.xlu0 %v11098_v34, %s10694_s13 }
 0x14f   : > { %1805 = vrot.lane.b32.xlu1 %v11109_v43, %s10695_s17 }
 0x152   : > { %1807 = vrot.lane.b32.xlu0 %v11113_v45, %s10695_s17 }
 0x153   : > { %1809 = vrot.lane.b32.xlu1 %v11118_v47, %s10695_s17 }
 0x156   : > { %1080 = vrot.lane.b32.xlu0 %v11126_v49, %s10694_s13 }
 0x157   : > { %1083 = vrot.lane.b32.xlu1 %v11130_v50, %s10694_s13 }
 0x15a   : > { %1085 = vrot.lane.b32.xlu0 %v11136_v51, %s10694_s13 }
 0x15b   : > { %1797 = vrot.lane.b32.xlu1 %v11103_v38, %s10695_s17 }
 0x15e   : > { %1799 = vrot.lane.b32.xlu0 %v11098_v34, %s10695_s17 }
 0x15f   : > { %1801 = vrot.lane.b32.xlu1 %v11144_v52, %s10695_s17 }
 0x162   : > { %1777 = vrot.lane.b32.xlu0 %v11130_v50, %s10695_s17 }
 0x163   : > { %1779 = vrot.lane.b32.xlu1 %v11136_v51, %s10695_s17 }
 0x166   : > { %1781 = vrot.lane.b32.xlu0 %v11120_v48, %s10695_s17 }
 0x167   : > { %1629 = vrot.lane.b32.xlu1 %v11148_v53, %s10696_s20 }
 0x16a   : > { %1637 = vrot.lane.b32.xlu0 %v11109_v43, %s10696_s20 }
 0x16b   : > { %1639 = vrot.lane.b32.xlu1 %v11113_v45, %s10696_s20 }
 0x16e   : > { %1627 = vrot.lane.b32.xlu0 %v11096_v30, %s10696_s20 }
 0x16f   : > { %1631 = vrot.lane.b32.xlu1 %v11103_v38, %s10696_s20 }
 0x172   : > { %1633 = vrot.lane.b32.xlu0 %v11098_v34, %s10696_s20 }
 0x173   : > { %2303 = vrot.lane.b32.xlu1 %v11109_v43, %s10697_s25 }
 0x174   : > { %v11261_v1 = vpop.permute.xlu0 %1459 }
 0x175   : > { %v11263_v2 = vpop.permute.xlu1 %1465 }
 0x176   : > { %2305 = vrot.lane.b32.xlu0 %v11113_v45, %s10697_s25 }
 0x177   : > { %2307 = vrot.lane.b32.xlu1 %v11118_v47, %s10697_s25 }
 0x178   : > { %v1464_v8 = vpop.permute.xlu0 %1463 }
 0x179   : > { %v11278_v9 = vpop.permute.xlu1 %2145  ;;  %v1475_v10 = vsel %vm1447_vm7, %v1464_v8, %v11263_v2  ;;  %v1489_v11 = vsel %vm1447_vm7, %v11261_v1, %v1464_v8 }
 0x17a   : > { %v1537_v12 = vmul.bf16 %v11268_v3, %v1489_v11  ;;  %v1538_v13 = vmul.bf16 %v11271_v4, %v1475_v10  ;;  %1607 = vrot.lane.b32.xlu0 %v11126_v49, %s10696_s20 }
 0x17b   : > { %1609 = vrot.lane.b32.xlu1 %v11130_v50, %s10696_s20 }
 0x17c   : > { %v2148_v16 = vpop.permute.xlu0 %2147  ;;  %3403 = vmatprep.subr.bf16.mxu0 %v1538_v13 }
 0x17d   : > { %v11296_v17 = vpop.permute.xlu1 %2149  ;;  %v2156_v18 = vsel %vm2125_vm8, %v11278_v9, %v2148_v16  ;;  %3404 = vmatpush1.bf16.msra.mxu0 %v1537_v12  ;;  %v9560_v12 = vld [vmem:[#allocation11 + $0xc] ss:$16 sps:$4 sm:$0xff]  }
 0x17e   : > { %v2157_v19 = vsel %vm2125_vm8, %v2148_v16, %v11296_v17  ;;  %v2209_v20 = vmul.bf16 %v11289_v14, %v2156_v18  ;;  %1611 = vrot.lane.b32.xlu0 %v11136_v51, %s10696_s20  ;;  %3548 = vmatprep.mubr.bf16.mxu1 %v9560_v12 }
 0x17f   : > { %v2210_v21 = vmul.bf16 %v11294_v15, %v2157_v19  ;;  %2295 = vrot.lane.b32.xlu1 %v11103_v38, %s10697_s25  ;;  %v11335_v38 = vsub.s32 0, %v11105_v41 }
 0x180   : > { %v11308_v23 = vpop.permute.xlu0 %1439 }
 0x181   : > { %v1442_v24 = vpop.permute.xlu1 %1441  ;;  %3516 = vmatprep.subr.bf16.mxu1 %v2210_v21 }
 0x182   : > { %2297 = vrot.lane.b32.xlu0 %v11098_v34, %s10697_s25  ;;  %v1457_v27 = vsel %vm1447_vm7, %v11308_v23, %v1442_v24  ;;  %v1337_v34 = vshrl.u32 %v11312_v25, 16  ;;  %3517 = vmatpush1.bf16.msra.mxu1 %v2209_v20 }
 0x183   : > { %2299 = vrot.lane.b32.xlu1 %v11144_v52, %s10697_s25  ;;  %v1533_v32 = vmul.bf16 %v11268_v3, %v1457_v27 }
 0x184   : > { %v11320_v28 = vpop.permute.xlu0 %1443 }
 0x185   : > { %v11322_v29 = vpop.permute.xlu1 %2137  ;;  %v1448_v31 = vsel %vm1447_vm7, %v1442_v24, %v11320_v28 }
 0x186   : > { %v1534_v33 = vmul.bf16 %v11271_v4, %v1448_v31  ;;  %1461 = vrot.lane.b32.xlu0 %v11148_v53, %s10689_s6  ;;  %v2016_v31 = vpack.i.b16 %v11242_v58, %v11242_v58 }
 0x187   : > { %1469 = vrot.lane.b32.xlu1 %v11109_v43, %s10689_s6  ;;  %v1338_v43 = vpack.i.b16 %v1337_v34, %v1337_v34 }
 0x188   : > { %v8593_v36 = vcombine.low %v1533_v32, %v1534_v33  ;;  %v2140_v37 = vpop.permute.xlu0 %2139  ;;  %v2023_v33 = vpack.i.b16 %v11246_v59, %v11246_v59 }
 0x189   : > { %v11337_v39 = vpop.permute.xlu1 %2141  ;;  %v2153_v40 = vsel %vm2125_vm8, %v11322_v29, %v2140_v37  ;;  %v11352_v63 = vrot.slane %v1338_v43, %v11335_v38 }
 0x18a   : > { %1557 = vst [vmem:[#allocation4 + $0xc0] sm:$0x33] %v8593_v36  ;;  %v2154_v42 = vsel %vm2125_vm8, %v2140_v37, %v11337_v39  ;;  %v2205_v44 = vmul.bf16 %v11289_v14, %v2153_v40  ;;  %1471 = vrot.lane.b32.xlu0 %v11113_v45, %s10689_s6  ;;  %v11357_v45 = vrot.slane %v1345_v46, %v11335_v38 }
 0x18b   : > { %v2206_v54 = vmul.bf16 %v11294_v15, %v2154_v42  ;;  %2275 = vrot.lane.b32.xlu1 %v11130_v50, %s10697_s25  ;;  %14375 = vst [vmem:[#allocation38_spill] sm:$0xff] %v11352_v63  ;;  %v11410_v40 = vrot.slane %v2016_v31, %v11274_v5  ;;  %v11415_v59 = vrot.slane %v2023_v33, %v11274_v5 }
 0x18c   : > { %v11349_v61 = vpop.permute.xlu0 %1303  ;;  %14376 = vst [vmem:[#allocation39_spill] sm:$0xff] %v11357_v45  ;;  %v1187_v33 = vpack.i.b16 %v11314_v26, %v11314_v26 }
 0x18d   : > { %v1312_v62 = vpop.permute.xlu1 %1311  ;;  %3518 = vmatprep.subr.bf16.mxu1 %v2206_v54  ;;  %14377 = vst [vmem:[#allocation40_spill] sm:$0xff] %v11410_v40  ;;  %14378 = vst [vmem:[#allocation41_spill] sm:$0xff] %v11415_v59 }
 0x18e   : > { %2277 = vrot.lane.b32.xlu0 %v11136_v51, %s10697_s25  ;;  %v1335_v0 = vsel %vm1289_vm9, %v11349_v61, %v1312_v62  ;;  %3519 = vmatpush1.bf16.msra.mxu1 %v2205_v44 }
 0x18f   : > { %2279 = vrot.lane.b32.xlu1 %v11120_v48, %s10697_s25  ;;  %v1373_v51 = vmul.bf16 %v11352_v63, %v1335_v0 }
 0x190   : > { %v11363_v50 = vpop.permute.xlu0 %1313 }
 0x191   : > { %v11365_v6 = vpop.permute.xlu1 %2117  ;;  %v1320_v7 = vsel %vm1289_vm9, %v1312_v62, %v11363_v50  ;;  %v9497_v8 = vld [vmem:[#allocation4 + $0xc4] ss:$16 sps:$4 sm:$0xff]   ;;  %v9499_v10 = vld [vmem:[#allocation4 + $0xc0] ss:$16 sps:$4 sm:$0xff]  }
 0x192   : > { %v1374_v11 = vmul.bf16 %v11357_v45, %v1320_v7  ;;  %1467 = vrot.lane.b32.xlu0 %v11144_v52, %s10689_s6  ;;  %3405 = vmatprep.subr.bf16.mxu0 %v9497_v8 }
 0x193   : > { %2151 = vrot.lane.b32.xlu1 %v11148_v53, %s10691_s28  ;;  %3406 = vmatpush1.bf16.msra.mxu0 %v9499_v10 }
 0x194   : > { %v2120_v13 = vpop.permute.xlu0 %2119  ;;  %3407 = vmatprep.subr.bf16.mxu0 %v1374_v11 }
 0x195   : > { %v11375_v16 = vpop.permute.xlu1 %2121  ;;  %v2126_v18 = vsel %vm2125_vm8, %v11365_v6, %v2120_v13 }
 0x196   : > { %v2127_v19 = vsel %vm2125_vm8, %v2120_v13, %v11375_v16  ;;  %v2201_v20 = vmul.bf16 %v11289_v14, %v2126_v18  ;;  %1445 = vrot.lane.b32.xlu0 %v11120_v48, %s10689_s6 }
 0x197   : > { %v2202_v21 = vmul.bf16 %v11294_v15, %v2127_v19  ;;  %2143 = vrot.lane.b32.xlu1 %v11096_v30, %s10691_s28  ;;  %3408 = vmatpush1.bf16.msra.mxu0 %v1373_v51  ;;  %v1052_v15 = vld [vmem:[#allocation9 + $0x10] sm:$0x11] }
 0x198   : > { %v11387_v22 = vpop.permute.xlu0 %1301 }
 0x199   : > { %v8643_v24 = vcombine.low %v2201_v20, %v2202_v21  ;;  %v1306_v27 = vpop.permute.xlu1 %1305 }
 0x19a   : > { %1315 = vrot.lane.b32.xlu0 %v11118_v47, %s10692_s18  ;;  %v1331_v32 = vsel %vm1289_vm9, %v11387_v22, %v1306_v27 }
 0x19b   : > { %2225 = vst [vmem:[#allocation4 + $0x2a0] sm:$0x33] %v8643_v24  ;;  %2123 = vrot.lane.b32.xlu1 %v11126_v49, %s10691_s28  ;;  %v1369_v37 = vmul.bf16 %v11352_v63, %v1331_v32  ;;  %v1180_v32 = vpack.i.b16 %v11312_v25, %v11312_v25  ;;  %v11473_v25 = vrot.slane %v1187_v33, %v11335_v38 }
 0x19c   : > { %v11399_v34 = vpop.permute.xlu0 %1307 }
 0x19d   : > { %v11401_v35 = vpop.permute.xlu1 %1977  ;;  %v1317_v36 = vsel %vm1289_vm9, %v1306_v27, %v11399_v34  ;;  %14380 = vst [vmem:[#allocation43_spill] sm:$0xff] %v11473_v25 }
 0x19e   : > { %v1370_v58 = vmul.bf16 %v11357_v45, %v1317_v36  ;;  %1309 = vrot.lane.b32.xlu0 %v11144_v52, %s10692_s18 }
 0x19f   : > { %1983 = vrot.lane.b32.xlu1 %v11148_v53, %s10693_s15 }
 0x1a0   : > { %v1980_v42 = vpop.permute.xlu0 %1979  ;;  %3409 = vmatprep.subr.bf16.mxu0 %v1370_v58 }
 0x1a1   : > { %v11417_v44 = vpop.permute.xlu1 %1981  ;;  %v1988_v43 = vsel %vm1957_vm10, %v11401_v35, %v1980_v42  ;;  %3410 = vmatpush1.bf16.msra.mxu0 %v1369_v37 }
 0x1a2   : > { %v1989_v46 = vsel %vm1957_vm10, %v1980_v42, %v11417_v44  ;;  %v2051_v54 = vmul.bf16 %v11410_v40, %v1988_v43  ;;  %1287 = vrot.lane.b32.xlu0 %v11120_v48, %s10692_s18  ;;  %v9500_v55 = vld [vmem:[#allocation4 + $0x2a4] ss:$16 sps:$4 sm:$0xff]   ;;  %v9502_v62 = vld [vmem:[#allocation4 + $0x2a0] ss:$16 sps:$4 sm:$0xff]   ;;  %v11468_v42 = vrot.slane %v1180_v32, %v11335_v38 }
 0x1a3   : > { %v2052_v0 = vmul.bf16 %v11415_v59, %v1989_v46  ;;  %1975 = vrot.lane.b32.xlu1 %v11096_v30, %s10693_s15  ;;  %3520 = vmatprep.subr.bf16.mxu1 %v9500_v55  ;;  %v1048_v43 = vld [vmem:[#allocation9] sm:$0x44] }
 0x1a4   : > { %v11429_v7 = vpop.permute.xlu0 %1281  ;;  %3521 = vmatpush1.bf16.msra.mxu1 %v9502_v62  ;;  %14379 = vst [vmem:[#allocation42_spill] sm:$0xff] %v11468_v42 }
 0x1a5   : > { %v1284_v8 = vpop.permute.xlu1 %1283  ;;  %3522 = vmatprep.subr.bf16.mxu1 %v2052_v0 }
 0x1a6   : > { %1147 = vrot.lane.b32.xlu0 %v11118_v47, %s10694_s13  ;;  %v1299_v10 = vsel %vm1289_vm9, %v11429_v7, %v1284_v8 }
 0x1a7   : > { %1955 = vrot.lane.b32.xlu1 %v11126_v49, %s10693_s15  ;;  %v1365_v13 = vmul.bf16 %v11352_v63, %v1299_v10 }
 0x1a8   : > { %v11437_v51 = vpop.permute.xlu0 %1285  ;;  %3523 = vmatpush1.bf16.msra.mxu1 %v2051_v54 }
 0x1a9   : > { %v11439_v11 = vpop.permute.xlu1 %1969  ;;  %v1290_v12 = vsel %vm1289_vm9, %v1284_v8, %v11437_v51  ;;  %v8615_v8 = vcombine.low %v1048_v43, %v1048_v43 }
 0x1aa   : > { %v1366_v18 = vmul.bf16 %v11357_v45, %v1290_v12  ;;  %1141 = vrot.lane.b32.xlu0 %v11144_v52, %s10694_s13  ;;  %v9531_v45 = vld [vmem:[#allocation4 + $0x1a4] ss:$16 sps:$4 sm:$0xff]  }
 0x1ab   : > { %1811 = vrot.lane.b32.xlu1 %v11148_v53, %s10695_s17 }
 0x1ac   : > { %v8579_v19 = vcombine.low %v1365_v13, %v1366_v18  ;;  %v1972_v20 = vpop.permute.xlu0 %1971  ;;  %v8616_v13 = vcombine.high %v1048_v43, %v1048_v43 }
 0x1ad   : > { %v11449_v21 = vpop.permute.xlu1 %1973  ;;  %v1985_v24 = vsel %vm1957_vm10, %v11439_v11, %v1972_v20 }
 0x1ae   : > { %1389 = vst [vmem:[#allocation4 + $0x60] sm:$0x33] %v8579_v19  ;;  %v1986_v27 = vsel %vm1957_vm10, %v1972_v20, %v11449_v21  ;;  %v2047_v31 = vmul.bf16 %v11410_v40, %v1985_v24  ;;  %1087 = vrot.lane.b32.xlu0 %v11120_v48, %s10694_s13  ;;  %v1844_v24 = vshrl.u32 %v8615_v8, 16 }
 0x1af   : > { %v2048_v36 = vmul.bf16 %v11415_v59, %v1986_v27  ;;  %1803 = vrot.lane.b32.xlu1 %v11096_v30, %s10695_s17 }
 0x1b0   : > { %v11465_v37 = vpop.permute.xlu0 %1113  ;;  %v1845_v43 = vpack.i.b16 %v1844_v24, %v1844_v24 }
 0x1b1   : > { %v1144_v58 = vpop.permute.xlu1 %1143  ;;  %3524 = vmatprep.subr.bf16.mxu1 %v2048_v36 }
 0x1b2   : > { %1783 = vrot.lane.b32.xlu0 %v11126_v49, %s10695_s17  ;;  %v1167_v26 = vsel %vm1089_vm11, %v11465_v37, %v1144_v58  ;;  %3525 = vmatpush1.bf16.msra.mxu1 %v2047_v31 }
 0x1b3   : > { %1641 = vrot.lane.b32.xlu1 %v11118_v47, %s10696_s20  ;;  %v1215_v10 = vmul.bf16 %v11468_v42, %v1167_v26 }
 0x1b4   : > { %v11479_v46 = vpop.permute.xlu0 %1145 }
 0x1b5   : > { %v11481_v54 = vpop.permute.xlu1 %1949  ;;  %v1152_v55 = vsel %vm1089_vm11, %v1144_v58, %v11479_v46  ;;  %v9503_v62 = vld [vmem:[#allocation4 + $0x64] ss:$16 sps:$4 sm:$0xff]   ;;  %v9505_v0 = vld [vmem:[#allocation4 + $0x60] ss:$16 sps:$4 sm:$0xff]   ;;  %v11508_v58 = vsub.s32 2, %v11105_v41 }
 0x1b6   : > { %v1216_v12 = vmul.bf16 %v11473_v25, %v1152_v55  ;;  %1635 = vrot.lane.b32.xlu0 %v11144_v52, %s10696_s20  ;;  %3411 = vmatprep.subr.bf16.mxu0 %v9503_v62 }
 0x1b7   : > { %2309 = vrot.lane.b32.xlu1 %v11148_v53, %s10697_s25  ;;  %3412 = vmatpush1.bf16.msra.mxu0 %v9505_v0  ;;  %v1852_v53 = vshrl.u32 %v8616_v13, 16  ;;  %v11523_v0 = vrot.slane %v1845_v43, %v11508_v58 }
 0x1b8   : > { %v1952_v18 = vpop.permute.xlu0 %1951  ;;  %3413 = vmatprep.subr.bf16.mxu0 %v1216_v12 }
 0x1b9   : > { %v11491_v19 = vpop.permute.xlu1 %1953  ;;  %v1958_v20 = vsel %vm1957_vm10, %v11481_v54, %v1952_v18  ;;  %14383 = vst [vmem:[#allocation46_spill] sm:$0xff] %v11523_v0 }
 0x1ba   : > { %v1959_v27 = vsel %vm1957_vm10, %v1952_v18, %v11491_v19  ;;  %v2043_v32 = vmul.bf16 %v11410_v40, %v1958_v20  ;;  %1613 = vrot.lane.b32.xlu0 %v11120_v48, %s10696_s20 }
 0x1bb   : > { %v2044_v52 = vmul.bf16 %v11415_v59, %v1959_v27  ;;  %2301 = vrot.lane.b32.xlu1 %v11096_v30, %s10697_s25  ;;  %3414 = vmatpush1.bf16.msra.mxu0 %v1215_v10  ;;  %v1853_v30 = vpack.i.b16 %v1852_v53, %v1852_v53 }
 0x1bc   : > { %v11503_v31 = vpop.permute.xlu0 %1111 }
 0x1bd   : > { %14381 = vst [vmem:[#allocation44_spill] sm:$0xff] %v11503_v31  ;;  %v8633_v33 = vcombine.low %v2043_v32, %v2044_v52  ;;  %v1138_v36 = vpop.permute.xlu1 %1137  ;;  %v11526_v8 = vrot.slane %v1853_v30, %v11508_v58 }
 0x1be   : > { %1473 = vrot.lane.b32.xlu0 %v11118_v47, %s10689_s6  ;;  %v1163_v48 = vsel %vm1089_vm11, %v11503_v31, %v1138_v36 }
 0x1bf   : > { %2067 = vst [vmem:[#allocation4 + $0x240] sm:$0x33] %v8633_v33  ;;  %2281 = vrot.lane.b32.xlu1 %v11126_v49, %s10697_s25  ;;  %v1211_v47 = vmul.bf16 %v11468_v42, %v1163_v48  ;;  %14384 = vst [vmem:[#allocation47_spill] sm:$0xff] %v11526_v8 }
 0x1c0   : > { %v11514_v26 = vpop.permute.xlu0 %1139 }
 0x1c1   : > { %v11516_v55 = vpop.permute.xlu1 %1805  ;;  %v1149_v62 = vsel %vm1089_vm11, %v1138_v36, %v11514_v26 }
 0x1c2   : > { %14382 = vst [vmem:[#allocation45_spill] sm:$0xff] %v11516_v55  ;;  %v1212_v41 = vmul.bf16 %v11473_v25, %v1149_v62 }
 0x1c4   : > { %v1808_v49 = vpop.permute.xlu0 %1807  ;;  %3415 = vmatprep.subr.bf16.mxu0 %v1212_v41 }
 0x1c5   : > { %v11528_v10 = vpop.permute.xlu1 %1809  ;;  %v1816_v12 = vsel %vm1785_vm12, %v11516_v55, %v1808_v49  ;;  %3416 = vmatpush1.bf16.msra.mxu0 %v1211_v47 }
 0x1c6   : > { %14385 = vst [vmem:[#allocation48_spill] sm:$0xff] %v11528_v10  ;;  %v1817_v13 = vsel %vm1785_vm12, %v1808_v49, %v11528_v10  ;;  %v1883_v18 = vmul.bf16 %v11523_v0, %v1816_v12  ;;  %v9508_v20 = vld [vmem:[#allocation4 + $0x244] ss:$16 sps:$4 sm:$0xff]   ;;  %v9510_v24 = vld [vmem:[#allocation4 + $0x240] ss:$16 sps:$4 sm:$0xff]  }
 0x1c7   : > { %v1884_v27 = vmul.bf16 %v11526_v8, %v1817_v13  ;;  %3526 = vmatprep.subr.bf16.mxu1 %v9508_v20  ;;  %v1663_v20 = vshrl.u32 %v11238_v56, 16 }
 0x1c8   : > { %v11536_v32 = vpop.permute.xlu0 %1080  ;;  %3527 = vmatpush1.bf16.msra.mxu1 %v9510_v24 }
 0x1c9   : > { %14386 = vst [vmem:[#allocation49_spill] sm:$0xff] %v11536_v32  ;;  %v1084_v52 = vpop.permute.xlu1 %1083  ;;  %3528 = vmatprep.subr.bf16.mxu1 %v1884_v27  ;;  %v1670_v27 = vshrl.u32 %v11240_v57, 16 }
 0x1ca   : > { %v1099_v53 = vsel %vm1089_vm11, %v11536_v32, %v1084_v52 }
 0x1cb   : > { %v1207_v48 = vmul.bf16 %v11468_v42, %v1099_v53  ;;  %v1664_v53 = vpack.i.b16 %v1663_v20, %v1663_v20  ;;  %v9530_v42 = vld [vmem:[#allocation4 + $0x3a0] ss:$16 sps:$4 sm:$0xff]  }
 0x1cc   : > { %v11540_v33 = vpop.permute.xlu0 %1085  ;;  %3529 = vmatpush1.bf16.msra.mxu1 %v1883_v18 }
 0x1cd   : > { %14387 = vst [vmem:[#allocation50_spill] sm:$0xff] %v11540_v33  ;;  %v11542_v36 = vpop.permute.xlu1 %1797  ;;  %v1090_v43 = vsel %vm1089_vm11, %v1084_v52, %v11540_v33  ;;  %v11571_v20 = vrot.slane %v1664_v53, %v11251_v60 }
 0x1ce   : > { %14388 = vst [vmem:[#allocation51_spill] sm:$0xff] %v11542_v36  ;;  %v1208_v30 = vmul.bf16 %v11473_v25, %v1090_v43 }
 0x1d0   : > { %v8569_v62 = vcombine.low %v1207_v48, %v1208_v30  ;;  %v1800_v41 = vpop.permute.xlu0 %1799  ;;  %v1671_v48 = vpack.i.b16 %v1670_v27, %v1670_v27  ;;  %v9514_v30 = vld [vmem:[#allocation4 + $0x3e4] ss:$16 sps:$4 sm:$0xff]   ;;  %v9516_v27 = vld [vmem:[#allocation4 + $0x3e0] ss:$16 sps:$4 sm:$0xff]  }
 0x1d1   : > { %v11548_v49 = vpop.permute.xlu1 %1801  ;;  %v1813_v47 = vsel %vm1785_vm12, %v11542_v36, %v1800_v41 }
 0x1d2   : > { %14389 = vst [vmem:[#allocation52_spill] sm:$0xff] %v11548_v49  ;;  %1231 = vst [vmem:[#allocation4] sm:$0x33] %v8569_v62  ;;  %v1814_v12 = vsel %vm1785_vm12, %v1800_v41, %v11548_v49  ;;  %v1879_v13 = vmul.bf16 %v11523_v0, %v1813_v47  ;;  %v11574_v40 = vrot.slane %v1671_v48, %v11251_v60 }
 0x1d3   : > { %v1880_v24 = vmul.bf16 %v11526_v8, %v1814_v12  ;;  %v8653_v48 = vcombine.low %v1052_v15, %v1052_v15 }
 0x1d4   : > { %v11558_v18 = vpop.permute.xlu0 %1777  ;;  %14393 = vst [vmem:[#allocation56_spill] sm:$0xff] %v11574_v40 }
 0x1d5   : > { %14390 = vst [vmem:[#allocation53_spill] sm:$0xff] %v11558_v18  ;;  %v1780_v52 = vpop.permute.xlu1 %1779  ;;  %3530 = vmatprep.subr.bf16.mxu1 %v1880_v24 }
 0x1d6   : > { %v1786_v43 = vsel %vm1785_vm12, %v11558_v18, %v1780_v52  ;;  %3531 = vmatpush1.bf16.msra.mxu1 %v1879_v13  ;;  %v9537_v18 = vld [vmem:[#allocation4 + $0x184] ss:$16 sps:$4 sm:$0xff]  }
 0x1d7   : > { %v1875_v57 = vmul.bf16 %v11523_v0, %v1786_v43  ;;  %3532 = vmatprep.subr.bf16.mxu1 %v9514_v30  ;;  %v9524_v30 = vld [vmem:[#allocation4 + $0x3c0] ss:$16 sps:$4 sm:$0xff]   ;;  %v9525_v0 = vld [vmem:[#allocation4 + $0x1c4] ss:$16 sps:$4 sm:$0xff]  }
 0x1d8   : > { %v11562_v62 = vpop.permute.xlu0 %1781 }
 0x1d9   : > { %14391 = vst [vmem:[#allocation54_spill] sm:$0xff] %v11562_v62  ;;  %v11564_v41 = vpop.permute.xlu1 %1629  ;;  %v1787_v56 = vsel %vm1785_vm12, %v1780_v52, %v11562_v62  ;;  %v9511_v47 = vld [vmem:[#allocation4 + $0x4] ss:$16 sps:$4 sm:$0xff]   ;;  %v9513_v12 = vld [vmem:[#allocation4] ss:$16 sps:$4 sm:$0xff]  }
 0x1da   : > { %14392 = vst [vmem:[#allocation55_spill] sm:$0xff] %v11564_v41  ;;  %v1876_v59 = vmul.bf16 %v11526_v8, %v1787_v56  ;;  %3417 = vmatprep.subr.bf16.mxu0 %v9511_v47  ;;  %v9521_v52 = vld [vmem:[#allocation4 + $0x3c4] ss:$16 sps:$4 sm:$0xff]   ;;  %3533 = vmatpush2.bf16.msra.mxu1 %v9516_v27  ;;  %v8654_v56 = vcombine.high %v1052_v15, %v1052_v15 }
 0x1db   : > { %3418 = vmatpush1.bf16.msra.mxu0 %v9513_v12  ;;  %3534 = vmatprep.subr.bf16.mxu1 %v9521_v52  ;;  %v9527_v47 = vld [vmem:[#allocation4 + $0x3a4] ss:$16 sps:$4 sm:$0xff]  }
 0x1dc   : > { %v8619_v14 = vcombine.low %v1875_v57, %v1876_v59  ;;  %v1638_v25 = vpop.permute.xlu0 %1637  ;;  %v2349_v53 = vpack.i.b16 %v8654_v56, %v8654_v56  ;;  %v9533_v27 = vld [vmem:[#allocation4 + $0x384] ss:$16 sps:$4 sm:$0xff]  }
 0x1dd   : > { %v11576_v24 = vpop.permute.xlu1 %1639  ;;  %v11580_v43 = vsel %vm1615_vm13, %v11564_v41, %v1638_v25 }
 0x1de   : > { %14394 = vst [vmem:[#allocation57_spill] sm:$0xff] %v11576_v24  ;;  %1899 = vst [vmem:[#allocation4 + $0x1e0] sm:$0x33] %v8619_v14  ;;  %v11584_v13 = vsel %vm1615_vm13, %v1638_v25, %v11576_v24  ;;  %v2342_v14 = vpack.i.b16 %v8653_v48, %v8653_v48  ;;  %3535 = vmatpush2.bf16.msra.mxu1 %v9524_v30  ;;  %v11612_v63 = vrot.slane %v2349_v53, %v11335_v38  ;;  %v9542_v53 = vld [vmem:[#allocation4 + $0x360] ss:$16 sps:$4 sm:$0xff]  }
 0x1df   : > { %3536 = vmatprep.subr.bf16.mxu1 %v9527_v47  ;;  %v9536_v47 = vld [vmem:[#allocation4 + $0x380] ss:$16 sps:$4 sm:$0xff]  }
 0x1e0   : > { %v11590_v12 = vpop.permute.xlu0 %1627  ;;  %v11609_v56 = vrot.slane %v2342_v14, %v11335_v38  ;;  %14399 = vst [vmem:[#allocation62_spill] sm:$0xff] %v11612_v63 }
 0x1e1   : > { %14395 = vst [vmem:[#allocation58_spill] sm:$0xff] %v11590_v12  ;;  %v1632_v57 = vpop.permute.xlu1 %1631 }
 0x1e2   : > { %v11594_v25 = vsel %vm1615_vm13, %v11590_v12, %v1632_v57  ;;  %14398 = vst [vmem:[#allocation61_spill] sm:$0xff] %v11609_v56  ;;  %3537 = vmatpush2.bf16.msra.mxu1 %v9530_v42 }
 0x1e3   : > { %3538 = vmatprep.subr.bf16.mxu1 %v9533_v27 }
 0x1e4   : > { %v11596_v8 = vpop.permute.xlu0 %1633 }
 0x1e5   : > { %14396 = vst [vmem:[#allocation59_spill] sm:$0xff] %v11596_v8  ;;  %v11598_v59 = vpop.permute.xlu1 %2303  ;;  %v11602_v15 = vsel %vm1615_vm13, %v1632_v57, %v11596_v8  ;;  %v9519_v52 = vld [vmem:[#allocation4 + $0x1e4] ss:$16 sps:$4 sm:$0xff]   ;;  %v9523_v48 = vld [vmem:[#allocation4 + $0x1e0] ss:$16 sps:$4 sm:$0xff]  }
 0x1e6   : > { %14397 = vst [vmem:[#allocation60_spill] sm:$0xff] %v11598_v59  ;;  %3419 = vmatprep.subr.bf16.mxu0 %v9519_v52  ;;  %v9539_v57 = vld [vmem:[#allocation4 + $0x364] ss:$16 sps:$4 sm:$0xff]   ;;  %v9529_v8 = vld [vmem:[#allocation4 + $0x1c0] ss:$16 sps:$4 sm:$0xff]   ;;  %3539 = vmatpush2.bf16.msra.mxu1 %v9536_v47 }
 0x1e7   : > { %3420 = vmatpush2.bf16.msra.mxu0 %v9523_v48  ;;  %3540 = vmatprep.subr.bf16.mxu1 %v9539_v57  ;;  %v9535_v48 = vld [vmem:[#allocation4 + $0x1a0] ss:$16 sps:$4 sm:$0xff]  }
 0x1e8   : > { %v2306_v12 = vpop.permute.xlu0 %2305  ;;  %3421 = vmatprep.subr.bf16.mxu0 %v9525_v0 }
 0x1e9   : > { %v11614_v41 = vpop.permute.xlu1 %2307  ;;  %v2314_v30 = vsel %vm2283_vm14, %v11598_v59, %v2306_v12  ;;  %v1051_v59 = vld [vmem:[#allocation9 + $0x8] sm:$0x88] }
 0x1ea   : > { %14400 = vst [vmem:[#allocation63_spill] sm:$0xff] %v11614_v41  ;;  %v2315_v42 = vsel %vm2283_vm14, %v2306_v12, %v11614_v41  ;;  %v2377_v14 = vmul.bf16 %v11609_v56, %v2314_v30  ;;  %3541 = vmatpush2.bf16.msra.mxu1 %v9542_v53  ;;  %v9541_v30 = vld [vmem:[#allocation4 + $0x180] ss:$16 sps:$4 sm:$0xff]   ;;  %v11628_v47 = vcombine.low %v1051_v59, %v1051_v59  ;;  %v1045_v41 = vld [vmem:[#allocation9 + $0x8] sm:$0x11] }
 0x1eb   : > { %v2378_v27 = vmul.bf16 %v11612_v63, %v2315_v42  ;;  %3422 = vmatpush2.bf16.msra.mxu0 %v9529_v8  ;;  %v11630_v42 = vcombine.high %v1051_v59, %v1051_v59 }
 0x1ec   : > { %v11622_v52 = vpop.permute.xlu0 %1607  ;;  %3423 = vmatprep.subr.bf16.mxu0 %v9531_v45  ;;  %v2187_v59 = vshrl.u32 %v11628_v47, 16 }
 0x1ed   : > { %14401 = vst [vmem:[#allocation64_spill] sm:$0xff] %v11622_v52  ;;  %v1610_v24 = vpop.permute.xlu1 %1609  ;;  %3542 = vmatprep.subr.bf16.mxu1 %v2378_v27  ;;  %v2194_v36 = vshrl.u32 %v11630_v42, 16 }
 0x1ee   : > { %v1625_v0 = vsel %vm1615_vm13, %v11622_v52, %v1610_v24  ;;  %3543 = vmatpush2.bf16.msra.mxu1 %v2377_v14  ;;  %v1047_v52 = vld [vmem:[#allocation9 + $0x8] sm:$0x22]  ;;  %v8567_v14 = vcombine.low %v1045_v41, %v1045_v41 }
 0x1ef   : > { %3424 = vmatpush2.bf16.msra.mxu0 %v9535_v48  ;;  %v1691_v45 = vmul.bf16 %v11571_v20, %v1625_v0  ;;  %v11647_v27 = vcombine.low %v1047_v52, %v1047_v52  ;;  %v11649_v0 = vcombine.high %v1045_v41, %v1045_v41 }
 0x1f0   : > { %v11626_v12 = vpop.permute.xlu0 %1611  ;;  %3425 = vmatprep.subr.bf16.mxu0 %v9537_v18 }
 0x1f1   : > { %14402 = vst [vmem:[#allocation65_spill] sm:$0xff] %v11626_v12  ;;  %v11632_v57 = vpop.permute.xlu1 %2295  ;;  %v1616_v8 = vsel %vm1615_vm13, %v1610_v24, %v11626_v12  ;;  %v14405_v24 = vmul.bf16 %v11574_v40, %v11584_v13  ;;  %v14407_v13 = vmul.bf16 %v11571_v20, %v11580_v43  ;;  %v1049_v12 = vld [vmem:[#allocation9 + $0x8] sm:$0x44] }
 0x1f2   : > { %14403 = vst [vmem:[#allocation66_spill] sm:$0xff] %v11632_v57  ;;  %v1692_v53 = vmul.bf16 %v11574_v40, %v1616_v8 }
 0x1f3   : > { %3426 = vmatpush2.bf16.msra.mxu0 %v9541_v30 }
 0x1f4   : > { %v8603_v48 = vcombine.low %v1691_v45, %v1692_v53  ;;  %v2298_v62 = vpop.permute.xlu0 %2297  ;;  %3427 = vmatprep.subr.bf16.mxu0 %v14405_v24  ;;  %v11654_v45 = vcombine.high %v1047_v52, %v1047_v52  ;;  %v2188_v24 = vpack.i.b16 %v2187_v59, %v2187_v59  ;;  %v2195_v52 = vpack.i.b16 %v2194_v36, %v2194_v36 }
 0x1f5   : > { %v11640_v49 = vpop.permute.xlu1 %2299  ;;  %v2311_v18 = vsel %vm2283_vm14, %v11632_v57, %v2298_v62  ;;  %v8617_v59 = vcombine.low %v1049_v12, %v1049_v12 }
 0x1f6   : > { %14404 = vst [vmem:[#allocation67_spill] sm:$0xff] %v11640_v49  ;;  %1715 = vst [vmem:[#allocation4 + $0x120] sm:$0x33] %v8603_v48  ;;  %v2312_v30 = vsel %vm2283_vm14, %v2298_v62, %v11640_v49  ;;  %v2373_v8 = vmul.bf16 %v11609_v56, %v2311_v18  ;;  %v14408_v48 = vmul.bf16 %v11574_v40, %v11602_v15  ;;  %v1351_v62 = vshrl.u32 %v8567_v14, 16 }
 0x1f7   : > { %v2374_v53 = vmul.bf16 %v11612_v63, %v2312_v30  ;;  %3428 = vmatpush2.bf16.msra.mxu0 %v14407_v13  ;;  %v1358_v18 = vshrl.u32 %v11649_v0, 16  ;;  %v1520_v30 = vpack.i.b16 %v11647_v27, %v11647_v27  ;;  %v1527_v49 = vpack.i.b16 %v11654_v45, %v11654_v45 }
 0x1f8   : > { %v11657_v57 = vpop.permute.xlu0 %1461  ;;  %3429 = vmatprep.subr.bf16.mxu0 %v14408_v48  ;;  %v14409_v15 = vmul.bf16 %v11571_v20, %v11594_v25  ;;  %v11682_v33 = vrot.slane %v2188_v24, %v11274_v5  ;;  %v1352_v55 = vpack.i.b16 %v1351_v62, %v1351_v62  ;;  %v11687_v25 = vrot.slane %v2195_v52, %v11274_v5 }
 0x1f9   : > { %14406 = vst [vmem:[#allocation68_spill] sm:$0xff] %v11657_v57  ;;  %v1470_v41 = vpop.permute.xlu1 %1469  ;;  %3544 = vmatprep.subr.bf16.mxu1 %v2374_v53  ;;  %v2030_v53 = vpack.i.b16 %v11628_v47, %v11628_v47  ;;  %v8618_v24 = vcombine.high %v1049_v12, %v1049_v12  ;;  %v1860_v62 = vshrl.u32 %v8617_v59, 16  ;;  %v1194_v52 = vpack.i.b16 %v8567_v14, %v8567_v14 }
 0x1fa   : > { %v1493_v43 = vsel %vm1447_vm7, %v11657_v57, %v1470_v41  ;;  %14410 = vst [vmem:[#allocation69_spill] sm:$0xff] %v11682_v33  ;;  %v1359_v57 = vpack.i.b16 %v1358_v18, %v1358_v18  ;;  %14411 = vst [vmem:[#allocation70_spill] sm:$0xff] %v11687_v25  ;;  %3545 = vmatpush2.bf16.msra.mxu1 %v2373_v8  ;;  %v1201_v12 = vpack.i.b16 %v11649_v0, %v11649_v0 }
 0x1fb   : > { %3430 = vmatpush2.bf16.msra.mxu0 %v14409_v15  ;;  %v1541_v10 = vmul.bf16 %v11268_v3, %v1493_v43  ;;  %v11690_v15 = vrot.slane %v1520_v30, %v11251_v60  ;;  %v2037_v43 = vpack.i.b16 %v11630_v42, %v11630_v42  ;;  %v11716_v14 = vrot.slane %v2030_v53, %v11274_v5 }
 0x1fc   : > { %v11672_v13 = vpop.permute.xlu0 %1471  ;;  %v1861_v30 = vpack.i.b16 %v1860_v62, %v1860_v62  ;;  %v1868_v59 = vshrl.u32 %v8618_v24, 16  ;;  %v11724_v0 = vrot.slane %v1194_v52, %v11335_v38  ;;  %v11732_v24 = vld [vmem:[#allocation11 + $0x24] ss:$16 sps:$4 sm:$0xff]  }
 0x1fd   : > { %v11677_v48 = vpop.permute.xlu1 %2275  ;;  %v1478_v36 = vsel %vm1447_vm7, %v1470_v41, %v11672_v13  ;;  %v9543_v40 = vld [vmem:[#allocation4 + $0x124] ss:$16 sps:$4 sm:$0xff]   ;;  %v9545_v32 = vld [vmem:[#allocation4 + $0x120] ss:$16 sps:$4 sm:$0xff]   ;;  %14412 = vst [vmem:[#allocation71_spill] sm:$0xff] %v11690_v15  ;;  %v11693_v41 = vrot.slane %v1527_v49, %v11251_v60  ;;  %v11707_v49 = vrot.slane %v1359_v57, %v11335_v38  ;;  %14416 = vst [vmem:[#allocation75_spill] sm:$0xff] %v11716_v14 }
 0x1fe   : > { %v1542_v31 = vmul.bf16 %v11271_v4, %v1478_v36  ;;  %3431 = vmatprep.subr.bf16.mxu0 %v9543_v40  ;;  %v11704_v40 = vrot.slane %v1352_v55, %v11335_v38  ;;  %v11718_v4 = vld [vmem:[#allocation11] ss:$16 sps:$4 sm:$0xff]   ;;  %v11721_v57 = vrot.slane %v2037_v43, %v11274_v5  ;;  %14418 = vst [vmem:[#allocation77_spill] sm:$0xff] %v11724_v0 }
 0x1ff   : > { %14413 = vst [vmem:[#allocation72_spill] sm:$0xff] %v11693_v41  ;;  %3432 = vmatpush2.bf16.msra.mxu0 %v9545_v32  ;;  %14415 = vst [vmem:[#allocation74_spill] sm:$0xff] %v11707_v49  ;;  %v11735_v5 = vrot.slane %v1201_v12, %v11335_v38  ;;  %v11749_v43 = vrot.slane %v1861_v30, %v11508_v58  ;;  %v1869_v52 = vpack.i.b16 %v1868_v59, %v1868_v59 }
 0x200   : > { %v2278_v18 = vpop.permute.xlu0 %2277  ;;  %14414 = vst [vmem:[#allocation73_spill] sm:$0xff] %v11704_v40  ;;  %3433 = vmatprep.subr.bf16.mxu0 %v1542_v31  ;;  %14417 = vst [vmem:[#allocation76_spill] sm:$0xff] %v11721_v57 }
 0x201   : > { %v11699_v36 = vpop.permute.xlu1 %2279  ;;  %v2284_v8 = vsel %vm2283_vm14, %v11677_v48, %v2278_v18  ;;  %14419 = vst [vmem:[#allocation78_spill] sm:$0xff] %v11735_v5  ;;  %14420 = vst [vmem:[#allocation79_spill] sm:$0xff] %v11749_v43 }
 0x202   : > { %v2285_v32 = vsel %vm2283_vm14, %v2278_v18, %v11699_v36  ;;  %v2369_v47 = vmul.bf16 %v11609_v56, %v2284_v8  ;;  %v1677_v18 = vshrl.u32 %v11647_v27, 16  ;;  %v1684_v8 = vshrl.u32 %v11654_v45, 16 }
 0x203   : > { %v2370_v42 = vmul.bf16 %v11612_v63, %v2285_v32  ;;  %3434 = vmatpush2.bf16.msra.mxu0 %v1541_v10 }
 0x204   : > { %v1468_v55 = vpop.permute.xlu0 %1467 }
 0x205   : > { %v8657_v32 = vcombine.low %v2369_v47, %v2370_v42  ;;  %v2152_v63 = vpop.permute.xlu1 %2151  ;;  %v1476_v53 = vsel %vm1447_vm7, %v11263_v2, %v1468_v55  ;;  %v1477_v31 = vsel %vm1447_vm7, %v1468_v55, %v11261_v1  ;;  %v1685_v47 = vpack.i.b16 %v1684_v8, %v1684_v8  ;;  %v1053_v55 = vld [vmem:[#allocation9 + $0x18] sm:$0x11] }
 0x206   : > { %v11739_v62 = vsel %vm2125_vm8, %v11296_v17, %v2152_v63  ;;  %v2171_v27 = vsel %vm2125_vm8, %v2152_v63, %v11278_v9  ;;  %v1539_v45 = vmul.bf16 %v11690_v15, %v1476_v53  ;;  %v1540_v2 = vmul.bf16 %v11693_v41, %v1477_v31  ;;  %3436 = vmatmul.mubr.bf16.vlgmr.msra.gmra.mxu0 %v11718_v4  ;;  %v11768_v31 = vld [vmem:[#allocation11 + $0x20] ss:$16 sps:$4 sm:$0xff]  }
 0x207   : > { %2393 = vst [vmem:[#allocation4 + $0x300] sm:$0x33] %v8657_v32  ;;  %v2211_v1 = vmul.bf16 %v11682_v33, %v11739_v62  ;;  %v2212_v10 = vmul.bf16 %v11687_v25, %v2171_v27  ;;  %v1678_v17 = vpack.i.b16 %v1677_v18, %v1677_v18  ;;  %3445 = vmatprep.mubr.bf16.mxu0 %v11732_v24 }
 0x208   : > { %v1446_v12 = vpop.permute.xlu0 %1445  ;;  %v11771_v27 = vrot.slane %v1869_v52, %v11508_v58  ;;  %3629 = vmatprep.subr.bf16.mxu0 %v1540_v2 }
 0x209   : > { %v2144_v9 = vpop.permute.xlu1 %2143  ;;  %v1449_v63 = vsel %vm1447_vm7, %v11320_v28, %v1446_v12  ;;  %v1450_v42 = vsel %vm1447_vm7, %v1446_v12, %v11308_v23  ;;  %v11775_v12 = vcombine.high %v1053_v55, %v1053_v55  ;;  %3630 = vmatpush1.bf16.msra.mxu0 %v1539_v45 }
 0x20a   : > { %v11759_v30 = vsel %vm2125_vm8, %v11337_v39, %v2144_v9  ;;  %v2167_v59 = vsel %vm2125_vm8, %v2144_v9, %v11322_v29  ;;  %v1535_v18 = vmul.bf16 %v11690_v15, %v1449_v63  ;;  %v1536_v8 = vmul.bf16 %v11693_v41, %v1450_v42  ;;  %14421 = vst [vmem:[#allocation80_spill] sm:$0xff] %v11771_v27  ;;  %v11785_v42 = vld [vmem:[#allocation11 + $0x44] ss:$16 sps:$4 sm:$0xff]  }
 0x20b   : > { %v2207_v28 = vmul.bf16 %v11682_v33, %v11759_v30  ;;  %v2208_v32 = vmul.bf16 %v11687_v25, %v2167_v59  ;;  %v11773_v39 = vcombine.low %v1053_v55, %v1053_v55 }
 0x20c   : > { %v8594_v23 = vcombine.low %v1535_v18, %v1536_v8  ;;  %v1316_v53 = vpop.permute.xlu0 %1315  ;;  %v11798_v8 = vrot.slane %v1678_v17, %v11251_v60 }
 0x20d   : > { %v2124_v29 = vpop.permute.xlu1 %2123  ;;  %v11779_v9 = vsel %vm1289_vm9, %v11363_v50, %v1316_v53  ;;  %v11783_v63 = vsel %vm1289_vm9, %v1316_v53, %v11349_v61 }
 0x20e   : > { %1558 = vst [vmem:[#allocation4 + $0xc8] sm:$0x33] %v8594_v23  ;;  %v2128_v58 = vsel %vm2125_vm8, %v11375_v16, %v2124_v29  ;;  %v2135_v52 = vsel %vm2125_vm8, %v2124_v29, %v11365_v6  ;;  %v1375_v55 = vmul.bf16 %v11704_v40, %v11779_v9  ;;  %v1376_v50 = vmul.bf16 %v11707_v49, %v11783_v63  ;;  %v9555_v59 = vld [vmem:[#allocation4 + $0x304] ss:$16 sps:$4 sm:$0xff]   ;;  %v9557_v18 = vld [vmem:[#allocation4 + $0x300] ss:$16 sps:$4 sm:$0xff]  }
 0x20f   : > { %v2203_v61 = vmul.bf16 %v11682_v33, %v2128_v58  ;;  %v2204_v2 = vmul.bf16 %v11687_v25, %v2135_v52  ;;  %14422 = vst [vmem:[#allocation81_spill] sm:$0xff] %v11798_v8  ;;  %v11801_v16 = vrot.slane %v1685_v47, %v11251_v60  ;;  %3546 = vmatprep.subr.bf16.mxu1 %v9555_v59  ;;  %v11803_v23 = vld [vmem:[#allocation11 + $0x8] ss:$16 sps:$4 sm:$0xff]  }
 0x210   : > { %v1310_v6 = vpop.permute.xlu0 %1309  ;;  %3446 = vmatmul.mubr.bf16.gmra.mxu0 %v11768_v31  ;;  %3547 = vmatpush2.bf16.msra.mxu1 %v9557_v18  ;;  %v2363_v59 = vpack.i.b16 %v11775_v12, %v11775_v12  ;;  %v14470_v33 = vld [vmem:[#allocation46_spill] sm:$0xff] }
 0x211   : > { %14423 = vst [vmem:[#allocation82_spill] sm:$0xff] %v11801_v16  ;;  %v8644_v53 = vcombine.low %v2203_v61, %v2204_v2  ;;  %v1984_v29 = vpop.permute.xlu1 %1983  ;;  %v11808_v45 = vsel %vm1289_vm9, %v11399_v34, %v1310_v6  ;;  %v11812_v63 = vsel %vm1289_vm9, %v1310_v6, %v11387_v22  ;;  %3455 = vmatprep.mubr.bf16.mxu0 %v11785_v42 }
 0x212   : > { %v11817_v60 = vsel %vm1957_vm10, %v11417_v44, %v1984_v29  ;;  %v11821_v17 = vsel %vm1957_vm10, %v1984_v29, %v11401_v35  ;;  %v1371_v47 = vmul.bf16 %v11704_v40, %v11808_v45  ;;  %v1372_v34 = vmul.bf16 %v11707_v49, %v11812_v63  ;;  %3742 = vmatprep.subr.bf16.mxu1 %v2212_v10  ;;  %v11831_v44 = vld [vmem:[#allocation11 + $0x2c] ss:$16 sps:$4 sm:$0xff]  }
 0x213   : > { %2226 = vst [vmem:[#allocation4 + $0x2a8] sm:$0x33] %v8644_v53  ;;  %v2053_v22 = vmul.bf16 %v11716_v14, %v11817_v60  ;;  %v2054_v58 = vmul.bf16 %v11721_v57, %v11821_v17  ;;  %v2356_v35 = vpack.i.b16 %v11773_v39, %v11773_v39  ;;  %3549 = vmatmul.mubr.bf16.vlgmr.msra.gmra.mxu1 %v11803_v23  ;;  %v11961_v60 = vld [vmem:[#allocation11 + $0x84] ss:$16 sps:$4 sm:$0xff]  }
 0x214   : > { %v1288_v52 = vpop.permute.xlu0 %1287  ;;  %3743 = vmatpush1.bf16.msra.mxu1 %v2211_v1  ;;  %3558 = vmatprep.mubr.bf16.mxu1 %v11831_v44 }
 0x215   : > { %v1976_v18 = vpop.permute.xlu1 %1975  ;;  %v1291_v10 = vsel %vm1289_vm9, %v11437_v51, %v1288_v52  ;;  %v1292_v61 = vsel %vm1289_vm9, %v1288_v52, %v11429_v7  ;;  %v9564_v2 = vld [vmem:[#allocation4 + $0xc8] ss:$16 sps:$4 sm:$0xff]   ;;  %v9566_v6 = vld [vmem:[#allocation4 + $0xcc] ss:$16 sps:$4 sm:$0xff]   ;;  %3744 = vmatprep.subr.bf16.mxu1 %v2208_v32  ;;  %v11865_v63 = vrot.slane %v2356_v35, %v11335_v38  ;;  %v11868_v32 = vrot.slane %v2363_v59, %v11335_v38 }
 0x216   : > { %v11847_v39 = vsel %vm1957_vm10, %v11449_v21, %v1976_v18  ;;  %v11851_v12 = vsel %vm1957_vm10, %v1976_v18, %v11439_v11  ;;  %v1367_v53 = vmul.bf16 %v11704_v40, %v1291_v10  ;;  %v1368_v51 = vmul.bf16 %v11707_v49, %v1292_v61  ;;  %3631 = vmatprep.subr.bf16.mxu0 %v9566_v6  ;;  %v11860_v21 = vld [vmem:[#allocation11 + $0x40] ss:$16 sps:$4 sm:$0xff]   ;;  %v11862_v11 = vld [vmem:[#allocation11 + $0x28] ss:$16 sps:$4 sm:$0xff]  }
 0x217   : > { %v2049_v7 = vmul.bf16 %v11716_v14, %v11847_v39  ;;  %v2050_v62 = vmul.bf16 %v11721_v57, %v11851_v12  ;;  %3632 = vmatpush1.bf16.msra.mxu0 %v9564_v2  ;;  %14424 = vst [vmem:[#allocation83_spill] sm:$0xff] %v11865_v63  ;;  %14425 = vst [vmem:[#allocation84_spill] sm:$0xff] %v11868_v32  ;;  %v14435_v12 = vld [vmem:[#allocation57_spill] sm:$0xff] }
 0x218   : > { %v8580_v1 = vcombine.low %v1367_v53, %v1368_v51  ;;  %v1148_v29 = vpop.permute.xlu0 %1147  ;;  %3745 = vmatpush1.bf16.msra.mxu1 %v2207_v28  ;;  %3633 = vmatprep.subr.bf16.mxu0 %v1376_v50  ;;  %v11892_v28 = vld [vmem:[#allocation11 + $0x4c] ss:$16 sps:$4 sm:$0xff]   ;;  %v11991_v39 = vld [vmem:[#allocation11 + $0x80] ss:$16 sps:$4 sm:$0xff]  }
 0x219   : > { %v1956_v17 = vpop.permute.xlu1 %1955  ;;  %v11872_v52 = vsel %vm1089_vm11, %v11479_v46, %v1148_v29  ;;  %v11876_v18 = vsel %vm1089_vm11, %v1148_v29, %v11465_v37  ;;  %3456 = vmatmul.mubr.bf16.gmra.mxu0 %v11860_v21  ;;  %v14426_v53 = vld [vmem:[#allocation44_spill] sm:$0xff] }
 0x21a   : > { %1390 = vst [vmem:[#allocation4 + $0x68] sm:$0x33] %v8580_v1  ;;  %v1960_v35 = vsel %vm1957_vm10, %v11491_v19, %v1956_v17  ;;  %v1967_v38 = vsel %vm1957_vm10, %v1956_v17, %v11481_v54  ;;  %v1217_v59 = vmul.bf16 %v11724_v0, %v11872_v52  ;;  %v1218_v46 = vmul.bf16 %v11735_v5, %v11876_v18  ;;  %v9572_v37 = vld [vmem:[#allocation4 + $0x2a8] ss:$16 sps:$4 sm:$0xff]   ;;  %v9574_v10 = vld [vmem:[#allocation4 + $0x2ac] ss:$16 sps:$4 sm:$0xff]  }
 0x21b   : > { %v2045_v61 = vmul.bf16 %v11716_v14, %v1960_v35  ;;  %v2046_v30 = vmul.bf16 %v11721_v57, %v1967_v38  ;;  %3559 = vmatmul.mubr.bf16.gmra.mxu1 %v11862_v11  ;;  %3746 = vmatprep.subr.bf16.mxu1 %v9574_v10  ;;  %v11895_v54 = vld [vmem:[#allocation11 + $0x64] ss:$16 sps:$4 sm:$0xff]   ;;  %v14427_v1 = vld [vmem:[#allocation48_spill] sm:$0xff] }
 0x21c   : > { %v1142_v19 = vpop.permute.xlu0 %1141  ;;  %3634 = vmatpush1.bf16.msra.mxu0 %v1375_v55  ;;  %3747 = vmatpush1.bf16.msra.mxu1 %v9572_v37  ;;  %v14428_v17 = vld [vmem:[#allocation45_spill] sm:$0xff]  ;;  %v11925_v10 = vld [vmem:[#allocation11 + $0x48] ss:$16 sps:$4 sm:$0xff]  }
 0x21d   : > { %v8634_v2 = vcombine.low %v2045_v61, %v2046_v30  ;;  %v1812_v6 = vpop.permute.xlu1 %1811  ;;  %v11899_v50 = vsel %vm1089_vm11, %v11514_v26, %v1142_v19  ;;  %v11903_v51 = vsel %vm1089_vm11, %v1142_v19, %v14426_v53  ;;  %3635 = vmatprep.subr.bf16.mxu0 %v1372_v34  ;;  %3748 = vmatprep.subr.bf16.mxu1 %v2054_v58  ;;  %v11928_v61 = vld [vmem:[#allocation11 + $0x60] ss:$16 sps:$4 sm:$0xff]   ;;  %v14429_v19 = vld [vmem:[#allocation50_spill] sm:$0xff]  ;;  %v14442_v52 = vld [vmem:[#allocation64_spill] sm:$0xff] }
 0x21e   : > { %v11910_v29 = vsel %vm1785_vm12, %v14427_v1, %v1812_v6  ;;  %v11914_v35 = vsel %vm1785_vm12, %v1812_v6, %v14428_v17  ;;  %v1214_v38 = vmul.bf16 %v11735_v5, %v11903_v51  ;;  %3568 = vmatprep.mubr.bf16.mxu1 %v11892_v28  ;;  %3465 = vmatprep.mubr.bf16.mxu0 %v11895_v54  ;;  %v14431_v1 = vld [vmem:[#allocation52_spill] sm:$0xff] }
 0x21f   : > { %2068 = vst [vmem:[#allocation4 + $0x248] sm:$0x33] %v8634_v2  ;;  %v1886_v55 = vmul.bf16 %v11771_v27, %v11914_v35  ;;  %v14430_v2 = vld [vmem:[#allocation49_spill] sm:$0xff]  ;;  %v14432_v35 = vld [vmem:[#allocation51_spill] sm:$0xff]  ;;  %v14443_v51 = vmul.bf16 %v11724_v0, %v11899_v50  ;;  %v9613_v57 = vld [vmem:[#allocation4 + $0x1c8] ss:$16 sps:$4 sm:$0xff]  }
 0x220   : > { %v1088_v37 = vpop.permute.xlu0 %1087  ;;  %3636 = vmatpush1.bf16.msra.mxu0 %v1371_v47  ;;  %3749 = vmatpush1.bf16.msra.mxu1 %v2053_v22 }
 0x221   : > { %v1804_v30 = vpop.permute.xlu1 %1803  ;;  %v1091_v34 = vsel %vm1089_vm11, %v14429_v19, %v1088_v37  ;;  %v1092_v6 = vsel %vm1089_vm11, %v1088_v37, %v14430_v2  ;;  %v9581_v58 = vld [vmem:[#allocation4 + $0x68] ss:$16 sps:$4 sm:$0xff]   ;;  %v9583_v53 = vld [vmem:[#allocation4 + $0x6c] ss:$16 sps:$4 sm:$0xff]   ;;  %3750 = vmatprep.subr.bf16.mxu1 %v2050_v62  ;;  %3466 = vmatmul.mubr.bf16.gmra.mxu0 %v11928_v61 }
 0x222   : > { %v11939_v17 = vsel %vm1785_vm12, %v14431_v1, %v1804_v30  ;;  %v11943_v9 = vsel %vm1785_vm12, %v1804_v30, %v14432_v35  ;;  %v1209_v26 = vmul.bf16 %v11724_v0, %v1091_v34  ;;  %v1210_v19 = vmul.bf16 %v11735_v5, %v1092_v6  ;;  %3637 = vmatprep.subr.bf16.mxu0 %v9583_v53  ;;  %v11957_v37 = vld [vmem:[#allocation11 + $0x6c] ss:$16 sps:$4 sm:$0xff]   ;;  %v14434_v1 = vld [vmem:[#allocation53_spill] sm:$0xff] }
 0x223   : > { %3569 = vmatmul.mubr.bf16.gmra.mxu1 %v11925_v10  ;;  %v14433_v2 = vld [vmem:[#allocation54_spill] sm:$0xff]  ;;  %3475 = vmatprep.mubr.bf16.mxu0 %v11961_v60  ;;  %v4160_v0 = vld [vmem:[#allocation24 + $0x8] sm:$0xff] }
 0x224   : > { %v8570_v30 = vcombine.low %v1209_v26, %v1210_v19  ;;  %v1784_v34 = vpop.permute.xlu0 %1783  ;;  %3638 = vmatpush1.bf16.msra.mxu0 %v9581_v58  ;;  %v14436_v26 = vld [vmem:[#allocation55_spill] sm:$0xff]  ;;  %3751 = vmatpush1.bf16.msra.mxu1 %v2049_v7  ;;  %v14445_v58 = vld [vmem:[#allocation66_spill] sm:$0xff] }
 0x225   : > { %v1642_v22 = vpop.permute.xlu1 %1641  ;;  %v1788_v6 = vsel %vm1785_vm12, %v14433_v2, %v1784_v34  ;;  %v1795_v53 = vsel %vm1785_vm12, %v1784_v34, %v14434_v1  ;;  %3639 = vmatprep.subr.bf16.mxu0 %v1218_v46  ;;  %3578 = vmatprep.mubr.bf16.mxu1 %v11957_v37  ;;  %v11988_v1 = vld [vmem:[#allocation11 + $0x68] ss:$16 sps:$4 sm:$0xff]   ;;  %v14439_v46 = vld [vmem:[#allocation63_spill] sm:$0xff] }
 0x226   : > { %1232 = vst [vmem:[#allocation4 + $0x8] sm:$0x33] %v8570_v30  ;;  %v11969_v62 = vsel %vm1615_vm13, %v14435_v12, %v1642_v22  ;;  %v11973_v35 = vsel %vm1615_vm13, %v1642_v22, %v14436_v26  ;;  %v1877_v19 = vmul.bf16 %v11749_v43, %v1788_v6  ;;  %v1878_v45 = vmul.bf16 %v11771_v27, %v1795_v53  ;;  %v9589_v2 = vld [vmem:[#allocation4 + $0x248] ss:$16 sps:$4 sm:$0xff]   ;;  %v9591_v34 = vld [vmem:[#allocation4 + $0x24c] ss:$16 sps:$4 sm:$0xff]  }
 0x227   : > { %3752 = vmatprep.subr.bf16.mxu1 %v9591_v34  ;;  %v14437_v53 = vld [vmem:[#allocation59_spill] sm:$0xff]  ;;  %v14438_v26 = vld [vmem:[#allocation58_spill] sm:$0xff] }
 0x228   : > { %v8620_v22 = vcombine.low %v1877_v19, %v1878_v45  ;;  %v1636_v6 = vpop.permute.xlu0 %1635  ;;  %3640 = vmatpush1.bf16.msra.mxu0 %v1217_v59  ;;  %v14440_v19 = vld [vmem:[#allocation60_spill] sm:$0xff]  ;;  %3753 = vmatpush1.bf16.msra.mxu1 %v9589_v2  ;;  %v14444_v59 = vld [vmem:[#allocation67_spill] sm:$0xff] }
 0x229   : > { %v2310_v7 = vpop.permute.xlu1 %2309  ;;  %v11995_v12 = vsel %vm1615_vm13, %v14437_v53, %v1636_v6  ;;  %v11999_v18 = vsel %vm1615_vm13, %v1636_v6, %v14438_v26  ;;  %3641 = vmatprep.subr.bf16.mxu0 %v1214_v38  ;;  %3754 = vmatprep.subr.bf16.mxu1 %v1886_v55  ;;  %v12027_v26 = vld [vmem:[#allocation11 + $0xa4] ss:$16 sps:$4 sm:$0xff]  }
 0x22a   : > { %1900 = vst [vmem:[#allocation4 + $0x1e8] sm:$0x33] %v8620_v22  ;;  %v12006_v45 = vsel %vm2283_vm14, %v14439_v46, %v2310_v7  ;;  %v12010_v34 = vsel %vm2283_vm14, %v2310_v7, %v14440_v19  ;;  %3476 = vmatmul.mubr.bf16.gmra.mxu0 %v11991_v39  ;;  %v12025_v7 = vld [vmem:[#allocation11 + $0x8c] ss:$16 sps:$4 sm:$0xff]   ;;  %v14441_v46 = vld [vmem:[#allocation65_spill] sm:$0xff] }
 0x22b   : > { %3579 = vmatmul.mubr.bf16.gmra.mxu1 %v11988_v1  ;;  %3485 = vmatprep.mubr.bf16.mxu0 %v12027_v26 }
 0x22c   : > { %v1614_v22 = vpop.permute.xlu0 %1613  ;;  %3642 = vmatpush1.bf16.msra.mxu0 %v14443_v51  ;;  %3588 = vmatprep.mubr.bf16.mxu1 %v12025_v7  ;;  %v12062_v51 = vld [vmem:[#allocation11 + $0xac] ss:$16 sps:$4 sm:$0xff]  }
 0x22d   : > { %v2302_v2 = vpop.permute.xlu1 %2301  ;;  %v1617_v19 = vsel %vm1615_vm13, %v14441_v46, %v1614_v22  ;;  %v1618_v53 = vsel %vm1615_vm13, %v1614_v22, %v14442_v52  ;;  %v9598_v38 = vld [vmem:[#allocation4 + $0x8] ss:$16 sps:$4 sm:$0xff]   ;;  %v9600_v55 = vld [vmem:[#allocation4 + $0xc] ss:$16 sps:$4 sm:$0xff]   ;;  %v14446_v52 = vmul.bf16 %v11749_v43, %v11910_v29  ;;  %v12060_v29 = vld [vmem:[#allocation11 + $0xa0] ss:$16 sps:$4 sm:$0xff]  }
 0x22e   : > { %v12038_v6 = vsel %vm2283_vm14, %v14444_v59, %v2302_v2  ;;  %v12042_v30 = vsel %vm2283_vm14, %v2302_v2, %v14445_v58  ;;  %v1693_v47 = vmul.bf16 %v11798_v8, %v1617_v19  ;;  %v1694_v46 = vmul.bf16 %v11801_v16, %v1618_v53  ;;  %3643 = vmatprep.subr.bf16.mxu0 %v9600_v55  ;;  %v9609_v58 = vld [vmem:[#allocation4 + $0x3ec] ss:$16 sps:$4 sm:$0xff]   ;;  %v12057_v53 = vld [vmem:[#allocation11 + $0x88] ss:$16 sps:$4 sm:$0xff]  }
 0x22f   : > { %3755 = vmatpush1.bf16.msra.mxu1 %v14446_v52  ;;  %v14447_v59 = vmul.bf16 %v11771_v27, %v11943_v9  ;;  %v14448_v9 = vld [vmem:[#allocation68_spill] sm:$0xff] }
 0x230   : > { %v8604_v2 = vcombine.low %v1693_v47, %v1694_v46  ;;  %v1474_v19 = vpop.permute.xlu0 %1473  ;;  %3644 = vmatpush1.bf16.msra.mxu0 %v9598_v38  ;;  %v9607_v38 = vld [vmem:[#allocation4 + $0x3e8] ss:$16 sps:$4 sm:$0xff]  }
 0x231   : > { %3756 = vmatprep.subr.bf16.mxu1 %v14447_v59  ;;  %v2282_v52 = vpop.permute.xlu1 %2281  ;;  %v12066_v55 = vsel %vm1447_vm7, %v11672_v13, %v1474_v19  ;;  %v12070_v59 = vsel %vm1447_vm7, %v1474_v19, %v14448_v9  ;;  %v9604_v47 = vld [vmem:[#allocation4 + $0x1e8] ss:$16 sps:$4 sm:$0xff]   ;;  %v9606_v46 = vld [vmem:[#allocation4 + $0x1ec] ss:$16 sps:$4 sm:$0xff]   ;;  %v14449_v19 = vmul.bf16 %v11749_v43, %v11939_v17 }
 0x232   : > { %1716 = vst [vmem:[#allocation4 + $0x128] sm:$0x33] %v8604_v2  ;;  %v2286_v50 = vsel %vm2283_vm14, %v11699_v36, %v2282_v52  ;;  %v2293_v22 = vsel %vm2283_vm14, %v2282_v52, %v11677_v48  ;;  %v9615_v9 = vld [vmem:[#allocation4 + $0x1cc] ss:$16 sps:$4 sm:$0xff]   ;;  %3645 = vmatprep.subr.bf16.mxu0 %v9606_v46  ;;  %v12085_v48 = vld [vmem:[#allocation11 + $0xc4] ss:$16 sps:$4 sm:$0xff]   ;;  %3486 = vmatmul.mubr.bf16.gmra.mxu0 %v12060_v29 }
 0x233   : > { %3757 = vmatpush1.bf16.msra.mxu1 %v14449_v19  ;;  %v2371_v2 = vmul.bf16 %v11865_v63, %v2286_v50  ;;  %v2372_v14 = vmul.bf16 %v11868_v32, %v2293_v22  ;;  %v9618_v36 = vld [vmem:[#allocation4 + $0x3cc] ss:$16 sps:$4 sm:$0xff]   ;;  %v9616_v17 = vld [vmem:[#allocation4 + $0x3c8] ss:$16 sps:$4 sm:$0xff]   ;;  %3495 = vmatprep.mubr.bf16.mxu0 %v12085_v48  ;;  %v12093_v46 = vld [vmem:[#allocation11 + $0xc0] ss:$16 sps:$4 sm:$0xff]  }
 0x234   : > { %3758 = vmatprep.subr.bf16.mxu1 %v9609_v58  ;;  %3589 = vmatmul.mubr.bf16.gmra.mxu1 %v12057_v53  ;;  %v9624_v50 = vld [vmem:[#allocation4 + $0x1ac] ss:$16 sps:$4 sm:$0xff]   ;;  %v12091_v58 = vld [vmem:[#allocation11 + $0xa8] ss:$16 sps:$4 sm:$0xff]  }
 0x235   : > { %v8658_v52 = vcombine.low %v2371_v2, %v2372_v14  ;;  %3646 = vmatpush2.bf16.msra.mxu0 %v9604_v47  ;;  %3598 = vmatprep.mubr.bf16.mxu1 %v12062_v51  ;;  %v9627_v22 = vld [vmem:[#allocation4 + $0x3ac] ss:$16 sps:$4 sm:$0xff]   ;;  %v9622_v19 = vld [vmem:[#allocation4 + $0x1a8] ss:$16 sps:$4 sm:$0xff]   ;;  %v12097_v2 = vld [vmem:[#allocation11 + $0xe4] ss:$16 sps:$4 sm:$0xff]  }
 0x236   : > { %3647 = vmatprep.subr.bf16.mxu0 %v9615_v9  ;;  %v12095_v14 = vld [vmem:[#allocation11 + $0xcc] ss:$16 sps:$4 sm:$0xff]   ;;  %v9625_v47 = vld [vmem:[#allocation4 + $0x3a8] ss:$16 sps:$4 sm:$0xff]  }
 0x237   : > { %3759 = vmatpush2.bf16.msra.mxu1 %v9607_v38  ;;  %2394 = vst [vmem:[#allocation4 + $0x308] sm:$0x33] %v8658_v52  ;;  %v9633_v38 = vld [vmem:[#allocation4 + $0x18c] ss:$16 sps:$4 sm:$0xff]   ;;  %v9640_v13 = vld [vmem:[#allocation4 + $0x368] ss:$16 sps:$4 sm:$0xff]  }
 0x238   : > { %3760 = vmatprep.subr.bf16.mxu1 %v9618_v36  ;;  %v9636_v9 = vld [vmem:[#allocation4 + $0x38c] ss:$16 sps:$4 sm:$0xff]   ;;  %v9631_v36 = vld [vmem:[#allocation4 + $0x188] ss:$16 sps:$4 sm:$0xff]  }
 0x239   : > { %3648 = vmatpush2.bf16.msra.mxu0 %v9613_v57  ;;  %v9634_v57 = vld [vmem:[#allocation4 + $0x388] ss:$16 sps:$4 sm:$0xff]   ;;  %v9642_v52 = vld [vmem:[#allocation4 + $0x36c] ss:$16 sps:$4 sm:$0xff]  }
 0x23a   : > { %3649 = vmatprep.subr.bf16.mxu0 %v9624_v50  ;;  %3496 = vmatmul.mubr.bf16.gmra.mxu0 %v12093_v46  ;;  %v12105_v50 = vld [vmem:[#allocation11 + $0xe0] ss:$16 sps:$4 sm:$0xff]  }
 0x23b   : > { %3761 = vmatpush2.bf16.msra.mxu1 %v9616_v17  ;;  %3505 = vmatprep.mubr.bf16.mxu0 %v12097_v2  ;;  %v12103_v17 = vld [vmem:[#allocation11 + $0xc8] ss:$16 sps:$4 sm:$0xff]  }
 0x23c   : > { %3762 = vmatprep.subr.bf16.mxu1 %v9627_v22  ;;  %3599 = vmatmul.mubr.bf16.gmra.mxu1 %v12091_v58  ;;  %v12107_v22 = vld [vmem:[#allocation11 + $0xec] ss:$16 sps:$4 sm:$0xff]  }
 0x23d   : > { %3650 = vmatpush2.bf16.msra.mxu0 %v9622_v19  ;;  %3608 = vmatprep.mubr.bf16.mxu1 %v12095_v14  ;;  %v14450_v19 = vmul.bf16 %v11801_v16, %v11973_v35  ;;  %v14453_v35 = vmul.bf16 %v11868_v32, %v12010_v34 }
 0x23e   : > { %3651 = vmatprep.subr.bf16.mxu0 %v9633_v38  ;;  %v14452_v38 = vmul.bf16 %v11801_v16, %v11999_v18  ;;  %v9646_v18 = vld [vmem:[#allocation4 + $0x128] ss:$16 sps:$4 sm:$0xff]   ;;  %v9654_v34 = vld [vmem:[#allocation4 + $0x30c] ss:$16 sps:$4 sm:$0xff]   ;;  %v4159_v16 = vld [vmem:[#allocation24] sm:$0xff] }
 0x23f   : > { %3763 = vmatpush2.bf16.msra.mxu1 %v9625_v47  ;;  %v14451_v47 = vmul.bf16 %v11798_v8, %v11969_v62  ;;  %v14454_v62 = vmul.bf16 %v11798_v8, %v11995_v12  ;;  %v14457_v12 = vmul.bf16 %v11865_v63, %v12038_v6 }
 0x240   : > { %3764 = vmatprep.subr.bf16.mxu1 %v9636_v9  ;;  %v10270_v9 = vld [vmem:[#allocation11 + $0x4] ss:$16 sps:$4 sm:$0xff]  }
 0x241   : > { %3652 = vmatpush2.bf16.msra.mxu0 %v9631_v36  ;;  %v9648_v36 = vld [vmem:[#allocation4 + $0x12c] ss:$16 sps:$4 sm:$0xff]  }
 0x242   : > { %3653 = vmatprep.subr.bf16.mxu0 %v14450_v19  ;;  %3506 = vmatmul.mubr.bf16.gmra.mxu0 %v12105_v50  ;;  %v10271_v19 = vld [vmem:[#allocation11 + $0xc] ss:$16 sps:$4 sm:$0xff]  }
 0x243   : > { %3765 = vmatpush2.bf16.msra.mxu1 %v9634_v57  ;;  %3661 = vmatprep.mubr.bf16.mxu0 %v10270_v9  ;;  %v12124_v57 = vld [vmem:[#allocation11 + $0xe8] ss:$16 sps:$4 sm:$0xff]  }
 0x244   : > { %3766 = vmatprep.subr.bf16.mxu1 %v9642_v52  ;;  %3609 = vmatmul.mubr.bf16.gmra.mxu1 %v12103_v17  ;;  %v14456_v52 = vmul.bf16 %v11868_v32, %v12042_v30  ;;  %v14459_v30 = vmul.bf16 %v11690_v15, %v12066_v55 }
 0x245   : > { %3654 = vmatpush2.bf16.msra.mxu0 %v14451_v47  ;;  %3618 = vmatprep.mubr.bf16.mxu1 %v12107_v22  ;;  %v9652_v47 = vld [vmem:[#allocation4 + $0x308] ss:$16 sps:$4 sm:$0xff]  }
 0x246   : > { %3655 = vmatprep.subr.bf16.mxu0 %v14452_v38 }
 0x247   : > { %3767 = vmatpush2.bf16.msra.mxu1 %v9640_v13  ;;  %v14455_v13 = vmul.bf16 %v11865_v63, %v12006_v45  ;;  %v14458_v45 = vmul.bf16 %v11693_v41, %v12070_v59 }
 0x248   : > { %3768 = vmatprep.subr.bf16.mxu1 %v14453_v35 }
 0x249   : > { %3656 = vmatpush2.bf16.msra.mxu0 %v14454_v62 }
 0x24a   : > { %3657 = vmatprep.subr.bf16.mxu0 %v9648_v36 }
 0x24b   : > { %3769 = vmatpush2.bf16.msra.mxu1 %v14455_v13 }
 0x24c   : > { %3770 = vmatprep.subr.bf16.mxu1 %v14456_v52  ;;  %3619 = vmatmul.mubr.bf16.gmra.mxu1 %v12124_v57 }
 0x24d   : > { %3658 = vmatpush2.bf16.msra.mxu0 %v9646_v18  ;;  %3774 = vmatprep.mubr.bf16.mxu1 %v10271_v19 }
 0x24e   : > { %3659 = vmatprep.subr.bf16.mxu0 %v14458_v45 }
 0x24f   : > { %3771 = vmatpush2.bf16.msra.mxu1 %v14457_v12 }
 0x250   : > { %3772 = vmatprep.subr.bf16.mxu1 %v9654_v34 }
 0x251   : > { %3660 = vmatpush2.bf16.msra.mxu0 %v14459_v30 }
 0x253   : > { %3773 = vmatpush2.bf16.msra.mxu1 %v9652_v47 }
 0x254   : > { %3662 = vmatmul.mubr.bf16.vlgmr.msra.gmra.mxu0 %v11718_v4  ;;  %v4347_v4 = vld [vmem:[#allocation3 + $0x28] sm:$0xff] }
 0x255   : > { %3671 = vmatprep.mubr.bf16.mxu0 %v11732_v24  ;;  %v4349_v24 = vld [vmem:[#allocation3 + $0x30] sm:$0xff]  ;;  %5131 = vst [vmem:[#allocation5 + $0x400] sm:$0xff] %v4347_v4 }
 0x256   : > { %3775 = vmatmul.mubr.bf16.vlgmr.msra.gmra.mxu1 %v11803_v23  ;;  %5133 = vst [vmem:[#allocation5 + $0x288] sm:$0xff] %v4349_v24  ;;  %v4350_v23 = vld [vmem:[#allocation3 + $0x38] sm:$0xff] }
 0x257   : > { %3784 = vmatprep.mubr.bf16.mxu1 %v11831_v44  ;;  %5134 = vst [vmem:[#allocation5 + $0x218] sm:$0xff] %v4350_v23 }
 0x25c   : > { %3672 = vmatmul.mubr.bf16.gmra.mxu0 %v11768_v31  ;;  %v4348_v31 = vld [vmem:[#allocation3 + $0x8] sm:$0xff] }
 0x25d   : > { %3681 = vmatprep.mubr.bf16.mxu0 %v11785_v42  ;;  %v12164_v42 = vcombine.low %v4347_v4, %v4349_v24  ;;  %5132 = vst [vmem:[#allocation5 + $0x268] sm:$0xff] %v4348_v31  ;;  %v12167_v44 = vcombine.high %v4348_v31, %v4350_v23 }
 0x25e   : > { %3785 = vmatmul.mubr.bf16.gmra.mxu1 %v11862_v11  ;;  %v12182_v11 = vcombine.low %v4348_v31, %v4350_v23 }
 0x25f   : > { %3794 = vmatprep.mubr.bf16.mxu1 %v11892_v28  ;;  %4613 = vrot.lane.b32.xlu1 %v12164_v42, %s10692_s18  ;;  %v4343_v28 = vld [vmem:[#allocation3] sm:$0xff] }
 0x260   : > { %4605 = vrot.lane.b32.xlu0 %v12167_v44, %s10692_s18  ;;  %5127 = vst [vmem:[#allocation5 + $0x358] sm:$0xff] %v4343_v28 }
 0x263   : > { %5179 = vrot.lane.b32.xlu1 %v12164_v42, %s10695_s17 }
 0x264   : > { %3682 = vmatmul.mubr.bf16.gmra.mxu0 %v11860_v21  ;;  %v12173_v21 = vcombine.high %v4347_v4, %v4349_v24 }
 0x265   : > { %3691 = vmatprep.mubr.bf16.mxu0 %v11895_v54  ;;  %v4345_v54 = vld [vmem:[#allocation3 + $0x10] sm:$0xff] }
 0x266   : > { %3795 = vmatmul.mubr.bf16.gmra.mxu1 %v11925_v10  ;;  %4615 = vrot.lane.b32.xlu0 %v12173_v21, %s10692_s18  ;;  %v4344_v10 = vld [vmem:[#allocation3 + $0x18] sm:$0xff]  ;;  %5129 = vst [vmem:[#allocation5 + $0x4c8] sm:$0xff] %v4345_v54 }
 0x267   : > { %3804 = vmatprep.mubr.bf16.mxu1 %v11957_v37  ;;  %5183 = vrot.lane.b32.xlu1 %v12182_v11, %s10695_s17  ;;  %v4346_v37 = vld [vmem:[#allocation3 + $0x20] sm:$0xff]  ;;  %5128 = vst [vmem:[#allocation5 + $0x20] sm:$0xff] %v4344_v10 }
 0x268   : > { %5130 = vst [vmem:[#allocation5 + $0xe8] sm:$0xff] %v4346_v37 }
 0x26a   : > { %5181 = vrot.lane.b32.xlu0 %v12173_v21, %s10695_s17 }
 0x26c   : > { %3692 = vmatmul.mubr.bf16.gmra.mxu0 %v11928_v61  ;;  %v12189_v61 = vcombine.low %v4343_v28, %v4345_v54 }
 0x26d   : > { %3701 = vmatprep.mubr.bf16.mxu0 %v11961_v60  ;;  %v12191_v60 = vcombine.high %v4344_v10, %v4346_v37 }
 0x26e   : > { %3805 = vmatmul.mubr.bf16.gmra.mxu1 %v11988_v1  ;;  %4607 = vrot.lane.b32.xlu1 %v12189_v61, %s10692_s18  ;;  %v12200_v1 = vcombine.high %v4343_v28, %v4345_v54 }
 0x26f   : > { %3814 = vmatprep.mubr.bf16.mxu1 %v12025_v7  ;;  %4603 = vrot.lane.b32.xlu0 %v12191_v60, %s10692_s18 }
 0x272   : > { %5171 = vrot.lane.b32.xlu1 %v12189_v61, %s10695_s17 }
 0x273   : > { %4609 = vrot.lane.b32.xlu0 %v12200_v1, %s10692_s18 }
 0x274   : > { %3702 = vmatmul.mubr.bf16.gmra.mxu0 %v11991_v39  ;;  %v12207_v39 = vcombine.low %v4344_v10, %v4346_v37 }
 0x275   : > { %3711 = vmatprep.mubr.bf16.mxu0 %v12027_v26 }
 0x276   : > { %3815 = vmatmul.mubr.bf16.gmra.mxu1 %v12057_v53  ;;  %5175 = vrot.lane.b32.xlu1 %v12207_v39, %s10695_s17 }
 0x277   : > { %3824 = vmatprep.mubr.bf16.mxu1 %v12062_v51  ;;  %5173 = vrot.lane.b32.xlu0 %v12200_v1, %s10695_s17 }
 0x27a   : > { %4429 = vrot.lane.b32.xlu1 %v12164_v42, %s10694_s13 }
 0x27b   : > { %4399 = vrot.lane.b32.xlu0 %v12167_v44, %s10694_s13 }
 0x27c   : > { %3712 = vmatmul.mubr.bf16.gmra.mxu0 %v12060_v29 }
 0x27d   : > { %3721 = vmatprep.mubr.bf16.mxu0 %v12085_v48 }
 0x27e   : > { %3825 = vmatmul.mubr.bf16.gmra.mxu1 %v12091_v58  ;;  %4397 = vrot.lane.b32.xlu1 %v12191_v60, %s10694_s13 }
 0x27f   : > { %3834 = vmatprep.mubr.bf16.mxu1 %v12095_v14  ;;  %4431 = vrot.lane.b32.xlu0 %v12173_v21, %s10694_s13 }
 0x282   : > { %4425 = vrot.lane.b32.xlu1 %v12200_v1, %s10694_s13 }
 0x283   : > { %4423 = vrot.lane.b32.xlu0 %v12189_v61, %s10694_s13 }
 0x284   : > { %3722 = vmatmul.mubr.bf16.gmra.mxu0 %v12093_v46 }
 0x285   : > { %3731 = vmatprep.mubr.bf16.mxu0 %v12097_v2 }
 0x286   : > { %3835 = vmatmul.mubr.bf16.gmra.mxu1 %v12103_v17  ;;  %4981 = vrot.lane.b32.xlu1 %v12164_v42, %s10696_s20 }
 0x287   : > { %3844 = vmatprep.mubr.bf16.mxu1 %v12107_v22  ;;  %4973 = vrot.lane.b32.xlu0 %v12167_v44, %s10696_s20 }
 0x28a   : > { %5547 = vrot.lane.b32.xlu1 %v12164_v42, %s10691_s28 }
 0x28b   : > { %4983 = vrot.lane.b32.xlu0 %v12173_v21, %s10696_s20 }
 0x28c   : > { %3732 = vmatmul.mubr.bf16.gmra.mxu0 %v12105_v50 }
 0x28e   : > { %3845 = vmatmul.mubr.bf16.gmra.mxu1 %v12124_v57  ;;  %5551 = vrot.lane.b32.xlu1 %v12182_v11, %s10691_s28 }
 0x28f   : > { %5549 = vrot.lane.b32.xlu0 %v12173_v21, %s10691_s28 }
 0x292   : > { %4975 = vrot.lane.b32.xlu1 %v12189_v61, %s10696_s20 }
 0x293   : > { %4971 = vrot.lane.b32.xlu0 %v12191_v60, %s10696_s20 }
 0x296   : > { %5539 = vrot.lane.b32.xlu1 %v12189_v61, %s10691_s28 }
 0x297   : > { %4977 = vrot.lane.b32.xlu0 %v12200_v1, %s10696_s20 }
 0x29a   : > { %5543 = vrot.lane.b32.xlu1 %v12207_v39, %s10691_s28 }
 0x29b   : > { %5541 = vrot.lane.b32.xlu0 %v12200_v1, %s10691_s28 }
 0x2c6   : > { %v3437_v6 = vpop.f32.mrf.mxu0 }
 0x2c8   : > { %v3439_v7 = vpop.f32.mrf.mxu0 }
 0x2ca   : > { %v3441_v26 = vpop.f32.mrf.mxu0 }
 0x2cc   : > { %v3443_v53 = vpop.f32.mrf.mxu0 }
 0x2d0   : > { %v3447_v29 = vpop.f32.mrf.mxu0 }
 0x2d2   : > { %v3449_v51 = vpop.f32.mrf.mxu0 }
 0x2d3   : > { %v3550_v55 = vpop.f32.mrf.mxu1 }
 0x2d4   : > { %v3451_v59 = vpop.f32.mrf.mxu0  ;;  %v3551_v48 = vadd.f32 %v3550_v55, %v3437_v6 }
 0x2d5   : > { %v3552_v58 = vpop.f32.mrf.mxu1 }
 0x2d6   : > { %v8827_v46 = vmul.f32 -1.442695, %v3551_v48  ;;  %v3553_v14 = vadd.f32 %v3552_v58, %v3439_v7  ;;  %v3453_v2 = vpop.f32.mrf.mxu0 }
 0x2d7   : > { %v3554_v17 = vpop.f32.mrf.mxu1 }
 0x2d8   : > { %9758 = vpow2.f32 %v8827_v46  ;;  %v8828_v50 = vmul.f32 -1.442695, %v3553_v14  ;;  %v3555_v22 = vadd.f32 %v3554_v17, %v3441_v26 }
 0x2d9   : > { %v3556_v38 = vpop.f32.mrf.mxu1  ;;  %v3457_v36 = vpop.f32.mrf.mxu0 }
 0x2da   : > { %9760 = vpow2.f32 %v8828_v50  ;;  %v8831_v35 = vmul.f32 -1.442695, %v3555_v22  ;;  %v3557_v9 = vadd.f32 %v3556_v38, %v3443_v53 }
 0x2db   : > { %v3560_v57 = vpop.f32.mrf.mxu1  ;;  %v3459_v18 = vpop.f32.mrf.mxu0 }
 0x2dc   : > { %9762 = vpow2.f32 %v8831_v35  ;;  %v8832_v62 = vmul.f32 -1.442695, %v3557_v9  ;;  %v3561_v13 = vadd.f32 %v3560_v57, %v3447_v29  ;;  %v12251_v9 = vpop.permute.xlu1 %4613 }
 0x2dd   : > { %v3562_v52 = vpop.f32.mrf.mxu1  ;;  %v3461_v12 = vpop.f32.mrf.mxu0 }
 0x2de   : > { %9764 = vpow2.f32 %v8832_v62  ;;  %v8835_v34 = vmul.f32 -1.442695, %v3561_v13  ;;  %v3563_v19 = vadd.f32 %v3562_v52, %v3449_v51 }
 0x2df   : > { %v3564_v45 = vpop.f32.mrf.mxu1  ;;  %v3463_v4 = vpop.f32.mrf.mxu0 }
 0x2e0   : > { %9766 = vpow2.f32 %v8835_v34  ;;  %v8836_v47 = vmul.f32 -1.442695, %v3563_v19  ;;  %v3565_v30 = vadd.f32 %v3564_v45, %v3451_v59 }
 0x2e1   : > { %v3566_v24 = vpop.f32.mrf.mxu1  ;;  %v3467_v54 = vpop.f32.mrf.mxu0 }
 0x2e2   : > { %9768 = vpow2.f32 %v8836_v47  ;;  %v8839_v31 = vmul.f32 -1.442695, %v3565_v30  ;;  %v3567_v23 = vadd.f32 %v3566_v24, %v3453_v2  ;;  %v12255_v24 = vpop.permute.xlu1 %5179 }
 0x2e3   : > { %v3570_v28 = vpop.f32.mrf.mxu1  ;;  %v3469_v26 = vpop.f32.mrf.mxu0  ;;  %14461 = vst [vmem:[#allocation48_spill] sm:$0xff] %v12255_v24 }
 0x2e4   : > { %9770 = vpow2.f32 %v8839_v31  ;;  %v8840_v10 = vmul.f32 -1.442695, %v3567_v23  ;;  %v3571_v37 = vadd.f32 %v3570_v28, %v3457_v36  ;;  %v12253_v36 = vpop.permute.xlu0 %4605 }
 0x2e5   : > { %v9759_v6 = vpop.eup %9758  ;;  %v3572_v7 = vpop.f32.mrf.mxu1  ;;  %14460 = vst [vmem:[#allocation44_spill] sm:$0xff] %v12253_v36 }
 0x2e6   : > { %v3999_v53 = vadd.f32 1.0, %v9759_v6  ;;  %9772 = vpow2.f32 %v8840_v10  ;;  %v8843_v29 = vmul.f32 -1.442695, %v3571_v37  ;;  %v3573_v51 = vadd.f32 %v3572_v7, %v3459_v18  ;;  %v3471_v59 = vpop.f32.mrf.mxu0 }
 0x2e7   : > { %v9761_v55 = vpop.eup %9760  ;;  %v3574_v48 = vpop.f32.mrf.mxu1 }
 0x2e8   : > { %9774 = vrcp.f32 %v3999_v53  ;;  %v4000_v58 = vadd.f32 1.0, %v9761_v55  ;;  %v8844_v46 = vmul.f32 -1.442695, %v3573_v51  ;;  %v3575_v14 = vadd.f32 %v3574_v48, %v3461_v12  ;;  %v3473_v50 = vpop.f32.mrf.mxu0  ;;  %v12257_v31 = vpop.permute.xlu0 %4615 }
 0x2e9   : > { %v9763_v2 = vpop.eup %9762  ;;  %9776 = vpow2.f32 %v8843_v29  ;;  %v3576_v17 = vpop.f32.mrf.mxu1  ;;  %14462 = vst [vmem:[#allocation45_spill] sm:$0xff] %v12257_v31 }
 0x2ea   : > { %9778 = vrcp.f32 %v4000_v58  ;;  %v4003_v22 = vadd.f32 1.0, %v9763_v2  ;;  %v8847_v38 = vmul.f32 -1.442695, %v3575_v14  ;;  %v3577_v35 = vadd.f32 %v3576_v17, %v3463_v4  ;;  %v3477_v13 = vpop.f32.mrf.mxu0  ;;  %v12259_v48 = vpop.permute.xlu1 %5183 }
 0x2eb   : > { %v9765_v57 = vpop.eup %9764  ;;  %9780 = vpow2.f32 %v8844_v46  ;;  %v3580_v62 = vpop.f32.mrf.mxu1  ;;  %14463 = vst [vmem:[#allocation50_spill] sm:$0xff] %v12259_v48 }
 0x2ec   : > { %9782 = vrcp.f32 %v4003_v22  ;;  %v4004_v18 = vadd.f32 1.0, %v9765_v57  ;;  %v8848_v52 = vmul.f32 -1.442695, %v3577_v35  ;;  %v3581_v34 = vadd.f32 %v3580_v62, %v3467_v54  ;;  %v3479_v45 = vpop.f32.mrf.mxu0  ;;  %v12261_v58 = vpop.permute.xlu0 %5181 }
 0x2ed   : > { %v9767_v19 = vpop.eup %9766  ;;  %9784 = vpow2.f32 %v8847_v38  ;;  %v3582_v12 = vpop.f32.mrf.mxu1 }
 0x2ee   : > { %9786 = vrcp.f32 %v4004_v18  ;;  %v4007_v47 = vadd.f32 1.0, %v9767_v19  ;;  %v8851_v30 = vmul.f32 -1.442695, %v3581_v34  ;;  %v3583_v4 = vadd.f32 %v3582_v12, %v3469_v26  ;;  %v3481_v10 = vpop.f32.mrf.mxu0 }
 0x2ef   : > { %v9769_v23 = vpop.eup %9768  ;;  %9788 = vpow2.f32 %v8848_v52  ;;  %v3584_v28 = vpop.f32.mrf.mxu1 }
 0x2f0   : > { %9790 = vrcp.f32 %v4007_v47  ;;  %v4008_v37 = vadd.f32 1.0, %v9769_v23  ;;  %v8852_v6 = vmul.f32 -1.442695, %v3583_v4  ;;  %v3585_v54 = vadd.f32 %v3584_v28, %v3471_v59  ;;  %v3483_v29 = vpop.f32.mrf.mxu0  ;;  %v12265_v52 = vpop.permute.xlu1 %4607 }
 0x2f1   : > { %v9771_v7 = vpop.eup %9770  ;;  %9792 = vpow2.f32 %v8851_v30  ;;  %v3586_v53 = vpop.f32.mrf.mxu1 }
 0x2f2   : > { %9794 = vrcp.f32 %v4008_v37  ;;  %v4011_v51 = vadd.f32 1.0, %v9771_v7  ;;  %v8855_v55 = vmul.f32 -1.442695, %v3585_v54  ;;  %v3587_v26 = vadd.f32 %v3586_v53, %v3473_v50  ;;  %v3487_v2 = vpop.f32.mrf.mxu0  ;;  %v12267_v34 = vpop.permute.xlu0 %4603 }
 0x2f3   : > { %v9773_v46 = vpop.eup %9772  ;;  %9796 = vpow2.f32 %v8852_v6  ;;  %14464 = vst [vmem:[#allocation49_spill] sm:$0xff] %v12267_v34 }
 0x2f4   : > { %v3590_v14 = vpop.f32.mrf.mxu1  ;;  %9798 = vrcp.f32 %v4011_v51  ;;  %v4012_v17 = vadd.f32 1.0, %v9773_v46  ;;  %v8856_v22 = vmul.f32 -1.442695, %v3587_v26  ;;  %v3489_v57 = vpop.f32.mrf.mxu0 }
 0x2f5   : > { %v3591_v59 = vadd.f32 %v3590_v14, %v3477_v13  ;;  %v12263_v38 = vpop.eup %9774  ;;  %9800 = vpow2.f32 %v8855_v55  ;;  %v12273_v51 = vpop.permute.xlu1 %5171 }
 0x2f6   : > { %v3592_v35 = vpop.f32.mrf.mxu1  ;;  %v9777_v62 = vpop.eup %9776  ;;  %9802 = vrcp.f32 %v4012_v17  ;;  %14465 = vst [vmem:[#allocation52_spill] sm:$0xff] %v12273_v51 }
 0x2f7   : > { %v8859_v50 = vmul.f32 -1.442695, %v3591_v59  ;;  %v3593_v18 = vadd.f32 %v3592_v35, %v3479_v45  ;;  %v12269_v19 = vpop.eup %9778  ;;  %v4015_v12 = vadd.f32 1.0, %v9777_v62  ;;  %9804 = vpow2.f32 %v8856_v22  ;;  %v3491_v30 = vpop.f32.mrf.mxu0 }
 0x2f8   : > { %v3594_v47 = vpop.f32.mrf.mxu1  ;;  %v9781_v13 = vpop.eup %9780 }
 0x2f9   : > { %9806 = vpow2.f32 %v8859_v50  ;;  %v8860_v4 = vmul.f32 -1.442695, %v3593_v18  ;;  %v3595_v23 = vadd.f32 %v3594_v47, %v3481_v10  ;;  %v12271_v28 = vpop.eup %9782  ;;  %v4016_v37 = vadd.f32 1.0, %v9781_v13  ;;  %v3493_v45 = vpop.f32.mrf.mxu0 }
 0x2fa   : > { %9808 = vrcp.f32 %v4015_v12  ;;  %v3596_v6 = vpop.f32.mrf.mxu1  ;;  %v9785_v54 = vpop.eup %9784  ;;  %v12284_v18 = vsel %vm1289_vm9, %v12253_v36, %v12251_v9  ;;  %v12289_v12 = vsel %vm1289_vm9, %v12251_v9, %v12257_v31 }
 0x2fb   : > { %9810 = vpow2.f32 %v8860_v4  ;;  %v8863_v7 = vmul.f32 -1.442695, %v3595_v23  ;;  %v3597_v53 = vadd.f32 %v3596_v6, %v3483_v29  ;;  %v12275_v55 = vpop.permute.xlu0 %4609  ;;  %v12277_v26 = vpop.eup %9786  ;;  %v4019_v46 = vadd.f32 1.0, %v9785_v54  ;;  %v14467_v4 = vld [vmem:[#allocation38_spill] sm:$0xff] }
 0x2fc   : > { %14466 = vst [vmem:[#allocation51_spill] sm:$0xff] %v12275_v55  ;;  %9812 = vrcp.f32 %v4016_v37  ;;  %v3600_v14 = vpop.f32.mrf.mxu1  ;;  %v3497_v10 = vpop.f32.mrf.mxu0 }
 0x2fd   : > { %v9789_v17 = vpop.eup %9788  ;;  %9814 = vpow2.f32 %v8863_v7  ;;  %v8864_v22 = vmul.f32 -1.442695, %v3597_v53  ;;  %v3601_v59 = vadd.f32 %v3600_v14, %v3487_v2  ;;  %v12293_v37 = vpop.permute.xlu1 %5175  ;;  %v14469_v14 = vld [vmem:[#allocation39_spill] sm:$0xff] }
 0x2fe   : > { %v12279_v35 = vpop.eup %9790  ;;  %9816 = vrcp.f32 %v4019_v46  ;;  %v4020_v62 = vadd.f32 1.0, %v9789_v17  ;;  %v3602_v50 = vpop.f32.mrf.mxu1  ;;  %14468 = vst [vmem:[#allocation54_spill] sm:$0xff] %v12293_v37  ;;  %v12302_v17 = vsel %vm1785_vm12, %v12255_v24, %v12261_v58 }
 0x2ff   : > { %v3499_v29 = vpop.f32.mrf.mxu0  ;;  %v9793_v47 = vpop.eup %9792  ;;  %9818 = vpow2.f32 %v8864_v22  ;;  %v8867_v13 = vmul.f32 -1.442695, %v3601_v59  ;;  %v3603_v2 = vadd.f32 %v3602_v50, %v3489_v57  ;;  %v12307_v50 = vsel %vm1785_vm12, %v12261_v58, %v12259_v48 }
 0x300   : > { %v5174_v6 = vpop.permute.xlu0 %5173  ;;  %v12295_v54 = vpop.eup %9794  ;;  %9820 = vrcp.f32 %v4020_v62  ;;  %v4023_v7 = vadd.f32 1.0, %v9793_v47 }
 0x301   : > { %v3604_v53 = vpop.f32.mrf.mxu1  ;;  %v3501_v46 = vpop.f32.mrf.mxu0  ;;  %9822 = vpow2.f32 %v8867_v13  ;;  %v8868_v22 = vmul.f32 -1.442695, %v3603_v2 }
 0x302   : > { %v9797_v57 = vpop.eup %9796  ;;  %v3605_v59 = vadd.f32 %v3604_v53, %v3491_v30  ;;  %9824 = vrcp.f32 %v4023_v7  ;;  %v12313_v2 = vpop.permute.xlu1 %4429  ;;  %v14472_v7 = vld [vmem:[#allocation47_spill] sm:$0xff] }
 0x303   : > { %v12309_v62 = vpop.eup %9798  ;;  %v4024_v47 = vadd.f32 1.0, %v9797_v57  ;;  %v3606_v23 = vpop.f32.mrf.mxu1  ;;  %9826 = vpow2.f32 %v8868_v22  ;;  %v12324_v22 = vsel %vm1289_vm9, %v12267_v34, %v12265_v52  ;;  %v12331_v57 = vsel %vm1289_vm9, %v12265_v52, %v12275_v55 }
 0x304   : > { %v3503_v9 = vpop.f32.mrf.mxu0  ;;  %v9801_v32 = vpop.eup %9800  ;;  %v8871_v63 = vmul.f32 -1.442695, %v3605_v59  ;;  %v3607_v25 = vadd.f32 %v3606_v23, %v3493_v45  ;;  %v12345_v52 = vsel %vm1785_vm12, %v5174_v6, %v12293_v37 }
 0x305   : > { %v12315_v30 = vpop.permute.xlu0 %4399  ;;  %v12317_v53 = vpop.eup %9802  ;;  %9828 = vrcp.f32 %v4024_v47  ;;  %v4027_v58 = vadd.f32 1.0, %v9801_v32 }
 0x306   : > { %14471 = vst [vmem:[#allocation53_spill] sm:$0xff] %v12315_v30  ;;  %v3610_v24 = vpop.f32.mrf.mxu1  ;;  %v9805_v45 = vpop.eup %9804  ;;  %9830 = vpow2.f32 %v8871_v63  ;;  %v8872_v23 = vmul.f32 -1.442695, %v3607_v25 }
 0x307   : > { %v3611_v59 = vadd.f32 %v3610_v24, %v3497_v10  ;;  %v9807_v13 = vpop.eup %9806  ;;  %v4028_v48 = vadd.f32 1.0, %v9805_v45  ;;  %v3507_v43 = vpop.f32.mrf.mxu0 }
 0x308   : > { %v3612_v27 = vpop.f32.mrf.mxu1  ;;  %v9809_v47 = vpop.eup %9808  ;;  %v4031_v41 = vadd.f32 1.0, %v9807_v13  ;;  %9832 = vpow2.f32 %v8872_v23  ;;  %v12341_v13 = vsel %vm1785_vm12, %v12273_v51, %v5174_v6  ;;  %v4163_v51 = vld [vmem:[#allocation24 + $0x20] sm:$0xff] }
 0x309   : > { %v12333_v15 = vpop.permute.xlu1 %4397  ;;  %v12335_v63 = vpop.permute.xlu0 %4431  ;;  %9834 = vrcp.f32 %v4027_v58  ;;  %v3613_v24 = vadd.f32 %v3612_v27, %v3499_v29 }
 0x30a   : > { %14473 = vst [vmem:[#allocation57_spill] sm:$0xff] %v12333_v15  ;;  %14474 = vst [vmem:[#allocation55_spill] sm:$0xff] %v12335_v63  ;;  %v9811_v25 = vpop.eup %9810  ;;  %v3614_v10 = vpop.f32.mrf.mxu1  ;;  %9836 = vrcp.f32 %v4028_v48 }
 0x30b   : > { %v9813_v23 = vpop.eup %9812  ;;  %v4032_v32 = vadd.f32 1.0, %v9811_v25  ;;  %9838 = vtanh.f32 %v3611_v59  ;;  %v3615_v58 = vadd.f32 %v3614_v10, %v3501_v46  ;;  %v3509_v27 = vpop.f32.mrf.mxu0  ;;  %v12356_v46 = vsel %vm1089_vm11, %v12315_v30, %v12313_v2  ;;  %v14479_v30 = vld [vmem:[#allocation43_spill] sm:$0xff] }
 0x30c   : > { %v9815_v56 = vpop.eup %9814  ;;  %v3616_v29 = vpop.f32.mrf.mxu1  ;;  %9840 = vrcp.f32 %v4031_v41  ;;  %14476 = vst [vmem:[#allocation58_spill] sm:$0xff] %v12356_v46  ;;  %v12358_v10 = vmul.f32 %v9809_v47, %v4159_v16  ;;  %v12362_v34 = vmul.f32 %v9813_v23, %v4160_v0 }
 0x30d   : > { %v9817_v8 = vpop.eup %9816  ;;  %v4035_v45 = vadd.f32 1.0, %v9815_v56  ;;  %v12349_v5 = vpop.permute.xlu1 %4425  ;;  %9842 = vtanh.f32 %v3613_v24  ;;  %v3617_v6 = vadd.f32 %v3616_v29, %v3503_v9  ;;  %v14477_v29 = vld [vmem:[#allocation42_spill] sm:$0xff] }
 0x30e   : > { %14475 = vst [vmem:[#allocation59_spill] sm:$0xff] %v12349_v5  ;;  %v4424_v48 = vpop.permute.xlu0 %4423  ;;  %v9819_v25 = vpop.eup %9818  ;;  %9844 = vrcp.f32 %v4032_v32  ;;  %v12367_v32 = vsel %vm1089_vm11, %v12313_v2, %v12335_v63 }
 0x30f   : > { %v3620_v37 = vpop.f32.mrf.mxu1  ;;  %v9821_v56 = vpop.eup %9820  ;;  %v4036_v41 = vadd.f32 1.0, %v9819_v25  ;;  %9846 = vtanh.f32 %v3615_v58  ;;  %v4164_v58 = vld [vmem:[#allocation24 + $0x28] sm:$0xff]  ;;  %v12379_v2 = vsel %vm1089_vm11, %v4424_v48, %v12349_v5  ;;  %v12383_v23 = vsel %vm1089_vm11, %v12333_v15, %v4424_v48 }
 0x310   : > { %v3621_v36 = vadd.f32 %v3620_v37, %v3507_v43  ;;  %v9823_v31 = vpop.eup %9822  ;;  %v3511_v24 = vpop.f32.mrf.mxu0  ;;  %9848 = vrcp.f32 %v4035_v45  ;;  %v12371_v37 = vmul.f32 %v9817_v8, %v4163_v51  ;;  %14480 = vst [vmem:[#allocation60_spill] sm:$0xff] %v12379_v2  ;;  %14481 = vst [vmem:[#allocation65_spill] sm:$0xff] %v12383_v23  ;;  %v4167_v51 = vld [vmem:[#allocation24 + $0x40] sm:$0xff]  ;;  %v12385_v63 = vmul.f32 %v9821_v56, %v4164_v58 }
 0x311   : > { %v3622_v9 = vpop.f32.mrf.mxu1  ;;  %v9825_v59 = vpop.eup %9824  ;;  %v4039_v40 = vadd.f32 1.0, %v9823_v31  ;;  %9850 = vtanh.f32 %v3617_v6 }
 0x312   : > { %v4982_v16 = vpop.permute.xlu1 %4981  ;;  %v12369_v47 = vpop.permute.xlu0 %4973  ;;  %v3623_v25 = vadd.f32 %v3622_v9, %v3509_v27  ;;  %9852 = vrcp.f32 %v4036_v41  ;;  %v12401_v56 = vmul.f32 %v9825_v59, %v4167_v51 }
 0x313   : > { %14478 = vst [vmem:[#allocation63_spill] sm:$0xff] %v12369_v47  ;;  %v9827_v43 = vpop.eup %9826  ;;  %v3624_v49 = vpop.f32.mrf.mxu1  ;;  %9854 = vtanh.f32 %v3621_v36 }
 0x314   : > { %v12375_v0 = vpop.eup %9828  ;;  %v4040_v45 = vadd.f32 1.0, %v9827_v43  ;;  %v3513_v27 = vpop.f32.mrf.mxu0  ;;  %v3625_v6 = vadd.f32 %v3624_v49, %v3511_v24  ;;  %9856 = vrcp.f32 %v4039_v40  ;;  %v12397_v40 = vsel %vm1615_vm13, %v12369_v47, %v4982_v16 }
 0x315   : > { %v9831_v8 = vpop.eup %9830  ;;  %v3626_v9 = vpop.f32.mrf.mxu1  ;;  %9858 = vtanh.f32 %v3623_v25  ;;  %14484 = vst [vmem:[#allocation66_spill] sm:$0xff] %v12397_v40 }
 0x316   : > { %v4043_v31 = vadd.f32 1.0, %v9831_v8  ;;  %v12389_v43 = vpop.permute.xlu1 %5547  ;;  %v12391_v5 = vpop.permute.xlu0 %4983  ;;  %v3627_v48 = vadd.f32 %v3626_v9, %v3513_v27  ;;  %9860 = vrcp.f32 %v4040_v45  ;;  %v14486_v45 = vld [vmem:[#allocation56_spill] sm:$0xff] }
 0x317   : > { %14482 = vst [vmem:[#allocation64_spill] sm:$0xff] %v12389_v43  ;;  %14483 = vst [vmem:[#allocation67_spill] sm:$0xff] %v12391_v5  ;;  %v9833_v55 = vpop.eup %9832  ;;  %v3663_v15 = vpop.f32.mrf.mxu0  ;;  %v12407_v25 = vsel %vm1615_vm13, %v4982_v16, %v12391_v5  ;;  %9862 = vtanh.f32 %v3625_v6 }
 0x318   : > { %v12399_v49 = vpop.eup %9834  ;;  %v3776_v24 = vpop.f32.mrf.mxu1  ;;  %14485 = vst [vmem:[#allocation68_spill] sm:$0xff] %v12407_v25  ;;  %v4044_v27 = vadd.f32 1.0, %v9833_v55  ;;  %9864 = vrcp.f32 %v4043_v31 }
 0x319   : > { %v12409_v8 = vpop.eup %9836  ;;  %v3777_v9 = vadd.f32 %v3776_v24, %v3663_v15  ;;  %v3665_v41 = vpop.f32.mrf.mxu0  ;;  %9866 = vtanh.f32 %v3627_v48 }
 0x31a   : > { %v9839_v36 = vpop.eup %9838  ;;  %v3778_v47 = vpop.f32.mrf.mxu1  ;;  %9868 = vrcp.f32 %v4044_v27  ;;  %v14490_v27 = vld [vmem:[#allocation36_spill] sm:$0xff] }
 0x31b   : > { %v12413_v51 = vpop.permute.xlu1 %5551  ;;  %v12415_v23 = vpop.eup %9840  ;;  %v4191_v58 = vmul.f32 %v9839_v36, %v12263_v38  ;;  %v8829_v16 = vmul.f32 -1.442695, %v3777_v9  ;;  %v3779_v5 = vadd.f32 %v3778_v47, %v3665_v41  ;;  %v4168_v36 = vld [vmem:[#allocation24 + $0x48] sm:$0xff]  ;;  %v14489_v9 = vmul.bf16 %v12289_v12, %v14469_v14 }
 0x31c   : > { %14487 = vst [vmem:[#allocation38_spill] sm:$0xff] %v12413_v51  ;;  %v3667_v40 = vpop.f32.mrf.mxu0  ;;  %v5550_v55 = vpop.permute.xlu0 %5549  ;;  %v14491_v12 = vmul.bf16 %v12284_v18, %v14467_v4  ;;  %v4184_v18 = vmul.f32 %v12375_v0, %v4168_v36 }
 0x31d   : > { %v9843_v6 = vpop.eup %9842  ;;  %v3780_v15 = vpop.f32.mrf.mxu1  ;;  %v12420_v31 = vsel %vm2125_vm8, %v12389_v43, %v5550_v55  ;;  %v4207_v59 = vadd.f32 %v4191_v58, %v12358_v10  ;;  %v8830_v2 = vmul.f32 -1.442695, %v3779_v5  ;;  %9870 = vpow2.f32 %v8829_v16  ;;  %7087 = vmatprep.subr.bf16.mxu0 %v14489_v9 }
 0x31e   : > { %14488 = vst [vmem:[#allocation39_spill] sm:$0xff] %v12420_v31  ;;  %v12422_v24 = vpop.eup %9844  ;;  %v4192_v25 = vmul.f32 %v9843_v6, %v12269_v19  ;;  %v3669_v38 = vpop.f32.mrf.mxu0  ;;  %v3781_v47 = vadd.f32 %v3780_v15, %v3667_v40  ;;  %v12431_v43 = vsel %vm2125_vm8, %v5550_v55, %v12413_v51  ;;  %7088 = vmatpush1.bf16.msra.mxu0 %v14491_v12  ;;  %v4171_v15 = vld [vmem:[#allocation24 + $0x60] sm:$0xff]  ;;  %v14493_v51 = vld [vmem:[#allocation37_spill] sm:$0xff]  ;;  %v4172_v12 = vld [vmem:[#allocation24 + $0x68] sm:$0xff] }
 0x31f   : > { %v9847_v48 = vpop.eup %9846  ;;  %v3782_v41 = vpop.f32.mrf.mxu1  ;;  %9872 = vtanh.f32 %v4207_v59  ;;  %4255 = vst [vmem:[#allocation24] sm:$0xff] %v4207_v59  ;;  %v4187_v0 = vmul.f32 %v12399_v49, %v4171_v15 }
 0x320   : > { %v4976_v58 = vpop.permute.xlu1 %4975  ;;  %v12435_v19 = vpop.eup %9848  ;;  %v4208_v5 = vadd.f32 %v4192_v25, %v12362_v34  ;;  %v4195_v40 = vmul.f32 %v9847_v48, %v12271_v28  ;;  %9874 = vpow2.f32 %v8830_v2  ;;  %v3783_v9 = vadd.f32 %v3782_v41, %v3669_v38 }
 0x321   : > { %v3673_v16 = vpop.f32.mrf.mxu0  ;;  %v12442_v6 = vpop.permute.xlu0 %4971  ;;  %v8833_v46 = vmul.f32 -1.442695, %v3781_v47  ;;  %v14494_v41 = vmul.bf16 %v12307_v50, %v14472_v7  ;;  %v14495_v47 = vmul.bf16 %v12302_v17, %v14470_v33 }
 0x322   : > { %14492 = vst [vmem:[#allocation46_spill] sm:$0xff] %v12442_v6  ;;  %v9851_v55 = vpop.eup %9850  ;;  %v3786_v10 = vpop.f32.mrf.mxu1  ;;  %9876 = vtanh.f32 %v4208_v5  ;;  %4256 = vst [vmem:[#allocation24 + $0x8] sm:$0xff] %v4208_v5  ;;  %v4211_v34 = vadd.f32 %v4195_v40, %v12371_v37  ;;  %v8834_v50 = vmul.f32 -1.442695, %v3783_v9  ;;  %v4188_v9 = vmul.f32 %v12409_v8, %v4172_v12 }
 0x323   : > { %v12446_v59 = vpop.eup %9852  ;;  %v4196_v28 = vmul.f32 %v9851_v55, %v12277_v26  ;;  %v3675_v25 = vpop.f32.mrf.mxu0  ;;  %v3787_v2 = vadd.f32 %v3786_v10, %v3673_v16  ;;  %7200 = vmatprep.subr.bf16.mxu1 %v14494_v41  ;;  %v12466_v55 = vsel %vm1615_vm13, %v12442_v6, %v4976_v58 }
 0x324   : > { %v9855_v48 = vpop.eup %9854  ;;  %v3788_v38 = vpop.f32.mrf.mxu1  ;;  %9878 = vtanh.f32 %v4211_v34  ;;  %4259 = vst [vmem:[#allocation24 + $0x20] sm:$0xff] %v4211_v34  ;;  %7201 = vmatpush1.bf16.msra.mxu1 %v14495_v47 }
 0x325   : > { %v12454_v31 = vpop.eup %9856  ;;  %v4212_v37 = vadd.f32 %v4196_v28, %v12385_v63  ;;  %v4199_v26 = vmul.f32 %v9855_v48, %v12279_v35  ;;  %v3677_v36 = vpop.f32.mrf.mxu0  ;;  %v3789_v40 = vadd.f32 %v3788_v38, %v3675_v25  ;;  %v8837_v25 = vmul.f32 -1.442695, %v3787_v2 }
 0x326   : > { %v12462_v10 = vpop.permute.xlu0 %4977  ;;  %v9859_v5 = vpop.eup %9858 }
 0x327   : > { %14496 = vst [vmem:[#allocation47_spill] sm:$0xff] %v12462_v10  ;;  %v3790_v16 = vpop.f32.mrf.mxu1  ;;  %v12468_v63 = vpop.permute.xlu1 %5539  ;;  %v12472_v35 = vsel %vm1615_vm13, %v4976_v58, %v12462_v10  ;;  %9880 = vtanh.f32 %v4212_v37  ;;  %4260 = vst [vmem:[#allocation24 + $0x28] sm:$0xff] %v4212_v37  ;;  %v4215_v17 = vadd.f32 %v4199_v26, %v12401_v56  ;;  %v4200_v15 = vmul.f32 %v9859_v5, %v12295_v54 }
 0x328   : > { %14497 = vst [vmem:[#allocation42_spill] sm:$0xff] %v12468_v63  ;;  %v12474_v49 = vpop.eup %9860  ;;  %v3679_v34 = vpop.f32.mrf.mxu0  ;;  %9882 = vpow2.f32 %v8833_v46  ;;  %v3791_v37 = vadd.f32 %v3790_v16, %v3677_v36  ;;  %v8838_v46 = vmul.f32 -1.442695, %v3789_v40 }
 0x329   : > { %v9863_v28 = vpop.eup %9862  ;;  %v3792_v48 = vpop.f32.mrf.mxu1  ;;  %9884 = vtanh.f32 %v4215_v17  ;;  %4263 = vst [vmem:[#allocation24 + $0x40] sm:$0xff] %v4215_v17  ;;  %v4216_v56 = vadd.f32 %v4200_v15, %v4184_v18 }
 0x32a   : > { %v12483_v41 = vpop.eup %9864  ;;  %v4203_v54 = vmul.f32 %v9863_v28, %v12309_v62  ;;  %v3683_v8 = vpop.f32.mrf.mxu0  ;;  %9886 = vpow2.f32 %v8834_v50  ;;  %v3793_v5 = vadd.f32 %v3792_v48, %v3679_v34  ;;  %v8841_v50 = vmul.f32 -1.442695, %v3791_v37 }
 0x32b   : > { %v9867_v12 = vpop.eup %9866  ;;  %v3796_v2 = vpop.f32.mrf.mxu1  ;;  %9888 = vtanh.f32 %v4216_v56  ;;  %4264 = vst [vmem:[#allocation24 + $0x48] sm:$0xff] %v4216_v56  ;;  %v14499_v34 = vmul.bf16 %v12331_v57, %v14469_v14  ;;  %v14501_v37 = vmul.bf16 %v12324_v22, %v14467_v4 }
 0x32c   : > { %v4219_v26 = vadd.f32 %v4203_v54, %v4187_v0  ;;  %v4204_v47 = vmul.f32 %v9867_v12, %v12317_v53  ;;  %v3685_v38 = vpop.f32.mrf.mxu0  ;;  %v12487_v58 = vpop.eup %9868  ;;  %9890 = vpow2.f32 %v8837_v25  ;;  %v3797_v17 = vadd.f32 %v3796_v2, %v3683_v8 }
 0x32d   : > { %v3798_v18 = vpop.f32.mrf.mxu1  ;;  %v12489_v15 = vpop.permute.xlu1 %5543  ;;  %7089 = vmatprep.subr.bf16.mxu0 %v14499_v34  ;;  %v8842_v54 = vmul.f32 -1.442695, %v3793_v5 }
 0x32e   : > { %14498 = vst [vmem:[#allocation43_spill] sm:$0xff] %v12489_v15  ;;  %v9871_v62 = vpop.eup %9870  ;;  %9892 = vtanh.f32 %v4219_v26  ;;  %4267 = vst [vmem:[#allocation24 + $0x60] sm:$0xff] %v4219_v26  ;;  %v4220_v36 = vadd.f32 %v4204_v47, %v4188_v9  ;;  %v3687_v40 = vpop.f32.mrf.mxu0  ;;  %v3799_v0 = vadd.f32 %v3798_v18, %v3685_v38  ;;  %7090 = vmatpush1.bf16.msra.mxu0 %v14501_v37  ;;  %v8845_v8 = vmul.f32 -1.442695, %v3797_v17 }
 0x32f   : > { %v5542_v16 = vpop.permute.xlu0 %5541  ;;  %v9873_v28 = vpop.eup %9872  ;;  %9894 = vpow2.f32 %v8838_v46  ;;  %v4001_v47 = vadd.f32 1.0, %v9871_v62 }
 0x330   : > { %v3800_v53 = vpop.f32.mrf.mxu1  ;;  %v12496_v25 = vsel %vm2125_vm8, %v12468_v63, %v5542_v16  ;;  %v12500_v48 = vsel %vm2125_vm8, %v5542_v16, %v12489_v15  ;;  %v9875_v9 = vpop.eup %9874  ;;  %v4239_v56 = vmul.f32 %v9873_v28, %v12415_v23  ;;  %9896 = vtanh.f32 %v4220_v36  ;;  %4268 = vst [vmem:[#allocation24 + $0x68] sm:$0xff] %v4220_v36 }
 0x331   : > { %14500 = vst [vmem:[#allocation56_spill] sm:$0xff] %v12496_v25  ;;  %v3689_v38 = vpop.f32.mrf.mxu0  ;;  %v9877_v57 = vpop.eup %9876  ;;  %v3801_v12 = vadd.f32 %v3800_v53, %v3687_v40  ;;  %9898 = vpow2.f32 %v8841_v50  ;;  %v8846_v36 = vmul.f32 -1.442695, %v3799_v0  ;;  %v4002_v28 = vadd.f32 1.0, %v9875_v9  ;;  %v4166_v25 = vld [vmem:[#allocation24 + $0x38] sm:$0xff] }
 0x332   : > { %v3802_v46 = vpop.f32.mrf.mxu1  ;;  %4271 = vst [vmem:[#allocation21] sm:$0xff] %v4239_v56  ;;  %v4240_v23 = vmul.f32 %v9877_v57, %v12422_v24  ;;  %v9879_v18 = vpop.eup %9878  ;;  %9900 = vpow2.f32 %v8842_v54 }
 0x333   : > { %v3693_v5 = vpop.f32.mrf.mxu0  ;;  %v3803_v22 = vadd.f32 %v3802_v46, %v3689_v38  ;;  %v4243_v40 = vmul.f32 %v9879_v18, %v12435_v19  ;;  %9902 = vpow2.f32 %v8845_v8  ;;  %v8849_v37 = vmul.f32 -1.442695, %v3801_v12 }
 0x334   : > { %v3806_v16 = vpop.f32.mrf.mxu1  ;;  %4272 = vst [vmem:[#allocation21 + $0x8] sm:$0xff] %v4240_v23  ;;  %v9305_v17 = vpack.c.bf16 %v4240_v23, %v4239_v56  ;;  %v9881_v34 = vpop.eup %9880  ;;  %9904 = vrcp.f32 %v4001_v47 }
 0x335   : > { %v3695_v53 = vpop.f32.mrf.mxu0  ;;  %v3807_v2 = vadd.f32 %v3806_v16, %v3693_v5  ;;  %v9883_v24 = vpop.eup %9882  ;;  %4275 = vst [vmem:[#allocation21 + $0x20] sm:$0xff] %v4243_v40  ;;  %v4244_v62 = vmul.f32 %v9881_v34, %v12446_v59  ;;  %v12513_v50 = vpack.c.bf16 %v4243_v40, %v4239_v56  ;;  %9906 = vpow2.f32 %v8846_v36 }
 0x336   : > { %v3808_v26 = vpop.f32.mrf.mxu1  ;;  %4335 = vst [vmem:[#allocation2 + $0x30] sm:$0xff] %v9305_v17  ;;  %5119 = vst [vmem:[#allocation5 + $0x10] sm:$0xff] %v9305_v17  ;;  %v9885_v38 = vpop.eup %9884  ;;  %v8850_v19 = vmul.f32 -1.442695, %v3803_v22  ;;  %9908 = vrcp.f32 %v4002_v28  ;;  %v14502_v5 = vmul.bf16 %v12345_v52, %v14472_v7  ;;  %v4005_v36 = vadd.f32 1.0, %v9883_v24 }
 0x337   : > { %v3697_v0 = vpop.f32.mrf.mxu0  ;;  %v9887_v54 = vpop.eup %9886  ;;  %4276 = vst [vmem:[#allocation21 + $0x28] sm:$0xff] %v4244_v62  ;;  %v9307_v57 = vpack.c.bf16 %v4244_v62, %v4243_v40  ;;  %v12516_v8 = vmul.f32 %v9885_v38, %v12454_v31  ;;  %4355 = vrot.lane.b32.xlu0 %v12513_v50, %s10694_s13  ;;  %4571 = vrot.lane.b32.xlu1 %v12513_v50, %s10692_s18  ;;  %9910 = vpow2.f32 %v8849_v37  ;;  %v8853_v12 = vmul.f32 -1.442695, %v3807_v2 }
 0x338   : > { %v3810_v9 = vpop.f32.mrf.mxu1  ;;  %v9889_v56 = vpop.eup %9888  ;;  %v3809_v46 = vadd.f32 %v3808_v26, %v3695_v53  ;;  %7202 = vmatprep.subr.bf16.mxu1 %v14502_v5  ;;  %v12529_v22 = vpack.c.bf16 %v4244_v62, %v4240_v23  ;;  %v14503_v2 = vmul.bf16 %v12341_v13, %v14470_v33  ;;  %9912 = vpow2.f32 %v8850_v19 }
 0x339   : > { %v3699_v59 = vpop.f32.mrf.mxu0  ;;  %v9891_v18 = vpop.eup %9890  ;;  %4337 = vst [vmem:[#allocation2 + $0x18] sm:$0xff] %v9307_v57  ;;  %5121 = vst [vmem:[#allocation5 + $0x360] sm:$0xff] %v9307_v57  ;;  %v12527_v31 = vmul.f32 %v9889_v56, %v12474_v49  ;;  %v4006_v28 = vadd.f32 1.0, %v9887_v54  ;;  %v3811_v23 = vadd.f32 %v3810_v9, %v3697_v0  ;;  %9914 = vpow2.f32 %v8853_v12 }
 0x33a   : > { %v3812_v47 = vpop.f32.mrf.mxu1  ;;  %4279 = vst [vmem:[#allocation21 + $0x40] sm:$0xff] %v12516_v8  ;;  %7203 = vmatpush1.bf16.msra.mxu1 %v14503_v2  ;;  %v8854_v34 = vmul.f32 -1.442695, %v3809_v46  ;;  %9916 = vrcp.f32 %v4005_v36  ;;  %v4009_v24 = vadd.f32 1.0, %v9891_v18 }
 0x33b   : > { %v3703_v16 = vpop.f32.mrf.mxu0  ;;  %v9893_v26 = vpop.eup %9892  ;;  %4280 = vst [vmem:[#allocation21 + $0x48] sm:$0xff] %v12527_v31  ;;  %v9309_v40 = vpack.c.bf16 %v12527_v31, %v12516_v8  ;;  %5135 = vrot.lane.b32.xlu1 %v12513_v50, %s10695_s17  ;;  %4573 = vrot.lane.b32.xlu0 %v12529_v22, %s10692_s18  ;;  %v3813_v19 = vadd.f32 %v3812_v47, %v3699_v59  ;;  %9918 = vrcp.f32 %v4006_v28  ;;  %v8857_v57 = vmul.f32 -1.442695, %v3811_v23 }
 0x33c   : > { %v3816_v52 = vpop.f32.mrf.mxu1  ;;  %v9895_v17 = vpop.eup %9894  ;;  %v12538_v49 = vmul.f32 %v9893_v26, %v12483_v41  ;;  %9920 = vpow2.f32 %v8854_v34 }
 0x33d   : > { %v3705_v13 = vpop.f32.mrf.mxu0  ;;  %v9897_v53 = vpop.eup %9896  ;;  %4339 = vst [vmem:[#allocation2 + $0x8] sm:$0xff] %v9309_v40  ;;  %5123 = vst [vmem:[#allocation5 + $0x480] sm:$0xff] %v9309_v40  ;;  %v4010_v38 = vadd.f32 1.0, %v9895_v17  ;;  %v3817_v56 = vadd.f32 %v3816_v52, %v3703_v16  ;;  %9922 = vrcp.f32 %v4009_v24  ;;  %v8858_v16 = vmul.f32 -1.442695, %v3813_v19 }
 0x33e   : > { %v3818_v37 = vpop.f32.mrf.mxu1  ;;  %4283 = vst [vmem:[#allocation21 + $0x60] sm:$0xff] %v12538_v49  ;;  %v4252_v41 = vmul.f32 %v9897_v53, %v12487_v58  ;;  %v9899_v0 = vpop.eup %9898 }
 0x33f   : > { %v3707_v62 = vpop.f32.mrf.mxu0  ;;  %4939 = vrot.lane.b32.xlu1 %v12513_v50, %s10696_s20  ;;  %5137 = vrot.lane.b32.xlu0 %v12529_v22, %s10695_s17  ;;  %v12551_v12 = vpop.eup %9900  ;;  %v4013_v59 = vadd.f32 1.0, %v9899_v0  ;;  %v3819_v47 = vadd.f32 %v3818_v37, %v3705_v13  ;;  %9924 = vrcp.f32 %v4010_v38  ;;  %v8861_v52 = vmul.f32 -1.442695, %v3817_v56 }
 0x340   : > { %v3820_v9 = vpop.f32.mrf.mxu1  ;;  %4284 = vst [vmem:[#allocation21 + $0x68] sm:$0xff] %v4252_v41  ;;  %v9311_v54 = vpack.c.bf16 %v4252_v41, %v12538_v49  ;;  %v9903_v5 = vpop.eup %9902  ;;  %9926 = vpow2.f32 %v8857_v57 }
 0x341   : > { %v3709_v58 = vpop.f32.mrf.mxu0  ;;  %v12553_v36 = vpop.eup %9904  ;;  %v3821_v17 = vadd.f32 %v3820_v9, %v3707_v62  ;;  %v4017_v23 = vadd.f32 1.0, %v9903_v5  ;;  %9928 = vrcp.f32 %v4013_v59  ;;  %v8862_v34 = vmul.f32 -1.442695, %v3819_v47 }
 0x342   : > { %v3822_v46 = vpop.f32.mrf.mxu1  ;;  %4341 = vst [vmem:[#allocation2 + $0x28] sm:$0xff] %v9311_v54  ;;  %5125 = vst [vmem:[#allocation5 + $0x2e0] sm:$0xff] %v9311_v54  ;;  %v9907_v26 = vpop.eup %9906  ;;  %9930 = vpow2.f32 %v8858_v16  ;;  %v12570_v59 = vpack.c.bf16 %v4252_v41, %v12527_v31 }
 0x343   : > { %v3713_v18 = vpop.f32.mrf.mxu0  ;;  %5503 = vrot.lane.b32.xlu1 %v12513_v50, %s10691_s28  ;;  %4941 = vrot.lane.b32.xlu0 %v12529_v22, %s10696_s20  ;;  %v12559_v28 = vpop.eup %9908  ;;  %v3823_v37 = vadd.f32 %v3822_v46, %v3709_v58  ;;  %v4018_v0 = vadd.f32 1.0, %v9907_v26  ;;  %9932 = vpow2.f32 %v8861_v52  ;;  %v8865_v19 = vmul.f32 -1.442695, %v3821_v17 }
 0x344   : > { %v3826_v2 = vpop.f32.mrf.mxu1  ;;  %v9911_v53 = vpop.eup %9910  ;;  %9934 = vrcp.f32 %v4017_v23  ;;  %v12567_v46 = vpack.c.bf16 %v12538_v49, %v12516_v8 }
 0x345   : > { %v3715_v40 = vpop.f32.mrf.mxu0  ;;  %v9913_v62 = vpop.eup %9912  ;;  %v3827_v9 = vadd.f32 %v3826_v2, %v3713_v18  ;;  %v4021_v57 = vadd.f32 1.0, %v9911_v53  ;;  %9936 = vpow2.f32 %v8862_v34  ;;  %v8866_v58 = vmul.f32 -1.442695, %v3823_v37 }
 0x346   : > { %v3828_v13 = vpop.f32.mrf.mxu1  ;;  %v9915_v5 = vpop.eup %9914  ;;  %9938 = vrcp.f32 %v4018_v0  ;;  %v4022_v16 = vadd.f32 1.0, %v9913_v62 }
 0x347   : > { %v3717_v24 = vpop.f32.mrf.mxu0  ;;  %4357 = vrot.lane.b32.xlu1 %v12529_v22, %s10694_s13  ;;  %5505 = vrot.lane.b32.xlu0 %v12529_v22, %s10691_s28  ;;  %v12572_v18 = vpop.eup %9916  ;;  %v3829_v2 = vadd.f32 %v3828_v13, %v3715_v40  ;;  %9940 = vpow2.f32 %v8865_v19  ;;  %v8869_v52 = vmul.f32 -1.442695, %v3827_v9  ;;  %v4025_v31 = vadd.f32 1.0, %v9915_v5 }
 0x348   : > { %v3830_v38 = vpop.f32.mrf.mxu1  ;;  %v12578_v49 = vpop.eup %9918  ;;  %9942 = vrcp.f32 %v4021_v57 }
 0x349   : > { %v3719_v54 = vpop.f32.mrf.mxu0  ;;  %v9921_v17 = vpop.eup %9920  ;;  %9944 = vpow2.f32 %v8866_v58  ;;  %v8870_v13 = vmul.f32 -1.442695, %v3829_v2  ;;  %v3831_v34 = vadd.f32 %v3830_v38, %v3717_v24 }
 0x34a   : > { %v3832_v56 = vpop.f32.mrf.mxu1  ;;  %v12580_v40 = vpop.eup %9922  ;;  %9946 = vrcp.f32 %v4022_v16  ;;  %v4026_v57 = vadd.f32 1.0, %v9921_v17 }
 0x34b   : > { %v3723_v47 = vpop.f32.mrf.mxu0  ;;  %4577 = vrot.lane.b32.xlu1 %v12567_v46, %s10692_s18  ;;  %4579 = vrot.lane.b32.xlu0 %v12570_v59, %s10692_s18  ;;  %9948 = vpow2.f32 %v8869_v52  ;;  %v8873_v38 = vmul.f32 -1.442695, %v3831_v34  ;;  %v3833_v16 = vadd.f32 %v3832_v56, %v3719_v54 }
 0x34c   : > { %v3836_v26 = vpop.f32.mrf.mxu1  ;;  %v12582_v0 = vpop.eup %9924  ;;  %9950 = vrcp.f32 %v4025_v31 }
 0x34d   : > { %v3725_v8 = vpop.f32.mrf.mxu0  ;;  %v3837_v23 = vadd.f32 %v3836_v26, %v3723_v47  ;;  %v9927_v9 = vpop.eup %9926  ;;  %v8874_v56 = vmul.f32 -1.442695, %v3833_v16  ;;  %v4014_v16 = vadd.f32 1.0, %v12551_v12 }
 0x34e   : > { %v3838_v41 = vpop.f32.mrf.mxu1  ;;  %v12588_v24 = vpop.eup %9928 }
 0x34f   : > { %v3727_v53 = vpop.f32.mrf.mxu0  ;;  %v3839_v62 = vadd.f32 %v3838_v41, %v3725_v8  ;;  %5143 = vrot.lane.b32.xlu1 %v12567_v46, %s10695_s17  ;;  %5145 = vrot.lane.b32.xlu0 %v12570_v59, %s10695_s17  ;;  %9952 = vtanh.f32 %v3837_v23  ;;  %v9931_v26 = vpop.eup %9930  ;;  %v4029_v41 = vadd.f32 1.0, %v9927_v9 }
 0x350   : > { %v3840_v37 = vpop.f32.mrf.mxu1  ;;  %9954 = vpow2.f32 %v8870_v13  ;;  %v9933_v31 = vpop.eup %9932  ;;  %v4030_v9 = vadd.f32 1.0, %v9931_v26  ;;  %v4161_v26 = vld [vmem:[#allocation24 + $0x10] sm:$0xff] }
 0x351   : > { %v3729_v19 = vpop.f32.mrf.mxu0  ;;  %v3841_v58 = vadd.f32 %v3840_v37, %v3727_v53  ;;  %9956 = vtanh.f32 %v3839_v62  ;;  %v9935_v23 = vpop.eup %9934 }
 0x352   : > { %v3842_v5 = vpop.f32.mrf.mxu1  ;;  %9958 = vrcp.f32 %v4026_v57  ;;  %v9937_v54 = vpop.eup %9936 }
 0x353   : > { %v3733_v47 = vpop.f32.mrf.mxu0  ;;  %v3843_v52 = vadd.f32 %v3842_v5, %v3729_v19  ;;  %4361 = vrot.lane.b32.xlu1 %v12567_v46, %s10694_s13  ;;  %4363 = vrot.lane.b32.xlu0 %v12570_v59, %s10694_s13  ;;  %9960 = vtanh.f32 %v3841_v58  ;;  %v9939_v37 = vpop.eup %9938 }
 0x354   : > { %v3846_v2 = vpop.f32.mrf.mxu1  ;;  %9962 = vpow2.f32 %v8873_v38  ;;  %v9941_v19 = vpop.eup %9940 }
 0x355   : > { %v3735_v8 = vpop.f32.mrf.mxu0  ;;  %v3847_v53 = vadd.f32 %v3846_v2, %v3733_v47  ;;  %9964 = vtanh.f32 %v3843_v52  ;;  %v9943_v58 = vpop.eup %9942 }
 0x356   : > { %v3848_v17 = vpop.f32.mrf.mxu1  ;;  %9966 = vrcp.f32 %v4029_v41  ;;  %v9945_v38 = vpop.eup %9944 }
 0x357   : > { %v3737_v13 = vpop.f32.mrf.mxu0  ;;  %v3849_v62 = vadd.f32 %v3848_v17, %v3735_v8  ;;  %4945 = vrot.lane.b32.xlu1 %v12567_v46, %s10696_s20  ;;  %4947 = vrot.lane.b32.xlu0 %v12570_v59, %s10696_s20  ;;  %9968 = vtanh.f32 %v3847_v53  ;;  %v9947_v2 = vpop.eup %9946  ;;  %v4033_v53 = vadd.f32 1.0, %v9933_v31 }
 0x358   : > { %v3850_v34 = vpop.f32.mrf.mxu1  ;;  %9970 = vpow2.f32 %v8874_v56  ;;  %v9949_v8 = vpop.eup %9948  ;;  %v4177_v56 = vmul.f32 %v9935_v23, %v4161_v26  ;;  %v4169_v26 = vld [vmem:[#allocation24 + $0x50] sm:$0xff] }
 0x359   : > { %v3739_v57 = vpop.f32.mrf.mxu0  ;;  %v3851_v47 = vadd.f32 %v3850_v34, %v3737_v13  ;;  %9972 = vtanh.f32 %v3849_v62  ;;  %v9951_v41 = vpop.eup %9950  ;;  %v4162_v13 = vld [vmem:[#allocation24 + $0x18] sm:$0xff] }
 0x35a   : > { %v3852_v5 = vpop.f32.mrf.mxu1  ;;  %9974 = vrcp.f32 %v4030_v9  ;;  %v4178_v6 = vmul.f32 %v9939_v37, %v4162_v13  ;;  %v4041_v13 = vadd.f32 1.0, %v9949_v8 }
 0x35b   : > { %v3853_v52 = vadd.f32 %v3852_v5, %v3739_v57  ;;  %5511 = vrot.lane.b32.xlu1 %v12567_v46, %s10691_s28  ;;  %5513 = vrot.lane.b32.xlu0 %v12570_v59, %s10691_s28  ;;  %9976 = vtanh.f32 %v3851_v47  ;;  %v4034_v57 = vadd.f32 1.0, %v9937_v54  ;;  %v4165_v5 = vld [vmem:[#allocation24 + $0x30] sm:$0xff]  ;;  %v4037_v47 = vadd.f32 1.0, %v9941_v19 }
 0x35c   : > { %v9953_v17 = vpop.eup %9952  ;;  %9978 = vrcp.f32 %v4014_v16  ;;  %v4181_v23 = vmul.f32 %v9943_v58, %v4165_v5  ;;  %v4038_v54 = vadd.f32 1.0, %v9945_v38  ;;  %v4174_v5 = vld [vmem:[#allocation24 + $0x78] sm:$0xff] }
 0x35d   : > { %v9955_v12 = vpop.eup %9954  ;;  %v4193_v34 = vmul.f32 %v9953_v17, %v12553_v36  ;;  %9980 = vtanh.f32 %v3853_v52 }
 0x35e   : > { %v9957_v62 = vpop.eup %9956  ;;  %9982 = vrcp.f32 %v4033_v53  ;;  %v4042_v38 = vadd.f32 1.0, %v9955_v12 }
 0x35f   : > { %v9959_v63 = vpop.eup %9958  ;;  %v4209_v15 = vadd.f32 %v4193_v34, %v4177_v56  ;;  %v4194_v9 = vmul.f32 %v9957_v62, %v12559_v28  ;;  %v4182_v28 = vmul.f32 %v9947_v2, %v4166_v25  ;;  %v4170_v56 = vld [vmem:[#allocation24 + $0x58] sm:$0xff]  ;;  %v4173_v34 = vld [vmem:[#allocation24 + $0x70] sm:$0xff] }
 0x360   : > { %v9961_v10 = vpop.eup %9960 }
 0x361   : > { %v9963_v16 = vpop.eup %9962  ;;  %9984 = vtanh.f32 %v4209_v15  ;;  %4257 = vst [vmem:[#allocation24 + $0x10] sm:$0xff] %v4209_v15  ;;  %v4210_v31 = vadd.f32 %v4194_v9, %v4178_v6  ;;  %v4197_v36 = vmul.f32 %v9961_v10, %v12572_v18  ;;  %v4185_v10 = vmul.f32 %v9951_v41, %v4169_v26 }
 0x362   : > { %v9965_v52 = vpop.eup %9964  ;;  %9986 = vrcp.f32 %v4034_v57  ;;  %v4045_v57 = vadd.f32 1.0, %v9963_v16 }
 0x363   : > { %v9967_v17 = vpop.eup %9966  ;;  %9988 = vtanh.f32 %v4210_v31  ;;  %4258 = vst [vmem:[#allocation24 + $0x18] sm:$0xff] %v4210_v31  ;;  %v4213_v37 = vadd.f32 %v4197_v36, %v4181_v23  ;;  %v4198_v53 = vmul.f32 %v9965_v52, %v12578_v49  ;;  %v4186_v49 = vmul.f32 %v9959_v63, %v4170_v56 }
 0x364   : > { %v9969_v19 = vpop.eup %9968  ;;  %9990 = vrcp.f32 %v4037_v47 }
 0x365   : > { %v9971_v15 = vpop.eup %9970  ;;  %9992 = vtanh.f32 %v4213_v37  ;;  %4261 = vst [vmem:[#allocation24 + $0x30] sm:$0xff] %v4213_v37  ;;  %v4214_v6 = vadd.f32 %v4198_v53, %v4182_v28  ;;  %v4201_v18 = vmul.f32 %v9969_v19, %v12580_v40  ;;  %v4189_v40 = vmul.f32 %v9967_v17, %v4173_v34 }
 0x366   : > { %v9973_v58 = vpop.eup %9972  ;;  %9994 = vrcp.f32 %v4038_v54  ;;  %v4046_v31 = vadd.f32 1.0, %v9971_v15 }
 0x367   : > { %v9975_v62 = vpop.eup %9974  ;;  %9996 = vtanh.f32 %v4214_v6  ;;  %4262 = vst [vmem:[#allocation24 + $0x38] sm:$0xff] %v4214_v6  ;;  %v4217_v25 = vadd.f32 %v4201_v18, %v4185_v10  ;;  %v4202_v2 = vmul.f32 %v9973_v58, %v12582_v0 }
 0x368   : > { %v9977_v8 = vpop.eup %9976  ;;  %9998 = vrcp.f32 %v4041_v13  ;;  %v4190_v63 = vmul.f32 %v9975_v62, %v4174_v5 }
 0x369   : > { %v9979_v9 = vpop.eup %9978  ;;  %10000 = vtanh.f32 %v4217_v25  ;;  %4265 = vst [vmem:[#allocation24 + $0x50] sm:$0xff] %v4217_v25  ;;  %v4218_v41 = vadd.f32 %v4202_v2, %v4186_v49  ;;  %v4205_v47 = vmul.f32 %v9977_v8, %v12588_v24 }
 0x36a   : > { %v9981_v12 = vpop.eup %9980  ;;  %10002 = vrcp.f32 %v4042_v38 }
 0x36b   : > { %10004 = vtanh.f32 %v4218_v41  ;;  %4266 = vst [vmem:[#allocation24 + $0x58] sm:$0xff] %v4218_v41  ;;  %v4221_v23 = vadd.f32 %v4205_v47, %v4189_v40  ;;  %v4206_v36 = vmul.f32 %v9981_v12, %v9979_v9  ;;  %v9983_v0 = vpop.eup %9982 }
 0x36c   : > { %10006 = vrcp.f32 %v4045_v57 }
 0x36d   : > { %10008 = vtanh.f32 %v4221_v23  ;;  %4269 = vst [vmem:[#allocation24 + $0x70] sm:$0xff] %v4221_v23  ;;  %v4222_v16 = vadd.f32 %v4206_v36, %v4190_v63  ;;  %v9674_v36 = vld [vmem:[#allocation12 + $0x4] ss:$20 sps:$4 sm:$0xff]  }
 0x36e   : > { %v9985_v52 = vpop.eup %9984  ;;  %10010 = vrcp.f32 %v4046_v31  ;;  %7119 = vmatprep.mubr.bf16.mxu0 %v9674_v36 }
 0x36f   : > { %v9987_v54 = vpop.eup %9986  ;;  %v4241_v26 = vmul.f32 %v9985_v52, %v9983_v0  ;;  %10012 = vtanh.f32 %v4222_v16  ;;  %4270 = vst [vmem:[#allocation24 + $0x78] sm:$0xff] %v4222_v16  ;;  %v9680_v16 = vld [vmem:[#allocation12 + $0xc] ss:$20 sps:$4 sm:$0xff]  }
 0x370   : > { %v9989_v24 = vpop.eup %9988  ;;  %7232 = vmatprep.mubr.bf16.mxu1 %v9680_v16 }
 0x371   : > { %v9991_v17 = vpop.eup %9990  ;;  %4273 = vst [vmem:[#allocation21 + $0x10] sm:$0xff] %v4241_v26  ;;  %v4242_v37 = vmul.f32 %v9989_v24, %v9987_v54 }
 0x372   : > { %v9993_v28 = vpop.eup %9992 }
 0x373   : > { %v9995_v53 = vpop.eup %9994  ;;  %4274 = vst [vmem:[#allocation21 + $0x18] sm:$0xff] %v4242_v37  ;;  %v9306_v19 = vpack.c.bf16 %v4242_v37, %v4241_v26  ;;  %v4245_v13 = vmul.f32 %v9993_v28, %v9991_v17 }
 0x374   : > { %v9997_v56 = vpop.eup %9996 }
 0x375   : > { %v9999_v15 = vpop.eup %9998  ;;  %4336 = vst [vmem:[#allocation2] sm:$0xff] %v9306_v19  ;;  %5120 = vst [vmem:[#allocation5 + $0x208] sm:$0xff] %v9306_v19  ;;  %v4246_v6 = vmul.f32 %v9997_v56, %v9995_v53  ;;  %v12610_v10 = vpack.c.bf16 %v4245_v13, %v4241_v26 }
 0x376   : > { %4277 = vst [vmem:[#allocation21 + $0x30] sm:$0xff] %v4245_v13  ;;  %v10001_v18 = vpop.eup %10000 }
 0x377   : > { %v10003_v58 = vpop.eup %10002  ;;  %4278 = vst [vmem:[#allocation21 + $0x38] sm:$0xff] %v4246_v6  ;;  %v9308_v38 = vpack.c.bf16 %v4246_v6, %v4245_v13  ;;  %v4249_v34 = vmul.f32 %v10001_v18, %v9999_v15  ;;  %5139 = vrot.lane.b32.xlu1 %v12610_v10, %s10695_s17  ;;  %v12614_v62 = vpack.c.bf16 %v4246_v6, %v4242_v37 }
 0x378   : > { %v10005_v25 = vpop.eup %10004 }
 0x379   : > { %v10007_v49 = vpop.eup %10006  ;;  %4338 = vst [vmem:[#allocation2 + $0x10] sm:$0xff] %v9308_v38  ;;  %5122 = vst [vmem:[#allocation5 + $0x490] sm:$0xff] %v9308_v38  ;;  %v4250_v2 = vmul.f32 %v10005_v25, %v10003_v58  ;;  %4567 = vrot.lane.b32.xlu0 %v12614_v62, %s10692_s18 }
 0x37a   : > { %4281 = vst [vmem:[#allocation21 + $0x50] sm:$0xff] %v4249_v34  ;;  %v10009_v8 = vpop.eup %10008 }
 0x37b   : > { %v10011_v57 = vpop.eup %10010  ;;  %4282 = vst [vmem:[#allocation21 + $0x58] sm:$0xff] %v4250_v2  ;;  %v9310_v5 = vpack.c.bf16 %v4250_v2, %v4249_v34  ;;  %v4253_v9 = vmul.f32 %v10009_v8, %v10007_v49  ;;  %5507 = vrot.lane.b32.xlu1 %v12610_v10, %s10691_s28 }
 0x37c   : > { %v10013_v41 = vpop.eup %10012 }
 0x37d   : > { %4340 = vst [vmem:[#allocation2 + $0x20] sm:$0xff] %v9310_v5  ;;  %5124 = vst [vmem:[#allocation5 + $0x3c0] sm:$0xff] %v9310_v5  ;;  %v4254_v40 = vmul.f32 %v10013_v41, %v10011_v57  ;;  %4935 = vrot.lane.b32.xlu0 %v12614_v62, %s10696_s20  ;;  %v12628_v31 = vpack.c.bf16 %v4253_v9, %v4249_v34 }
 0x37e   : > { %4285 = vst [vmem:[#allocation21 + $0x70] sm:$0xff] %v4253_v9 }
 0x37f   : > { %4286 = vst [vmem:[#allocation21 + $0x78] sm:$0xff] %v4254_v40  ;;  %v9312_v47 = vpack.c.bf16 %v4254_v40, %v4253_v9  ;;  %4351 = vrot.lane.b32.xlu1 %v12614_v62, %s10694_s13  ;;  %v12624_v12 = vpack.c.bf16 %v4254_v40, %v4250_v2 }
 0x381   : > { %4342 = vst [vmem:[#allocation2 + $0x38] sm:$0xff] %v9312_v47  ;;  %5126 = vst [vmem:[#allocation5 + $0x300] sm:$0xff] %v9312_v47  ;;  %4569 = vrot.lane.b32.xlu0 %v12624_v12, %s10692_s18  ;;  %v14505_v47 = vld [vmem:[#allocation35_spill] sm:$0xff] }
 0x383   : > { %5147 = vrot.lane.b32.xlu1 %v12628_v31, %s10695_s17 }
 0x385   : > { %4789 = vrot.lane.b32.xlu0 %v12167_v44, %s10689_s6 }
 0x387   : > { %5515 = vrot.lane.b32.xlu1 %v12628_v31, %s10691_s28 }
 0x389   : > { %4799 = vrot.lane.b32.xlu0 %v12173_v21, %s10689_s6 }
 0x38b   : > { %4797 = vrot.lane.b32.xlu1 %v12164_v42, %s10689_s6 }
 0x38d   : > { %5365 = vrot.lane.b32.xlu0 %v12173_v21, %s10693_s15 }
 0x38f   : > { %5363 = vrot.lane.b32.xlu1 %v12164_v42, %s10693_s15 }
 0x391   : > { %4353 = vrot.lane.b32.xlu0 %v12624_v12, %s10694_s13 }
 0x393   : > { %5367 = vrot.lane.b32.xlu1 %v12182_v11, %s10693_s15 }
 0x395   : > { %4787 = vrot.lane.b32.xlu0 %v12191_v60, %s10689_s6 }
 0x397   : > { %4791 = vrot.lane.b32.xlu1 %v12189_v61, %s10689_s6 }
 0x399   : > { %4793 = vrot.lane.b32.xlu0 %v12200_v1, %s10689_s6 }
 0x39b   : > { %5355 = vrot.lane.b32.xlu1 %v12189_v61, %s10693_s15 }
 0x39d   : > { %5357 = vrot.lane.b32.xlu0 %v12200_v1, %s10693_s15 }
 0x39f   : > { %5359 = vrot.lane.b32.xlu1 %v12207_v39, %s10693_s15 }
 0x3a1   : > { %4937 = vrot.lane.b32.xlu0 %v12624_v12, %s10696_s20 }
 0x3a3   : > { %4761 = vrot.lane.b32.xlu1 %v12567_v46, %s10689_s6 }
 0x3a5   : > { %4763 = vrot.lane.b32.xlu0 %v12570_v59, %s10689_s6 }
 0x3a7   : > { %5327 = vrot.lane.b32.xlu1 %v12567_v46, %s10693_s15 }
 0x3a9   : > { %5329 = vrot.lane.b32.xlu0 %v12570_v59, %s10693_s15  ;;  %v12674_v23 = vpop.permute.xlu1 %4571  ;;  %v12678_v63 = vpop.permute.xlu0 %4355 }
 0x3ab   : > { %5331 = vrot.lane.b32.xlu1 %v12628_v31, %s10693_s15 }
 0x3ad   : > { %4751 = vrot.lane.b32.xlu0 %v12614_v62, %s10689_s6  ;;  %v12684_v0 = vpop.permute.xlu1 %5135  ;;  %v12688_v52 = vpop.permute.xlu0 %4573 }
 0x3af   : > { %4755 = vrot.lane.b32.xlu1 %v12513_v50, %s10689_s6 }
 0x3b1   : > { %4753 = vrot.lane.b32.xlu0 %v12624_v12, %s10689_s6  ;;  %v4940_v54 = vpop.permute.xlu1 %4939  ;;  %v5138_v26 = vpop.permute.xlu0 %5137 }
 0x3b3   : > { %5319 = vrot.lane.b32.xlu1 %v12513_v50, %s10693_s15 }
 0x3b5   : > { %4757 = vrot.lane.b32.xlu0 %v12529_v22, %s10689_s6  ;;  %v12700_v24 = vpop.permute.xlu1 %5503  ;;  %v12704_v17 = vpop.permute.xlu0 %4941 }
 0x3b7   : > { %5323 = vrot.lane.b32.xlu1 %v12610_v10, %s10693_s15 }
 0x3b9   : > { %5321 = vrot.lane.b32.xlu0 %v12529_v22, %s10693_s15  ;;  %v12710_v37 = vpop.permute.xlu1 %4357  ;;  %v5506_v28 = vpop.permute.xlu0 %5505 }
 0x3ba   : > { %v12782_v34 = vsel %vm2125_vm8, %v12700_v24, %v5506_v28  ;;  %v12800_v57 = vsel %vm1089_vm11, %v12678_v63, %v12710_v37 }
 0x3bb   : > { %4611 = vrot.lane.b32.xlu1 %v12207_v39, %s10692_s18 }
 0x3bd   : > { %4617 = vrot.lane.b32.xlu0 %v12182_v11, %s10692_s18  ;;  %v4578_v53 = vpop.permute.xlu1 %4577  ;;  %v12720_v19 = vpop.permute.xlu0 %4579 }
 0x3be   : > { %v4586_v16 = vsel %vm1289_vm9, %v4578_v53, %v12720_v19 }
 0x3bf   : > { %4575 = vrot.lane.b32.xlu1 %v12610_v10, %s10692_s18 }
 0x3c1   : > { %4581 = vrot.lane.b32.xlu0 %v12628_v31, %s10692_s18  ;;  %v12726_v13 = vpop.permute.xlu1 %5143  ;;  %v5146_v56 = vpop.permute.xlu0 %5145 }
 0x3c3   : > { %4427 = vrot.lane.b32.xlu1 %v12207_v39, %s10694_s13 }
 0x3c5   : > { %4433 = vrot.lane.b32.xlu0 %v12182_v11, %s10694_s13  ;;  %v12734_v15 = vpop.permute.xlu1 %4361  ;;  %v12738_v6 = vpop.permute.xlu0 %4363 }
 0x3c7   : > { %4359 = vrot.lane.b32.xlu1 %v12610_v10, %s10694_s13 }
 0x3c9   : > { %4365 = vrot.lane.b32.xlu0 %v12628_v31, %s10694_s13 }
 0x3cb   : > { %4979 = vrot.lane.b32.xlu1 %v12207_v39, %s10696_s20 }
 0x3cd   : > { %4985 = vrot.lane.b32.xlu0 %v12182_v11, %s10696_s20 }
 0x3cf   : > { %4943 = vrot.lane.b32.xlu1 %v12610_v10, %s10696_s20 }
 0x3d1   : > { %4949 = vrot.lane.b32.xlu0 %v12628_v31, %s10696_s20 }
 0x3d3   : > { %5733 = vrot.lane.b32.xlu1 %v12173_v21, %s10697_s25  ;;  %v12744_v21 = vpop.permute.xlu1 %4945 }
 0x3d5   : > { %5731 = vrot.lane.b32.xlu0 %v12164_v42, %s10697_s25  ;;  %v12748_v42 = vpop.permute.xlu0 %4947 }
 0x3d7   : > { %4801 = vrot.lane.b32.xlu1 %v12182_v11, %s10689_s6 }
 0x3d9   : > { %5735 = vrot.lane.b32.xlu0 %v12182_v11, %s10697_s25  ;;  %v12754_v11 = vpop.permute.xlu1 %5511 }
 0x3da   : > { %14504 = vst [vmem:[#allocation36_spill] sm:$0xff] %v12754_v11 }
 0x3db   : > { %5725 = vrot.lane.b32.xlu1 %v12200_v1, %s10697_s25  ;;  %v5514_v1 = vpop.permute.xlu0 %5513 }
 0x3dc   : > { %v12856_v41 = vsel %vm2125_vm8, %v12754_v11, %v5514_v1 }
 0x3dd   : > { %5723 = vrot.lane.b32.xlu0 %v12189_v61, %s10697_s25  ;;  %v12762_v61 = vsel %vm1785_vm12, %v12684_v0, %v5138_v26 }
 0x3df   : > { %4795 = vrot.lane.b32.xlu1 %v12207_v39, %s10689_s6 }
 0x3e1   : > { %5727 = vrot.lane.b32.xlu0 %v12207_v39, %s10697_s25  ;;  %v4583_v39 = vsel %vm1289_vm9, %v12674_v23, %v12688_v52 }
 0x3e2   : > { %v4640_v49 = vmul.bf16 %v4583_v39, %v14469_v14 }
 0x3e3   : > { %5697 = vrot.lane.b32.xlu1 %v12570_v59, %s10697_s25  ;;  %v5207_v59 = vmul.bf16 %v12762_v61, %v14470_v33 }
 0x3e5   : > { %5695 = vrot.lane.b32.xlu0 %v12567_v46, %s10697_s25 }
 0x3e7   : > { %4765 = vrot.lane.b32.xlu1 %v12628_v31, %s10689_s6 }
 0x3e9   : > { %v12764_v18 = vpop.permute.xlu1 %5139  ;;  %5699 = vrot.lane.b32.xlu0 %v12628_v31, %s10697_s25 }
 0x3ea   : > { %v5152_v46 = vsel %vm1785_vm12, %v5138_v26, %v12764_v18  ;;  %v5154_v26 = vsel %vm1785_vm12, %v12726_v13, %v5146_v56 }
 0x3eb   : > { %v5208_v58 = vmul.bf16 %v5152_v46, %v14472_v7  ;;  %5689 = vrot.lane.b32.xlu1 %v12529_v22, %s10697_s25  ;;  %v12778_v38 = vpop.permute.xlu0 %4567  ;;  %v12795_v22 = vsel %vm1615_vm13, %v4940_v54, %v12704_v17  ;;  %v4644_v46 = vmul.bf16 %v4586_v16, %v14469_v14  ;;  %v5211_v9 = vmul.bf16 %v5154_v26, %v14470_v33  ;;  %v14511_v33 = vld [vmem:[#allocation60_spill] sm:$0xff] }
 0x3ec   : > { %v4597_v25 = vsel %vm1289_vm9, %v12778_v38, %v12674_v23  ;;  %v14512_v61 = vmul.bf16 %v14511_v33, %v14479_v30  ;;  %v14515_v33 = vld [vmem:[#allocation65_spill] sm:$0xff] }
 0x3ed   : > { %v4639_v2 = vmul.bf16 %v4597_v25, %v14467_v4  ;;  %v12789_v8 = vpop.permute.xlu1 %5507  ;;  %5687 = vrot.lane.b32.xlu0 %v12513_v50, %s10697_s25  ;;  %7091 = vmatprep.subr.bf16.mxu0 %v4644_v46  ;;  %v9668_v46 = vld [vmem:[#allocation5 + $0x35c] ss:$368 sps:$4 sm:$0xff]  }
 0x3ee   : > { %v12804_v5 = vsel %vm2125_vm8, %v5506_v28, %v12789_v8 }
 0x3ef   : > { %4759 = vrot.lane.b32.xlu1 %v12610_v10, %s10689_s6  ;;  %v12812_v50 = vpop.permute.xlu0 %4935 }
 0x3f0   : > { %v12816_v40 = vsel %vm1615_vm13, %v12812_v50, %v4940_v54 }
 0x3f1   : > { %v12822_v23 = vpop.permute.xlu1 %4351  ;;  %5691 = vrot.lane.b32.xlu0 %v12610_v10, %s10697_s25 }
 0x3f2   : > { %v12833_v54 = vsel %vm1089_vm11, %v12822_v23, %v12678_v63 }
 0x3f3   : > { %5177 = vrot.lane.b32.xlu1 %v12191_v60, %s10695_s17  ;;  %v12841_v10 = vpop.permute.xlu0 %4569 }
 0x3f4   : > { %v4601_v39 = vsel %vm1289_vm9, %v12841_v10, %v4578_v53 }
 0x3f5   : > { %v4643_v25 = vmul.bf16 %v4601_v39, %v14467_v4  ;;  %v12847_v63 = vpop.permute.xlu1 %5147  ;;  %5185 = vrot.lane.b32.xlu0 %v12167_v44, %s10695_s17 }
 0x3f6   : > { %v5155_v31 = vsel %vm1785_vm12, %v5146_v56, %v12847_v63 }
 0x3f7   : > { %v5212_v53 = vmul.bf16 %v5155_v31, %v14472_v7  ;;  %5141 = vrot.lane.b32.xlu1 %v12614_v62, %s10695_s17  ;;  %v12861_v4 = vpop.permute.xlu0 %4789  ;;  %7092 = vmatpush1.bf16.msra.mxu0 %v4643_v25 }
 0x3f8   : > { %7093 = vmatprep.subr.bf16.mxu0 %v4640_v49  ;;  %v9665_v49 = vld [vmem:[#allocation5 + $0x404] ss:$-376 sps:$4 sm:$0xff]  }
 0x3f9   : > { %v12863_v14 = vpop.permute.xlu1 %5515  ;;  %5149 = vrot.lane.b32.xlu0 %v12624_v12, %s10695_s17  ;;  %7204 = vmatprep.subr.bf16.mxu1 %v5212_v53  ;;  %v14507_v53 = vmul.bf16 %v12367_v32, %v14479_v30 }
 0x3fa   : > { %v12871_v56 = vsel %vm2125_vm8, %v5514_v1, %v12863_v14  ;;  %7205 = vmatpush1.bf16.msra.mxu1 %v5211_v9  ;;  %v14508_v9 = vld [vmem:[#allocation58_spill] sm:$0xff] }
 0x3fb   : > { %5545 = vrot.lane.b32.xlu1 %v12191_v60, %s10691_s28  ;;  %v12877_v31 = vpop.permute.xlu0 %4799  ;;  %7206 = vmatprep.subr.bf16.mxu1 %v5208_v58 }
 0x3fc   : > { %7094 = vmatpush1.bf16.msra.mxu0 %v4639_v2  ;;  %v9663_v2 = vld [vmem:[#allocation5 + $0x400] ss:$-376 sps:$4 sm:$0xff]  }
 0x3fd   : > { %v4798_v26 = vpop.permute.xlu1 %4797  ;;  %5553 = vrot.lane.b32.xlu0 %v12167_v44, %s10691_s28  ;;  %7095 = vmatprep.subr.bf16.mxu0 %v14507_v53  ;;  %v14509_v53 = vmul.bf16 %v14508_v9, %v14477_v29  ;;  %v14514_v9 = vld [vmem:[#allocation41_spill] sm:$0xff] }
 0x3fe   : > { %v12883_v39 = vsel %vm1447_vm7, %v4798_v26, %v12877_v31  ;;  %v12887_v1 = vsel %vm1447_vm7, %v12861_v4, %v4798_v26  ;;  %v4370_v26 = vsel %vm1089_vm11, %v12734_v15, %v12738_v6  ;;  %7207 = vmatpush1.bf16.msra.mxu1 %v5207_v59 }
 0x3ff   : > { %5509 = vrot.lane.b32.xlu1 %v12614_v62, %s10691_s28  ;;  %v5366_v25 = vpop.permute.xlu0 %5365  ;;  %7208 = vmatprep.subr.bf16.mxu1 %v9665_v49  ;;  %v4460_v28 = vmul.bf16 %v4370_v26, %v14479_v30 }
 0x400   : > { %7096 = vmatpush1.bf16.msra.mxu0 %v14509_v53  ;;  %v5989_v53 = vld [vmem:[#allocation5 + $0x2e0] sm:$0xff] }
 0x401   : > { %v12895_v7 = vpop.permute.xlu1 %5363  ;;  %5517 = vrot.lane.b32.xlu0 %v12624_v12, %s10691_s28  ;;  %7097 = vmatprep.subr.bf16.mxu0 %v14512_v61  ;;  %v14516_v61 = vmul.bf16 %v14515_v33, %v14477_v29 }
 0x402   : > { %14506 = vst [vmem:[#allocation37_spill] sm:$0xff] %v12895_v7  ;;  %v12907_v16 = vsel %vm1957_vm10, %v12895_v7, %v5366_v25  ;;  %7209 = vmatpush1.bf16.msra.mxu1 %v9663_v2 }
 0x403   : > { %5737 = vrot.lane.b32.xlu1 %v12167_v44, %s10697_s25  ;;  %v12911_v58 = vpop.permute.xlu0 %4353  ;;  %7210 = vmatprep.subr.bf16.mxu1 %v9668_v46 }
 0x404   : > { %v4385_v32 = vsel %vm1089_vm11, %v12911_v58, %v12734_v15  ;;  %v14513_v15 = vld [vmem:[#allocation40_spill] sm:$0xff]  ;;  %7098 = vmatpush1.bf16.msra.mxu0 %v14516_v61 }
 0x405   : > { %v4459_v36 = vmul.bf16 %v4385_v32, %v14477_v29  ;;  %v12924_v7 = vpop.permute.xlu1 %5367  ;;  %5369 = vrot.lane.b32.xlu0 %v12167_v44, %s10693_s15  ;;  %v9666_v44 = vld [vmem:[#allocation5 + $0x358] ss:$368 sps:$4 sm:$0xff]   ;;  %7099 = vmatprep.subr.bf16.mxu0 %v4460_v28 }
 0x406   : > { %14510 = vst [vmem:[#allocation35_spill] sm:$0xff] %v12924_v7  ;;  %v12935_v49 = vsel %vm1957_vm10, %v5366_v25, %v12924_v7  ;;  %v5987_v25 = vld [vmem:[#allocation5 + $0x480] sm:$0xff]  ;;  %7211 = vmatpush1.bf16.msra.mxu1 %v9666_v44  ;;  %v14517_v44 = vmul.bf16 %v12800_v57, %v14479_v30  ;;  %v14518_v30 = vmul.bf16 %v12833_v54, %v14477_v29 }
 0x407   : > { %5729 = vrot.lane.b32.xlu1 %v12191_v60, %s10697_s25  ;;  %v12941_v32 = vpop.permute.xlu0 %4787  ;;  %v9128_v7 = vcombine.high %v5987_v25, %v5989_v53  ;;  %v9127_v11 = vcombine.low %v5987_v25, %v5989_v53  ;;  %v4954_v57 = vsel %vm1615_vm13, %v12744_v21, %v12748_v42  ;;  %v14521_v54 = vmul.bf16 %v12431_v43, %v14493_v51 }
 0x408   : > { %7100 = vmatpush1.bf16.msra.mxu0 %v4459_v36  ;;  %v14519_v36 = vld [vmem:[#allocation68_spill] sm:$0xff]  ;;  %v14527_v43 = vmul.bf16 %v12500_v48, %v14493_v51 }
 0x409   : > { %v4792_v59 = vpop.permute.xlu1 %4791  ;;  %5361 = vrot.lane.b32.xlu0 %v12191_v60, %s10693_s15  ;;  %7212 = vmatprep.subr.bf16.mxu1 %v9128_v7  ;;  %v14520_v53 = vmul.bf16 %v14519_v36, %v14486_v45  ;;  %v14522_v36 = vld [vmem:[#allocation66_spill] sm:$0xff] }
 0x40a   : > { %v12950_v26 = vsel %vm1447_vm7, %v12941_v32, %v4792_v59  ;;  %7101 = vmatprep.subr.bf16.mxu0 %v14517_v44  ;;  %7213 = vmatpush1.bf16.msra.mxu1 %v9127_v11 }
 0x40b   : > { %5701 = vrot.lane.b32.xlu1 %v12624_v12, %s10697_s25  ;;  %v12954_v2 = vpop.permute.xlu0 %4793 }
 0x40c   : > { %v12958_v33 = vsel %vm1447_vm7, %v4792_v59, %v12954_v2  ;;  %v9671_v59 = vld [vmem:[#allocation5 + $0x14] ss:$848 sps:$4 sm:$0xff]   ;;  %7102 = vmatpush1.bf16.msra.mxu0 %v14518_v30 }
 0x40d   : > { %v4832_v46 = vmul.bf16 %v12958_v33, %v14505_v47  ;;  %v12964_v61 = vpop.permute.xlu1 %5355  ;;  %5333 = vrot.lane.b32.xlu0 %v12624_v12, %s10693_s15  ;;  %7214 = vmatprep.subr.bf16.mxu1 %v9671_v59  ;;  %v9669_v12 = vld [vmem:[#allocation5 + $0x10] ss:$848 sps:$4 sm:$0xff]   ;;  %v5012_v59 = vmul.bf16 %v4954_v57, %v14486_v45  ;;  %v14541_v33 = vmul.bf16 %v12950_v26, %v11268_v3 }
 0x40e   : > { %7103 = vmatprep.subr.bf16.mxu0 %v14520_v53  ;;  %7215 = vmatpush1.bf16.msra.mxu1 %v9669_v12  ;;  %v14524_v12 = vmul.bf16 %v12472_v35, %v14486_v45  ;;  %v14543_v26 = vld [vmem:[#allocation49_spill] sm:$0xff] }
 0x40f   : > { %5693 = vrot.lane.b32.xlu1 %v12614_v62, %s10697_s25  ;;  %v5358_v28 = vpop.permute.xlu0 %5357  ;;  %7216 = vmatprep.subr.bf16.mxu1 %v14521_v54 }
 0x410   : > { %v5371_v7 = vsel %vm1957_vm10, %v12964_v61, %v5358_v28 }
 0x411   : > { %v12975_v60 = vpop.permute.xlu1 %5359  ;;  %5325 = vrot.lane.b32.xlu0 %v12614_v62, %s10693_s15  ;;  %v5399_v25 = vmul.bf16 %v5371_v7, %v14513_v15  ;;  %v14523_v7 = vmul.bf16 %v14522_v36, %v11571_v20  ;;  %v14529_v36 = vld [vmem:[#allocation56_spill] sm:$0xff] }
 0x412   : > { %v5372_v11 = vsel %vm1957_vm10, %v5358_v28, %v12975_v60  ;;  %v14530_v35 = vmul.bf16 %v14529_v36, %v14490_v27 }
 0x413   : > { %v5400_v62 = vmul.bf16 %v5372_v11, %v14514_v9  ;;  %v12992_v44 = vpop.permute.xlu0 %4937  ;;  %7104 = vmatpush2.bf16.msra.mxu0 %v14523_v7 }
 0x414   : > { %v4969_v29 = vsel %vm1615_vm13, %v12992_v44, %v12744_v21  ;;  %7105 = vmatprep.subr.bf16.mxu0 %v14524_v12  ;;  %v14525_v21 = vld [vmem:[#allocation39_spill] sm:$0xff]  ;;  %v14531_v12 = vmul.bf16 %v12871_v56, %v14493_v51  ;;  %v14533_v56 = vmul.bf16 %v12856_v41, %v14490_v27  ;;  %v14537_v41 = vmul.bf16 %v12782_v34, %v14490_v27 }
 0x415   : > { %v5011_v28 = vmul.bf16 %v4969_v29, %v11571_v20  ;;  %v4762_v30 = vpop.permute.xlu1 %4761  ;;  %v14526_v53 = vmul.bf16 %v14525_v21, %v14490_v27  ;;  %v14528_v29 = vmul.bf16 %v12466_v55, %v11571_v20  ;;  %v14532_v21 = vmul.bf16 %v12795_v22, %v14486_v45 }
 0x416   : > { %v14536_v22 = vmul.bf16 %v12883_v39, %v14505_v47  ;;  %v14539_v39 = vmul.bf16 %v12887_v1, %v11268_v3 }
 0x417   : > { %v13008_v11 = vpop.permute.xlu0 %4763  ;;  %7217 = vmatpush2.bf16.msra.mxu1 %v14526_v53  ;;  %7106 = vmatpush2.bf16.msra.mxu0 %v14528_v29 }
 0x418   : > { %7218 = vmatprep.subr.bf16.mxu1 %v14527_v43  ;;  %7107 = vmatprep.subr.bf16.mxu0 %v5012_v59  ;;  %v4770_v45 = vsel %vm1447_vm7, %v4762_v30, %v13008_v11 }
 0x419   : > { %v13016_v57 = vpop.permute.xlu1 %5327 }
 0x41b   : > { %v5330_v54 = vpop.permute.xlu0 %5329  ;;  %7219 = vmatpush2.bf16.msra.mxu1 %v14530_v35  ;;  %7108 = vmatpush2.bf16.msra.mxu0 %v5011_v28  ;;  %v14534_v28 = vmul.bf16 %v12804_v5, %v14493_v51  ;;  %v4828_v5 = vmul.bf16 %v4770_v45, %v14505_v47  ;;  %v14545_v45 = vld [vmem:[#allocation74_spill] sm:$0xff] }
 0x41c   : > { %v5338_v7 = vsel %vm1957_vm10, %v13016_v57, %v5330_v54  ;;  %7220 = vmatprep.subr.bf16.mxu1 %v14531_v12  ;;  %7109 = vmatprep.subr.bf16.mxu0 %v14532_v21 }
 0x41d   : > { %v13029_v48 = vpop.permute.xlu1 %5331  ;;  %v5395_v53 = vmul.bf16 %v5338_v7, %v14513_v15 }
 0x41e   : > { %v5339_v55 = vsel %vm1957_vm10, %v5330_v54, %v13029_v48  ;;  %v14535_v54 = vmul.bf16 %v12816_v40, %v11571_v20  ;;  %v14538_v20 = vmul.bf16 %v12935_v49, %v14514_v9  ;;  %v14540_v49 = vmul.bf16 %v12907_v16, %v14513_v15 }
 0x41f   : > { %v5396_v59 = vmul.bf16 %v5339_v55, %v14514_v9  ;;  %v13038_v43 = vpop.permute.xlu0 %4751  ;;  %7221 = vmatpush2.bf16.msra.mxu1 %v14533_v56  ;;  %v14542_v56 = vld [vmem:[#allocation51_spill] sm:$0xff] }
 0x420   : > { %7222 = vmatprep.subr.bf16.mxu1 %v14534_v28  ;;  %7110 = vmatpush2.bf16.msra.mxu0 %v14535_v54  ;;  %v9677_v28 = vld [vmem:[#allocation5 + $0x39c] ss:$-488 sps:$4 sm:$0xff]  }
 0x421   : > { %v4756_v29 = vpop.permute.xlu1 %4755  ;;  %7111 = vmatprep.subr.bf16.mxu0 %v14536_v22 }
 0x422   : > { %v4781_v27 = vsel %vm1447_vm7, %v13038_v43, %v4756_v29 }
 0x423   : > { %v13054_v36 = vpop.permute.xlu0 %4753  ;;  %7223 = vmatpush2.bf16.msra.mxu1 %v14537_v41  ;;  %v4823_v1 = vmul.bf16 %v4781_v27, %v11268_v3  ;;  %v14547_v41 = vld [vmem:[#allocation44_spill] sm:$0xff] }
 0x424   : > { %v4785_v51 = vsel %vm1447_vm7, %v13054_v36, %v4762_v30  ;;  %7224 = vmatprep.subr.bf16.mxu1 %v14538_v20  ;;  %7112 = vmatpush2.bf16.msra.mxu0 %v14539_v39  ;;  %v13109_v20 = vld [vmem:[#allocation12] ss:$20 sps:$4 sm:$0xff]  }
 0x425   : > { %v4827_v40 = vmul.bf16 %v4785_v51, %v11268_v3  ;;  %v13066_v35 = vpop.permute.xlu1 %5319  ;;  %7113 = vmatprep.subr.bf16.mxu0 %v4832_v46 }
 0x427   : > { %v13076_v34 = vpop.permute.xlu0 %4757  ;;  %7225 = vmatpush2.bf16.msra.mxu1 %v14540_v49  ;;  %v9675_v49 = vld [vmem:[#allocation5 + $0x398] ss:$-488 sps:$4 sm:$0xff]  }
 0x428   : > { %v4767_v30 = vsel %vm1447_vm7, %v4756_v29, %v13076_v34  ;;  %7226 = vmatprep.subr.bf16.mxu1 %v5400_v62  ;;  %7114 = vmatpush2.bf16.msra.mxu0 %v14541_v33  ;;  %v14544_v29 = vld [vmem:[#allocation73_spill] sm:$0xff] }
 0x429   : > { %v4824_v7 = vmul.bf16 %v4767_v30, %v14505_v47  ;;  %v13085_v12 = vpop.permute.xlu1 %5323  ;;  %7115 = vmatprep.subr.bf16.mxu0 %v4828_v5 }
 0x42b   : > { %v5322_v46 = vpop.permute.xlu0 %5321  ;;  %7227 = vmatpush2.bf16.msra.mxu1 %v5399_v25 }
 0x42c   : > { %v5335_v16 = vsel %vm1957_vm10, %v13066_v35, %v5322_v46  ;;  %v5336_v55 = vsel %vm1957_vm10, %v5322_v46, %v13085_v12  ;;  %7228 = vmatprep.subr.bf16.mxu1 %v5396_v59  ;;  %7116 = vmatpush2.bf16.msra.mxu0 %v4827_v40  ;;  %v13125_v46 = vld [vmem:[#allocation12 + $0x2c] ss:$20 sps:$4 sm:$0xff]  }
 0x42d   : > { %v5391_v62 = vmul.bf16 %v5335_v16, %v14513_v15  ;;  %v5392_v47 = vmul.bf16 %v5336_v55, %v14514_v9  ;;  %v4612_v21 = vpop.permute.xlu1 %4611  ;;  %v14546_v15 = vld [vmem:[#allocation45_spill] sm:$0xff]  ;;  %7117 = vmatprep.subr.bf16.mxu0 %v4824_v7 }
 0x42e   : > { %v13098_v3 = vsel %vm1289_vm9, %v14542_v56, %v4612_v21  ;;  %v4621_v25 = vsel %vm1289_vm9, %v4612_v21, %v14543_v26  ;;  %v14548_v56 = vld [vmem:[#allocation59_spill] sm:$0xff] }
 0x42f   : > { %v4649_v54 = vmul.bf16 %v13098_v3, %v14544_v29  ;;  %v4650_v22 = vmul.bf16 %v4621_v25, %v14545_v45  ;;  %v4618_v59 = vpop.permute.xlu0 %4617  ;;  %7229 = vmatpush2.bf16.msra.mxu1 %v5395_v53  ;;  %v9693_v3 = vld [vmem:[#allocation5 + $0x298] ss:$-152 sps:$4 sm:$0xff]  }
 0x430   : > { %v4623_v9 = vsel %vm1289_vm9, %v14546_v15, %v4618_v59  ;;  %v4624_v51 = vsel %vm1289_vm9, %v4618_v59, %v14547_v41  ;;  %7118 = vmatpush2.bf16.msra.mxu0 %v4823_v1  ;;  %7230 = vmatprep.subr.bf16.mxu1 %v5392_v47  ;;  %v14551_v59 = vld [vmem:[#allocation78_spill] sm:$0xff]  ;;  %v14552_v41 = vld [vmem:[#allocation55_spill] sm:$0xff] }
 0x431   : > { %v4653_v5 = vmul.bf16 %v4623_v9, %v14544_v29  ;;  %v4654_v40 = vmul.bf16 %v4624_v51, %v14545_v45  ;;  %v4576_v39 = vpop.permute.xlu1 %4575  ;;  %7313 = vmatprep.subr.bf16.mxu0 %v9677_v28  ;;  %v14550_v28 = vld [vmem:[#allocation77_spill] sm:$0xff] }
 0x432   : > { %v13115_v27 = vsel %vm1289_vm9, %v12688_v52, %v4576_v39  ;;  %v13119_v53 = vsel %vm1289_vm9, %v4576_v39, %v12778_v38  ;;  %v9678_v38 = vld [vmem:[#allocation12 + $0x8] ss:$20 sps:$4 sm:$0xff]   ;;  %v14553_v39 = vld [vmem:[#allocation53_spill] sm:$0xff] }
 0x433   : > { %v4641_v30 = vmul.bf16 %v13115_v27, %v14544_v29  ;;  %v4642_v7 = vmul.bf16 %v13119_v53, %v14545_v45  ;;  %v4582_v33 = vpop.permute.xlu0 %4581  ;;  %7120 = vmatmul.mubr.bf16.vlgmr.msra.gmra.mxu0 %v13109_v20  ;;  %7231 = vmatpush2.bf16.msra.mxu1 %v5391_v62  ;;  %v9687_v62 = vld [vmem:[#allocation12 + $0x34] ss:$20 sps:$4 sm:$0xff]   ;;  %v13247_v53 = vld [vmem:[#allocation12 + $0x58] ss:$20 sps:$4 sm:$0xff]  }
 0x434   : > { %v13129_v1 = vsel %vm1289_vm9, %v12720_v19, %v4582_v33  ;;  %v4588_v52 = vsel %vm1289_vm9, %v4582_v33, %v12841_v10  ;;  %v14549_v19 = vld [vmem:[#allocation57_spill] sm:$0xff]  ;;  %7314 = vmatpush1.bf16.msra.mxu0 %v9675_v49  ;;  %7129 = vmatprep.mubr.bf16.mxu0 %v13125_v46  ;;  %v13158_v49 = vld [vmem:[#allocation12 + $0x28] ss:$20 sps:$4 sm:$0xff]   ;;  %14560 = vst [vmem:[#allocation58_spill] sm:$0xff] %v13247_v53  ;;  %v13270_v27 = vld [vmem:[#allocation12 + $0xa4] ss:$20 sps:$4 sm:$0xff]  }
 0x435   : > { %v4645_v16 = vmul.bf16 %v13129_v1, %v14544_v29  ;;  %v4646_v55 = vmul.bf16 %v4588_v52, %v14545_v45  ;;  %v4428_v21 = vpop.permute.xlu1 %4427  ;;  %v9686_v10 = vld [vmem:[#allocation5 + $0x384] ss:$-312 sps:$4 sm:$0xff]   ;;  %7426 = vmatprep.subr.bf16.mxu1 %v4654_v40  ;;  %v9684_v40 = vld [vmem:[#allocation5 + $0x380] ss:$-312 sps:$4 sm:$0xff]   ;;  %v14559_v1 = vld [vmem:[#allocation63_spill] sm:$0xff] }
 0x436   : > { %v13139_v26 = vsel %vm1089_vm11, %v14548_v56, %v4428_v21  ;;  %v13143_v25 = vsel %vm1089_vm11, %v4428_v21, %v14549_v19  ;;  %7233 = vmatmul.mubr.bf16.vlgmr.msra.gmra.mxu1 %v9678_v38  ;;  %7315 = vmatprep.subr.bf16.mxu0 %v9686_v10  ;;  %v9695_v10 = vld [vmem:[#allocation5 + $0x29c] ss:$-152 sps:$4 sm:$0xff]   ;;  %v9696_v38 = vld [vmem:[#allocation12 + $0x5c] ss:$20 sps:$4 sm:$0xff]  }
 0x437   : > { %v4434_v9 = vpop.permute.xlu0 %4433  ;;  %7427 = vmatpush1.bf16.msra.mxu1 %v4653_v5  ;;  %7242 = vmatprep.mubr.bf16.mxu1 %v9687_v62  ;;  %v13176_v5 = vld [vmem:[#allocation12 + $0x54] ss:$20 sps:$4 sm:$0xff]   ;;  %v14557_v62 = vld [vmem:[#allocation82_spill] sm:$0xff] }
 0x438   : > { %v13152_v51 = vsel %vm1089_vm11, %v14552_v41, %v4434_v9  ;;  %v13156_v33 = vsel %vm1089_vm11, %v4434_v9, %v14553_v39  ;;  %7428 = vmatprep.subr.bf16.mxu1 %v4650_v22  ;;  %v9689_v22 = vld [vmem:[#allocation12 + $0x30] ss:$20 sps:$4 sm:$0xff]   ;;  %7316 = vmatpush1.bf16.msra.mxu0 %v9684_v40 }
 0x439   : > { %v4470_v52 = vmul.bf16 %v13156_v33, %v14551_v59  ;;  %v4360_v21 = vpop.permute.xlu1 %4359  ;;  %v14556_v9 = vld [vmem:[#allocation81_spill] sm:$0xff]  ;;  %7317 = vmatprep.subr.bf16.mxu0 %v9695_v10  ;;  %v14562_v29 = vmul.bf16 %v13152_v51, %v14550_v28  ;;  %v14565_v51 = vld [vmem:[#allocation71_spill] sm:$0xff] }
 0x43a   : > { %v13166_v56 = vsel %vm1089_vm11, %v12710_v37, %v4360_v21  ;;  %v13170_v19 = vsel %vm1089_vm11, %v4360_v21, %v12822_v23 }
 0x43b   : > { %v4366_v41 = vpop.permute.xlu0 %4365  ;;  %7130 = vmatmul.mubr.bf16.gmra.mxu0 %v13158_v49  ;;  %7429 = vmatpush1.bf16.msra.mxu1 %v4649_v54  ;;  %v14558_v54 = vld [vmem:[#allocation67_spill] sm:$0xff] }
 0x43c   : > { %v13180_v37 = vsel %vm1089_vm11, %v12738_v6, %v4366_v41  ;;  %v13184_v23 = vsel %vm1089_vm11, %v4366_v41, %v12911_v58  ;;  %v14554_v6 = vld [vmem:[#allocation47_spill] sm:$0xff]  ;;  %v14555_v58 = vld [vmem:[#allocation46_spill] sm:$0xff]  ;;  %7430 = vmatprep.subr.bf16.mxu1 %v4646_v55  ;;  %7139 = vmatprep.mubr.bf16.mxu0 %v13176_v5 }
 0x43d   : > { %v4980_v33 = vpop.permute.xlu1 %4979  ;;  %v13215_v55 = vld [vmem:[#allocation12 + $0x50] ss:$20 sps:$4 sm:$0xff]   ;;  %7318 = vmatpush1.bf16.msra.mxu0 %v9693_v3  ;;  %v14571_v47 = vmul.bf16 %v13184_v23, %v14551_v59 }
 0x43e   : > { %v13196_v21 = vsel %vm1615_vm13, %v14554_v6, %v4980_v33  ;;  %v13200_v41 = vsel %vm1615_vm13, %v4980_v33, %v14555_v58  ;;  %7243 = vmatmul.mubr.bf16.gmra.mxu1 %v9689_v22  ;;  %v13264_v22 = vld [vmem:[#allocation12 + $0x78] ss:$20 sps:$4 sm:$0xff]  }
 0x43f   : > { %v4986_v15 = vpop.permute.xlu0 %4985  ;;  %7431 = vmatpush1.bf16.msra.mxu1 %v4645_v16  ;;  %7252 = vmatprep.mubr.bf16.mxu1 %v9696_v38 }
 0x440   : > { %v13209_v6 = vsel %vm1615_vm13, %v14558_v54, %v4986_v15  ;;  %v13213_v33 = vsel %vm1615_vm13, %v4986_v15, %v14559_v1  ;;  %7432 = vmatprep.subr.bf16.mxu1 %v4642_v7  ;;  %v13232_v1 = vld [vmem:[#allocation12 + $0x7c] ss:$20 sps:$4 sm:$0xff]  }
 0x441   : > { %v4944_v39 = vpop.permute.xlu1 %4943  ;;  %v9702_v7 = vld [vmem:[#allocation5 + $0x310] ss:$336 sps:$4 sm:$0xff]  }
 0x442   : > { %v13223_v54 = vsel %vm1615_vm13, %v12704_v17, %v4944_v39  ;;  %v13227_v15 = vsel %vm1615_vm13, %v4944_v39, %v12812_v50  ;;  %v9704_v17 = vld [vmem:[#allocation5 + $0x314] ss:$336 sps:$4 sm:$0xff]   ;;  %v14566_v39 = vld [vmem:[#allocation72_spill] sm:$0xff] }
 0x443   : > { %v4950_v10 = vpop.permute.xlu0 %4949  ;;  %7140 = vmatmul.mubr.bf16.gmra.mxu0 %v13215_v55  ;;  %7433 = vmatpush1.bf16.msra.mxu1 %v4641_v30 }
 0x444   : > { %v13240_v50 = vsel %vm1615_vm13, %v12748_v42, %v4950_v10  ;;  %v13244_v45 = vsel %vm1615_vm13, %v4950_v10, %v12992_v44  ;;  %v13256_v42 = vld [vmem:[#allocation12 + $0x84] ss:$20 sps:$4 sm:$0xff]   ;;  %7434 = vmatprep.subr.bf16.mxu1 %v4470_v52  ;;  %7149 = vmatprep.mubr.bf16.mxu0 %v13232_v1 }
 0x445   : > { %v5734_v3 = vpop.permute.xlu1 %5733  ;;  %14561 = vst [vmem:[#allocation60_spill] sm:$0xff] %v13256_v42  ;;  %7319 = vmatprep.subr.bf16.mxu0 %v9704_v17  ;;  %v14563_v17 = vmul.bf16 %v13143_v25, %v14551_v59 }
 0x446   : > { %7253 = vmatmul.mubr.bf16.gmra.mxu1 %v13247_v53  ;;  %7320 = vmatpush1.bf16.msra.mxu0 %v9702_v7  ;;  %v14564_v7 = vld [vmem:[#allocation61_spill] sm:$0xff] }
 0x447   : > { %v13259_v44 = vpop.permute.xlu0 %5731  ;;  %7435 = vmatpush1.bf16.msra.mxu1 %v14562_v29  ;;  %7262 = vmatprep.mubr.bf16.mxu1 %v13256_v42  ;;  %v13300_v29 = vld [vmem:[#allocation12 + $0xac] ss:$20 sps:$4 sm:$0xff]  }
 0x448   : > { %v5742_v10 = vsel %vm2283_vm14, %v13259_v44, %v5734_v3  ;;  %7436 = vmatprep.subr.bf16.mxu1 %v14563_v17  ;;  %14570 = vst [vmem:[#allocation41_spill] sm:$0xff] %v13300_v29 }
 0x449   : > { %v4802_v16 = vpop.permute.xlu1 %4801  ;;  %v5771_v38 = vmul.bf16 %v5742_v10, %v14564_v7  ;;  %v14569_v10 = vmul.bf16 %v13139_v26, %v14550_v28  ;;  %v14572_v26 = vmul.bf16 %v13180_v37, %v14550_v28  ;;  %v13354_v37 = vld [vmem:[#allocation12 + $0xc8] ss:$20 sps:$4 sm:$0xff]  }
 0x44a   : > { %v13274_v30 = vsel %vm1447_vm7, %v12877_v31, %v4802_v16  ;;  %v13278_v52 = vsel %vm1447_vm7, %v4802_v16, %v12861_v4  ;;  %v13293_v4 = vld [vmem:[#allocation12 + $0x80] ss:$20 sps:$4 sm:$0xff]   ;;  %v14568_v16 = vld [vmem:[#allocation62_spill] sm:$0xff] }
 0x44b   : > { %v13288_v40 = vpop.permute.xlu0 %5735  ;;  %7150 = vmatmul.mubr.bf16.gmra.mxu0 %v13264_v22  ;;  %14567 = vst [vmem:[#allocation40_spill] sm:$0xff] %v13293_v4  ;;  %7437 = vmatpush1.bf16.msra.mxu1 %v14569_v10  ;;  %v14573_v10 = vmul.bf16 %v13170_v19, %v14551_v59  ;;  %v13339_v59 = vld [vmem:[#allocation12 + $0xa8] ss:$20 sps:$4 sm:$0xff]  }
 0x44c   : > { %v5743_v31 = vsel %vm2283_vm14, %v5734_v3, %v13288_v40  ;;  %7159 = vmatprep.mubr.bf16.mxu0 %v13270_v27  ;;  %7438 = vmatprep.subr.bf16.mxu1 %v14571_v47  ;;  %14574 = vst [vmem:[#allocation65_spill] sm:$0xff] %v13339_v59 }
 0x44d   : > { %v5772_v25 = vmul.bf16 %v5743_v31, %v14568_v16  ;;  %v5726_v17 = vpop.permute.xlu1 %5725  ;;  %v13310_v31 = vld [vmem:[#allocation12 + $0xa0] ss:$20 sps:$4 sm:$0xff]  }
 0x44e   : > { %7263 = vmatmul.mubr.bf16.gmra.mxu1 %v13293_v4  ;;  %v13327_v4 = vld [vmem:[#allocation12 + $0xcc] ss:$20 sps:$4 sm:$0xff]  }
 0x44f   : > { %v13305_v3 = vpop.permute.xlu0 %5723  ;;  %7439 = vmatpush1.bf16.msra.mxu1 %v14572_v26  ;;  %7272 = vmatprep.mubr.bf16.mxu1 %v13300_v29 }
 0x450   : > { %v5739_v58 = vsel %vm2283_vm14, %v13305_v3, %v5726_v17  ;;  %7440 = vmatprep.subr.bf16.mxu1 %v14573_v10  ;;  %7321 = vmatprep.subr.bf16.mxu0 %v5772_v25  ;;  %v13345_v10 = vld [vmem:[#allocation12 + $0xd4] ss:$20 sps:$4 sm:$0xff]   ;;  %v14577_v25 = vmul.bf16 %v13213_v33, %v14557_v62 }
 0x451   : > { %v4796_v42 = vpop.permute.xlu1 %4795  ;;  %v5767_v53 = vmul.bf16 %v5739_v58, %v14564_v7  ;;  %7322 = vmatpush1.bf16.msra.mxu0 %v5771_v38  ;;  %v14575_v58 = vmul.bf16 %v13166_v56, %v14550_v28  ;;  %14576 = vst [vmem:[#allocation68_spill] sm:$0xff] %v13345_v10  ;;  %v14578_v28 = vmul.bf16 %v13209_v6, %v14556_v9 }
 0x452   : > { %v13318_v23 = vsel %vm1447_vm7, %v12954_v2, %v4796_v42  ;;  %v13322_v47 = vsel %vm1447_vm7, %v4796_v42, %v12941_v32  ;;  %v14581_v6 = vmul.bf16 %v13196_v21, %v14556_v9  ;;  %v14584_v21 = vmul.bf16 %v13240_v50, %v14556_v9  ;;  %v13423_v50 = vld [vmem:[#allocation12 + $0x11c] ss:$20 sps:$4 sm:$0xff]  }
 0x453   : > { %v13334_v2 = vpop.permute.xlu0 %5727  ;;  %7160 = vmatmul.mubr.bf16.gmra.mxu0 %v13310_v31  ;;  %7441 = vmatpush1.bf16.msra.mxu1 %v14575_v58  ;;  %v14579_v58 = vmul.bf16 %v13200_v41, %v14557_v62  ;;  %v13385_v41 = vld [vmem:[#allocation12 + $0xd0] ss:$20 sps:$4 sm:$0xff]   ;;  %14586 = vst [vmem:[#allocation56_spill] sm:$0xff] %v13423_v50 }
 0x454   : > { %v5740_v32 = vsel %vm2283_vm14, %v5726_v17, %v13334_v2  ;;  %7442 = vmatprep.subr.bf16.mxu1 %v14577_v25  ;;  %7169 = vmatprep.mubr.bf16.mxu0 %v13327_v4  ;;  %v13373_v25 = vld [vmem:[#allocation12 + $0xf4] ss:$20 sps:$4 sm:$0xff]   ;;  %14580 = vst [vmem:[#allocation66_spill] sm:$0xff] %v13385_v41 }
 0x455   : > { %v5768_v19 = vmul.bf16 %v5740_v32, %v14568_v16  ;;  %v5698_v42 = vpop.permute.xlu1 %5697 }
 0x456   : > { %7273 = vmatmul.mubr.bf16.gmra.mxu1 %v13339_v59 }
 0x457   : > { %v13351_v17 = vpop.permute.xlu0 %5695  ;;  %7443 = vmatpush2.bf16.msra.mxu1 %v14578_v28  ;;  %7282 = vmatprep.mubr.bf16.mxu1 %v13345_v10  ;;  %v13391_v28 = vld [vmem:[#allocation12 + $0xfc] ss:$20 sps:$4 sm:$0xff]   ;;  %v14585_v10 = vmul.bf16 %v13227_v15, %v14557_v62 }
 0x458   : > { %v5706_v38 = vsel %vm2283_vm14, %v13351_v17, %v5698_v42  ;;  %7444 = vmatprep.subr.bf16.mxu1 %v14579_v58  ;;  %7323 = vmatprep.subr.bf16.mxu0 %v5768_v19  ;;  %14582 = vst [vmem:[#allocation39_spill] sm:$0xff] %v13391_v28  ;;  %v14583_v19 = vmul.bf16 %v13244_v45, %v14557_v62  ;;  %v13408_v45 = vld [vmem:[#allocation5 + $0x2d8] sm:$0xff] }
 0x459   : > { %v4766_v32 = vpop.permute.xlu1 %4765  ;;  %7324 = vmatpush1.bf16.msra.mxu0 %v5767_v53  ;;  %v13435_v62 = vld [vmem:[#allocation12 + $0xf8] ss:$20 sps:$4 sm:$0xff]  }
 0x45a   : > { %v13364_v56 = vsel %vm1447_vm7, %v13008_v11, %v4766_v32  ;;  %v13368_v33 = vsel %vm1447_vm7, %v4766_v32, %v13054_v36  ;;  %v5763_v11 = vmul.bf16 %v5706_v38, %v14564_v7  ;;  %v13400_v38 = vld [vmem:[#allocation12 + $0xf0] ss:$20 sps:$4 sm:$0xff]   ;;  %14587 = vst [vmem:[#allocation51_spill] sm:$0xff] %v13435_v62 }
 0x45b   : > { %v13379_v26 = vpop.permute.xlu0 %5699  ;;  %7170 = vmatmul.mubr.bf16.gmra.mxu0 %v13354_v37  ;;  %7445 = vmatpush2.bf16.msra.mxu1 %v14581_v6  ;;  %v13410_v6 = vld [vmem:[#allocation5 + $0xd8] sm:$0xff] }
 0x45c   : > { %v5707_v36 = vsel %vm2283_vm14, %v5698_v42, %v13379_v26  ;;  %7446 = vmatprep.subr.bf16.mxu1 %v14583_v19  ;;  %7179 = vmatprep.mubr.bf16.mxu0 %v13373_v25 }
 0x45d   : > { %v5764_v32 = vmul.bf16 %v5707_v36, %v14568_v16  ;;  %v5690_v58 = vpop.permute.xlu1 %5689 }
 0x45e   : > { %7283 = vmatmul.mubr.bf16.gmra.mxu1 %v13385_v41 }
 0x45f   : > { %v13397_v42 = vpop.permute.xlu0 %5687  ;;  %7447 = vmatpush2.bf16.msra.mxu1 %v14584_v21  ;;  %7292 = vmatprep.mubr.bf16.mxu1 %v13391_v28  ;;  %v14588_v21 = vmul.bf16 %v13223_v54, %v14556_v9  ;;  %v14591_v28 = vmul.bf16 %v13278_v52, %v14566_v39  ;;  %v13466_v52 = vld [vmem:[#allocation12 + $0x118] ss:$20 sps:$4 sm:$0xff]   ;;  %v14597_v9 = vmul.bf16 %v13274_v30, %v14565_v51 }
 0x460   : > { %v5703_v53 = vsel %vm2283_vm14, %v13397_v42, %v5690_v58  ;;  %7448 = vmatprep.subr.bf16.mxu1 %v14585_v10  ;;  %7325 = vmatprep.subr.bf16.mxu0 %v5764_v32  ;;  %v14589_v32 = vld [vmem:[#allocation54_spill] sm:$0xff] }
 0x461   : > { %v4760_v36 = vpop.permute.xlu1 %4759  ;;  %7326 = vmatpush1.bf16.msra.mxu0 %v5763_v11 }
 0x462   : > { %v13414_v19 = vsel %vm1447_vm7, %v13076_v34, %v4760_v36  ;;  %v13418_v41 = vsel %vm1447_vm7, %v4760_v36, %v13038_v43  ;;  %v5759_v34 = vmul.bf16 %v5703_v53, %v14564_v7 }
 0x463   : > { %v13429_v59 = vpop.permute.xlu0 %5691  ;;  %7180 = vmatmul.mubr.bf16.gmra.mxu0 %v13400_v38  ;;  %7449 = vmatpush2.bf16.msra.mxu1 %v14588_v21  ;;  %v13459_v21 = vld [vmem:[#allocation12 + $0x124] ss:$20 sps:$4 sm:$0xff]  }
 0x464   : > { %v5704_v43 = vsel %vm2283_vm14, %v5690_v58, %v13429_v59  ;;  %v14590_v58 = vld [vmem:[#allocation52_spill] sm:$0xff]  ;;  %7450 = vmatprep.subr.bf16.mxu1 %v14591_v28  ;;  %7189 = vmatprep.mubr.bf16.mxu0 %v13423_v50  ;;  %14594 = vst [vmem:[#allocation49_spill] sm:$0xff] %v13459_v21 }
 0x465   : > { %v5760_v10 = vmul.bf16 %v5704_v43, %v14568_v16  ;;  %v5178_v36 = vpop.permute.xlu1 %5177  ;;  %v14592_v16 = vld [vmem:[#allocation79_spill] sm:$0xff]  ;;  %v14593_v43 = vld [vmem:[#allocation80_spill] sm:$0xff] }
 0x466   : > { %v13445_v7 = vsel %vm1785_vm12, %v14589_v32, %v5178_v36  ;;  %v13449_v53 = vsel %vm1785_vm12, %v5178_v36, %v14590_v58  ;;  %v14595_v32 = vld [vmem:[#allocation50_spill] sm:$0xff]  ;;  %v14596_v36 = vld [vmem:[#allocation48_spill] sm:$0xff]  ;;  %7293 = vmatmul.mubr.bf16.gmra.mxu1 %v13435_v62 }
 0x467   : > { %v5186_v54 = vpop.permute.xlu0 %5185  ;;  %7451 = vmatpush2.bf16.msra.mxu1 %v14597_v9  ;;  %7302 = vmatprep.mubr.bf16.mxu1 %v13459_v21 }
 0x468   : > { %v5192_v15 = vsel %vm1785_vm12, %v14595_v32, %v5186_v54  ;;  %v5205_v58 = vsel %vm1785_vm12, %v5186_v54, %v14596_v36  ;;  %v14598_v32 = vmul.bf16 %v13322_v47, %v14566_v39  ;;  %7327 = vmatprep.subr.bf16.mxu0 %v5760_v10  ;;  %v14602_v10 = vmul.bf16 %v13318_v23, %v14565_v51  ;;  %v14604_v47 = vld [vmem:[#allocation70_spill] sm:$0xff]  ;;  %v13531_v23 = vld [vmem:[#allocation12 + $0x10] ss:$20 sps:$4 sm:$0xff]  }
 0x469   : > { %v5221_v28 = vmul.bf16 %v5192_v15, %v14592_v16  ;;  %v5222_v11 = vmul.bf16 %v5205_v58, %v14593_v43  ;;  %v5142_v29 = vpop.permute.xlu1 %5141  ;;  %7328 = vmatpush1.bf16.msra.mxu0 %v5759_v34  ;;  %v14601_v15 = vld [vmem:[#allocation42_spill] sm:$0xff]  ;;  %v14605_v34 = vmul.bf16 %v13368_v33, %v14566_v39  ;;  %14608 = vst [vmem:[#allocation74_spill] sm:$0xff] %v13531_v23  ;;  %v14332_v36 = vmov 0  }
 0x46a   : > { %v13475_v50 = vsel %vm1785_vm12, %v12764_v18, %v5142_v29  ;;  %v13479_v54 = vsel %vm1785_vm12, %v5142_v29, %v12684_v0  ;;  %7452 = vmatprep.subr.bf16.mxu1 %v14598_v32  ;;  %v13498_v29 = vld [vmem:[#allocation12 + $0x120] ss:$20 sps:$4 sm:$0xff]  }
 0x46b   : > { %v5150_v30 = vpop.permute.xlu0 %5149  ;;  %7190 = vmatmul.mubr.bf16.gmra.mxu0 %v13466_v52  ;;  %14599 = vst [vmem:[#allocation73_spill] sm:$0xff] %v13498_v29  ;;  %v14600_v32 = vld [vmem:[#allocation43_spill] sm:$0xff]  ;;  %7453 = vmatpush2.bf16.msra.mxu1 %v14602_v10  ;;  %v14615_v10 = vld [vmem:[#allocation84_spill] sm:$0xff] }
 0x46c   : > { %v13491_v18 = vsel %vm1785_vm12, %v12847_v63, %v5150_v30  ;;  %v13495_v0 = vsel %vm1785_vm12, %v5150_v30, %v12726_v13  ;;  %v14603_v30 = vld [vmem:[#allocation69_spill] sm:$0xff]  ;;  %7454 = vmatprep.subr.bf16.mxu1 %v14605_v34  ;;  %7539 = vmatprep.subr.bf16.mxu0 %v5222_v11  ;;  %v14609_v11 = vmul.bf16 %v13364_v56, %v14565_v51  ;;  %v14611_v56 = vld [vmem:[#allocation36_spill] sm:$0xff] }
 0x46d   : > { %v5214_v9 = vmul.bf16 %v13495_v0, %v14593_v43  ;;  %v5546_v58 = vpop.permute.xlu1 %5545  ;;  %7345 = vmatprep.mubr.bf16.mxu0 %v14332_v36  ;;  %v9735_v36 = vld [vmem:[#allocation5 + $0x9c] ss:$1064 sps:$4 sm:$0xff]  }
 0x46e   : > { %v13506_v63 = vsel %vm2125_vm8, %v14600_v32, %v5546_v58  ;;  %v13510_v13 = vsel %vm2125_vm8, %v5546_v58, %v14601_v15  ;;  %v14606_v32 = vld [vmem:[#allocation38_spill] sm:$0xff]  ;;  %v14607_v15 = vld [vmem:[#allocation64_spill] sm:$0xff]  ;;  %7303 = vmatmul.mubr.bf16.gmra.mxu1 %v13498_v29 }
 0x46f   : > { %v5554_v21 = vpop.permute.xlu0 %5553  ;;  %7455 = vmatpush2.bf16.msra.mxu1 %v14609_v11  ;;  %v14620_v29 = vld [vmem:[#allocation76_spill] sm:$0xff] }
 0x470   : > { %v13524_v62 = vsel %vm2125_vm8, %v14606_v32, %v5554_v21  ;;  %v13528_v58 = vsel %vm2125_vm8, %v5554_v21, %v14607_v15  ;;  %v10272_v15 = vld [vmem:[#allocation12 + $0x4] ss:$20 sps:$4 sm:$0xff]  }
 0x471   : > { %v5510_v34 = vpop.permute.xlu1 %5509  ;;  %7458 = vmatprep.mubr.bf16.mxu1 %v10272_v15  ;;  %v14619_v15 = vld [vmem:[#allocation75_spill] sm:$0xff] }
 0x472   : > { %v13540_v32 = vsel %vm2125_vm8, %v12789_v8, %v5510_v34  ;;  %v13544_v21 = vsel %vm2125_vm8, %v5510_v34, %v12700_v24  ;;  %v14610_v8 = vmul.bf16 %v13418_v41, %v14566_v39  ;;  %v14612_v41 = vmul.bf16 %v13414_v19, %v14565_v51  ;;  %v14617_v19 = vld [vmem:[#allocation37_spill] sm:$0xff] }
 0x473   : > { %v5518_v33 = vpop.permute.xlu0 %5517  ;;  %7346 = vmatmul.mubr.bf16.vlgmr.msra.gmra.mxu0 %v13531_v23 }
 0x474   : > { %7456 = vmatprep.subr.bf16.mxu1 %v14610_v8  ;;  %v13558_v24 = vsel %vm2125_vm8, %v12863_v14, %v5518_v33  ;;  %v13562_v34 = vsel %vm2125_vm8, %v5518_v33, %v14611_v56  ;;  %7540 = vmatpush1.bf16.msra.mxu0 %v5221_v28  ;;  %v14613_v33 = vmul.bf16 %v13449_v53, %v14593_v43  ;;  %v9733_v8 = vld [vmem:[#allocation5 + $0x98] ss:$1064 sps:$4 sm:$0xff]   ;;  %v14614_v56 = vld [vmem:[#allocation83_spill] sm:$0xff] }
 0x475   : > { %v5738_v0 = vpop.permute.xlu1 %5737  ;;  %7457 = vmatpush2.bf16.msra.mxu1 %v14612_v41  ;;  %v9213_v28 = vcombine.low %v13408_v45, %v13410_v6  ;;  %v14618_v41 = vmov 0  }
 0x476   : > { %v13571_v39 = vsel %vm2283_vm14, %v13288_v40, %v5738_v0  ;;  %v13575_v14 = vsel %vm2283_vm14, %v5738_v0, %v13259_v44  ;;  %7541 = vmatprep.subr.bf16.mxu0 %v14613_v33  ;;  %7652 = vmatprep.subr.bf16.mxu1 %v9735_v36  ;;  %v14616_v0 = vld [vmem:[#allocation35_spill] sm:$0xff]  ;;  %v13598_v33 = vld [vmem:[#allocation12 + $0x38] ss:$20 sps:$4 sm:$0xff]  }
 0x477   : > { %v5370_v44 = vpop.permute.xlu0 %5369  ;;  %7355 = vmatprep.mubr.bf16.mxu0 %v14618_v41 }
 0x478   : > { %v13591_v51 = vsel %vm1957_vm10, %v14616_v0, %v5370_v44  ;;  %v13595_v53 = vsel %vm1957_vm10, %v5370_v44, %v14617_v19  ;;  %7459 = vmatmul.mubr.bf16.vlgmr.msra.gmra.mxu1 %v13109_v20  ;;  %v14621_v0 = vmul.bf16 %v13445_v7, %v14592_v16  ;;  %v14622_v7 = vcombine.high %v13408_v45, %v13410_v6  ;;  %v9737_v6 = vld [vmem:[#allocation5 + $0x158] ss:$400 sps:$4 sm:$0xff]  }
 0x479   : > { %v5406_v11 = vmul.bf16 %v13595_v53, %v14620_v29  ;;  %v5730_v23 = vpop.permute.xlu1 %5729  ;;  %7653 = vmatpush1.bf16.msra.mxu1 %v9733_v8  ;;  %7468 = vmatprep.mubr.bf16.mxu1 %v13125_v46  ;;  %v14623_v45 = vmul.bf16 %v13491_v18, %v14592_v16  ;;  %v14624_v46 = vmul.bf16 %v13479_v54, %v14593_v43  ;;  %v14646_v53 = vld [vmem:[#allocation68_spill] sm:$0xff] }
 0x47a   : > { %v13607_v36 = vsel %vm2283_vm14, %v13334_v2, %v5730_v23  ;;  %v13611_v44 = vsel %vm2283_vm14, %v5730_v23, %v13305_v3  ;;  %7542 = vmatpush1.bf16.msra.mxu0 %v14621_v0  ;;  %7654 = vmatprep.subr.bf16.mxu1 %v14622_v7  ;;  %v9739_v23 = vld [vmem:[#allocation5 + $0x15c] ss:$400 sps:$4 sm:$0xff]  }
 0x47b   : > { %v5769_v19 = vmul.bf16 %v13607_v36, %v14614_v56  ;;  %v5770_v40 = vmul.bf16 %v13611_v44, %v14615_v10  ;;  %v5362_v20 = vpop.permute.xlu0 %5361  ;;  %7543 = vmatprep.subr.bf16.mxu0 %v5214_v9  ;;  %7356 = vmatmul.mubr.bf16.gmra.mxu0 %v13598_v33  ;;  %v14648_v36 = vld [vmem:[#allocation39_spill] sm:$0xff] }
 0x47c   : > { %v13622_v2 = vsel %vm1957_vm10, %v12975_v60, %v5362_v20  ;;  %v13626_v3 = vsel %vm1957_vm10, %v5362_v20, %v12964_v61  ;;  %7365 = vmatprep.mubr.bf16.mxu0 %v14618_v41  ;;  %v14649_v44 = vld [vmem:[#allocation51_spill] sm:$0xff] }
 0x47d   : > { %v5402_v9 = vmul.bf16 %v13626_v3, %v14620_v29  ;;  %v5702_v0 = vpop.permute.xlu1 %5701  ;;  %7655 = vmatpush1.bf16.msra.mxu1 %v9213_v28  ;;  %v13661_v28 = vld [vmem:[#allocation12 + $0x60] ss:$20 sps:$4 sm:$0xff]  }
 0x47e   : > { %v13639_v60 = vsel %vm2283_vm14, %v13379_v26, %v5702_v0  ;;  %v5721_v61 = vsel %vm2283_vm14, %v5702_v0, %v13351_v17  ;;  %7544 = vmatpush1.bf16.msra.mxu0 %v14623_v45  ;;  %v9742_v26 = vld [vmem:[#allocation5 + $0x26c] ss:$-80 sps:$4 sm:$0xff]   ;;  %7656 = vmatprep.subr.bf16.mxu1 %v9739_v23  ;;  %v9746_v0 = vld [vmem:[#allocation5 + $0x284] ss:$-336 sps:$4 sm:$0xff]   ;;  %v14625_v23 = vmul.bf16 %v13475_v50, %v14592_v16 }
 0x47f   : > { %v5765_v20 = vmul.bf16 %v13639_v60, %v14614_v56  ;;  %v5766_v7 = vmul.bf16 %v5721_v61, %v14615_v10  ;;  %v5334_v8 = vpop.permute.xlu0 %5333  ;;  %7545 = vmatprep.subr.bf16.mxu0 %v14624_v46  ;;  %v9744_v61 = vld [vmem:[#allocation5 + $0x280] ss:$-336 sps:$4 sm:$0xff]  }
 0x480   : > { %v13654_v17 = vsel %vm1957_vm10, %v13029_v48, %v5334_v8  ;;  %v13658_v18 = vsel %vm1957_vm10, %v5334_v8, %v13016_v57  ;;  %7469 = vmatmul.mubr.bf16.gmra.mxu1 %v13158_v49  ;;  %v9740_v8 = vld [vmem:[#allocation5 + $0x268] ss:$-80 sps:$4 sm:$0xff]   ;;  %v9749_v49 = vld [vmem:[#allocation5 + $0x24] ss:$200 sps:$4 sm:$0xff]  }
 0x481   : > { %v5398_v43 = vmul.bf16 %v13658_v18, %v14620_v29  ;;  %v5694_v54 = vpop.permute.xlu1 %5693  ;;  %7657 = vmatpush1.bf16.msra.mxu1 %v9737_v6  ;;  %7478 = vmatprep.mubr.bf16.mxu1 %v13176_v5  ;;  %v9747_v6 = vld [vmem:[#allocation5 + $0x20] ss:$200 sps:$4 sm:$0xff]   ;;  %v14627_v5 = vmul.bf16 %v13571_v39, %v14614_v56 }
 0x482   : > { %v5705_v48 = vsel %vm2283_vm14, %v13429_v59, %v5694_v54  ;;  %v5717_v57 = vsel %vm2283_vm14, %v5694_v54, %v13397_v42  ;;  %7546 = vmatpush1.bf16.msra.mxu0 %v14625_v23  ;;  %7658 = vmatprep.subr.bf16.mxu1 %v9746_v0  ;;  %v13695_v0 = vld [vmem:[#allocation12 + $0x88] ss:$20 sps:$4 sm:$0xff]   ;;  %v13710_v39 = vld [vmem:[#allocation12 + $0xb0] ss:$20 sps:$4 sm:$0xff]  }
 0x483   : > { %v5761_v45 = vmul.bf16 %v5705_v48, %v14614_v56  ;;  %v5762_v46 = vmul.bf16 %v5717_v57, %v14615_v10  ;;  %v5326_v60 = vpop.permute.xlu0 %5325  ;;  %7547 = vmatprep.subr.bf16.mxu0 %v9742_v26  ;;  %7366 = vmatmul.mubr.bf16.gmra.mxu0 %v13661_v28  ;;  %v14626_v26 = vmul.bf16 %v13575_v14, %v14615_v10  ;;  %v9753_v54 = vld [vmem:[#allocation5 + $0x20c] ss:$648 sps:$4 sm:$0xff]   ;;  %v9755_v56 = vld [vmem:[#allocation12 + $0xd8] ss:$20 sps:$4 sm:$0xff]  }
 0x484   : > { %v13679_v59 = vsel %vm1957_vm10, %v13085_v12, %v5326_v60  ;;  %v13683_v42 = vsel %vm1957_vm10, %v5326_v60, %v13066_v35  ;;  %v5990_v12 = vld [vmem:[#allocation5 + $0x300] sm:$0xff]  ;;  %7375 = vmatprep.mubr.bf16.mxu0 %v14618_v41  ;;  %v14629_v10 = vmul.bf16 %v13524_v62, %v14603_v30  ;;  %v14633_v62 = vmul.bf16 %v13558_v24, %v14603_v30  ;;  %v14640_v24 = vld [vmem:[#allocation74_spill] sm:$0xff] }
 0x485   : > { %v5393_v50 = vmul.bf16 %v13679_v59, %v14619_v15  ;;  %v5394_v16 = vmul.bf16 %v13683_v42, %v14620_v29  ;;  %7659 = vmatpush1.bf16.msra.mxu1 %v9744_v61  ;;  %v5988_v35 = vld [vmem:[#allocation5 + $0x3c0] sm:$0xff] }
 0x486   : > { %7548 = vmatpush1.bf16.msra.mxu0 %v9740_v8  ;;  %7660 = vmatprep.subr.bf16.mxu1 %v14626_v26  ;;  %v9130_v60 = vcombine.high %v5988_v35, %v5990_v12  ;;  %v9129_v14 = vcombine.low %v5988_v35, %v5990_v12  ;;  %v10277_v29 = vld [vmem:[#allocation12 + $0x5c] ss:$20 sps:$4 sm:$0xff]  }
 0x487   : > { %7549 = vmatprep.subr.bf16.mxu0 %v9749_v49 }
 0x488   : > { %7479 = vmatmul.mubr.bf16.gmra.mxu1 %v13215_v55  ;;  %v9751_v55 = vld [vmem:[#allocation5 + $0x208] ss:$648 sps:$4 sm:$0xff]  }
 0x489   : > { %7661 = vmatpush1.bf16.msra.mxu1 %v14627_v5  ;;  %7488 = vmatprep.mubr.bf16.mxu1 %v13232_v1  ;;  %v14628_v1 = vmul.bf16 %v13528_v58, %v14604_v47  ;;  %v14631_v58 = vmul.bf16 %v13506_v63, %v14603_v30  ;;  %v14638_v63 = vld [vmem:[#allocation56_spill] sm:$0xff] }
 0x48a   : > { %7550 = vmatpush1.bf16.msra.mxu0 %v9747_v6  ;;  %7662 = vmatprep.subr.bf16.mxu1 %v5770_v40  ;;  %v14644_v40 = vld [vmem:[#allocation41_spill] sm:$0xff] }
 0x48b   : > { %7551 = vmatprep.subr.bf16.mxu0 %v9130_v60  ;;  %7376 = vmatmul.mubr.bf16.gmra.mxu0 %v13695_v0 }
 0x48c   : > { %7385 = vmatprep.mubr.bf16.mxu0 %v14618_v41 }
 0x48d   : > { %7663 = vmatpush1.bf16.msra.mxu1 %v5769_v19  ;;  %v14650_v19 = vld [vmem:[#allocation49_spill] sm:$0xff] }
 0x48e   : > { %7552 = vmatpush1.bf16.msra.mxu0 %v9129_v14  ;;  %7664 = vmatprep.subr.bf16.mxu1 %v5766_v7 }
 0x48f   : > { %7553 = vmatprep.subr.bf16.mxu0 %v9753_v54 }
 0x490   : > { %7489 = vmatmul.mubr.bf16.gmra.mxu1 %v13264_v22  ;;  %v14630_v22 = vmul.bf16 %v13510_v13, %v14604_v47  ;;  %v9756_v13 = vld [vmem:[#allocation12 + $0x100] ss:$20 sps:$4 sm:$0xff]  }
 0x491   : > { %7665 = vmatpush1.bf16.msra.mxu1 %v5765_v20  ;;  %7498 = vmatprep.mubr.bf16.mxu1 %v13270_v27  ;;  %v14632_v27 = vmul.bf16 %v13562_v34, %v14604_v47  ;;  %v10276_v34 = vld [vmem:[#allocation12 + $0x30] ss:$20 sps:$4 sm:$0xff]  }
 0x492   : > { %7554 = vmatpush1.bf16.msra.mxu0 %v9751_v55  ;;  %7666 = vmatprep.subr.bf16.mxu1 %v5762_v46 }
 0x493   : > { %7555 = vmatprep.subr.bf16.mxu0 %v14628_v1  ;;  %7386 = vmatmul.mubr.bf16.gmra.mxu0 %v13710_v39 }
 0x494   : > { %7395 = vmatprep.mubr.bf16.mxu0 %v14618_v41 }
 0x495   : > { %7667 = vmatpush1.bf16.msra.mxu1 %v5761_v45 }
 0x496   : > { %7556 = vmatpush2.bf16.msra.mxu0 %v14629_v10 }
 0x497   : > { %7557 = vmatprep.subr.bf16.mxu0 %v14630_v22 }
 0x498   : > { %7499 = vmatmul.mubr.bf16.gmra.mxu1 %v13310_v31  ;;  %v14634_v31 = vmul.bf16 %v13544_v21, %v14604_v47  ;;  %v14636_v47 = vmul.bf16 %v13591_v51, %v14619_v15  ;;  %v10275_v21 = vld [vmem:[#allocation12 + $0x34] ss:$20 sps:$4 sm:$0xff]  }
 0x499   : > { %7508 = vmatprep.mubr.bf16.mxu1 %v13327_v4  ;;  %v14635_v4 = vmul.bf16 %v13540_v32, %v14603_v30  ;;  %v10273_v30 = vld [vmem:[#allocation12 + $0xc] ss:$20 sps:$4 sm:$0xff]   ;;  %v14639_v32 = vmul.bf16 %v13654_v17, %v14619_v15  ;;  %v14645_v51 = vld [vmem:[#allocation65_spill] sm:$0xff] }
 0x49a   : > { %7558 = vmatpush2.bf16.msra.mxu0 %v14631_v58 }
 0x49b   : > { %7559 = vmatprep.subr.bf16.mxu0 %v14632_v27  ;;  %7396 = vmatmul.mubr.bf16.gmra.mxu0 %v9755_v56 }
 0x49c   : > { %7405 = vmatprep.mubr.bf16.mxu0 %v14618_v41 }
 0x49e   : > { %7560 = vmatpush2.bf16.msra.mxu0 %v14633_v62 }
 0x49f   : > { %7561 = vmatprep.subr.bf16.mxu0 %v14634_v31 }
 0x4a0   : > { %7509 = vmatmul.mubr.bf16.gmra.mxu1 %v13354_v37  ;;  %v9757_v37 = vld [vmem:[#allocation12 + $0x128] ss:$20 sps:$4 sm:$0xff]  }
 0x4a1   : > { %7518 = vmatprep.mubr.bf16.mxu1 %v13373_v25  ;;  %v14637_v25 = vmul.bf16 %v13622_v2, %v14619_v15  ;;  %v14643_v15 = vld [vmem:[#allocation40_spill] sm:$0xff]  ;;  %v14651_v2 = vld [vmem:[#allocation73_spill] sm:$0xff] }
 0x4a2   : > { %7562 = vmatpush2.bf16.msra.mxu0 %v14635_v4 }
 0x4a3   : > { %7563 = vmatprep.subr.bf16.mxu0 %v5406_v11  ;;  %7406 = vmatmul.mubr.bf16.gmra.mxu0 %v9756_v13  ;;  %v14642_v11 = vld [vmem:[#allocation60_spill] sm:$0xff] }
 0x4a4   : > { %7415 = vmatprep.mubr.bf16.mxu0 %v14618_v41 }
 0x4a6   : > { %7564 = vmatpush2.bf16.msra.mxu0 %v14636_v47 }
 0x4a7   : > { %7565 = vmatprep.subr.bf16.mxu0 %v5402_v9 }
 0x4a8   : > { %7519 = vmatmul.mubr.bf16.gmra.mxu1 %v13400_v38  ;;  %v10274_v38 = vld [vmem:[#allocation12 + $0x8] ss:$20 sps:$4 sm:$0xff]  }
 0x4a9   : > { %7528 = vmatprep.mubr.bf16.mxu1 %v14638_v63 }
 0x4aa   : > { %7566 = vmatpush2.bf16.msra.mxu0 %v14637_v25 }
 0x4ab   : > { %7567 = vmatprep.subr.bf16.mxu0 %v5398_v43  ;;  %7416 = vmatmul.mubr.bf16.gmra.mxu0 %v9757_v37 }
 0x4ac   : > { %7571 = vmatprep.mubr.bf16.mxu0 %v10273_v30 }
 0x4ae   : > { %7568 = vmatpush2.bf16.msra.mxu0 %v14639_v32 }
 0x4af   : > { %7569 = vmatprep.subr.bf16.mxu0 %v5394_v16 }
 0x4b0   : > { %7529 = vmatmul.mubr.bf16.gmra.mxu1 %v13466_v52  ;;  %v14641_v52 = vld [vmem:[#allocation58_spill] sm:$0xff] }
 0x4b1   : > { %7684 = vmatprep.mubr.bf16.mxu1 %v14618_v41 }
 0x4b2   : > { %7570 = vmatpush2.bf16.msra.mxu0 %v5393_v50 }
 0x4b5   : > { %7572 = vmatmul.mubr.bf16.vlgmr.msra.gmra.mxu0 %v10274_v38 }
 0x4b6   : > { %7581 = vmatprep.mubr.bf16.mxu0 %v10275_v21 }
 0x4b8   : > { %7685 = vmatmul.mubr.bf16.vlgmr.msra.gmra.mxu1 %v14640_v24 }
 0x4b9   : > { %7694 = vmatprep.mubr.bf16.mxu1 %v14618_v41 }
 0x4bd   : > { %7582 = vmatmul.mubr.bf16.gmra.mxu0 %v10276_v34 }
 0x4be   : > { %7591 = vmatprep.mubr.bf16.mxu0 %v10277_v29 }
 0x4c0   : > { %7695 = vmatmul.mubr.bf16.gmra.mxu1 %v13598_v33  ;;  %v14647_v33 = vld [vmem:[#allocation66_spill] sm:$0xff] }
 0x4c1   : > { %7704 = vmatprep.mubr.bf16.mxu1 %v14618_v41 }
 0x4c5   : > { %7592 = vmatmul.mubr.bf16.gmra.mxu0 %v14641_v52 }
 0x4c6   : > { %7601 = vmatprep.mubr.bf16.mxu0 %v14642_v11 }
 0x4c8   : > { %7705 = vmatmul.mubr.bf16.gmra.mxu1 %v13661_v28 }
 0x4c9   : > { %7714 = vmatprep.mubr.bf16.mxu1 %v14618_v41 }
 0x4cd   : > { %7602 = vmatmul.mubr.bf16.gmra.mxu0 %v14643_v15 }
 0x4ce   : > { %7611 = vmatprep.mubr.bf16.mxu0 %v14644_v40 }
 0x4d0   : > { %7715 = vmatmul.mubr.bf16.gmra.mxu1 %v13695_v0 }
 0x4d1   : > { %7724 = vmatprep.mubr.bf16.mxu1 %v14618_v41 }
 0x4d5   : > { %7612 = vmatmul.mubr.bf16.gmra.mxu0 %v14645_v51 }
 0x4d6   : > { %7621 = vmatprep.mubr.bf16.mxu0 %v14646_v53 }
 0x4d8   : > { %7725 = vmatmul.mubr.bf16.gmra.mxu1 %v13710_v39 }
 0x4d9   : > { %7734 = vmatprep.mubr.bf16.mxu1 %v14618_v41 }
 0x4dd   : > { %7622 = vmatmul.mubr.bf16.gmra.mxu0 %v14647_v33 }
 0x4de   : > { %7631 = vmatprep.mubr.bf16.mxu0 %v14648_v36 }
 0x4e0   : > { %7735 = vmatmul.mubr.bf16.gmra.mxu1 %v9755_v56 }
 0x4e1   : > { %7744 = vmatprep.mubr.bf16.mxu1 %v14618_v41 }
 0x4e5   : > { %7632 = vmatmul.mubr.bf16.gmra.mxu0 %v14649_v44 }
 0x4e6   : > { %7641 = vmatprep.mubr.bf16.mxu0 %v14650_v19 }
 0x4e8   : > { %7745 = vmatmul.mubr.bf16.gmra.mxu1 %v9756_v13 }
 0x4e9   : > { %7754 = vmatprep.mubr.bf16.mxu1 %v14618_v41 }
 0x4ed   : > { %7642 = vmatmul.mubr.bf16.gmra.mxu0 %v14651_v2 }
 0x4f0   : > { %7755 = vmatmul.mubr.bf16.gmra.mxu1 %v9757_v37 }
 0x4f3   : > { %v7121_v3 = vpop.f32.mrf.mxu0 }
 0x4f5   : > { %v7123_v9 = vpop.f32.mrf.mxu0 }
 0x4f6   : > { %v7234_v7 = vpop.f32.mrf.mxu1 }
 0x4f7   : > { %v7125_v20 = vpop.f32.mrf.mxu0  ;;  %v13797_v17 = vadd.f32 %v7234_v7, %v7121_v3 }
 0x4f8   : > { %v7236_v28 = vpop.f32.mrf.mxu1 }
 0x4f9   : > { %v7127_v18 = vpop.f32.mrf.mxu0  ;;  %v13799_v43 = vadd.f32 %v7236_v28, %v7123_v9 }
 0x4fa   : > { %v7238_v57 = vpop.f32.mrf.mxu1 }
 0x4fb   : > { %v7131_v48 = vpop.f32.mrf.mxu0  ;;  %v13801_v23 = vadd.f32 %v7238_v57, %v7125_v20 }
 0x4fc   : > { %v7240_v61 = vpop.f32.mrf.mxu1 }
 0x4fd   : > { %v7133_v8 = vpop.f32.mrf.mxu0  ;;  %v13803_v41 = vadd.f32 %v7240_v61, %v7127_v18 }
 0x4fe   : > { %v7244_v46 = vpop.f32.mrf.mxu1 }
 0x4ff   : > { %v7135_v45 = vpop.f32.mrf.mxu0  ;;  %v13805_v49 = vadd.f32 %v7244_v46, %v7131_v48 }
 0x500   : > { %v7246_v42 = vpop.f32.mrf.mxu1 }
 0x501   : > { %v7137_v59 = vpop.f32.mrf.mxu0  ;;  %v13807_v50 = vadd.f32 %v7246_v42, %v7133_v8 }
 0x502   : > { %v7248_v6 = vpop.f32.mrf.mxu1 }
 0x503   : > { %v7141_v16 = vpop.f32.mrf.mxu0  ;;  %v13809_v12 = vadd.f32 %v7248_v6, %v7135_v45 }
 0x504   : > { %v7250_v35 = vpop.f32.mrf.mxu1 }
 0x505   : > { %v7143_v26 = vpop.f32.mrf.mxu0  ;;  %v13811_v0 = vadd.f32 %v7250_v35, %v7137_v59 }
 0x506   : > { %v7254_v5 = vpop.f32.mrf.mxu1 }
 0x507   : > { %v7145_v60 = vpop.f32.mrf.mxu0  ;;  %v13813_v14 = vadd.f32 %v7254_v5, %v7141_v16 }
 0x508   : > { %v7256_v55 = vpop.f32.mrf.mxu1 }
 0x509   : > { %v7147_v54 = vpop.f32.mrf.mxu0  ;;  %v13815_v39 = vadd.f32 %v7256_v55, %v7143_v26 }
 0x50a   : > { %v7258_v10 = vpop.f32.mrf.mxu1 }
 0x50b   : > { %v7151_v1 = vpop.f32.mrf.mxu0  ;;  %v13817_v22 = vadd.f32 %v7258_v10, %v7145_v60 }
 0x50c   : > { %v7260_v58 = vpop.f32.mrf.mxu1 }
 0x50d   : > { %v7153_v56 = vpop.f32.mrf.mxu0  ;;  %v13819_v27 = vadd.f32 %v7260_v58, %v7147_v54 }
 0x50e   : > { %v7264_v31 = vpop.f32.mrf.mxu1 }
 0x50f   : > { %v7155_v62 = vpop.f32.mrf.mxu0  ;;  %v13821_v13 = vadd.f32 %v7264_v31, %v7151_v1 }
 0x510   : > { %v7266_v47 = vpop.f32.mrf.mxu1 }
 0x511   : > { %v7157_v4 = vpop.f32.mrf.mxu0  ;;  %v13823_v37 = vadd.f32 %v7266_v47, %v7153_v56 }
 0x512   : > { %v7268_v63 = vpop.f32.mrf.mxu1 }
 0x513   : > { %v7161_v25 = vpop.f32.mrf.mxu0  ;;  %v13825_v30 = vadd.f32 %v7268_v63, %v7155_v62 }
 0x514   : > { %v7270_v38 = vpop.f32.mrf.mxu1 }
 0x515   : > { %v7163_v32 = vpop.f32.mrf.mxu0  ;;  %v13827_v21 = vadd.f32 %v7270_v38, %v7157_v4 }
 0x516   : > { %v7274_v34 = vpop.f32.mrf.mxu1 }
 0x517   : > { %v7165_v24 = vpop.f32.mrf.mxu0  ;;  %v13829_v29 = vadd.f32 %v7274_v34, %v7161_v25 }
 0x518   : > { %v7276_v11 = vpop.f32.mrf.mxu1 }
 0x519   : > { %v7167_v52 = vpop.f32.mrf.mxu0  ;;  %v13831_v15 = vadd.f32 %v7276_v11, %v7163_v32 }
 0x51a   : > { %v7278_v51 = vpop.f32.mrf.mxu1 }
 0x51b   : > { %v7171_v40 = vpop.f32.mrf.mxu0  ;;  %v13833_v53 = vadd.f32 %v7278_v51, %v7165_v24 }
 0x51c   : > { %v7280_v36 = vpop.f32.mrf.mxu1 }
 0x51d   : > { %v7173_v33 = vpop.f32.mrf.mxu0  ;;  %v13835_v44 = vadd.f32 %v7280_v36, %v7167_v52 }
 0x51e   : > { %v7284_v2 = vpop.f32.mrf.mxu1 }
 0x51f   : > { %v7175_v19 = vpop.f32.mrf.mxu0  ;;  %v13837_v3 = vadd.f32 %v7284_v2, %v7171_v40 }
 0x520   : > { %v7286_v20 = vpop.f32.mrf.mxu1 }
 0x521   : > { %v7177_v9 = vpop.f32.mrf.mxu0  ;;  %v13839_v7 = vadd.f32 %v7286_v20, %v7173_v33 }
 0x522   : > { %v7288_v28 = vpop.f32.mrf.mxu1 }
 0x523   : > { %v13841_v18 = vpop.f32.mrf.mxu0  ;;  %v13843_v48 = vadd.f32 %v7288_v28, %v7175_v19 }
 0x524   : > { %v7290_v8 = vpop.f32.mrf.mxu1 }
 0x525   : > { %v13845_v57 = vpop.f32.mrf.mxu0  ;;  %v13847_v61 = vadd.f32 %v7290_v8, %v7177_v9 }
 0x526   : > { %v13851_v46 = vpop.f32.mrf.mxu1 }
 0x527   : > { %v13849_v45 = vpop.f32.mrf.mxu0 }
 0x528   : > { %v13855_v42 = vpop.f32.mrf.mxu1 }
 0x529   : > { %v13853_v59 = vpop.f32.mrf.mxu0 }
 0x52a   : > { %v13859_v6 = vpop.f32.mrf.mxu1 }
 0x52b   : > { %v13857_v16 = vpop.f32.mrf.mxu0 }
 0x52c   : > { %v13863_v35 = vpop.f32.mrf.mxu1 }
 0x52d   : > { %v13861_v26 = vpop.f32.mrf.mxu0 }
 0x52e   : > { %v13867_v5 = vpop.f32.mrf.mxu1 }
 0x52f   : > { %v13865_v60 = vpop.f32.mrf.mxu0 }
 0x530   : > { %v13871_v55 = vpop.f32.mrf.mxu1 }
 0x531   : > { %v13869_v54 = vpop.f32.mrf.mxu0 }
 0x532   : > { %v13873_v1 = vpop.f32.mrf.mxu1 }
 0x533   : > { %v7347_v10 = vpop.f32.mrf.mxu0 }
 0x534   : > { %v13875_v56 = vpop.f32.mrf.mxu1  ;;  %v7348_v62 = vadd.f32 %v7347_v10, %v13797_v17 }
 0x535   : > { %v7349_v58 = vpop.f32.mrf.mxu0 }
 0x536   : > { %v7350_v47 = vadd.f32 %v7349_v58, %v13799_v43  ;;  %v9219_v38 = vmul.f32 -1.442695, %v7348_v62 }
 0x537   : > { %v7351_v31 = vpop.f32.mrf.mxu0 }
 0x538   : > { %v13878_v4 = vpop.f32.mrf.mxu1  ;;  %v7352_v63 = vadd.f32 %v7351_v31, %v13801_v23  ;;  %v9220_v11 = vmul.f32 -1.442695, %v7350_v47  ;;  %10014 = vpow2.f32 %v9219_v38 }
 0x539   : > { %v7353_v25 = vpop.f32.mrf.mxu0 }
 0x53a   : > { %v13882_v32 = vpop.f32.mrf.mxu1  ;;  %v7354_v24 = vadd.f32 %v7353_v25, %v13803_v41  ;;  %v9223_v51 = vmul.f32 -1.442695, %v7352_v63  ;;  %10016 = vpow2.f32 %v9220_v11 }
 0x53b   : > { %v7357_v34 = vpop.f32.mrf.mxu0 }
 0x53c   : > { %v13885_v52 = vpop.f32.mrf.mxu1  ;;  %v7358_v40 = vadd.f32 %v7357_v34, %v13805_v49  ;;  %v9224_v43 = vmul.f32 -1.442695, %v7354_v24  ;;  %10018 = vpow2.f32 %v9223_v51 }
 0x53d   : > { %v7359_v17 = vpop.f32.mrf.mxu0 }
 0x53e   : > { %v7360_v33 = vadd.f32 %v7359_v17, %v13807_v50  ;;  %v13889_v36 = vpop.f32.mrf.mxu1  ;;  %v9227_v41 = vmul.f32 -1.442695, %v7358_v40  ;;  %10020 = vpow2.f32 %v9224_v43 }
 0x53f   : > { %v7361_v23 = vpop.f32.mrf.mxu0 }
 0x540   : > { %v7362_v19 = vadd.f32 %v7361_v23, %v13809_v12  ;;  %v13892_v2 = vpop.f32.mrf.mxu1  ;;  %v9228_v20 = vmul.f32 -1.442695, %v7360_v33  ;;  %10022 = vpow2.f32 %v9227_v41 }
 0x541   : > { %v7363_v9 = vpop.f32.mrf.mxu0 }
 0x542   : > { %v13894_v28 = vpop.f32.mrf.mxu1  ;;  %v9231_v49 = vmul.f32 -1.442695, %v7362_v19  ;;  %10024 = vpow2.f32 %v9228_v20  ;;  %v7364_v24 = vadd.f32 %v7363_v9, %v13811_v0 }
 0x543   : > { %v7367_v8 = vpop.f32.mrf.mxu0 }
 0x544   : > { %v7368_v50 = vadd.f32 %v7367_v8, %v13813_v14  ;;  %v13897_v10 = vpop.f32.mrf.mxu1  ;;  %10026 = vpow2.f32 %v9231_v49 }
 0x545   : > { %v7369_v58 = vpop.f32.mrf.mxu0 }
 0x546   : > { %v9235_v12 = vmul.f32 -1.442695, %v7368_v50  ;;  %v7370_v62 = vadd.f32 %v7369_v58, %v13815_v39  ;;  %v13900_v31 = vpop.f32.mrf.mxu1  ;;  %v10015_v39 = vpop.eup %10014 }
 0x547   : > { %v7371_v47 = vpop.f32.mrf.mxu0  ;;  %v10017_v19 = vpop.eup %10016  ;;  %v7909_v20 = vadd.f32 1.0, %v10015_v39 }
 0x548   : > { %v9236_v25 = vmul.f32 -1.442695, %v7370_v62  ;;  %v7372_v63 = vadd.f32 %v7371_v47, %v13817_v22  ;;  %v13903_v38 = vpop.f32.mrf.mxu1  ;;  %10028 = vpow2.f32 %v9235_v12  ;;  %v9232_v22 = vmul.f32 -1.442695, %v7364_v24 }
 0x549   : > { %v7373_v14 = vpop.f32.mrf.mxu0  ;;  %v7910_v12 = vadd.f32 1.0, %v10017_v19 }
 0x54a   : > { %v9239_v34 = vmul.f32 -1.442695, %v7372_v63  ;;  %v7374_v11 = vadd.f32 %v7373_v14, %v13819_v27  ;;  %v13907_v40 = vpop.f32.mrf.mxu1  ;;  %10030 = vpow2.f32 %v9236_v25  ;;  %v10019_v27 = vpop.eup %10018 }
 0x54b   : > { %v7377_v17 = vpop.f32.mrf.mxu0  ;;  %v10021_v8 = vpop.eup %10020  ;;  %v7913_v25 = vadd.f32 1.0, %v10019_v27 }
 0x54c   : > { %v9240_v51 = vmul.f32 -1.442695, %v7374_v11  ;;  %v7378_v33 = vadd.f32 %v7377_v17, %v13821_v13  ;;  %v13910_v43 = vpop.f32.mrf.mxu1  ;;  %10032 = vpow2.f32 %v9239_v34  ;;  %v7914_v24 = vadd.f32 1.0, %v10021_v8 }
 0x54d   : > { %v7379_v23 = vpop.f32.mrf.mxu0  ;;  %v10023_v47 = vpop.eup %10022 }
 0x54e   : > { %v9243_v0 = vmul.f32 -1.442695, %v7378_v33  ;;  %v7380_v41 = vadd.f32 %v7379_v23, %v13823_v37  ;;  %v13913_v9 = vpop.f32.mrf.mxu1  ;;  %10034 = vpow2.f32 %v9240_v51  ;;  %v7917_v39 = vadd.f32 1.0, %v10023_v47 }
 0x54f   : > { %v7381_v49 = vpop.f32.mrf.mxu0  ;;  %10036 = vpow2.f32 %v9232_v22  ;;  %v10025_v37 = vpop.eup %10024 }
 0x550   : > { %v9244_v50 = vmul.f32 -1.442695, %v7380_v41  ;;  %v7382_v58 = vadd.f32 %v7381_v49, %v13825_v30  ;;  %v13916_v13 = vpop.f32.mrf.mxu1  ;;  %10038 = vpow2.f32 %v9243_v0  ;;  %v7918_v22 = vadd.f32 1.0, %v10025_v37 }
 0x551   : > { %v7383_v62 = vpop.f32.mrf.mxu0  ;;  %10040 = vrcp.f32 %v7909_v20  ;;  %v10027_v34 = vpop.eup %10026 }
 0x552   : > { %v13918_v63 = vpop.f32.mrf.mxu1  ;;  %10042 = vpow2.f32 %v9244_v50  ;;  %v9247_v11 = vmul.f32 -1.442695, %v7382_v58  ;;  %v7384_v17 = vadd.f32 %v7383_v62, %v13827_v21  ;;  %v7921_v0 = vadd.f32 1.0, %v10027_v34 }
 0x553   : > { %v7387_v14 = vpop.f32.mrf.mxu0  ;;  %10044 = vrcp.f32 %v7910_v12 }
 0x554   : > { %v13921_v30 = vpop.f32.mrf.mxu1  ;;  %v7388_v51 = vadd.f32 %v7387_v14, %v13829_v29  ;;  %10046 = vrcp.f32 %v7913_v25  ;;  %v9248_v20 = vmul.f32 -1.442695, %v7384_v17 }
 0x555   : > { %v7389_v33 = vpop.f32.mrf.mxu0  ;;  %v10029_v19 = vpop.eup %10028  ;;  %10048 = vrcp.f32 %v7914_v24 }
 0x556   : > { %v13924_v23 = vpop.f32.mrf.mxu1  ;;  %v7390_v41 = vadd.f32 %v7389_v33, %v13831_v15  ;;  %10050 = vpow2.f32 %v9247_v11  ;;  %v9251_v8 = vmul.f32 -1.442695, %v7388_v51  ;;  %v7925_v58 = vadd.f32 1.0, %v10029_v19 }
 0x557   : > { %v7391_v27 = vpop.f32.mrf.mxu0  ;;  %v10031_v49 = vpop.eup %10030  ;;  %10052 = vrcp.f32 %v7917_v39 }
 0x558   : > { %v13927_v21 = vpop.f32.mrf.mxu1  ;;  %v7392_v29 = vadd.f32 %v7391_v27, %v13833_v53  ;;  %10054 = vrcp.f32 %v7918_v22  ;;  %v9252_v47 = vmul.f32 -1.442695, %v7390_v41  ;;  %v7926_v37 = vadd.f32 1.0, %v10031_v49 }
 0x559   : > { %v7393_v50 = vpop.f32.mrf.mxu0  ;;  %v10033_v62 = vpop.eup %10032  ;;  %10056 = vrcp.f32 %v7921_v0 }
 0x55a   : > { %v13930_v12 = vpop.f32.mrf.mxu1  ;;  %v7394_v15 = vadd.f32 %v7393_v50, %v13835_v44  ;;  %10058 = vpow2.f32 %v9248_v20  ;;  %v9255_v34 = vmul.f32 -1.442695, %v7392_v29  ;;  %v7929_v39 = vadd.f32 1.0, %v10033_v62 }
 0x55b   : > { %v7397_v25 = vpop.f32.mrf.mxu0  ;;  %v10035_v14 = vpop.eup %10034  ;;  %10060 = vpow2.f32 %v9251_v8  ;;  %v7295_v62 = vadd.f32 %v13851_v46, %v13841_v18  ;;  %v7297_v18 = vadd.f32 %v13855_v42, %v13845_v57 }
 0x55c   : > { %v13933_v24 = vpop.f32.mrf.mxu1  ;;  %v7398_v53 = vadd.f32 %v7397_v25, %v13837_v3  ;;  %v13936_v17 = vpop.eup %10036  ;;  %10062 = vrcp.f32 %v7925_v58  ;;  %v9256_v44 = vmul.f32 -1.442695, %v7394_v15  ;;  %v7930_v41 = vadd.f32 1.0, %v10035_v14 }
 0x55d   : > { %v7399_v11 = vpop.f32.mrf.mxu0  ;;  %v10039_v33 = vpop.eup %10038  ;;  %10064 = vpow2.f32 %v9252_v47 }
 0x55e   : > { %v13938_v51 = vpop.f32.mrf.mxu1  ;;  %v7400_v22 = vadd.f32 %v7399_v11, %v13839_v7  ;;  %v13941_v0 = vpop.eup %10040  ;;  %10066 = vrcp.f32 %v7926_v37  ;;  %v9259_v20 = vmul.f32 -1.442695, %v7398_v53  ;;  %v7933_v29 = vadd.f32 1.0, %v10039_v33 }
 0x55f   : > { %v7401_v19 = vpop.f32.mrf.mxu0  ;;  %v10043_v3 = vpop.eup %10042  ;;  %10068 = vpow2.f32 %v9255_v34 }
 0x560   : > { %v13943_v27 = vpop.f32.mrf.mxu1  ;;  %v13945_v8 = vpop.eup %10044  ;;  %10070 = vrcp.f32 %v7929_v39  ;;  %v7402_v50 = vadd.f32 %v7401_v19, %v13843_v48  ;;  %v9260_v47 = vmul.f32 -1.442695, %v7400_v22  ;;  %v7934_v37 = vadd.f32 1.0, %v10043_v3 }
 0x561   : > { %v7403_v49 = vpop.f32.mrf.mxu0  ;;  %v13950_v7 = vpop.eup %10046  ;;  %10072 = vpow2.f32 %v9256_v44 }
 0x562   : > { %v13948_v58 = vpop.f32.mrf.mxu1  ;;  %v13954_v25 = vpop.eup %10048  ;;  %10074 = vrcp.f32 %v7930_v41 }
 0x563   : > { %v7407_v15 = vpop.f32.mrf.mxu0  ;;  %v10051_v14 = vpop.eup %10050  ;;  %10076 = vpow2.f32 %v9259_v20 }
 0x564   : > { %v13956_v48 = vpop.f32.mrf.mxu1  ;;  %v7408_v46 = vadd.f32 %v7407_v15, %v7295_v62 }
 0x565   : > { %v7409_v34 = vpop.f32.mrf.mxu0 }
 0x566   : > { %10501 = shalt.err (!%p10498_p3)
}
 0x567   : > { %s10701_s1 = smov 512   ;;  %s10702_s6 = smov 32   ;;  %v13972_v57 = vpop.eup %10052  ;;  %10078 = vrcp.f32 %v7933_v29  ;;  %v9263_v42 = vmul.f32 -1.442695, %v7402_v50  ;;  %v7404_v53 = vadd.f32 %v7403_v49, %v13847_v61  ;;  %v13975_v11 = vpop.f32.mrf.mxu1 }
 0x568   : > { %p14653_p6 = pmov %p14652_p7  ;;  %14654 = vst [vmem:[#allocation45_spill] sm:$0xff] %v13975_v11  ;;  %s10512_s15 = scalar_lea.vmem %s13958_s29, 2048 }
 0x569   : > { %p10513_p8 = scmp.ne.s32.totalorder %s13958_s29, %s10512_s15  ;;  %p10519_p2 = scmp.lt.s32.totalorder %s13958_s29, %s13958_s29 }
 0x56a   : > { %9354 = dma.vmem_to_hbm [thread:$0]  (%p14653_p6), %s8297_s16, 2048, %s14198_s9, [#allocation22], %s10701_s1, %s10701_s1, %s10702_s6  }
 0x56b   : > { %p14655_p9 = pmov %p14653_p6  ;;  %p10520_p5 = scmp.lt.s32.totalorder %s10512_s15, %s10512_s15 }
 0x56d   : > { %p10514_p10 = pnand %p10513_p8, %p14655_p9  ;;  %p10521_p7 = por %p10520_p5, %p10519_p2 }
 0x56f   : > { %p10515_p0 = pneg %p10514_p10 }
 0x571   : > { %p10522_p12 = pnand %p10521_p7, %p10515_p0 }
 0x573   : > { %10525 = shalt.err (!%p10522_p12)
}
 0x574   : > { %p14656_p11 = pmov %p14653_p6  ;;  %v13992_v61 = vpop.eup %10054  ;;  %v7299_v39 = vadd.f32 %v13859_v6, %v13849_v45  ;;  %10080 = vpow2.f32 %v9260_v47  ;;  %v7410_v33 = vadd.f32 %v7409_v34, %v7297_v18  ;;  %v7411_v44 = vpop.f32.mrf.mxu0  ;;  %v7937_v19 = vadd.f32 1.0, %v10051_v14  ;;  %s10703_s20 = smov [#allocation26]  }
 0x575   : > { %v13996_v22 = vpop.eup %10056  ;;  %10082 = vrcp.f32 %v7934_v37  ;;  %v13998_v41 = vpop.f32.mrf.mxu1  ;;  %v7301_v20 = vadd.f32 %v13863_v35, %v13853_v59  ;;  %v9264_v62 = vmul.f32 -1.442695, %v7404_v53  ;;  %v7305_v47 = vadd.f32 %v13867_v5, %v13857_v16  ;;  %s8335_s25 = sshll.u32 %s10703_s20, 4  ;;  %p14670_p4 = pmov %p14653_p6  ;;  %s8336_s25 = int_to_ptr.vmem [resolvable:$true] %s8335_s25 }
 0x576   : > { %9358 = dma.vmem_to_hbm [thread:$0]  (%p14656_p11), %s13958_s29, 2048, %s14200_s11, [#allocation25], %s10701_s1, %s10701_s1, %s10702_s6   ;;  %v10059_v3 = vpop.eup %10058  ;;  %10084 = vtanh.f32 %v7408_v46  ;;  %v7412_v49 = vadd.f32 %v7411_v44, %v7299_v39  ;;  %v7413_v29 = vpop.f32.mrf.mxu0  ;;  %v7307_v35 = vadd.f32 %v13871_v55, %v13861_v26  ;;  %v7922_v39 = vadd.f32 1.0, %v13936_v17 }
 0x577   : > { %v10061_v50 = vpop.eup %10060  ;;  %10086 = vpow2.f32 %v9263_v42  ;;  %v14002_v45 = vpop.f32.mrf.mxu1  ;;  %v7414_v15 = vadd.f32 %v7413_v29, %v7301_v20  ;;  %v7938_v18 = vadd.f32 1.0, %v10059_v3  ;;  %s10536_s26 = scalar_lea.vmem %s8336_s25, 2048  ;;  %p10543_p6 = scmp.lt.s32.totalorder %s8336_s25, %s8336_s25 }
 0x578   : > { %v10063_v6 = vpop.eup %10062  ;;  %10088 = vtanh.f32 %v7410_v33  ;;  %v7417_v37 = vpop.f32.mrf.mxu0  ;;  %v7309_v33 = vadd.f32 %v13873_v1, %v13865_v60  ;;  %v7941_v20 = vadd.f32 1.0, %v10061_v50  ;;  %p10537_p1 = scmp.ne.s32.totalorder %s8336_s25, %s10536_s26  ;;  %p10544_p8 = scmp.lt.s32.totalorder %s10536_s26, %s10536_s26 }
 0x579   : > { %v10065_v14 = vpop.eup %10064  ;;  %10090 = vrcp.f32 %v7937_v19  ;;  %v14006_v34 = vpop.f32.mrf.mxu1  ;;  %v7418_v46 = vadd.f32 %v7417_v37, %v7305_v47 }
 0x57a   : > { %14657 = vst [vmem:[#allocation44_spill] sm:$0xff] %v14006_v34  ;;  %v10067_v59 = vpop.eup %10066  ;;  %10092 = vtanh.f32 %v7412_v49  ;;  %v7419_v42 = vpop.f32.mrf.mxu0  ;;  %v7311_v49 = vadd.f32 %v13875_v56, %v13869_v54  ;;  %v7942_v47 = vadd.f32 1.0, %v10065_v14  ;;  %p10538_p13 = pnand %p10537_p1, %p14670_p4  ;;  %p10545_p9 = por %p10544_p8, %p10543_p6 }
 0x57b   : > { %v10069_v53 = vpop.eup %10068  ;;  %10094 = vpow2.f32 %v9264_v62  ;;  %v14011_v16 = vpop.f32.mrf.mxu1  ;;  %v7420_v44 = vadd.f32 %v7419_v42, %v7307_v35 }
 0x57c   : > { %14658 = vst [vmem:[#allocation59_spill] sm:$0xff] %v14011_v16  ;;  %v10071_v5 = vpop.eup %10070  ;;  %10096 = vtanh.f32 %v7414_v15  ;;  %v7421_v19 = vpop.f32.mrf.mxu0  ;;  %v7945_v50 = vadd.f32 1.0, %v10069_v53  ;;  %p10539_p3 = pneg %p10538_p13 }
 0x57d   : > { %v10073_v3 = vpop.eup %10072  ;;  %10098 = vrcp.f32 %v7938_v18  ;;  %v14015_v26 = vpop.f32.mrf.mxu1  ;;  %v7422_v17 = vadd.f32 %v7421_v19, %v7309_v33  ;;  %v8069_v18 = vld [vmem:[#allocation26] sm:$0xff] }
 0x57e   : > { %14659 = vst [vmem:[#allocation57_spill] sm:$0xff] %v14015_v26  ;;  %v10075_v55 = vpop.eup %10074  ;;  %10100 = vtanh.f32 %v7418_v46  ;;  %v7423_v29 = vpop.f32.mrf.mxu0  ;;  %v7946_v54 = vadd.f32 1.0, %v10073_v3  ;;  %p10546_p10 = pnand %p10545_p9, %p10539_p3 }
 0x57f   : > { %v10077_v62 = vpop.eup %10076  ;;  %10102 = vrcp.f32 %v7922_v39  ;;  %v14019_v37 = vpop.f32.mrf.mxu1  ;;  %v7424_v1 = vadd.f32 %v7423_v29, %v7311_v49  ;;  %v8070_v39 = vld [vmem:[#allocation26 + $0x8] sm:$0xff] }
 0x580   : > { %14660 = vst [vmem:[#allocation77_spill] sm:$0xff] %v14019_v37  ;;  %v10079_v60 = vpop.eup %10078  ;;  %10104 = vtanh.f32 %v7420_v44  ;;  %v7573_v42 = vpop.f32.mrf.mxu0  ;;  %v7949_v46 = vadd.f32 1.0, %v10077_v62  ;;  %v8085_v44 = vmul.f32 %v10063_v6, %v8069_v18  ;;  %v8086_v62 = vmul.f32 %v10067_v59, %v8070_v39  ;;  %v8081_v39 = vld [vmem:[#allocation26 + $0x60] sm:$0xff] }
 0x581   : > { %v10081_v15 = vpop.eup %10080  ;;  %10106 = vrcp.f32 %v7941_v20  ;;  %v14021_v35 = vpop.f32.mrf.mxu1  ;;  %v8073_v20 = vld [vmem:[#allocation26 + $0x20] sm:$0xff] }
 0x582   : > { %14661 = vst [vmem:[#allocation78_spill] sm:$0xff] %v14021_v35  ;;  %v10083_v26 = vpop.eup %10082  ;;  %10108 = vtanh.f32 %v7422_v17  ;;  %v7575_v33 = vpop.f32.mrf.mxu0  ;;  %v7950_v29 = vadd.f32 1.0, %v10081_v15  ;;  %v8074_v35 = vld [vmem:[#allocation26 + $0x28] sm:$0xff]  ;;  %v8089_v18 = vmul.f32 %v10071_v5, %v8073_v20 }
 0x583   : > { %v10085_v56 = vpop.eup %10084  ;;  %10110 = vrcp.f32 %v7942_v47  ;;  %v14023_v14 = vpop.f32.mrf.mxu1 }
 0x584   : > { %14662 = vst [vmem:[#allocation55_spill] sm:$0xff] %v14023_v14  ;;  %v10087_v19 = vpop.eup %10086  ;;  %v8101_v49 = vmul.f32 %v10085_v56, %v13941_v0  ;;  %10112 = vtanh.f32 %v7424_v1  ;;  %v7577_v37 = vpop.f32.mrf.mxu0  ;;  %v8077_v14 = vld [vmem:[#allocation26 + $0x40] sm:$0xff]  ;;  %v8078_v0 = vld [vmem:[#allocation26 + $0x48] sm:$0xff]  ;;  %v7574_v1 = vadd.f32 %v7573_v42, %v13878_v4 }
 0x585   : > { %v10089_v53 = vpop.eup %10088  ;;  %10114 = vrcp.f32 %v7945_v50  ;;  %v7686_v3 = vpop.f32.mrf.mxu1  ;;  %v7953_v6 = vadd.f32 1.0, %v10087_v19 }
 0x586   : > { %v10091_v17 = vpop.eup %10090  ;;  %10116 = vrcp.f32 %v7946_v54  ;;  %v8117_v47 = vadd.f32 %v8101_v49, %v8085_v44  ;;  %v8102_v16 = vmul.f32 %v10089_v53, %v13945_v8  ;;  %v7579_v56 = vpop.f32.mrf.mxu0  ;;  %v8090_v44 = vmul.f32 %v10075_v55, %v8074_v35 }
 0x587   : > { %v10093_v11 = vpop.eup %10092  ;;  %10118 = vrcp.f32 %v7949_v46  ;;  %v7688_v50 = vpop.f32.mrf.mxu1  ;;  %v8093_v8 = vmul.f32 %v10079_v60, %v8077_v14  ;;  %v7576_v46 = vadd.f32 %v7575_v33, %v13882_v32  ;;  %v7687_v19 = vadd.f32 %v7686_v3, %v7574_v1 }
 0x588   : > { %v10095_v15 = vpop.eup %10094  ;;  %10120 = vtanh.f32 %v8117_v47  ;;  %8165 = vst [vmem:[#allocation26] sm:$0xff] %v8117_v47  ;;  %v8118_v34 = vadd.f32 %v8102_v16, %v8086_v62  ;;  %v8105_v54 = vmul.f32 %v10093_v11, %v13950_v7  ;;  %v7583_v5 = vpop.f32.mrf.mxu0  ;;  %v8094_v53 = vmul.f32 %v10083_v26, %v8078_v0  ;;  %v8082_v16 = vld [vmem:[#allocation26 + $0x68] sm:$0xff] }
 0x589   : > { %v10097_v59 = vpop.eup %10096  ;;  %10122 = vrcp.f32 %v7950_v29  ;;  %v7690_v49 = vpop.f32.mrf.mxu1  ;;  %v7954_v7 = vadd.f32 1.0, %v10095_v15  ;;  %v7578_v11 = vadd.f32 %v7577_v37, %v13885_v52  ;;  %v7689_v55 = vadd.f32 %v7688_v50, %v7576_v46 }
 0x58a   : > { %v10099_v20 = vpop.eup %10098  ;;  %10124 = vtanh.f32 %v8118_v34  ;;  %8166 = vst [vmem:[#allocation26 + $0x8] sm:$0xff] %v8118_v34  ;;  %v8121_v4 = vadd.f32 %v8105_v54, %v8089_v18  ;;  %v8106_v42 = vmul.f32 %v10097_v59, %v13954_v25  ;;  %v7585_v60 = vpop.f32.mrf.mxu0  ;;  %v8097_v34 = vmul.f32 %v10091_v17, %v8081_v39 }
 0x58b   : > { %v10101_v47 = vpop.eup %10100  ;;  %10126 = vrcp.f32 %v7953_v6  ;;  %v7692_v35 = vpop.f32.mrf.mxu1  ;;  %v8098_v3 = vmul.f32 %v10099_v20, %v8082_v16  ;;  %v9221_v25 = vmul.f32 -1.442695, %v7687_v19  ;;  %v7580_v26 = vadd.f32 %v7579_v56, %v13889_v36 }
 0x58c   : > { %v10103_v32 = vpop.eup %10102  ;;  %10128 = vtanh.f32 %v8121_v4  ;;  %8169 = vst [vmem:[#allocation26 + $0x20] sm:$0xff] %v8121_v4  ;;  %v8122_v14 = vadd.f32 %v8106_v42, %v8090_v44  ;;  %v8109_v33 = vmul.f32 %v10101_v47, %v13972_v57  ;;  %v7691_v62 = vadd.f32 %v7690_v49, %v7578_v11  ;;  %v7587_v6 = vpop.f32.mrf.mxu0 }
 0x58d   : > { %v10105_v29 = vpop.eup %10104  ;;  %v7696_v18 = vpop.f32.mrf.mxu1  ;;  %v7584_v1 = vadd.f32 %v7583_v5, %v13892_v2  ;;  %v9222_v57 = vmul.f32 -1.442695, %v7689_v55  ;;  %v7586_v17 = vadd.f32 %v7585_v60, %v13894_v28  ;;  %v7693_v15 = vadd.f32 %v7692_v35, %v7580_v26 }
 0x58e   : > { %v10107_v0 = vpop.eup %10106  ;;  %10130 = vtanh.f32 %v8122_v14  ;;  %8170 = vst [vmem:[#allocation26 + $0x28] sm:$0xff] %v8122_v14  ;;  %v8125_v52 = vadd.f32 %v8109_v33, %v8093_v8  ;;  %v8110_v37 = vmul.f32 %v10105_v29, %v13992_v61  ;;  %v7589_v54 = vpop.f32.mrf.mxu0  ;;  %v9225_v61 = vmul.f32 -1.442695, %v7691_v62 }
 0x58f   : > { %v10109_v50 = vpop.eup %10108  ;;  %10132 = vrcp.f32 %v7954_v7  ;;  %v7698_v44 = vpop.f32.mrf.mxu1  ;;  %v7697_v39 = vadd.f32 %v7696_v18, %v7584_v1  ;;  %v7588_v2 = vadd.f32 %v7587_v6, %v13897_v10  ;;  %v7590_v4 = vadd.f32 %v7589_v54, %v13900_v31 }
 0x590   : > { %v10111_v36 = vpop.eup %10110  ;;  %10134 = vtanh.f32 %v8125_v52  ;;  %8173 = vst [vmem:[#allocation26 + $0x40] sm:$0xff] %v8125_v52  ;;  %v8126_v56 = vadd.f32 %v8110_v37, %v8094_v53  ;;  %v8113_v59 = vmul.f32 %v10109_v50, %v13996_v22  ;;  %v7699_v46 = vadd.f32 %v7698_v44, %v7586_v17  ;;  %v7593_v19 = vpop.f32.mrf.mxu0 }
 0x591   : > { %v10113_v8 = vpop.eup %10112  ;;  %10136 = vpow2.f32 %v9221_v25  ;;  %v7700_v5 = vpop.f32.mrf.mxu1  ;;  %v9226_v53 = vmul.f32 -1.442695, %v7693_v15  ;;  %v9229_v11 = vmul.f32 -1.442695, %v7697_v39 }
 0x592   : > { %v10115_v49 = vpop.eup %10114  ;;  %10138 = vtanh.f32 %v8126_v56  ;;  %8174 = vst [vmem:[#allocation26 + $0x48] sm:$0xff] %v8126_v56  ;;  %v8129_v28 = vadd.f32 %v8113_v59, %v8097_v34  ;;  %v8114_v20 = vmul.f32 %v10113_v8, %v10103_v32  ;;  %v7701_v22 = vadd.f32 %v7700_v5, %v7588_v2  ;;  %v7595_v16 = vpop.f32.mrf.mxu0 }
 0x593   : > { %v10117_v42 = vpop.eup %10116  ;;  %10140 = vpow2.f32 %v9222_v57  ;;  %v7702_v47 = vpop.f32.mrf.mxu1  ;;  %v9230_v35 = vmul.f32 -1.442695, %v7699_v46  ;;  %v7594_v34 = vadd.f32 %v7593_v19, %v13903_v38  ;;  %v7596_v52 = vadd.f32 %v7595_v16, %v13907_v40 }
 0x594   : > { %v10119_v7 = vpop.eup %10118  ;;  %10142 = vtanh.f32 %v8129_v28  ;;  %8177 = vst [vmem:[#allocation26 + $0x60] sm:$0xff] %v8129_v28  ;;  %v8130_v10 = vadd.f32 %v8114_v20, %v8098_v3  ;;  %v7703_v55 = vadd.f32 %v7702_v47, %v7590_v4  ;;  %v7597_v14 = vpop.f32.mrf.mxu0  ;;  %v9233_v29 = vmul.f32 -1.442695, %v7701_v22 }
 0x595   : > { %v10121_v60 = vpop.eup %10120  ;;  %10144 = vpow2.f32 %v9225_v61  ;;  %v7706_v32 = vpop.f32.mrf.mxu1  ;;  %v7598_v1 = vadd.f32 %v7597_v14, %v13910_v43 }
 0x596   : > { %v10123_v33 = vpop.eup %10122  ;;  %v8149_v31 = vmul.f32 %v10121_v60, %v10107_v0  ;;  %10146 = vtanh.f32 %v8130_v10  ;;  %8178 = vst [vmem:[#allocation26 + $0x68] sm:$0xff] %v8130_v10  ;;  %v9234_v26 = vmul.f32 -1.442695, %v7703_v55  ;;  %v7599_v62 = vpop.f32.mrf.mxu0  ;;  %v7707_v37 = vadd.f32 %v7706_v32, %v7594_v34 }
 0x597   : > { %v10125_v25 = vpop.eup %10124  ;;  %10148 = vpow2.f32 %v9226_v53  ;;  %v7708_v3 = vpop.f32.mrf.mxu1  ;;  %v7600_v59 = vadd.f32 %v7599_v62, %v13913_v9 }
 0x598   : > { %v10127_v6 = vpop.eup %10126  ;;  %8181 = vst [vmem:[#allocation23] sm:$0xff] %v8149_v31  ;;  %8253 = vst [vmem:[%s10971_s2] sm:$0xff] %v8149_v31  ;;  %v8150_v18 = vmul.f32 %v10125_v25, %v10111_v36  ;;  %10150 = vpow2.f32 %v9229_v11  ;;  %v7603_v38 = vpop.f32.mrf.mxu0  ;;  %v7709_v15 = vadd.f32 %v7708_v3, %v7596_v52  ;;  %v9237_v43 = vmul.f32 -1.442695, %v7707_v37 }
 0x599   : > { %v10129_v0 = vpop.eup %10128  ;;  %10152 = vpow2.f32 %v9230_v35  ;;  %v7710_v50 = vpop.f32.mrf.mxu1  ;;  %v7604_v4 = vadd.f32 %v7603_v38, %v13916_v13 }
 0x59a   : > { %8182 = vst [vmem:[#allocation23 + $0x8] sm:$0xff] %v8150_v18  ;;  %v9313_v57 = vpack.c.bf16 %v8150_v18, %v8149_v31  ;;  %8254 = vst [vmem:[%s10971_s2 + $0x8] sm:$0xff] %v8150_v18  ;;  %v8153_v17 = vmul.f32 %v10129_v0, %v10115_v49  ;;  %10154 = vpow2.f32 %v9233_v29  ;;  %v7605_v44 = vpop.f32.mrf.mxu0  ;;  %v7711_v39 = vadd.f32 %v7710_v50, %v7598_v1 }
 0x59b   : > { %v10131_v54 = vpop.eup %10130  ;;  %10156 = vpow2.f32 %v9234_v26  ;;  %v7712_v36 = vpop.f32.mrf.mxu1  ;;  %v9238_v49 = vmul.f32 -1.442695, %v7709_v15  ;;  %v7606_v31 = vadd.f32 %v7605_v44, %v13918_v63 }
 0x59c   : > { %v10133_v40 = vpop.eup %10132  ;;  %8245 = vst [vmem:[#allocation3] sm:$0xff] %v9313_v57  ;;  %8185 = vst [vmem:[#allocation23 + $0x20] sm:$0xff] %v8153_v17  ;;  %v8154_v56 = vmul.f32 %v10131_v54, %v10117_v42  ;;  %v7607_v61 = vpop.f32.mrf.mxu0  ;;  %v7713_v28 = vadd.f32 %v7712_v36, %v7600_v59  ;;  %10158 = vpow2.f32 %v9237_v43  ;;  %v9241_v16 = vmul.f32 -1.442695, %v7711_v39 }
 0x59d   : > { %8257 = vst [vmem:[%s10971_s2 + $0x20] sm:$0xff] %v8153_v17  ;;  %v10135_v8 = vpop.eup %10134  ;;  %v7716_v2 = vpop.f32.mrf.mxu1  ;;  %10160 = vpow2.f32 %v9238_v49  ;;  %v7608_v50 = vadd.f32 %v7607_v61, %v13921_v30 }
 0x59e   : > { %v10137_v46 = vpop.eup %10136  ;;  %8186 = vst [vmem:[#allocation23 + $0x28] sm:$0xff] %v8154_v56  ;;  %v9315_v19 = vpack.c.bf16 %v8154_v56, %v8153_v17  ;;  %8258 = vst [vmem:[%s10971_s2 + $0x28] sm:$0xff] %v8154_v56  ;;  %v8157_v5 = vmul.f32 %v10135_v8, %v10119_v7  ;;  %v7609_v53 = vpop.f32.mrf.mxu0  ;;  %v7717_v10 = vadd.f32 %v7716_v2, %v7604_v4  ;;  %v9242_v35 = vmul.f32 -1.442695, %v7713_v28 }
 0x59f   : > { %v10139_v20 = vpop.eup %10138  ;;  %v7718_v42 = vpop.f32.mrf.mxu1  ;;  %v7911_v32 = vadd.f32 1.0, %v10137_v46  ;;  %10162 = vpow2.f32 %v9241_v16  ;;  %v7610_v44 = vadd.f32 %v7609_v53, %v13924_v23 }
 0x5a0   : > { %v10141_v22 = vpop.eup %10140  ;;  %8247 = vst [vmem:[#allocation3 + $0x10] sm:$0xff] %v9315_v19  ;;  %8189 = vst [vmem:[#allocation23 + $0x40] sm:$0xff] %v8157_v5  ;;  %v8158_v9 = vmul.f32 %v10139_v20, %v10123_v33  ;;  %v7613_v11 = vpop.f32.mrf.mxu0  ;;  %v9245_v3 = vmul.f32 -1.442695, %v7717_v10  ;;  %v7719_v18 = vadd.f32 %v7718_v42, %v7606_v31  ;;  %10164 = vpow2.f32 %v9242_v35 }
 0x5a1   : > { %8261 = vst [vmem:[%s10971_s2 + $0x40] sm:$0xff] %v8157_v5  ;;  %v10143_v47 = vpop.eup %10142  ;;  %v7720_v55 = vpop.f32.mrf.mxu1  ;;  %v7912_v26 = vadd.f32 1.0, %v10141_v22  ;;  %10166 = vrcp.f32 %v7911_v32 }
 0x5a2   : > { %v10145_v7 = vpop.eup %10144  ;;  %8190 = vst [vmem:[#allocation23 + $0x48] sm:$0xff] %v8158_v9  ;;  %v9317_v60 = vpack.c.bf16 %v8158_v9, %v8157_v5  ;;  %8262 = vst [vmem:[%s10971_s2 + $0x48] sm:$0xff] %v8158_v9  ;;  %v8161_v13 = vmul.f32 %v10143_v47, %v10127_v6  ;;  %v7615_v34 = vpop.f32.mrf.mxu0  ;;  %v9246_v36 = vmul.f32 -1.442695, %v7719_v18  ;;  %v7721_v56 = vadd.f32 %v7720_v55, %v7608_v50 }
 0x5a3   : > { %v10147_v14 = vpop.eup %10146  ;;  %v7722_v33 = vpop.f32.mrf.mxu1  ;;  %v7915_v63 = vadd.f32 1.0, %v10145_v7  ;;  %10168 = vrcp.f32 %v7912_v26  ;;  %v7616_v61 = vadd.f32 %v7615_v34, %v13930_v12 }
 0x5a4   : > { %v10149_v29 = vpop.eup %10148  ;;  %8249 = vst [vmem:[#allocation3 + $0x28] sm:$0xff] %v9317_v60  ;;  %8193 = vst [vmem:[#allocation23 + $0x60] sm:$0xff] %v8161_v13  ;;  %v8162_v25 = vmul.f32 %v10147_v14, %v10133_v40  ;;  %v7617_v6 = vpop.f32.mrf.mxu0  ;;  %10170 = vpow2.f32 %v9245_v3  ;;  %v7614_v40 = vadd.f32 %v7613_v11, %v13927_v21  ;;  %v7723_v8 = vadd.f32 %v7722_v33, %v7610_v44 }
 0x5a5   : > { %8265 = vst [vmem:[%s10971_s2 + $0x60] sm:$0xff] %v8161_v13  ;;  %v10151_v62 = vpop.eup %10150  ;;  %v7726_v52 = vpop.f32.mrf.mxu1  ;;  %v7916_v38 = vadd.f32 1.0, %v10149_v29  ;;  %10172 = vrcp.f32 %v7915_v63  ;;  %v9249_v49 = vmul.f32 -1.442695, %v7721_v56  ;;  %v7618_v21 = vadd.f32 %v7617_v6, %v13933_v24 }
 0x5a6   : > { %v10153_v37 = vpop.eup %10152  ;;  %8194 = vst [vmem:[#allocation23 + $0x68] sm:$0xff] %v8162_v25  ;;  %v9319_v0 = vpack.c.bf16 %v8162_v25, %v8161_v13  ;;  %8266 = vst [vmem:[%s10971_s2 + $0x68] sm:$0xff] %v8162_v25  ;;  %v7619_v57 = vpop.f32.mrf.mxu0  ;;  %v7919_v54 = vadd.f32 1.0, %v10151_v62  ;;  %v7727_v2 = vadd.f32 %v7726_v52, %v7614_v40  ;;  %v9250_v53 = vmul.f32 -1.442695, %v7723_v8  ;;  %v14663_v40 = vld [vmem:[#allocation44_spill] sm:$0xff] }
 0x5a7   : > { %v10155_v1 = vpop.eup %10154  ;;  %v7728_v17 = vpop.f32.mrf.mxu1  ;;  %v7920_v39 = vadd.f32 1.0, %v10153_v37  ;;  %10174 = vrcp.f32 %v7916_v38  ;;  %v7620_v12 = vadd.f32 %v7619_v57, %v13938_v51 }
 0x5a8   : > { %v10157_v15 = vpop.eup %10156  ;;  %8251 = vst [vmem:[#allocation3 + $0x30] sm:$0xff] %v9319_v0  ;;  %v7623_v43 = vpop.f32.mrf.mxu0  ;;  %v7923_v30 = vadd.f32 1.0, %v10155_v1  ;;  %10176 = vrcp.f32 %v7919_v54  ;;  %v7729_v28 = vadd.f32 %v7728_v17, %v7616_v61  ;;  %v9253_v22 = vmul.f32 -1.442695, %v7727_v2 }
 0x5a9   : > { %v7730_v59 = vpop.f32.mrf.mxu1  ;;  %v7924_v5 = vadd.f32 1.0, %v10157_v15  ;;  %v10159_v23 = vpop.eup %10158  ;;  %10178 = vpow2.f32 %v9246_v36  ;;  %v7624_v24 = vadd.f32 %v7623_v43, %v13943_v27 }
 0x5aa   : > { %v7625_v46 = vpop.f32.mrf.mxu0  ;;  %10180 = vrcp.f32 %v7920_v39  ;;  %v10161_v42 = vpop.eup %10160  ;;  %v7731_v9 = vadd.f32 %v7730_v59, %v7618_v21  ;;  %v7927_v10 = vadd.f32 1.0, %v10159_v23  ;;  %v9254_v55 = vmul.f32 -1.442695, %v7729_v28  ;;  %v14664_v39 = vld [vmem:[#allocation45_spill] sm:$0xff] }
 0x5ab   : > { %v7732_v19 = vpop.f32.mrf.mxu1  ;;  %10182 = vrcp.f32 %v7923_v30  ;;  %v7928_v35 = vadd.f32 1.0, %v10161_v42  ;;  %v7626_v27 = vadd.f32 %v7625_v46, %v13948_v58 }
 0x5ac   : > { %v7627_v20 = vpop.f32.mrf.mxu0  ;;  %10184 = vrcp.f32 %v7924_v5  ;;  %v10163_v11 = vpop.eup %10162  ;;  %v7733_v7 = vadd.f32 %v7732_v19, %v7620_v12  ;;  %v9257_v32 = vmul.f32 -1.442695, %v7731_v9 }
 0x5ad   : > { %v7736_v4 = vpop.f32.mrf.mxu1  ;;  %10186 = vpow2.f32 %v9249_v49  ;;  %v10165_v14 = vpop.eup %10164  ;;  %v7931_v29 = vadd.f32 1.0, %v10163_v11  ;;  %v7628_v54 = vadd.f32 %v7627_v20, %v13956_v48  ;;  %v14665_v48 = vld [vmem:[#allocation59_spill] sm:$0xff] }
 0x5ae   : > { %v7629_v16 = vpop.f32.mrf.mxu0  ;;  %10188 = vpow2.f32 %v9250_v53  ;;  %v7737_v31 = vadd.f32 %v7736_v4, %v7624_v24  ;;  %v14061_v33 = vpop.eup %10166  ;;  %v9258_v26 = vmul.f32 -1.442695, %v7733_v7  ;;  %v7932_v6 = vadd.f32 1.0, %v10165_v14  ;;  %v14666_v53 = vld [vmem:[#allocation57_spill] sm:$0xff] }
 0x5af   : > { %v7738_v47 = vpop.f32.mrf.mxu1  ;;  %10190 = vpow2.f32 %v9253_v22  ;;  %v7630_v8 = vadd.f32 %v7629_v16, %v14664_v39 }
 0x5b0   : > { %v7633_v60 = vpop.f32.mrf.mxu0  ;;  %10192 = vrcp.f32 %v7927_v10  ;;  %v14063_v25 = vpop.eup %10168  ;;  %v9261_v0 = vmul.f32 -1.442695, %v7737_v31  ;;  %v7739_v63 = vadd.f32 %v7738_v47, %v7626_v27  ;;  %v14667_v10 = vld [vmem:[#allocation77_spill] sm:$0xff] }
 0x5b1   : > { %v7740_v13 = vpop.f32.mrf.mxu1  ;;  %10194 = vpow2.f32 %v9254_v55  ;;  %v10171_v18 = vpop.eup %10170  ;;  %v7634_v52 = vadd.f32 %v7633_v60, %v13998_v41 }
 0x5b2   : > { %v7635_v51 = vpop.f32.mrf.mxu0  ;;  %10196 = vrcp.f32 %v7928_v35  ;;  %v14067_v37 = vpop.eup %10172  ;;  %v7935_v15 = vadd.f32 1.0, %v10171_v18  ;;  %v7741_v30 = vadd.f32 %v7740_v13, %v7628_v54 }
 0x5b3   : > { %v7742_v34 = vpop.f32.mrf.mxu1  ;;  %10198 = vpow2.f32 %v9257_v32  ;;  %v7636_v58 = vadd.f32 %v7635_v51, %v14002_v45  ;;  %v9262_v45 = vmul.f32 -1.442695, %v7739_v63  ;;  %v14668_v51 = vld [vmem:[#allocation78_spill] sm:$0xff] }
 0x5b4   : > { %v7637_v62 = vpop.f32.mrf.mxu0  ;;  %v14069_v50 = vpop.eup %10174  ;;  %10200 = vrcp.f32 %v7931_v29  ;;  %v7743_v21 = vadd.f32 %v7742_v34, %v7630_v8  ;;  %v9265_v9 = vmul.f32 -1.442695, %v7741_v30 }
 0x5b5   : > { %v7746_v3 = vpop.f32.mrf.mxu1  ;;  %v14072_v17 = vpop.eup %10176  ;;  %10202 = vpow2.f32 %v9258_v26  ;;  %v7638_v56 = vadd.f32 %v7637_v62, %v14663_v40  ;;  %v14669_v62 = vld [vmem:[#allocation55_spill] sm:$0xff] }
 0x5b6   : > { %v7639_v1 = vpop.f32.mrf.mxu0  ;;  %v7747_v57 = vadd.f32 %v7746_v3, %v7634_v52  ;;  %v10179_v36 = vpop.eup %10178  ;;  %10204 = vrcp.f32 %v7932_v6  ;;  %v9266_v7 = vmul.f32 -1.442695, %v7743_v21 }
 0x5b7   : > { %v7748_v38 = vpop.f32.mrf.mxu1  ;;  %v14076_v59 = vpop.eup %10180  ;;  %10206 = vpow2.f32 %v9261_v0  ;;  %v7640_v19 = vadd.f32 %v7639_v1, %v14665_v48  ;;  %v7936_v49 = vadd.f32 1.0, %v10179_v36  ;;  %v8071_v1 = vld [vmem:[#allocation26 + $0x10] sm:$0xff] }
 0x5b8   : > { %v7643_v41 = vpop.f32.mrf.mxu0  ;;  %v7749_v43 = vadd.f32 %v7748_v38, %v7636_v58  ;;  %v14079_v46 = vpop.eup %10182  ;;  %10208 = vtanh.f32 %v7747_v57 }
 0x5b9   : > { %v7750_v44 = vpop.f32.mrf.mxu1  ;;  %v14082_v23 = vpop.eup %10184  ;;  %10210 = vrcp.f32 %v7935_v15  ;;  %v7644_v42 = vadd.f32 %v7643_v41, %v14666_v53  ;;  %v8072_v15 = vld [vmem:[#allocation26 + $0x18] sm:$0xff] }
 0x5ba   : > { %v7645_v61 = vpop.f32.mrf.mxu0  ;;  %v7751_v5 = vadd.f32 %v7750_v44, %v7638_v56  ;;  %v10187_v4 = vpop.eup %10186  ;;  %10212 = vtanh.f32 %v7749_v43  ;;  %v8075_v56 = vld [vmem:[#allocation26 + $0x30] sm:$0xff] }
 0x5bb   : > { %v7752_v2 = vpop.f32.mrf.mxu1  ;;  %v10189_v12 = vpop.eup %10188  ;;  %10214 = vpow2.f32 %v9262_v45  ;;  %v7646_v11 = vadd.f32 %v7645_v61, %v14667_v10  ;;  %v7939_v31 = vadd.f32 1.0, %v10187_v4 }
 0x5bc   : > { %v7647_v28 = vpop.f32.mrf.mxu0  ;;  %v7753_v22 = vadd.f32 %v7752_v2, %v7640_v19  ;;  %v10191_v47 = vpop.eup %10190  ;;  %10216 = vtanh.f32 %v7751_v5  ;;  %v7940_v26 = vadd.f32 1.0, %v10189_v12  ;;  %v8076_v2 = vld [vmem:[#allocation26 + $0x38] sm:$0xff] }
 0x5bd   : > { %v7756_v20 = vpop.f32.mrf.mxu1  ;;  %v10193_v24 = vpop.eup %10192  ;;  %10218 = vrcp.f32 %v7936_v49  ;;  %v7648_v34 = vadd.f32 %v7647_v28, %v14668_v51  ;;  %v7943_v57 = vadd.f32 1.0, %v10191_v47  ;;  %v8079_v28 = vld [vmem:[#allocation26 + $0x50] sm:$0xff]  ;;  %v8080_v12 = vld [vmem:[#allocation26 + $0x58] sm:$0xff] }
 0x5be   : > { %v7757_v55 = vadd.f32 %v7756_v20, %v7644_v42  ;;  %v7649_v60 = vpop.f32.mrf.mxu0  ;;  %v10195_v35 = vpop.eup %10194  ;;  %10220 = vtanh.f32 %v7753_v22  ;;  %v8087_v41 = vmul.f32 %v10193_v24, %v8071_v1 }
 0x5bf   : > { %v7758_v16 = vpop.f32.mrf.mxu1  ;;  %v10197_v32 = vpop.eup %10196  ;;  %10222 = vpow2.f32 %v9265_v9  ;;  %v7650_v3 = vadd.f32 %v7649_v60, %v14669_v62  ;;  %v7944_v40 = vadd.f32 1.0, %v10195_v35  ;;  %v8083_v60 = vld [vmem:[#allocation26 + $0x70] sm:$0xff] }
 0x5c0   : > { %v7759_v14 = vadd.f32 %v7758_v16, %v7646_v11  ;;  %v10199_v27 = vpop.eup %10198  ;;  %10224 = vtanh.f32 %v7757_v55  ;;  %v8088_v8 = vmul.f32 %v10197_v32, %v8072_v15 }
 0x5c1   : > { %v7760_v13 = vpop.f32.mrf.mxu1  ;;  %v10201_v18 = vpop.eup %10200  ;;  %10226 = vpow2.f32 %v9266_v7  ;;  %v7947_v61 = vadd.f32 1.0, %v10199_v27 }
 0x5c2   : > { %v7761_v6 = vadd.f32 %v7760_v13, %v7648_v34  ;;  %v10203_v52 = vpop.eup %10202  ;;  %10228 = vtanh.f32 %v7759_v14  ;;  %v8091_v5 = vmul.f32 %v10201_v18, %v8075_v56  ;;  %v8084_v14 = vld [vmem:[#allocation26 + $0x78] sm:$0xff] }
 0x5c3   : > { %v7762_v29 = vpop.f32.mrf.mxu1  ;;  %v10205_v63 = vpop.eup %10204  ;;  %10230 = vrcp.f32 %v7939_v31  ;;  %v7948_v21 = vadd.f32 1.0, %v10203_v52 }
 0x5c4   : > { %v7763_v0 = vadd.f32 %v7762_v29, %v7650_v3  ;;  %v10207_v38 = vpop.eup %10206  ;;  %10232 = vrcp.f32 %v7940_v26 }
 0x5c5   : > { %v10209_v58 = vpop.eup %10208  ;;  %10234 = vtanh.f32 %v7761_v6  ;;  %v7951_v22 = vadd.f32 1.0, %v10207_v38 }
 0x5c6   : > { %v10211_v54 = vpop.eup %10210  ;;  %v8103_v44 = vmul.f32 %v10209_v58, %v14061_v33  ;;  %10236 = vtanh.f32 %v7763_v0 }
 0x5c7   : > { %v10213_v36 = vpop.eup %10212  ;;  %10238 = vrcp.f32 %v7943_v57 }
 0x5c8   : > { %v10215_v43 = vpop.eup %10214  ;;  %v8119_v39 = vadd.f32 %v8103_v44, %v8087_v41  ;;  %v8104_v45 = vmul.f32 %v10213_v36, %v14063_v25  ;;  %v8092_v25 = vmul.f32 %v10205_v63, %v8076_v2 }
 0x5c9   : > { %v10217_v30 = vpop.eup %10216  ;;  %v7952_v11 = vadd.f32 1.0, %v10215_v43 }
 0x5ca   : > { %v10219_v48 = vpop.eup %10218  ;;  %10240 = vtanh.f32 %v8119_v39  ;;  %8167 = vst [vmem:[#allocation26 + $0x10] sm:$0xff] %v8119_v39  ;;  %v8120_v19 = vadd.f32 %v8104_v45, %v8088_v8  ;;  %v8107_v33 = vmul.f32 %v10217_v30, %v14067_v37  ;;  %v8095_v37 = vmul.f32 %v10211_v54, %v8079_v28 }
 0x5cb   : > { %v10221_v49 = vpop.eup %10220  ;;  %10242 = vrcp.f32 %v7944_v40  ;;  %v8096_v7 = vmul.f32 %v10219_v48, %v8080_v12 }
 0x5cc   : > { %v10223_v20 = vpop.eup %10222  ;;  %10244 = vtanh.f32 %v8120_v19  ;;  %8168 = vst [vmem:[#allocation26 + $0x18] sm:$0xff] %v8120_v19  ;;  %v8123_v4 = vadd.f32 %v8107_v33, %v8091_v5  ;;  %v8108_v53 = vmul.f32 %v10221_v49, %v14069_v50 }
 0x5cd   : > { %v10225_v42 = vpop.eup %10224  ;;  %10246 = vrcp.f32 %v7947_v61  ;;  %v7955_v35 = vadd.f32 1.0, %v10223_v20 }
 0x5ce   : > { %v10227_v9 = vpop.eup %10226  ;;  %10248 = vtanh.f32 %v8123_v4  ;;  %8171 = vst [vmem:[#allocation26 + $0x30] sm:$0xff] %v8123_v4  ;;  %v8124_v16 = vadd.f32 %v8108_v53, %v8092_v25  ;;  %v8111_v47 = vmul.f32 %v10225_v42, %v14072_v17 }
 0x5cf   : > { %v10229_v10 = vpop.eup %10228  ;;  %10250 = vrcp.f32 %v7948_v21  ;;  %v7956_v31 = vadd.f32 1.0, %v10227_v9 }
 0x5d0   : > { %v10231_v55 = vpop.eup %10230  ;;  %10252 = vtanh.f32 %v8124_v16  ;;  %8172 = vst [vmem:[#allocation26 + $0x38] sm:$0xff] %v8124_v16  ;;  %v8127_v24 = vadd.f32 %v8111_v47, %v8095_v37  ;;  %v8112_v50 = vmul.f32 %v10229_v10, %v14076_v59 }
 0x5d1   : > { %v10233_v13 = vpop.eup %10232  ;;  %10254 = vrcp.f32 %v7951_v22  ;;  %v8099_v34 = vmul.f32 %v10231_v55, %v8083_v60 }
 0x5d2   : > { %v10235_v32 = vpop.eup %10234  ;;  %10256 = vtanh.f32 %v8127_v24  ;;  %8175 = vst [vmem:[#allocation26 + $0x50] sm:$0xff] %v8127_v24  ;;  %v8128_v17 = vadd.f32 %v8112_v50, %v8096_v7  ;;  %v8100_v59 = vmul.f32 %v10233_v13, %v8084_v14 }
 0x5d3   : > { %v10237_v51 = vpop.eup %10236  ;;  %10258 = vrcp.f32 %v7952_v11  ;;  %v8115_v29 = vmul.f32 %v10235_v32, %v14079_v46 }
 0x5d4   : > { %10260 = vtanh.f32 %v8128_v17  ;;  %8176 = vst [vmem:[#allocation26 + $0x58] sm:$0xff] %v8128_v17  ;;  %v8116_v27 = vmul.f32 %v10237_v51, %v14082_v23  ;;  %v10239_v62 = vpop.eup %10238 }
 0x5d5   : > { %10262 = vrcp.f32 %v7955_v35  ;;  %v8131_v26 = vadd.f32 %v8115_v29, %v8099_v34 }
 0x5d6   : > { %10264 = vrcp.f32 %v7956_v31  ;;  %v8132_v3 = vadd.f32 %v8116_v27, %v8100_v59 }
 0x5d7   : > { %v10241_v18 = vpop.eup %10240  ;;  %10266 = vtanh.f32 %v8131_v26  ;;  %8179 = vst [vmem:[#allocation26 + $0x70] sm:$0xff] %v8131_v26 }
 0x5d8   : > { %v10243_v6 = vpop.eup %10242  ;;  %v8151_v52 = vmul.f32 %v10241_v18, %v10239_v62  ;;  %10268 = vtanh.f32 %v8132_v3  ;;  %8180 = vst [vmem:[#allocation26 + $0x78] sm:$0xff] %v8132_v3 }
 0x5d9   : > { %v10245_v46 = vpop.eup %10244 }
 0x5da   : > { %10549 = shalt.err (!%p10546_p10)
}
 0x5db   : > { %p14671_p0 = pmov %p14670_p4  ;;  %v10247_v23 = vpop.eup %10246  ;;  %8183 = vst [vmem:[#allocation23 + $0x10] sm:$0xff] %v8151_v52  ;;  %8255 = vst [vmem:[%s10971_s2 + $0x10] sm:$0xff] %v8151_v52  ;;  %v8152_v0 = vmul.f32 %v10245_v46, %v10243_v6  ;;  %s9321_s29 = sshll.u32 %s10792_s27, 11 }
 0x5dc   : > { %v10249_v63 = vpop.eup %10248  ;;  %s8283_s5 = sshll.u32 %s10971_s2, 4  ;;  %s10704_s28 = smov [#allocation23]   ;;  %s14119_s5 = int_to_ptr.vmem [resolvable:$true] %s8283_s5 }
 0x5dd   : > { %9360 = dma.vmem_to_hbm [thread:$0]  (%p14671_p0), %s8336_s25, 2048, %s14201_s12, [#allocation25], %s10701_s1, %s10701_s1, %s10702_s6   ;;  %v10251_v1 = vpop.eup %10250  ;;  %8184 = vst [vmem:[#allocation23 + $0x18] sm:$0xff] %v8152_v0  ;;  %v9314_v38 = vpack.c.bf16 %v8152_v0, %v8151_v52  ;;  %v8155_v58 = vmul.f32 %v10249_v63, %v10247_v23 }
 0x5de   : > { %8256 = vst [vmem:[%s10971_s2 + $0x18] sm:$0xff] %v8152_v0  ;;  %v10253_v57 = vpop.eup %10252  ;;  %s8309_s18 = sshll.u32 %s10704_s28, 4  ;;  %s14117_s17 = scalar_lea.hbm %s14197_s8, %s9321_s29  ;;  %s14122_s18 = int_to_ptr.vmem [resolvable:$true] %s8309_s18 }
 0x5df   : > { %v10255_v15 = vpop.eup %10254  ;;  %8246 = vst [vmem:[#allocation3 + $0x18] sm:$0xff] %v9314_v38  ;;  %8187 = vst [vmem:[#allocation23 + $0x30] sm:$0xff] %v8155_v58  ;;  %v8156_v54 = vmul.f32 %v10253_v57, %v10251_v1  ;;  %s8270_s20 = scalar_lea.sflag [#allocation8], %s10944_s3  ;;  %s10560_s25 = scalar_lea.vmem %s14119_s5, 2048 }
 0x5e0   : > { %8259 = vst [vmem:[%s10971_s2 + $0x30] sm:$0xff] %v8155_v58  ;;  %v10257_v41 = vpop.eup %10256  ;;  %p10561_p2 = scmp.ne.s32.totalorder %s14119_s5, %s10560_s25  ;;  %p14672_p5 = scmp.ne.s32.totalorder %s14356_s10, 0 }
 0x5e1   : > { %v10259_v44 = vpop.eup %10258  ;;  %8188 = vst [vmem:[#allocation23 + $0x38] sm:$0xff] %v8156_v54  ;;  %v9316_v36 = vpack.c.bf16 %v8156_v54, %v8155_v58  ;;  %8260 = vst [vmem:[%s10971_s2 + $0x38] sm:$0xff] %v8156_v54  ;;  %v8159_v40 = vmul.f32 %v10257_v41, %v10255_v15  ;;  %s10705_s26 = smov [#allocation20]  }
 0x5e2   : > { %v10261_v56 = vpop.eup %10260  ;;  %p10562_p7 = pnand %p10561_p2, %p14672_p5  ;;  %s10564_s16 = sshll.u32 %s10705_s26, 4  ;;  %s10565_s16 = int_to_ptr.vmem [resolvable:$false] %s10564_s16 }
 0x5e3   : > { %v10263_v43 = vpop.eup %10262  ;;  %8248 = vst [vmem:[#allocation3 + $0x20] sm:$0xff] %v9316_v36  ;;  %8191 = vst [vmem:[#allocation23 + $0x50] sm:$0xff] %v8159_v40  ;;  %v8160_v39 = vmul.f32 %v10261_v56, %v10259_v44  ;;  %s10566_s4 = scalar_lea.vmem %s10565_s16, 4096  ;;  %p10567_p11 = scmp.lt.s32.totalorder %s14119_s5, %s10565_s16 }
 0x5e4   : > { %8263 = vst [vmem:[%s10971_s2 + $0x50] sm:$0xff] %v8159_v40  ;;  %v10265_v8 = vpop.eup %10264  ;;  %p10563_p12 = pneg %p10562_p7  ;;  %p10568_p1 = scmp.lt.s32.totalorder %s10566_s4, %s10560_s25 }
 0x5e5   : > { %v10267_v45 = vpop.eup %10266  ;;  %8192 = vst [vmem:[#allocation23 + $0x58] sm:$0xff] %v8160_v39  ;;  %v9318_v30 = vpack.c.bf16 %v8160_v39, %v8159_v40  ;;  %8264 = vst [vmem:[%s10971_s2 + $0x58] sm:$0xff] %v8160_v39 }
 0x5e6   : > { %v10269_v61 = vpop.eup %10268  ;;  %v8163_v2 = vmul.f32 %v10267_v45, %v10263_v43  ;;  %p10569_p4 = por %p10568_p1, %p10567_p11 }
 0x5e7   : > { %8250 = vst [vmem:[#allocation3 + $0x8] sm:$0xff] %v9318_v30  ;;  %v8164_v48 = vmul.f32 %v10269_v61, %v10265_v8 }
 0x5e8   : > { %8195 = vst [vmem:[#allocation23 + $0x70] sm:$0xff] %v8163_v2  ;;  %8267 = vst [vmem:[%s10971_s2 + $0x70] sm:$0xff] %v8163_v2  ;;  %p10570_p13 = pnand %p10569_p4, %p10563_p12 }
 0x5e9   : > { %8196 = vst [vmem:[#allocation23 + $0x78] sm:$0xff] %v8164_v48  ;;  %v9320_v19 = vpack.c.bf16 %v8164_v48, %v8163_v2  ;;  %8268 = vst [vmem:[%s10971_s2 + $0x78] sm:$0xff] %v8164_v48 }
 0x5ea   : > { %10573 = shalt.err (!%p10570_p13)
}
 0x5eb   : > { %s10574_s2 = scalar_lea.hbm %s14117_s17, 2048  ;;  %s10578_s28 = scalar_lea.hbm %s14197_s8, 16384 }
 0x5ec   : > { %p10575_p3 = scmp.ne.s32.totalorder %s14117_s17, %s10574_s2  ;;  %p10579_p9 = scmp.lt.s32.totalorder %s14117_s17, %s14197_s8 }
 0x5ed   : > { %p10580_p10 = scmp.lt.s32.totalorder %s10578_s28, %s10574_s2 }
 0x5ee   : > { %p10576_p6 = pnand %p10575_p3, %p14672_p5 }
 0x5ef   : > { %p10581_p0 = por %p10580_p10, %p10579_p9 }
 0x5f0   : > { %p10577_p8 = pneg %p10576_p6 }
 0x5f2   : > { %p10582_p2 = pnand %p10581_p0, %p10577_p8 }
 0x5f4   : > { %10585 = shalt.err (!%p10582_p2)
}
 0x5f5   : > { %9352 = dma.vmem_to_hbm [thread:$0]  (%p14672_p5), %s14119_s5, 2048, %s14117_s17, %s8270_s20, %s10701_s1, %s10701_s1, %s10702_s6   ;;  %8252 = vst [vmem:[#allocation3 + $0x38] sm:$0xff] %v9320_v19 }
 0x5f6   : > { %s10586_s25 = scalar_lea.vmem %s14122_s18, 2048  ;;  %p14673_p12 = scmp.eq.s32.totalorder %s10792_s27, 7 }
 0x5f7   : > { %p10587_p7 = scmp.ne.s32.totalorder %s14122_s18, %s10586_s25  ;;  %p10593_p4 = scmp.lt.s32.totalorder %s14122_s18, %s14122_s18 }
 0x5f8   : > { %p10594_p13 = scmp.lt.s32.totalorder %s10586_s25, %s10586_s25 }
 0x5f9   : > { %p10588_p11 = pnand %p10587_p7, %p14673_p12 }
 0x5fa   : > { %p10595_p3 = por %p10594_p13, %p10593_p4 }
 0x5fb   : > { %p10589_p1 = pneg %p10588_p11 }
 0x5fd   : > { %p10596_p6 = pnand %p10595_p3, %p10589_p1 }
 0x5ff   : > { %10599 = shalt.err (!%p10596_p6)
}
 0x600   : > { %p14674_p8 = pmov %p14673_p12  ;;  %s14675_s5 = sld [smem:[#allocation91_spill]] }
 0x602   : > { %p14676_p5 = pmov %p14674_p8 }
 0x606   : > { %9356 = dma.vmem_to_hbm [thread:$0]  (%p14674_p8), %s14122_s18, 2048, %s14675_s5, [#allocation22], %s10701_s1, %s10701_s1, %s10702_s6  }
 0x607   : > { %10647 = dma.done.wait (%p14676_p5), [#allocation22], 4096   ;;  %p14677_p9 = pmov %p14676_p5 }
 0x608   : > { %p14678_p10 = pmov %p14676_p5 }
 0x609   : > { %10649 = vsyncadd (%p14677_p9), [#allocation22], 4294963200 }
 0x60a   : > { %10651 = dma.done.wait (%p14678_p10), [#allocation25], 4096   ;;  %p14679_p0 = pmov %p14676_p5 }
 0x60c   : > { %10653 = vsyncadd (%p14679_p0), [#allocation25], 4294963200 }
 0x60d PF: > { %p9423_p2 = scmp.ge.s32.totalorder %s10672_s24, 2  ;;  %s8366_s17 = sand.u32 1, %s10660_s21  }
 0x60e   : > { %p14680_p7 = scmp.ne.s32.totalorder %s14357_s30, 0  ;;  %s8367_s1 = scalar_lea.sflag [#allocation8], %s8366_s17 }
 0x610   : > { %p9397_p12 = pnand %p9423_p2, %p14680_p7 }
 0x612   : > { %p9398_p11 = pneg %p9397_p12 }
 0x614   : > { %10655 = dma.done.wait (%p9398_p11), %s8367_s1, 2048  }
 0x615   : > { %10657 = vsyncadd (%p9398_p11), %s8367_s1, 4294965248  ;;  %p32_p1 = scmp.ge.s32.totalorder %s10885_s14, 10   ;;  %s14681_s21 = smov %s10664_s22 }
 0x616   : > { %s14682_s22 = smov %s10668_s23  ;;  %s14683_s23 = smov %s10897_s19 }
 0x617   : > { %s14684_s24 = smov %s10885_s14  ;;  %34 = sbr.rel (!%p32_p1) target bundleno = 19 (0x13), region = 161 }
 0x61c   :  { %8372 = vsyncpa [#allocation7], 1 }
 0x61d   :  { %8374 = vsyncpa [#allocation7 + $0x1], 1 }
 0x61e   :  { %8375 = vsyncpa [#allocation10], 1 }
 0x61f   :  { %8376 = vsyncpa [#allocation13], 1 }
 0x620   :  { %8377 = vsyncpa [#allocation16], 1 }
 0x621   :  { %8378 = vsyncpa [#allocation19], 1 }
 0x622   :  { %8379 = vsyncpa [#allocation8], 1 }
 0x623   :  { %8381 = vsyncpa [#allocation8 + $0x1], 1 }
 0x624   :  { %8382 = vsyncpa [#allocation22], 1 }
 0x625   :  { %8383 = vsyncpa [#allocation25], 1 }

</bundles_post_ra>
